<compile_context>
chip_gen: v7x
topology: tpu7x:2x2x1
jax: 0.10.0
libtpu: 0.0.40
codegen_flags: <defaults>
</compile_context>

<pallas_src>
import functools

import jax
import jax.numpy as jnp
from jax.experimental import pallas as pl
from jax.experimental.pallas import tpu as pltpu


# --------------------------------------------------------------------------
# Kernel 1: 3x3 convolution (9 shifted MXU matmuls) + per-image channel stats
# --------------------------------------------------------------------------
def _conv3x3_kernel(x_ref, w_ref, b_ref, y_ref, psum_ref, psumsq_ref,
                    *, H, W, C_in, C_out):
    # x_ref:      (1, H+2, W+2, C_in)   zero-padded NHWC image for this batch index
    # w_ref:      (9, C_in, C_out)      conv taps (kh*3+kw), f32, loaded once
    # b_ref:      (1, C_out)            conv bias, f32, loaded once
    # y_ref:      (1, H*W, C_out)       pre-BN conv output, f32
    # psum_ref / psumsq_ref: (1, 8, C_out)  per-image channel sums (row 0 valid)
    x = x_ref[0].astype(jnp.float32)                      # (H+2, W+2, C_in)
    acc = jnp.zeros((H * W, C_out), jnp.float32)
    for dy in range(3):
        for dx in range(3):
            patch = x[dy:dy + H, dx:dx + W, :].reshape(H * W, C_in)
            acc += jnp.dot(patch, w_ref[dy * 3 + dx],
                           preferred_element_type=jnp.float32,
                           precision=jax.lax.Precision.HIGHEST)
    acc += b_ref[...]                                     # broadcast (1, C_out)
    y_ref[0] = acc
    s = jnp.sum(acc, axis=0, keepdims=True)               # (1, C_out)
    sq = jnp.sum(acc * acc, axis=0, keepdims=True)        # (1, C_out)
    psum_ref[0] = jnp.broadcast_to(s, (8, C_out))
    psumsq_ref[0] = jnp.broadcast_to(sq, (8, C_out))


def _conv3x3_nhwc(x_pad, w_taps, bias2):
    """x_pad: (B, H+2, W+2, Cin); w_taps: (9, Cin, Cout) f32; bias2: (1, Cout) f32."""
    B, Hp2, Wp2, C_in = x_pad.shape
    H, W = Hp2 - 2, Wp2 - 2
    C_out = w_taps.shape[-1]

    kernel = functools.partial(_conv3x3_kernel, H=H, W=W, C_in=C_in, C_out=C_out)

    # Explicit VMEM budget: double-buffered in/out blocks + in-kernel temporaries.
    x_block_bytes = Hp2 * Wp2 * C_in * x_pad.dtype.itemsize
    y_block_bytes = H * W * C_out * 4
    stat_bytes = 2 * 8 * C_out * 4
    w_bytes = 9 * C_in * C_out * 4
    tmp_bytes = 6 * H * W * max(C_in, C_out) * 4
    est = 2 * (x_block_bytes + y_block_bytes + stat_bytes) + w_bytes + tmp_bytes
    vmem_limit = int(min(48 * 2**20, max(16 * 2**20, 2 * est)))

    out_shapes = (
        jax.ShapeDtypeStruct((B, H * W, C_out), jnp.float32),
        jax.ShapeDtypeStruct((B, 8, C_out), jnp.float32),
        jax.ShapeDtypeStruct((B, 8, C_out), jnp.float32),
    )
    conv_out, psum, psumsq = pl.pallas_call(
        kernel,
        out_shape=out_shapes,
        grid_spec=pltpu.PrefetchScalarGridSpec(
            num_scalar_prefetch=0,
            grid=(B,),
            in_specs=[
                pl.BlockSpec((1, Hp2, Wp2, C_in), lambda b: (b, 0, 0, 0)),
                pl.BlockSpec((9, C_in, C_out), lambda b: (0, 0, 0)),   # constant -> DMA'd once
                pl.BlockSpec((1, C_out), lambda b: (0, 0)),            # constant -> DMA'd once
            ],
            out_specs=[
                pl.BlockSpec((1, H * W, C_out), lambda b: (b, 0, 0)),
                pl.BlockSpec((1, 8, C_out), lambda b: (b, 0, 0)),
                pl.BlockSpec((1, 8, C_out), lambda b: (b, 0, 0)),
            ],
        ),
        compiler_params=pltpu.CompilerParams(
            dimension_semantics=("parallel",),
            vmem_limit_bytes=vmem_limit,
        ),
    )(x_pad, w_taps, bias2)
    return conv_out, psum[:, 0, :], psumsq[:, 0, :]


# --------------------------------------------------------------------------
# Kernel 2: fused BatchNorm (folded scale/shift) + ReLU, memory-bound streaming
# --------------------------------------------------------------------------
def _bn_relu_kernel(y_ref, scale_ref, shift_ref, o_ref):
    y = y_ref[...]                                         # (block_rows, C_out) f32
    out = y * scale_ref[...] + shift_ref[...]              # folded per-channel affine
    o_ref[...] = jnp.maximum(out, 0.0).astype(o_ref.dtype)


def _pick_block_rows(total_rows, row_bytes, out_itemsize, target_bytes=4 << 20):
    # Sublane packing: 8 rows for 32-bit, 16 for 16-bit, 32 for 8-bit outputs.
    pack = 8 * max(1, 4 // max(1, out_itemsize))
    cap = max(pack, min(total_rows, target_bytes // max(1, row_bytes)))
    if total_rows >= 2 * pack:
        cap = min(cap, total_rows // 2)        # keep >= 2 grid steps (v7x: 2 TCs)
    cap = (cap // pack) * pack
    for r in range(cap, pack - 1, -pack):
        if total_rows % r == 0:
            return r
    return total_rows                          # fallback: one full-extent block


def _bn_relu(y2, scale, shift, out_dtype):
    rows, C_out = y2.shape
    out_itemsize = jnp.dtype(out_dtype).itemsize
    block_rows = _pick_block_rows(rows, C_out * 4, out_itemsize)
    grid = rows // block_rows

    in_block_bytes = block_rows * C_out * 4
    out_block_bytes = block_rows * C_out * out_itemsize
    est = 2 * in_block_bytes + 2 * out_block_bytes + (1 << 20)
    vmem_limit = int(min(48 * 2**20, max(16 * 2**20, 2 * est)))

    return pl.pallas_call(
        _bn_relu_kernel,
        out_shape=jax.ShapeDtypeStruct((rows, C_out), out_dtype),
        grid_spec=pltpu.PrefetchScalarGridSpec(
            num_scalar_prefetch=0,
            grid=(grid,),
            in_specs=[
                pl.BlockSpec((block_rows, C_out), lambda i: (i, 0)),
                pl.BlockSpec((1, C_out), lambda i: (0, 0)),   # constant -> DMA'd once
                pl.BlockSpec((1, C_out), lambda i: (0, 0)),   # constant -> DMA'd once
            ],
            out_specs=pl.BlockSpec((block_rows, C_out), lambda i: (i, 0)),
        ),
        compiler_params=pltpu.CompilerParams(
            dimension_semantics=("parallel",),
            vmem_limit_bytes=vmem_limit,
        ),
    )(y2, scale, shift)


# --------------------------------------------------------------------------
# Public wrapper: Conv2d(3x3, s1, p1) -> BatchNorm2d (training stats) -> ReLU
# --------------------------------------------------------------------------
def conv_bn_relu(x, conv_w, conv_b, bn_gamma, bn_beta, eps=1e-5):
    """x: (B, Cin, H, W) NCHW; conv_w: (Cout, Cin, 3, 3); conv_b/gamma/beta: (Cout,)."""
    B, C_in, H, W = x.shape
    C_out, C_in_w, KH, KW = conv_w.shape
    assert (KH, KW) == (3, 3) and C_in_w == C_in, "supports kernel_size=3, groups=1 only"

    # NCHW -> NHWC, zero-pad spatially by 1 (padding=1, stride=1, dilation=1).
    x_nhwc = jnp.transpose(x, (0, 2, 3, 1))
    x_pad = jnp.pad(x_nhwc, ((0, 0), (1, 1), (1, 1), (0, 0)))
    # (Cout, Cin, 3, 3) -> (3, 3, Cin, Cout) -> (9, Cin, Cout); keep params f32.
    w_taps = jnp.transpose(conv_w, (2, 3, 1, 0)).reshape(9, C_in, C_out).astype(jnp.float32)
    bias2 = conv_b.reshape(1, C_out).astype(jnp.float32)

    conv_out, ch_sum, ch_sumsq = _conv3x3_nhwc(x_pad, w_taps, bias2)

    # Batch-norm batch statistics over (B, H, W) per channel (biased variance),
    # folded into a per-channel scale/shift (2 ops/element in kernel 2).
    n = float(B * H * W)
    total = ch_sum.sum(axis=0)
    total_sq = ch_sumsq.sum(axis=0)
    mean = total / n
    var = jnp.maximum(total_sq / n - mean * mean, 0.0)
    inv_std = jax.lax.rsqrt(var + eps)
    gamma = bn_gamma.astype(jnp.float32)
    beta = bn_beta.astype(jnp.float32)
    scale = (gamma * inv_std).reshape(1, C_out)
    shift = (beta - mean * gamma * inv_std).reshape(1, C_out)

    out2 = _bn_relu(conv_out.reshape(B * H * W, C_out), scale, shift, x.dtype)
    out = out2.reshape(B, H, W, C_out)
    return jnp.transpose(out, (0, 3, 1, 2))  # back to NCHW


# --------------------------------------------------------------------------
# Pure-JAX reference (independent of the kernels)
# --------------------------------------------------------------------------
def _reference_conv_bn_relu(x, conv_w, conv_b, bn_gamma, bn_beta, eps=1e-5):
    y = jax.lax.conv_general_dilated(
        x.astype(jnp.float32), conv_w.astype(jnp.float32),
        window_strides=(1, 1), padding=((1, 1), (1, 1)),
        dimension_numbers=("NCHW", "OIHW", "NCHW"),
        precision=jax.lax.Precision.HIGHEST,
    ) + conv_b.astype(jnp.float32).reshape(1, -1, 1, 1)
    mean = y.mean(axis=(0, 2, 3), keepdims=True)
    var = ((y - mean) ** 2).mean(axis=(0, 2, 3), keepdims=True)   # biased (training mode)
    yhat = (y - mean) / jnp.sqrt(var + eps)
    out = yhat * bn_gamma.reshape(1, -1, 1, 1) + bn_beta.reshape(1, -1, 1, 1)
    return jnp.maximum(out, 0.0).astype(x.dtype)


if __name__ == "__main__":
    B, C_in, C_out, H, W = 2, 4, 8, 16, 16
    eps = 1e-5

    key = jax.random.PRNGKey(0)
    kx, kw, kb, kg, kbt = jax.random.split(key, 5)
    x = jax.random.normal(kx, (B, C_in, H, W), dtype=jnp.float32)
    conv_w = 0.2 * jax.random.normal(kw, (C_out, C_in, 3, 3), dtype=jnp.float32)
    conv_b = 0.1 * jax.random.normal(kb, (C_out,), dtype=jnp.float32)
    bn_gamma = 1.0 + 0.1 * jax.random.normal(kg, (C_out,), dtype=jnp.float32)
    bn_beta = 0.1 * jax.random.normal(kbt, (C_out,), dtype=jnp.float32)

    out = conv_bn_relu(x, conv_w, conv_b, bn_gamma, bn_beta, eps=eps)
    out = jax.block_until_ready(out)

    ref = _reference_conv_bn_relu(x, conv_w, conv_b, bn_gamma, bn_beta, eps=eps)
    assert out.shape == (B, C_out, H, W)
    max_err = float(jnp.max(jnp.abs(out - ref)))
    assert jnp.allclose(out, ref, atol=1e-3, rtol=1e-3), f"mismatch vs reference (max abs err {max_err})"

    print("KERNEL_OK")
</pallas_src>

<mosaic_0001>
module attributes {stable_mosaic.version = 11 : i64} {
  func.func @_conv3x3_kernel(%arg0: i32, %arg1: memref<1x18x18x4xf32, #tpu.memory_space<vmem>>, %arg2: memref<9x4x8xf32, #tpu.memory_space<vmem>>, %arg3: memref<1x8xf32, #tpu.memory_space<vmem>>, %arg4: memref<1x256x8xf32, #tpu.memory_space<vmem>>, %arg5: memref<1x8x8xf32, #tpu.memory_space<vmem>>, %arg6: memref<1x8x8xf32, #tpu.memory_space<vmem>>) attributes {dimension_semantics = [#tpu.dimension_semantics<parallel>], iteration_bounds = array<i64: 2>, scalar_prefetch = 0 : i64, scratch_operands = 0 : i64, tpu.core_type = #tpu.core_type<tc>, window_params = [{transform_indices = @transform_0, window_bounds = array<i64: 1, 18, 18, 4>}, {pipeline_mode = #tpu.pipeline_mode<synchronous>, transform_indices = @transform_1, window_bounds = array<i64: 9, 4, 8>}, {pipeline_mode = #tpu.pipeline_mode<synchronous>, transform_indices = @transform_2, window_bounds = array<i64: 1, 8>}, {transform_indices = @transform_3, window_bounds = array<i64: 1, 256, 8>}, {transform_indices = @transform_4, window_bounds = array<i64: 1, 8, 8>}, {transform_indices = @transform_5, window_bounds = array<i64: 1, 8, 8>}]} {
    %c0 = arith.constant 0 : index
    %c0_0 = arith.constant 0 : index
    %c0_1 = arith.constant 0 : index
    %c0_2 = arith.constant 0 : index
    %0 = vector.load %arg1[%c0, %c0_0, %c0_1, %c0_2] : memref<1x18x18x4xf32, #tpu.memory_space<vmem>>, vector<1x18x18x4xf32>
    %1 = vector.shape_cast %0 : vector<1x18x18x4xf32> to vector<18x18x4xf32>
    %cst = arith.constant 0.000000e+00 : f32
    %2 = vector.broadcast %cst : f32 to vector<256x8xf32>
    %3 = vector.extract_strided_slice %1 {offsets = [0, 0, 0], sizes = [16, 16, 4], strides = [1, 1, 1]} : vector<18x18x4xf32> to vector<16x16x4xf32>
    %4 = vector.shape_cast %3 : vector<16x16x4xf32> to vector<256x4xf32>
    %c0_3 = arith.constant 0 : index
    %c0_4 = arith.constant 0 : index
    %c0_5 = arith.constant 0 : index
    %5 = vector.load %arg2[%c0_3, %c0_4, %c0_5] : memref<9x4x8xf32, #tpu.memory_space<vmem>>, vector<1x4x8xf32>
    %6 = vector.shape_cast %5 : vector<1x4x8xf32> to vector<4x8xf32>
    %cst_6 = arith.constant dense<0.000000e+00> : vector<256x8xf32>
    %7 = tpu.matmul %4, %6, %cst_6 {dimension_numbers = #tpu.dot_dimension_numbers<[1], [0], [0], [1], [0, 0, 1, 1], [], []>, precision = #tpu.contract_precision<fp32>} : vector<256x4xf32>, vector<4x8xf32>, vector<256x8xf32> -> vector<256x8xf32>
    %8 = arith.addf %2, %7 : vector<256x8xf32>
    %9 = vector.extract_strided_slice %1 {offsets = [0, 1, 0], sizes = [16, 16, 4], strides = [1, 1, 1]} : vector<18x18x4xf32> to vector<16x16x4xf32>
    %10 = vector.shape_cast %9 : vector<16x16x4xf32> to vector<256x4xf32>
    %c1 = arith.constant 1 : index
    %c0_7 = arith.constant 0 : index
    %c0_8 = arith.constant 0 : index
    %11 = vector.load %arg2[%c1, %c0_7, %c0_8] : memref<9x4x8xf32, #tpu.memory_space<vmem>>, vector<1x4x8xf32>
    %12 = vector.shape_cast %11 : vector<1x4x8xf32> to vector<4x8xf32>
    %cst_9 = arith.constant dense<0.000000e+00> : vector<256x8xf32>
    %13 = tpu.matmul %10, %12, %cst_9 {dimension_numbers = #tpu.dot_dimension_numbers<[1], [0], [0], [1], [0, 0, 1, 1], [], []>, precision = #tpu.contract_precision<fp32>} : vector<256x4xf32>, vector<4x8xf32>, vector<256x8xf32> -> vector<256x8xf32>
    %14 = arith.addf %8, %13 : vector<256x8xf32>
    %15 = vector.extract_strided_slice %1 {offsets = [0, 2, 0], sizes = [16, 16, 4], strides = [1, 1, 1]} : vector<18x18x4xf32> to vector<16x16x4xf32>
    %16 = vector.shape_cast %15 : vector<16x16x4xf32> to vector<256x4xf32>
    %c2 = arith.constant 2 : index
    %c0_10 = arith.constant 0 : index
    %c0_11 = arith.constant 0 : index
    %17 = vector.load %arg2[%c2, %c0_10, %c0_11] : memref<9x4x8xf32, #tpu.memory_space<vmem>>, vector<1x4x8xf32>
    %18 = vector.shape_cast %17 : vector<1x4x8xf32> to vector<4x8xf32>
    %cst_12 = arith.constant dense<0.000000e+00> : vector<256x8xf32>
    %19 = tpu.matmul %16, %18, %cst_12 {dimension_numbers = #tpu.dot_dimension_numbers<[1], [0], [0], [1], [0, 0, 1, 1], [], []>, precision = #tpu.contract_precision<fp32>} : vector<256x4xf32>, vector<4x8xf32>, vector<256x8xf32> -> vector<256x8xf32>
    %20 = arith.addf %14, %19 : vector<256x8xf32>
    %21 = vector.extract_strided_slice %1 {offsets = [1, 0, 0], sizes = [16, 16, 4], strides = [1, 1, 1]} : vector<18x18x4xf32> to vector<16x16x4xf32>
    %22 = vector.shape_cast %21 : vector<16x16x4xf32> to vector<256x4xf32>
    %c3 = arith.constant 3 : index
    %c0_13 = arith.constant 0 : index
    %c0_14 = arith.constant 0 : index
    %23 = vector.load %arg2[%c3, %c0_13, %c0_14] : memref<9x4x8xf32, #tpu.memory_space<vmem>>, vector<1x4x8xf32>
    %24 = vector.shape_cast %23 : vector<1x4x8xf32> to vector<4x8xf32>
    %cst_15 = arith.constant dense<0.000000e+00> : vector<256x8xf32>
    %25 = tpu.matmul %22, %24, %cst_15 {dimension_numbers = #tpu.dot_dimension_numbers<[1], [0], [0], [1], [0, 0, 1, 1], [], []>, precision = #tpu.contract_precision<fp32>} : vector<256x4xf32>, vector<4x8xf32>, vector<256x8xf32> -> vector<256x8xf32>
    %26 = arith.addf %20, %25 : vector<256x8xf32>
    %27 = vector.extract_strided_slice %1 {offsets = [1, 1, 0], sizes = [16, 16, 4], strides = [1, 1, 1]} : vector<18x18x4xf32> to vector<16x16x4xf32>
    %28 = vector.shape_cast %27 : vector<16x16x4xf32> to vector<256x4xf32>
    %c4 = arith.constant 4 : index
    %c0_16 = arith.constant 0 : index
    %c0_17 = arith.constant 0 : index
    %29 = vector.load %arg2[%c4, %c0_16, %c0_17] : memref<9x4x8xf32, #tpu.memory_space<vmem>>, vector<1x4x8xf32>
    %30 = vector.shape_cast %29 : vector<1x4x8xf32> to vector<4x8xf32>
    %cst_18 = arith.constant dense<0.000000e+00> : vector<256x8xf32>
    %31 = tpu.matmul %28, %30, %cst_18 {dimension_numbers = #tpu.dot_dimension_numbers<[1], [0], [0], [1], [0, 0, 1, 1], [], []>, precision = #tpu.contract_precision<fp32>} : vector<256x4xf32>, vector<4x8xf32>, vector<256x8xf32> -> vector<256x8xf32>
    %32 = arith.addf %26, %31 : vector<256x8xf32>
    %33 = vector.extract_strided_slice %1 {offsets = [1, 2, 0], sizes = [16, 16, 4], strides = [1, 1, 1]} : vector<18x18x4xf32> to vector<16x16x4xf32>
    %34 = vector.shape_cast %33 : vector<16x16x4xf32> to vector<256x4xf32>
    %c5 = arith.constant 5 : index
    %c0_19 = arith.constant 0 : index
    %c0_20 = arith.constant 0 : index
    %35 = vector.load %arg2[%c5, %c0_19, %c0_20] : memref<9x4x8xf32, #tpu.memory_space<vmem>>, vector<1x4x8xf32>
    %36 = vector.shape_cast %35 : vector<1x4x8xf32> to vector<4x8xf32>
    %cst_21 = arith.constant dense<0.000000e+00> : vector<256x8xf32>
    %37 = tpu.matmul %34, %36, %cst_21 {dimension_numbers = #tpu.dot_dimension_numbers<[1], [0], [0], [1], [0, 0, 1, 1], [], []>, precision = #tpu.contract_precision<fp32>} : vector<256x4xf32>, vector<4x8xf32>, vector<256x8xf32> -> vector<256x8xf32>
    %38 = arith.addf %32, %37 : vector<256x8xf32>
    %39 = vector.extract_strided_slice %1 {offsets = [2, 0, 0], sizes = [16, 16, 4], strides = [1, 1, 1]} : vector<18x18x4xf32> to vector<16x16x4xf32>
    %40 = vector.shape_cast %39 : vector<16x16x4xf32> to vector<256x4xf32>
    %c6 = arith.constant 6 : index
    %c0_22 = arith.constant 0 : index
    %c0_23 = arith.constant 0 : index
    %41 = vector.load %arg2[%c6, %c0_22, %c0_23] : memref<9x4x8xf32, #tpu.memory_space<vmem>>, vector<1x4x8xf32>
    %42 = vector.shape_cast %41 : vector<1x4x8xf32> to vector<4x8xf32>
    %cst_24 = arith.constant dense<0.000000e+00> : vector<256x8xf32>
    %43 = tpu.matmul %40, %42, %cst_24 {dimension_numbers = #tpu.dot_dimension_numbers<[1], [0], [0], [1], [0, 0, 1, 1], [], []>, precision = #tpu.contract_precision<fp32>} : vector<256x4xf32>, vector<4x8xf32>, vector<256x8xf32> -> vector<256x8xf32>
    %44 = arith.addf %38, %43 : vector<256x8xf32>
    %45 = vector.extract_strided_slice %1 {offsets = [2, 1, 0], sizes = [16, 16, 4], strides = [1, 1, 1]} : vector<18x18x4xf32> to vector<16x16x4xf32>
    %46 = vector.shape_cast %45 : vector<16x16x4xf32> to vector<256x4xf32>
    %c7 = arith.constant 7 : index
    %c0_25 = arith.constant 0 : index
    %c0_26 = arith.constant 0 : index
    %47 = vector.load %arg2[%c7, %c0_25, %c0_26] : memref<9x4x8xf32, #tpu.memory_space<vmem>>, vector<1x4x8xf32>
    %48 = vector.shape_cast %47 : vector<1x4x8xf32> to vector<4x8xf32>
    %cst_27 = arith.constant dense<0.000000e+00> : vector<256x8xf32>
    %49 = tpu.matmul %46, %48, %cst_27 {dimension_numbers = #tpu.dot_dimension_numbers<[1], [0], [0], [1], [0, 0, 1, 1], [], []>, precision = #tpu.contract_precision<fp32>} : vector<256x4xf32>, vector<4x8xf32>, vector<256x8xf32> -> vector<256x8xf32>
    %50 = arith.addf %44, %49 : vector<256x8xf32>
    %51 = vector.extract_strided_slice %1 {offsets = [2, 2, 0], sizes = [16, 16, 4], strides = [1, 1, 1]} : vector<18x18x4xf32> to vector<16x16x4xf32>
    %52 = vector.shape_cast %51 : vector<16x16x4xf32> to vector<256x4xf32>
    %c8 = arith.constant 8 : index
    %c0_28 = arith.constant 0 : index
    %c0_29 = arith.constant 0 : index
    %53 = vector.load %arg2[%c8, %c0_28, %c0_29] : memref<9x4x8xf32, #tpu.memory_space<vmem>>, vector<1x4x8xf32>
    %54 = vector.shape_cast %53 : vector<1x4x8xf32> to vector<4x8xf32>
    %cst_30 = arith.constant dense<0.000000e+00> : vector<256x8xf32>
    %55 = tpu.matmul %52, %54, %cst_30 {dimension_numbers = #tpu.dot_dimension_numbers<[1], [0], [0], [1], [0, 0, 1, 1], [], []>, precision = #tpu.contract_precision<fp32>} : vector<256x4xf32>, vector<4x8xf32>, vector<256x8xf32> -> vector<256x8xf32>
    %56 = arith.addf %50, %55 : vector<256x8xf32>
    %c0_31 = arith.constant 0 : index
    %c0_32 = arith.constant 0 : index
    %57 = vector.load %arg3[%c0_31, %c0_32] : memref<1x8xf32, #tpu.memory_space<vmem>>, vector<1x8xf32>
    %58 = vector.broadcast %57 : vector<1x8xf32> to vector<256x8xf32>
    %59 = arith.addf %56, %58 : vector<256x8xf32>
    %c0_33 = arith.constant 0 : index
    %c0_34 = arith.constant 0 : index
    %c0_35 = arith.constant 0 : index
    %60 = vector.load %arg4[%c0_33, %c0_34, %c0_35] : memref<1x256x8xf32, #tpu.memory_space<vmem>>, vector<1x256x8xf32>
    %61 = vector.shape_cast %60 : vector<1x256x8xf32> to vector<256x8xf32>
    %62 = vector.shape_cast %59 : vector<256x8xf32> to vector<1x256x8xf32>
    tpu.vector_store %arg4[%c0_33, %c0_34, %c0_35], %62 {strides = array<i32>} : memref<1x256x8xf32, #tpu.memory_space<vmem>>, vector<1x256x8xf32>,
    %cst_36 = arith.constant dense<0.000000e+00> : vector<8xf32>
    %63 = vector.multi_reduction <add>, %59, %cst_36 [0] : vector<256x8xf32> to vector<8xf32>
    %64 = vector.shape_cast %63 : vector<8xf32> to vector<1x8xf32>
    %65 = arith.mulf %59, %59 : vector<256x8xf32>
    %cst_37 = arith.constant dense<0.000000e+00> : vector<8xf32>
    %66 = vector.multi_reduction <add>, %65, %cst_37 [0] : vector<256x8xf32> to vector<8xf32>
    %67 = vector.shape_cast %66 : vector<8xf32> to vector<1x8xf32>
    %68 = vector.shape_cast %64 : vector<1x8xf32> to vector<1x8xf32>
    %69 = vector.broadcast %68 : vector<1x8xf32> to vector<8x8xf32>
    %c0_38 = arith.constant 0 : index
    %c0_39 = arith.constant 0 : index
    %c0_40 = arith.constant 0 : index
    %70 = vector.load %arg5[%c0_38, %c0_39, %c0_40] : memref<1x8x8xf32, #tpu.memory_space<vmem>>, vector<1x8x8xf32>
    %71 = vector.shape_cast %70 : vector<1x8x8xf32> to vector<8x8xf32>
    %72 = vector.shape_cast %69 : vector<8x8xf32> to vector<1x8x8xf32>
    tpu.vector_store %arg5[%c0_38, %c0_39, %c0_40], %72 {strides = array<i32>} : memref<1x8x8xf32, #tpu.memory_space<vmem>>, vector<1x8x8xf32>,
    %73 = vector.shape_cast %67 : vector<1x8xf32> to vector<1x8xf32>
    %74 = vector.broadcast %73 : vector<1x8xf32> to vector<8x8xf32>
    %c0_41 = arith.constant 0 : index
    %c0_42 = arith.constant 0 : index
    %c0_43 = arith.constant 0 : index
    %75 = vector.load %arg6[%c0_41, %c0_42, %c0_43] : memref<1x8x8xf32, #tpu.memory_space<vmem>>, vector<1x8x8xf32>
    %76 = vector.shape_cast %75 : vector<1x8x8xf32> to vector<8x8xf32>
    %77 = vector.shape_cast %74 : vector<8x8xf32> to vector<1x8x8xf32>
    tpu.vector_store %arg6[%c0_41, %c0_42, %c0_43], %77 {strides = array<i32>} : memref<1x8x8xf32, #tpu.memory_space<vmem>>, vector<1x8x8xf32>,
    return
  }
  func.func @transform_0(%arg0: i32) -> (i32, i32, i32, i32) {
    %c0_i32 = arith.constant 0 : i32
    %c0_i32_0 = arith.constant 0 : i32
    %c0_i32_1 = arith.constant 0 : i32
    %c0_i32_2 = arith.constant 0 : i32
    return %arg0, %c0_i32, %c0_i32_0, %c0_i32_1 : i32, i32, i32, i32
  }
  func.func @transform_1(%arg0: i32) -> (i32, i32, i32) {
    %c0_i32 = arith.constant 0 : i32
    %c0_i32_0 = arith.constant 0 : i32
    %c0_i32_1 = arith.constant 0 : i32
    %c0_i32_2 = arith.constant 0 : i32
    return %c0_i32, %c0_i32_0, %c0_i32_1 : i32, i32, i32
  }
  func.func @transform_2(%arg0: i32) -> (i32, i32) {
    %c0_i32 = arith.constant 0 : i32
    %c0_i32_0 = arith.constant 0 : i32
    %c0_i32_1 = arith.constant 0 : i32
    return %c0_i32, %c0_i32_0 : i32, i32
  }
  func.func @transform_3(%arg0: i32) -> (i32, i32, i32) {
    %c0_i32 = arith.constant 0 : i32
    %c0_i32_0 = arith.constant 0 : i32
    %c0_i32_1 = arith.constant 0 : i32
    return %arg0, %c0_i32, %c0_i32_0 : i32, i32, i32
  }
  func.func @transform_4(%arg0: i32) -> (i32, i32, i32) {
    %c0_i32 = arith.constant 0 : i32
    %c0_i32_0 = arith.constant 0 : i32
    %c0_i32_1 = arith.constant 0 : i32
    return %arg0, %c0_i32, %c0_i32_0 : i32, i32, i32
  }
  func.func @transform_5(%arg0: i32) -> (i32, i32, i32) {
    %c0_i32 = arith.constant 0 : i32
    %c0_i32_0 = arith.constant 0 : i32
    %c0_i32_1 = arith.constant 0 : i32
    return %arg0, %c0_i32, %c0_i32_0 : i32, i32, i32
  }
}

</mosaic_0001>

<bundles_post_ra>
// kernel: tpu_custom_call.1
= control target key start
LH: loop header
LB: loop body
LE: loop exit
PB: predicated region body
PF: predicated region fallthrough
CT: control target
= control target key end

     0   :  { %11 = vsyncpa [#allocation3], 0  ;;  %s27899_s0 = inlined_call_operand.vmem [shape: f32[2,18,18,4], index: 0, kind: input, shape index: {}]   ;;  %s27900_s1 = inlined_call_operand.vmem [shape: f32[9,4,8], index: 1, kind: input, shape index: {}]   ;;  %s27901_s2 = inlined_call_operand.vmem [shape: f32[1,8], index: 2, kind: input, shape index: {}]   ;;  %s27902_s3 = inlined_call_operand.vmem [shape: f32[2,256,8], index: 3, kind: output, shape index: {0}]   ;;  %s27903_s4 = inlined_call_operand.hbm [shape: f32[2,8,8], index: 4, kind: output, shape index: {1}]   ;;  %s27904_s5 = inlined_call_operand.hbm [shape: f32[2,8,8], index: 5, kind: output, shape index: {2}]  }
   0x1   :  { %13 = vsyncpa [#allocation3 + $0x1], 0 }
   0x2   :  { %14 = vsyncpa [#allocation5], 0 }
   0x3   :  { %16 = vsyncpa [#allocation5 + $0x1], 0  ;;  %s23851_s18 = smov 0   ;;  %s23853_s19 = smov 0  }
   0x4   :  { %s23855_s20 = smov 0   ;;  %s23857_s21 = smov 0  }
   0x5 LB: > { %s23872_s22 = sadd.s32 4294967295, %s23817_s21   ;;  %s17433_s23 = sadd.s32 4294967294, %s23817_s21   ;;  %s23817_s21 = sphi %s23857_s21, %s30314_s21   ;;  %s23813_s20 = sphi %s23855_s20, %s30313_s20   ;;  %s23809_s19 = sphi %s23853_s19, %s30312_s19   ;;  %s23805_s18 = sphi %s23851_s18, %s30311_s18  }
   0x6   : > { %s23876_s24 = sadd.s32 1, %s23817_s21   ;;  %s123_s25 = sadd.s32 1, %s23813_s20 }
   0x7   : > { %s120_s26 = ssub.s32 %s23817_s21, %s23876_s24  ;;  %p133_p0 = scmp.ne.s32.totalorder %s23813_s20, %s23809_s19 }
   0x8   : > { %p121_p1 = scmp.eq.s32.totalorder %s120_s26, 0  ;;  %p134_p2 = scmp.eq.s32.totalorder %s23872_s22, 1 }
   0x9   : > { %p139_p3 = scmp.ne.s32.totalorder %s23809_s19, %s23805_s18  ;;  %p140_p4 = scmp.eq.s32.totalorder %s17433_s23, 1 }
   0xa   : > { %s23887_s27 = scalar_select %p121_p1, %s23813_s20, %s123_s25  }
   0xb   : > { %p23889_p5 = por %p134_p2, %p133_p0  ;;  %p23893_p6 = por %p140_p4, %p139_p3 }
   0xc   : > { %p17436_p7 = scmp.ge.s32.totalorder %s23817_s21, 1  ;;  %p198_p8 = scmp.lt.s32.totalorder %s23817_s21, 3 }
   0xe   : > { %p199_p9 = pnand %p17436_p7, %p198_p8 }
  0x10   : > { %202 = sbr.rel (%p199_p9) target bundleno = 2054 (0x806), region = 32 }
  0x17   : > { %vm497_vm0 = vcmask 1043456   ;;  %v17445_v0 = vld [vmem:[%s27900_s1 + $0x10] sm:$0xf]  ;;  %p236_p10 = scmp.lt.s32.totalorder %s23872_s22, 1  ;;  %v17442_v2 = vld [vmem:[%s27900_s1 + $0x4] sm:$0xf] }
  0x18   : > { %v7922_v1 = vsel %vm497_vm0, %v17445_v0, 0  ;;  %v499_v4 = vsel %vm497_vm0, %v17442_v2, 0  ;;  %vm349_vm1 = vcmask 1046528   ;;  %vm432_vm2 = vcmask 31744   ;;  %s17453_s26 = sshll.u32 %s23872_s22, 7  ;;  %s23819_s17 = smov [#allocation2]  }
  0x19   : > { %v23907_v3 = vand.u32 4294901760, %v7922_v1  ;;  %s23910_s9 = scalar_select %p236_p10, %s23872_s22, 1  ;;  %v23913_v5 = vand.u32 4294901760, %v499_v4  ;;  %vm4126_vm3 = vcmask 1045504   ;;  %vm17072_vm4 = vcmask 64512  }
  0x1a   : > { %s27824_s12 = scalar_lea.hbm %s27903_s4, %s17453_s26  ;;  %s27832_s14 = scalar_lea.hbm %s27904_s5, %s17453_s26 }
  0x1b   : > { %28866 = vst [vmem:[#allocation8_spill] sm:$0xff] %v23907_v3  ;;  %20590 = vmatprep.subr.mxu0 %v23907_v3  ;;  %s23636_s10 = smul.u32 432, %s23910_s9  ;;  %v23918_v6 = vsub.f32 %v7922_v1, %v23907_v3  ;;  %19240 = vmatprep.subr.mxu1 %v23913_v5  ;;  %v23923_v7 = vsub.f32 %v499_v4, %v23913_v5 }
  0x1c   : > { %20591 = vmatpush3.msra.mxu0 %v23907_v3  ;;  %19241 = vmatpush3.msra.mxu1 %v23913_v5 }
  0x1d   : > { %28867 = vst [vmem:[#allocation9_spill] sm:$0xff] %v23918_v6  ;;  %s23928_s13 = scalar_lea.vmem %s27899_s0, %s23636_s10  ;;  %v23932_v8 = vand.u32 4294901760, %v23918_v6  ;;  %v23938_v12 = vand.u32 4294901760, %v23923_v7 }
  0x1e   : > { %v249_v9 = vld [vmem:[%s23928_s13 + $0x18] sm:$0xff]  ;;  %v250_v10 = vld [vmem:[%s23928_s13 + $0x20] sm:$0xff]  ;;  %v251_v11 = vld [vmem:[%s23928_s13 + $0x28] sm:$0x3] }
  0x1f   : > { %28868 = vst [vmem:[#allocation10_spill] sm:$0xff] %v23932_v8  ;;  %v355_v13 = vrot.slane %v249_v9, 1  ;;  %v356_v14 = vrot.slane %v250_v10, 1  ;;  %v358_v15 = vrot.slane %v251_v11, 1  ;;  %v246_v16 = vld [vmem:[%s23928_s13] sm:$0xff]  ;;  %v247_v17 = vld [vmem:[%s23928_s13 + $0x8] sm:$0xff]  ;;  %20640 = vmatprep.subr.mxu0 %v23932_v8  ;;  %v891_v20 = vsub.f32 %v23923_v7, %v23938_v12 }
  0x20   : > { %v350_v18 = vrot.slane %v246_v16, 1  ;;  %v351_v19 = vrot.slane %v247_v17, 1  ;;  %v252_v21 = vld [vmem:[%s23928_s13 + $0x30] sm:$0xff]  ;;  %v253_v22 = vld [vmem:[%s23928_s13 + $0x38] sm:$0xff]  ;;  %v254_v27 = vld [vmem:[%s23928_s13 + $0x40] sm:$0x3] }
  0x21   : > { %v357_v23 = vsel %vm349_vm1, %v355_v13, %v356_v14  ;;  %v359_v24 = vsel %vm349_vm1, %v356_v14, %v358_v15  ;;  %v360_v25 = vrot.slane %v252_v21, 1  ;;  %v248_v26 = vld [vmem:[%s23928_s13 + $0x10] sm:$0x3]  ;;  %v23954_v31 = vand.u32 4294901760, %v891_v20  ;;  %v255_v32 = vld [vmem:[%s23928_s13 + $0x48] sm:$0xff]  ;;  %v24018_v2 = vld [vmem:[%s23928_s13 + $0x60] sm:$0xff] }
  0x22   : > { %v437_v28 = vsel %vm432_vm2, %v357_v23, 0  ;;  %v439_v29 = vsel %vm432_vm2, %v359_v24, 0  ;;  %v352_v30 = vsel %vm349_vm1, %v350_v18, %v351_v19  ;;  %v361_v36 = vrot.slane %v253_v22, 1  ;;  %v23973_v43 = vld [vmem:[%s23928_s13 + $0x50] sm:$0xff]  ;;  %v23991_v53 = vld [vmem:[%s23928_s13 + $0x58] sm:$0x3] }
  0x23   : > { %v23957_v33 = vand.u32 4294901760, %v437_v28  ;;  %v23959_v34 = vand.u32 4294901760, %v439_v29  ;;  %v433_v35 = vsel %vm432_vm2, %v352_v30, 0  ;;  %19290 = vmatprep.subr.mxu1 %v23954_v31  ;;  %v353_v38 = vrot.slane %v248_v26, 1  ;;  %28873 = vst [vmem:[#allocation15_spill] sm:$0xff] %v23973_v43  ;;  %28877 = vst [vmem:[#allocation19_spill] sm:$0xff] %v23991_v53 }
  0x24   : > { %v23962_v37 = vand.u32 4294901760, %v433_v35  ;;  %v363_v39 = vrot.slane %v254_v27, 1  ;;  %v362_v42 = vsel %vm349_vm1, %v360_v25, %v361_v36  ;;  %v365_v44 = vrot.slane %v255_v32, 1  ;;  %28880 = vst [vmem:[#allocation22_spill] sm:$0xff] %v24018_v2  ;;  %v24031_v13 = vld [vmem:[%s23928_s13 + $0x68] sm:$0xff]  ;;  %v24051_v23 = vld [vmem:[%s23928_s13 + $0x78] sm:$0xff] }
  0x25   : > { %28869 = vst [vmem:[#allocation11_spill] sm:$0xff] %v23957_v33  ;;  %28870 = vst [vmem:[#allocation12_spill] sm:$0xff] %v23959_v34  ;;  %v23966_v40 = vsub.f32 %v437_v28, %v23957_v33  ;;  %v23969_v41 = vsub.f32 %v439_v29, %v23959_v34  ;;  %v441_v46 = vsel %vm432_vm2, %v362_v42, 0  ;;  %v354_v47 = vsel %vm349_vm1, %v351_v19, %v353_v38  ;;  %v24039_v18 = vld [vmem:[%s23928_s13 + $0x70] sm:$0x3] }
  0x26   : > { %v23976_v45 = vsub.f32 %v433_v35, %v23962_v37  ;;  %v364_v48 = vsel %vm349_vm1, %v361_v36, %v363_v39  ;;  %v23987_v51 = vand.u32 4294901760, %v441_v46  ;;  %v435_v52 = vsel %vm432_vm2, %v354_v47, 0  ;;  %28884 = vst [vmem:[#allocation26_spill] sm:$0xff] %v24031_v13  ;;  %28887 = vst [vmem:[#allocation29_spill] sm:$0xff] %v24039_v18  ;;  %v24070_v35 = vld [vmem:[%s23928_s13 + $0x80] sm:$0xff] }
  0x27   : > { %28871 = vst [vmem:[#allocation13_spill] sm:$0xff] %v23966_v40  ;;  %28872 = vst [vmem:[#allocation14_spill] sm:$0xff] %v23969_v41  ;;  %v23982_v49 = vand.u32 4294901760, %v23966_v40  ;;  %v23985_v50 = vand.u32 4294901760, %v23969_v41  ;;  %v23994_v55 = vand.u32 4294901760, %v435_v52  ;;  %v443_v56 = vsel %vm432_vm2, %v364_v48, 0 }
  0x28   : > { %28876 = vst [vmem:[#allocation18_spill] sm:$0xff] %v23987_v51  ;;  %v27906_v54 = vand.u32 4294901760, %v23976_v45  ;;  %v366_v57 = vrot.slane %v23973_v43, 1  ;;  %v24000_v58 = vsub.f32 %v441_v46, %v23987_v51  ;;  %v24002_v59 = vand.u32 4294901760, %v443_v56  ;;  %28889 = vst [vmem:[#allocation31_spill] sm:$0xff] %v24051_v23  ;;  %v24081_v46 = vld [vmem:[%s23928_s13 + $0x90] sm:$0xff] }
  0x29   : > { %28874 = vst [vmem:[#allocation16_spill] sm:$0xff] %v23982_v49  ;;  %28875 = vst [vmem:[#allocation17_spill] sm:$0xff] %v23985_v50  ;;  %20592 = vmatprep.mubr.f32.mxu0 %v23982_v49  ;;  %v590_v60 = vsub.f32 %v23966_v40, %v23982_v49  ;;  %v600_v61 = vsub.f32 %v23969_v41, %v23985_v50  ;;  %v24013_v63 = vsub.f32 %v435_v52, %v23994_v55 }
  0x2a   : > { %28878 = vst [vmem:[#allocation20_spill] sm:$0xff] %v24000_v58  ;;  %28879 = vst [vmem:[#allocation21_spill] sm:$0xff] %v24002_v59  ;;  %20593 = vmatmul.mubr.f32.vlgmr.msra.gmra.mrb[0].mxu0 %v23985_v50  ;;  %v570_v62 = vsub.f32 %v23976_v45, %v27906_v54  ;;  %v367_v0 = vsel %vm349_vm1, %v365_v44, %v366_v57  ;;  %v368_v1 = vrot.slane %v23991_v53, 1  ;;  %v24021_v4 = vand.u32 4294901760, %v24000_v58  ;;  %v24078_v44 = vld [vmem:[%s23928_s13 + $0x88] sm:$0x3] }
  0x2b   : > { %v24024_v9 = vsub.f32 %v443_v56, %v24002_v59  ;;  %20641 = vmatpush3.msra.mxu0 %v23932_v8  ;;  %v24027_v10 = vand.u32 4294901760, %v590_v60  ;;  %v445_v11 = vsel %vm432_vm2, %v367_v0, 0  ;;  %v27905_v15 = vand.u32 4294901760, %v24013_v63  ;;  %28893 = vst [vmem:[#allocation35_spill] sm:$0xff] %v24070_v35  ;;  %28895 = vst [vmem:[#allocation37_spill] sm:$0xff] %v24078_v44 }
  0x2c   : > { %28881 = vst [vmem:[#allocation23_spill] sm:$0xff] %v24021_v4  ;;  %v571_v14 = vand.u32 4294901760, %v570_v62  ;;  %v24034_v16 = vand.u32 4294901760, %v445_v11  ;;  %v24036_v17 = vand.u32 4294901760, %v600_v61  ;;  %20690 = vmatprep.subr.mxu0 %v23907_v3  ;;  %20595 = vmatprep.mubr.f32.mxu0 %v24021_v4  ;;  %v369_v20 = vsel %vm349_vm1, %v366_v57, %v368_v1  ;;  %28896 = vst [vmem:[#allocation38_spill] sm:$0xff] %v24081_v46  ;;  %v24091_v57 = vld [vmem:[%s23928_s13 + $0x98] sm:$0xff] }
  0x2d   : > { %28882 = vst [vmem:[#allocation24_spill] sm:$0xff] %v24024_v9  ;;  %28883 = vst [vmem:[#allocation25_spill] sm:$0xff] %v24027_v10  ;;  %v24044_v19 = vand.u32 4294901760, %v24024_v9  ;;  %v610_v21 = vsub.f32 %v24000_v58, %v24021_v4  ;;  %v370_v22 = vrot.slane %v24018_v2, 1  ;;  %v580_v24 = vsub.f32 %v24013_v63, %v27905_v15  ;;  %v24349_v2 = vld [vmem:[%s23928_s13 + $0x120] sm:$0xff] }
  0x2e   : > { %28885 = vst [vmem:[#allocation27_spill] sm:$0xff] %v24034_v16  ;;  %28886 = vst [vmem:[#allocation28_spill] sm:$0xff] %v24036_v17  ;;  %19242 = vmatprep.mubr.f32.mxu1 %v571_v14  ;;  %v24057_v25 = vsub.f32 %v445_v11, %v24034_v16  ;;  %v447_v26 = vsel %vm432_vm2, %v369_v20, 0  ;;  %v371_v27 = vrot.slane %v24031_v13, 1  ;;  %v373_v32 = vrot.slane %v24039_v18, 1  ;;  %v24334_v13 = vld [vmem:[%s23928_s13 + $0x110] sm:$0xff] }
  0x2f   : > { %28888 = vst [vmem:[#allocation30_spill] sm:$0xff] %v24044_v19  ;;  %20596 = vmatmul.mubr.f32.gmra.mrb[2].mxu0 %v24044_v19  ;;  %v24062_v28 = vand.u32 4294901760, %v447_v26  ;;  %v24064_v29 = vand.u32 4294901760, %v610_v21  ;;  %v620_v30 = vsub.f32 %v24024_v9, %v24044_v19  ;;  %v581_v36 = vand.u32 4294901760, %v580_v24  ;;  %28899 = vst [vmem:[#allocation41_spill] sm:$0xff] %v24091_v57  ;;  %v24193_v19 = vld [vmem:[%s23928_s13 + $0xc8] sm:$0xff] }
  0x30   : > { %28890 = vst [vmem:[#allocation32_spill] sm:$0xff] %v24057_v25  ;;  %v24073_v38 = vand.u32 4294901760, %v24057_v25  ;;  %v372_v39 = vsel %vm349_vm1, %v370_v22, %v371_v27  ;;  %v375_v42 = vrot.slane %v24051_v23, 1  ;;  %v374_v56 = vsel %vm349_vm1, %v371_v27, %v373_v32  ;;  %28924 = vst [vmem:[#allocation66_spill] sm:$0xff] %v24193_v19 }
  0x31   : > { %28891 = vst [vmem:[#allocation33_spill] sm:$0xff] %v24062_v28  ;;  %28892 = vst [vmem:[#allocation34_spill] sm:$0xff] %v24064_v29  ;;  %v24084_v47 = vsub.f32 %v447_v26, %v24062_v28  ;;  %v449_v48 = vsel %vm432_vm2, %v372_v39, 0  ;;  %v24087_v52 = vand.u32 4294901760, %v620_v30  ;;  %19243 = vmatmul.mubr.f32.vlgmr.msra.gmra.mrb[0].mxu1 %v581_v36  ;;  %v451_v61 = vsel %vm432_vm2, %v374_v56, 0 }
  0x32   : > { %28894 = vst [vmem:[#allocation36_spill] sm:$0xff] %v24073_v38  ;;  %20598 = vmatprep.mubr.f32.mxu0 %v24073_v38  ;;  %v24094_v60 = vand.u32 4294901760, %v449_v48  ;;  %v630_v62 = vsub.f32 %v24057_v25, %v24073_v38  ;;  %v376_v0 = vrot.slane %v24070_v35, 1  ;;  %19291 = vmatpush3.msra.mxu1 %v23954_v31  ;;  %v24105_v11 = vand.u32 4294901760, %v451_v61  ;;  %v24126_v36 = vld [vmem:[%s23928_s13 + $0xa0] sm:$0x3] }
  0x33   : > { %28897 = vst [vmem:[#allocation39_spill] sm:$0xff] %v24084_v47  ;;  %28898 = vst [vmem:[#allocation40_spill] sm:$0xff] %v24087_v52  ;;  %19245 = vmatprep.mubr.f32.mxu1 %v24027_v10  ;;  %v24103_v1 = vand.u32 4294901760, %v24084_v47  ;;  %v378_v14 = vrot.slane %v24078_v44, 1  ;;  %v380_v20 = vrot.slane %v24081_v46, 1  ;;  %v381_v24 = vrot.slane %v24091_v57, 1  ;;  %19340 = vmatprep.subr.mxu1 %v23923_v7 }
  0x34   : > { %28900 = vst [vmem:[#allocation42_spill] sm:$0xff] %v24094_v60  ;;  %28902 = vst [vmem:[#allocation44_spill] sm:$0xff] %v24105_v11  ;;  %v24110_v21 = vsub.f32 %v449_v48, %v24094_v60  ;;  %v24112_v22 = vand.u32 4294901760, %v630_v62  ;;  %v377_v31 = vsel %vm349_vm1, %v375_v42, %v376_v0  ;;  %v24119_v26 = vsub.f32 %v451_v61, %v24105_v11  ;;  %v24137_v61 = vld [vmem:[%s23928_s13 + $0xa8] sm:$0xff]  ;;  %v24140_v62 = vld [vmem:[%s23928_s13 + $0xb0] sm:$0xff] }
  0x35   : > { %28901 = vst [vmem:[#allocation43_spill] sm:$0xff] %v24103_v1  ;;  %20599 = vmatmul.mubr.f32.gmra.mrb[4].mxu0 %v24103_v1  ;;  %v453_v27 = vsel %vm432_vm2, %v377_v31, 0  ;;  %v640_v30 = vsub.f32 %v24084_v47, %v24103_v1  ;;  %v379_v32 = vsel %vm349_vm1, %v376_v0, %v378_v14  ;;  %28906 = vst [vmem:[#allocation48_spill] sm:$0xff] %v24126_v36  ;;  %19246 = vmatmul.mubr.f32.gmra.mrb[2].mxu1 %v24036_v17  ;;  %v24296_v35 = vld [vmem:[%s23928_s13 + $0x100] sm:$0x3] }
  0x36   : > { %28903 = vst [vmem:[#allocation45_spill] sm:$0xff] %v24110_v21  ;;  %28904 = vst [vmem:[#allocation46_spill] sm:$0xff] %v24112_v22  ;;  %v24130_v39 = vand.u32 4294901760, %v24110_v21  ;;  %v24132_v42 = vand.u32 4294901760, %v453_v27  ;;  %v455_v48 = vsel %vm432_vm2, %v379_v32, 0  ;;  %v382_v56 = vsel %vm349_vm1, %v380_v20, %v381_v24  ;;  %19248 = vmatprep.mubr.f32.mxu1 %v24064_v29 }
  0x37   : > { %28905 = vst [vmem:[#allocation47_spill] sm:$0xff] %v24119_v26  ;;  %28909 = vst [vmem:[#allocation51_spill] sm:$0xff] %v24137_v61  ;;  %v24144_v0 = vand.u32 4294901760, %v24119_v26  ;;  %v24146_v14 = vand.u32 4294901760, %v640_v30  ;;  %v24148_v31 = vand.u32 4294901760, %v455_v48  ;;  %v457_v15 = vsel %vm432_vm2, %v382_v56, 0 }
  0x38   : > { %28907 = vst [vmem:[#allocation49_spill] sm:$0xff] %v24130_v39  ;;  %28908 = vst [vmem:[#allocation50_spill] sm:$0xff] %v24132_v42  ;;  %20601 = vmatprep.mubr.f32.mxu0 %v24130_v39  ;;  %v24153_v20 = vsub.f32 %v453_v27, %v24132_v42  ;;  %v650_v32 = vsub.f32 %v24110_v21, %v24130_v39  ;;  %v24157_v54 = vand.u32 4294901760, %v457_v15  ;;  %v383_v17 = vrot.slane %v24126_v36, 1  ;;  %v24179_v39 = vld [vmem:[%s23928_s13 + $0xb8] sm:$0x3] }
  0x39   : > { %28910 = vst [vmem:[#allocation52_spill] sm:$0xff] %v24140_v62  ;;  %28911 = vst [vmem:[#allocation53_spill] sm:$0xff] %v24144_v0  ;;  %20602 = vmatmul.mubr.f32.gmra.mrb[6].mxu0 %v24144_v0  ;;  %v24162_v30 = vsub.f32 %v455_v48, %v24148_v31  ;;  %v660_v56 = vsub.f32 %v24119_v26, %v24144_v0  ;;  %v385_v10 = vrot.slane %v24137_v61, 1  ;;  %v386_v27 = vrot.slane %v24140_v62, 1  ;;  %v24182_v0 = vld [vmem:[%s23928_s13 + $0xc0] sm:$0xff]  ;;  %v24256_v36 = vld [vmem:[%s23928_s13 + $0xf0] sm:$0xff] }
  0x3a   : > { %28912 = vst [vmem:[#allocation54_spill] sm:$0xff] %v24146_v14  ;;  %28913 = vst [vmem:[#allocation55_spill] sm:$0xff] %v24148_v31  ;;  %19249 = vmatmul.mubr.f32.gmra.mrb[4].mxu1 %v24087_v52  ;;  %v24170_v6 = vand.u32 4294901760, %v24153_v20  ;;  %v24172_v8 = vand.u32 4294901760, %v650_v32  ;;  %v24175_v29 = vsub.f32 %v457_v15, %v24157_v54  ;;  %v384_v48 = vsel %vm349_vm1, %v381_v24, %v383_v17  ;;  %v24243_v61 = vld [vmem:[%s23928_s13 + $0xe0] sm:$0xff] }
  0x3b   : > { %28914 = vst [vmem:[#allocation56_spill] sm:$0xff] %v24153_v20  ;;  %28915 = vst [vmem:[#allocation57_spill] sm:$0xff] %v24157_v54  ;;  %19251 = vmatprep.mubr.f32.mxu1 %v24112_v22  ;;  %v24186_v1 = vand.u32 4294901760, %v24162_v30  ;;  %v24188_v52 = vand.u32 4294901760, %v660_v56  ;;  %v459_v32 = vsel %vm432_vm2, %v384_v48, 0  ;;  %v387_v38 = vsel %vm349_vm1, %v385_v10, %v386_v27 }
  0x3c   : > { %28916 = vst [vmem:[#allocation58_spill] sm:$0xff] %v24162_v30  ;;  %28917 = vst [vmem:[#allocation59_spill] sm:$0xff] %v24170_v6  ;;  %20604 = vmatprep.mubr.f32.mxu0 %v24170_v6  ;;  %v24197_v15 = vand.u32 4294901760, %v24175_v29  ;;  %v24199_v17 = vand.u32 4294901760, %v459_v32  ;;  %v670_v24 = vsub.f32 %v24153_v20, %v24170_v6  ;;  %v461_v22 = vsel %vm432_vm2, %v387_v38, 0 }
  0x3d   : > { %28918 = vst [vmem:[#allocation60_spill] sm:$0xff] %v24172_v8  ;;  %28919 = vst [vmem:[#allocation61_spill] sm:$0xff] %v24175_v29  ;;  %v24205_v56 = vld [vmem:[%s23928_s13 + $0xd0] sm:$0x3]  ;;  %20605 = vmatmul.mubr.f32.gmra.mrb[8].mxu0 %v24186_v1  ;;  %v24208_v10 = vand.u32 4294901760, %v461_v22  ;;  %v680_v48 = vsub.f32 %v24162_v30, %v24186_v1  ;;  %v388_v4 = vrot.slane %v24179_v39, 1 }
  0x3e   : > { %28920 = vst [vmem:[#allocation62_spill] sm:$0xff] %v24179_v39  ;;  %28921 = vst [vmem:[#allocation63_spill] sm:$0xff] %v24182_v0  ;;  %v390_v50 = vrot.slane %v24182_v0, 1  ;;  %19252 = vmatmul.mubr.f32.gmra.mrb[6].mxu1 %v24146_v14  ;;  %20607 = vmatprep.mubr.f32.mxu0 %v24197_v15  ;;  %v24217_v38 = vsub.f32 %v459_v32, %v24199_v17  ;;  %v24219_v6 = vand.u32 4294901760, %v670_v24  ;;  %v391_v62 = vrot.slane %v24193_v19, 1  ;;  %v24233_v24 = vld [vmem:[%s23928_s13 + $0xd8] sm:$0xff] }
  0x3f   : > { %28922 = vst [vmem:[#allocation64_spill] sm:$0xff] %v24186_v1  ;;  %28923 = vst [vmem:[#allocation65_spill] sm:$0xff] %v24188_v52  ;;  %v690_v49 = vsub.f32 %v24175_v29, %v24197_v15  ;;  %19254 = vmatprep.mubr.f32.mxu1 %v24172_v8  ;;  %v24226_v1 = vsub.f32 %v461_v22, %v24208_v10  ;;  %v24228_v14 = vand.u32 4294901760, %v680_v48  ;;  %v393_v32 = vrot.slane %v24205_v56, 1  ;;  %v24556_v20 = vld [vmem:[%s23928_s13 + $0x190] sm:$0x3] }
  0x40   : > { %28925 = vst [vmem:[#allocation67_spill] sm:$0xff] %v24197_v15  ;;  %28926 = vst [vmem:[#allocation68_spill] sm:$0xff] %v24199_v17  ;;  %v389_v0 = vsel %vm349_vm1, %v386_v27, %v388_v4  ;;  %v24236_v39 = vand.u32 4294901760, %v24217_v38  ;;  %v392_v8 = vsel %vm349_vm1, %v390_v50, %v391_v62  ;;  %v396_v57 = vrot.slane %v24243_v61, 1 }
  0x41   : > { %28927 = vst [vmem:[#allocation69_spill] sm:$0xff] %v24205_v56  ;;  %28928 = vst [vmem:[#allocation70_spill] sm:$0xff] %v24208_v10  ;;  %v463_v15 = vsel %vm432_vm2, %v389_v0, 0  ;;  %v24239_v19 = vand.u32 4294901760, %v690_v49  ;;  %v24246_v22 = vand.u32 4294901760, %v24226_v1  ;;  %v465_v4 = vsel %vm432_vm2, %v392_v8, 0 }
  0x42   : > { %28929 = vst [vmem:[#allocation71_spill] sm:$0xff] %v24217_v38  ;;  %28930 = vst [vmem:[#allocation72_spill] sm:$0xff] %v24219_v6  ;;  %v24248_v48 = vand.u32 4294901760, %v463_v15  ;;  %v394_v27 = vsel %vm349_vm1, %v391_v62, %v393_v32  ;;  %v24253_v56 = vld [vmem:[%s23928_s13 + $0xe8] sm:$0x3]  ;;  %19255 = vmatmul.mubr.f32.gmra.mrb[8].mxu1 %v24188_v52  ;;  %20608 = vmatmul.mubr.f32.gmra.mrb[10].mxu0 %v24236_v39  ;;  %v24260_v49 = vand.u32 4294901760, %v465_v4 }
  0x43   : > { %28931 = vst [vmem:[#allocation73_spill] sm:$0xff] %v24226_v1  ;;  %28932 = vst [vmem:[#allocation74_spill] sm:$0xff] %v24228_v14  ;;  %v700_v50 = vsub.f32 %v24217_v38, %v24236_v39  ;;  %v467_v0 = vsel %vm432_vm2, %v394_v27, 0  ;;  %v395_v8 = vrot.slane %v24233_v24, 1  ;;  %19257 = vmatprep.mubr.f32.mxu1 %v24219_v6  ;;  %20610 = vmatprep.mubr.f32.mxu0 %v24246_v22  ;;  %v398_v6 = vrot.slane %v24253_v56, 1 }
  0x44   : > { %28933 = vst [vmem:[#allocation75_spill] sm:$0xff] %v24233_v24  ;;  %28934 = vst [vmem:[#allocation76_spill] sm:$0xff] %v24236_v39  ;;  %v24269_v62 = vsub.f32 %v463_v15, %v24248_v48  ;;  %v24271_v32 = vand.u32 4294901760, %v467_v0  ;;  %v710_v52 = vsub.f32 %v24226_v1, %v24246_v22  ;;  %v24277_v39 = vld [vmem:[%s23928_s13 + $0xf8] sm:$0xff]  ;;  %v24280_v27 = vsub.f32 %v465_v4, %v24260_v49  ;;  %v24429_v1 = vld [vmem:[%s23928_s13 + $0x148] sm:$0x3] }
  0x45   : > { %28935 = vst [vmem:[#allocation77_spill] sm:$0xff] %v24239_v19  ;;  %28936 = vst [vmem:[#allocation78_spill] sm:$0xff] %v24243_v61  ;;  %v24282_v24 = vand.u32 4294901760, %v700_v50  ;;  %v400_v46 = vrot.slane %v24256_v36, 1  ;;  %v397_v61 = vsel %vm349_vm1, %v395_v8, %v396_v57 }
  0x46   : > { %28937 = vst [vmem:[#allocation79_spill] sm:$0xff] %v24246_v22  ;;  %28938 = vst [vmem:[#allocation80_spill] sm:$0xff] %v24248_v48  ;;  %v24287_v15 = vand.u32 4294901760, %v24269_v62  ;;  %v24290_v44 = vsub.f32 %v467_v0, %v24271_v32  ;;  %v24292_v22 = vand.u32 4294901760, %v710_v52  ;;  %19258 = vmatmul.mubr.f32.gmra.mrb[10].mxu1 %v24228_v14  ;;  %v24300_v4 = vand.u32 4294901760, %v24280_v27 }
  0x47   : > { %28939 = vst [vmem:[#allocation81_spill] sm:$0xff] %v24253_v56  ;;  %28940 = vst [vmem:[#allocation82_spill] sm:$0xff] %v24256_v36  ;;  %v469_v50 = vsel %vm432_vm2, %v397_v61, 0  ;;  %v399_v36 = vsel %vm349_vm1, %v396_v57, %v398_v6  ;;  %v401_v56 = vrot.slane %v24277_v39, 1  ;;  %19260 = vmatprep.mubr.f32.mxu1 %v24239_v19  ;;  %v403_v19 = vrot.slane %v24296_v35, 1 }
  0x48   : > { %28941 = vst [vmem:[#allocation83_spill] sm:$0xff] %v24260_v49  ;;  %28942 = vst [vmem:[#allocation84_spill] sm:$0xff] %v24269_v62  ;;  %20611 = vmatmul.mubr.f32.gmra.mrb[12].mxu0 %v24287_v15  ;;  %v24308_v52 = vand.u32 4294901760, %v24290_v44  ;;  %v24310_v0 = vand.u32 4294901760, %v469_v50  ;;  %v720_v8 = vsub.f32 %v24269_v62, %v24287_v15  ;;  %v471_v14 = vsel %vm432_vm2, %v399_v36, 0 }
  0x49   : > { %28943 = vst [vmem:[#allocation85_spill] sm:$0xff] %v24271_v32  ;;  %28944 = vst [vmem:[#allocation86_spill] sm:$0xff] %v24277_v39  ;;  %20613 = vmatprep.mubr.f32.mxu0 %v24300_v4  ;;  %v24316_v6 = vand.u32 4294901760, %v471_v14  ;;  %v730_v57 = vsub.f32 %v24280_v27, %v24300_v4  ;;  %v402_v61 = vsel %vm349_vm1, %v400_v46, %v401_v56  ;;  %v24323_v39 = vld [vmem:[%s23928_s13 + $0x108] sm:$0xff] }
  0x4a   : > { %28945 = vst [vmem:[#allocation87_spill] sm:$0xff] %v24280_v27  ;;  %28946 = vst [vmem:[#allocation88_spill] sm:$0xff] %v24282_v24  ;;  %v24328_v36 = vand.u32 4294901760, %v720_v8  ;;  %v473_v23 = vsel %vm432_vm2, %v402_v61, 0  ;;  %v740_v18 = vsub.f32 %v24290_v44, %v24308_v52  ;;  %19261 = vmatmul.mubr.f32.gmra.mrb[12].mxu1 %v24282_v24  ;;  %v24346_v8 = vld [vmem:[%s23928_s13 + $0x118] sm:$0x3] }
  0x4b   : > { %28947 = vst [vmem:[#allocation89_spill] sm:$0xff] %v24287_v15  ;;  %28948 = vst [vmem:[#allocation90_spill] sm:$0xff] %v24290_v44  ;;  %v24326_v15 = vsub.f32 %v469_v50, %v24310_v0  ;;  %v24338_v46 = vsub.f32 %v471_v14, %v24316_v6  ;;  %v404_v50 = vsel %vm349_vm1, %v401_v56, %v403_v19  ;;  %v24352_v61 = vld [vmem:[%s23928_s13 + $0x128] sm:$0xff]  ;;  %19263 = vmatprep.mubr.f32.mxu1 %v24292_v22 }
  0x4c   : > { %28949 = vst [vmem:[#allocation91_spill] sm:$0xff] %v24292_v22  ;;  %28950 = vst [vmem:[#allocation92_spill] sm:$0xff] %v24296_v35  ;;  %v24342_v35 = vand.u32 4294901760, %v473_v23  ;;  %20614 = vmatmul.mubr.f32.gmra.mrb[14].mxu0 %v24308_v52  ;;  %v24359_v14 = vand.u32 4294901760, %v740_v18  ;;  %v405_v19 = vrot.slane %v24323_v39, 1  ;;  %v406_v22 = vrot.slane %v24334_v13, 1 }
  0x4d   : > { %28951 = vst [vmem:[#allocation93_spill] sm:$0xff] %v24300_v4  ;;  %28952 = vst [vmem:[#allocation94_spill] sm:$0xff] %v24308_v52  ;;  %v24340_v4 = vand.u32 4294901760, %v730_v57  ;;  %v24357_v24 = vand.u32 4294901760, %v24326_v15  ;;  %v475_v57 = vsel %vm432_vm2, %v404_v50, 0  ;;  %v24364_v56 = vand.u32 4294901760, %v24338_v46 }
  0x4e   : > { %28953 = vst [vmem:[#allocation95_spill] sm:$0xff] %v24310_v0  ;;  %28954 = vst [vmem:[#allocation96_spill] sm:$0xff] %v24316_v6  ;;  %v24367_v53 = vsub.f32 %v473_v23, %v24342_v35  ;;  %v24369_v43 = vand.u32 4294901760, %v475_v57  ;;  %v408_v50 = vrot.slane %v24346_v8, 1  ;;  %v410_v52 = vrot.slane %v24349_v2, 1  ;;  %19264 = vmatmul.mubr.f32.gmra.mrb[14].mxu1 %v24328_v36 }
  0x4f   : > { %28955 = vst [vmem:[#allocation97_spill] sm:$0xff] %v24323_v39  ;;  %28956 = vst [vmem:[#allocation98_spill] sm:$0xff] %v24326_v15  ;;  %20616 = vmatprep.mubr.f32.mxu0 %v24357_v24  ;;  %v750_v18 = vsub.f32 %v24326_v15, %v24357_v24  ;;  %v411_v39 = vrot.slane %v24352_v61, 1  ;;  %v24389_v15 = vld [vmem:[%s23928_s13 + $0x130] sm:$0x3]  ;;  %19266 = vmatprep.mubr.f32.mxu1 %v24340_v4 }
  0x50   : > { %28957 = vst [vmem:[#allocation99_spill] sm:$0xff] %v24328_v36  ;;  %28958 = vst [vmem:[#allocation100_spill] sm:$0xff] %v24334_v13  ;;  %v24380_v23 = vand.u32 4294901760, %v24367_v53  ;;  %v24383_v44 = vsub.f32 %v475_v57, %v24369_v43  ;;  %v407_v13 = vsel %vm349_vm1, %v405_v19, %v406_v22  ;;  %20617 = vmatmul.mubr.f32.gmra.mrb[16].mxu0 %v24364_v56 }
  0x51   : > { %28959 = vst [vmem:[#allocation101_spill] sm:$0xff] %v24338_v46  ;;  %28960 = vst [vmem:[#allocation102_spill] sm:$0xff] %v24340_v4  ;;  %v477_v36 = vsel %vm432_vm2, %v407_v13, 0  ;;  %v412_v57 = vsel %vm349_vm1, %v410_v52, %v411_v39  ;;  %v24411_v4 = vld [vmem:[%s23928_s13 + $0x140] sm:$0xff] }
  0x52   : > { %28961 = vst [vmem:[#allocation103_spill] sm:$0xff] %v24342_v35  ;;  %28962 = vst [vmem:[#allocation104_spill] sm:$0xff] %v24346_v8  ;;  %v24399_v8 = vld [vmem:[%s23928_s13 + $0x138] sm:$0xff]  ;;  %20619 = vmatprep.mubr.f32.mxu0 %v24380_v23  ;;  %v24403_v19 = vand.u32 4294901760, %v24383_v44  ;;  %v481_v52 = vsel %vm432_vm2, %v412_v57, 0  ;;  %19267 = vmatmul.mubr.f32.gmra.mrb[16].mxu1 %v24359_v14 }
  0x53   : > { %28963 = vst [vmem:[#allocation105_spill] sm:$0xff] %v24349_v2  ;;  %28964 = vst [vmem:[#allocation106_spill] sm:$0xff] %v24352_v61  ;;  %v24393_v61 = vand.u32 4294901760, %v750_v18  ;;  %v409_v2 = vsel %vm349_vm1, %v406_v22, %v408_v50  ;;  %v770_v22 = vsub.f32 %v24367_v53, %v24380_v23  ;;  %v413_v50 = vrot.slane %v24389_v15, 1 }
  0x54   : > { %28965 = vst [vmem:[#allocation107_spill] sm:$0xff] %v24357_v24  ;;  %28966 = vst [vmem:[#allocation108_spill] sm:$0xff] %v24359_v14  ;;  %v760_v24 = vsub.f32 %v24338_v46, %v24364_v56  ;;  %v24405_v46 = vand.u32 4294901760, %v477_v36  ;;  %v479_v18 = vsel %vm432_vm2, %v409_v2, 0  ;;  %v780_v2 = vsub.f32 %v24383_v44, %v24403_v19  ;;  %20620 = vmatmul.mubr.f32.gmra.mrb[18].mxu0 %v24403_v19 }
  0x55   : > { %28967 = vst [vmem:[#allocation109_spill] sm:$0xff] %v24364_v56  ;;  %28968 = vst [vmem:[#allocation110_spill] sm:$0xff] %v24367_v53  ;;  %v24413_v13 = vand.u32 4294901760, %v479_v18  ;;  %v415_v62 = vrot.slane %v24399_v8, 1  ;;  %19269 = vmatprep.mubr.f32.mxu1 %v24393_v61  ;;  %v24436_v14 = vand.u32 4294901760, %v770_v22 }
  0x56   : > { %28969 = vst [vmem:[#allocation111_spill] sm:$0xff] %v24369_v43  ;;  %28970 = vst [vmem:[#allocation112_spill] sm:$0xff] %v24380_v23  ;;  %v24407_v56 = vand.u32 4294901760, %v760_v24  ;;  %v24421_v27 = vsub.f32 %v477_v36, %v24405_v46  ;;  %v24423_v24 = vand.u32 4294901760, %v481_v52  ;;  %v414_v36 = vsel %vm349_vm1, %v411_v39, %v413_v50 }
  0x57   : > { %28971 = vst [vmem:[#allocation113_spill] sm:$0xff] %v24383_v44  ;;  %28972 = vst [vmem:[#allocation114_spill] sm:$0xff] %v24389_v15  ;;  %v24434_v57 = vsub.f32 %v479_v18, %v24413_v13  ;;  %v416_v23 = vrot.slane %v24411_v4, 1  ;;  %v24441_v15 = vld [vmem:[%s23928_s13 + $0x150] sm:$0xff]  ;;  %v418_v50 = vrot.slane %v24429_v1, 1 }
  0x58   : > { %28973 = vst [vmem:[#allocation115_spill] sm:$0xff] %v24393_v61  ;;  %28974 = vst [vmem:[#allocation116_spill] sm:$0xff] %v24399_v8  ;;  %v24444_v8 = vand.u32 4294901760, %v24421_v27  ;;  %v24447_v44 = vsub.f32 %v481_v52, %v24423_v24  ;;  %v483_v61 = vsel %vm432_vm2, %v414_v36, 0  ;;  %19270 = vmatmul.mubr.f32.gmra.mrb[18].mxu1 %v24407_v56  ;;  %v420_v53 = vrot.slane %v24441_v15, 1 }
  0x59   : > { %28975 = vst [vmem:[#allocation117_spill] sm:$0xff] %v24403_v19  ;;  %28976 = vst [vmem:[#allocation118_spill] sm:$0xff] %v24405_v46  ;;  %v24449_v19 = vand.u32 4294901760, %v780_v2  ;;  %v24453_v18 = vand.u32 4294901760, %v24434_v57  ;;  %v24455_v22 = vand.u32 4294901760, %v483_v61  ;;  %v417_v39 = vsel %vm349_vm1, %v415_v62, %v416_v23  ;;  %19272 = vmatprep.mubr.f32.mxu1 %v24436_v14 }
  0x5a   : > { %28977 = vst [vmem:[#allocation119_spill] sm:$0xff] %v24407_v56  ;;  %28978 = vst [vmem:[#allocation120_spill] sm:$0xff] %v24411_v4  ;;  %v24460_v4 = vld [vmem:[%s23928_s13 + $0x158] sm:$0xff]  ;;  %20622 = vmatprep.mubr.f32.mxu0 %v24444_v8  ;;  %v24465_v52 = vand.u32 4294901760, %v24447_v44  ;;  %v790_v2 = vsub.f32 %v24421_v27, %v24444_v8  ;;  %v485_v36 = vsel %vm432_vm2, %v417_v39, 0  ;;  %v24485_v39 = vld [vmem:[%s23928_s13 + $0x168] sm:$0xff] }
  0x5b   : > { %28979 = vst [vmem:[#allocation121_spill] sm:$0xff] %v24413_v13  ;;  %28980 = vst [vmem:[#allocation122_spill] sm:$0xff] %v24421_v27  ;;  %20623 = vmatmul.mubr.f32.gmra.mrb[20].mxu0 %v24453_v18  ;;  %v24474_v62 = vsub.f32 %v483_v61, %v24455_v22  ;;  %v24476_v56 = vand.u32 4294901760, %v485_v36  ;;  %v24482_v27 = vld [vmem:[%s23928_s13 + $0x160] sm:$0x3]  ;;  %v421_v38 = vrot.slane %v24460_v4, 1 }
  0x5c   : > { %28981 = vst [vmem:[#allocation123_spill] sm:$0xff] %v24423_v24  ;;  %28982 = vst [vmem:[#allocation124_spill] sm:$0xff] %v24429_v1  ;;  %v800_v1 = vsub.f32 %v24434_v57, %v24453_v18  ;;  %20625 = vmatprep.mubr.f32.mxu0 %v24465_v52  ;;  %v810_v61 = vsub.f32 %v24447_v44, %v24465_v52  ;;  %19273 = vmatmul.mubr.f32.gmra.mrb[20].mxu1 %v24449_v19 }
  0x5d   : > { %28983 = vst [vmem:[#allocation125_spill] sm:$0xff] %v24434_v57  ;;  %28984 = vst [vmem:[#allocation126_spill] sm:$0xff] %v24436_v14  ;;  %v24495_v29 = vand.u32 4294901760, %v24474_v62  ;;  %v24505_v57 = vld [vmem:[%s23928_s13 + $0x170] sm:$0xff] }
  0x5e   : > { %28985 = vst [vmem:[#allocation127_spill] sm:$0xff] %v24441_v15  ;;  %28986 = vst [vmem:[#allocation128_spill] sm:$0xff] %v24444_v8  ;;  %v419_v8 = vsel %vm349_vm1, %v416_v23, %v418_v50  ;;  %v24488_v15 = vand.u32 4294901760, %v790_v2  ;;  %v24498_v23 = vsub.f32 %v485_v36, %v24476_v56  ;;  %v24500_v50 = vand.u32 4294901760, %v800_v1  ;;  %v24508_v2 = vld [vmem:[%s23928_s13 + $0x178] sm:$0x3] }
  0x5f   : > { %28987 = vst [vmem:[#allocation129_spill] sm:$0xff] %v24447_v44  ;;  %28988 = vst [vmem:[#allocation130_spill] sm:$0xff] %v24449_v19  ;;  %v487_v14 = vsel %vm432_vm2, %v419_v8, 0  ;;  %v24511_v8 = vand.u32 4294901760, %v810_v61  ;;  %v425_v44 = vrot.slane %v24485_v39, 1  ;;  %20626 = vmatmul.mubr.f32.gmra.mrb[22].mxu0 %v24495_v29 }
  0x60   : > { %28989 = vst [vmem:[#allocation131_spill] sm:$0xff] %v24453_v18  ;;  %28990 = vst [vmem:[#allocation132_spill] sm:$0xff] %v24455_v22  ;;  %v24502_v18 = vand.u32 4294901760, %v487_v14  ;;  %19275 = vmatprep.mubr.f32.mxu1 %v24488_v15  ;;  %v24519_v1 = vand.u32 4294901760, %v24498_v23 }
  0x61   : > { %28991 = vst [vmem:[#allocation133_spill] sm:$0xff] %v24460_v4  ;;  %28992 = vst [vmem:[#allocation134_spill] sm:$0xff] %v24465_v52  ;;  %v422_v52 = vsel %vm349_vm1, %v420_v53, %v421_v38  ;;  %v423_v4 = vrot.slane %v24482_v27, 1  ;;  %v820_v53 = vsub.f32 %v24474_v62, %v24495_v29  ;;  %19276 = vmatmul.mubr.f32.gmra.mrb[22].mxu1 %v24500_v50 }
  0x62   : > { %28993 = vst [vmem:[#allocation135_spill] sm:$0xff] %v24474_v62  ;;  %28994 = vst [vmem:[#allocation136_spill] sm:$0xff] %v24476_v56  ;;  %v24522_v36 = vsub.f32 %v487_v14, %v24502_v18  ;;  %v489_v19 = vsel %vm432_vm2, %v422_v52, 0  ;;  %20628 = vmatprep.mubr.f32.mxu0 %v24519_v1  ;;  %v24550_v62 = vld [vmem:[%s23928_s13 + $0x180] sm:$0xff]  ;;  %19278 = vmatprep.mubr.f32.mxu1 %v24511_v8 }
  0x63   : > { %28995 = vst [vmem:[#allocation137_spill] sm:$0xff] %v24482_v27  ;;  %28996 = vst [vmem:[#allocation138_spill] sm:$0xff] %v24485_v39  ;;  %v24527_v61 = vand.u32 4294901760, %v489_v19  ;;  %v424_v39 = vsel %vm349_vm1, %v421_v38, %v423_v4  ;;  %v428_v27 = vrot.slane %v24508_v2, 1  ;;  %v24536_v52 = vand.u32 4294901760, %v820_v53  ;;  %v24553_v53 = vld [vmem:[%s23928_s13 + $0x188] sm:$0xff] }
  0x64   : > { %28997 = vst [vmem:[#allocation139_spill] sm:$0xff] %v24488_v15  ;;  %28998 = vst [vmem:[#allocation140_spill] sm:$0xff] %v24495_v29  ;;  %v426_v15 = vrot.slane %v24505_v57, 1  ;;  %v24534_v14 = vand.u32 4294901760, %v24522_v36  ;;  %v491_v30 = vsel %vm432_vm2, %v424_v39, 0  ;;  %v830_v29 = vsub.f32 %v24498_v23, %v24519_v1 }
  0x65   : > { %28999 = vst [vmem:[#allocation141_spill] sm:$0xff] %v24498_v23  ;;  %29000 = vst [vmem:[#allocation142_spill] sm:$0xff] %v24500_v50  ;;  %v24543_v38 = vsub.f32 %v489_v19, %v24527_v61  ;;  %v24545_v4 = vand.u32 4294901760, %v491_v30  ;;  %19279 = vmatmul.mubr.f32.gmra.mrb[24].mxu1 %v24536_v52 }
  0x66   : > { %29001 = vst [vmem:[#allocation143_spill] sm:$0xff] %v24502_v18  ;;  %29002 = vst [vmem:[#allocation144_spill] sm:$0xff] %v24505_v57  ;;  %v429_v57 = vsel %vm349_vm1, %v426_v15, %v428_v27  ;;  %20629 = vmatmul.mubr.f32.gmra.mrb[24].mxu0 %v24534_v14  ;;  %v24560_v39 = vand.u32 4294901760, %v830_v29  ;;  %v840_v50 = vsub.f32 %v24522_v36, %v24534_v14  ;;  %v7910_v29 = vrot.slane %v24550_v62, 1 }
  0x67   : > { %29003 = vst [vmem:[#allocation145_spill] sm:$0xff] %v24508_v2  ;;  %29004 = vst [vmem:[#allocation146_spill] sm:$0xff] %v24511_v8  ;;  %v427_v2 = vsel %vm349_vm1, %v425_v44, %v426_v15  ;;  %v495_v44 = vsel %vm432_vm2, %v429_v57, 0  ;;  %v24567_v27 = vand.u32 4294901760, %v24543_v38  ;;  %v24570_v15 = vsub.f32 %v491_v30, %v24545_v4 }
  0x68   : > { %29005 = vst [vmem:[#allocation147_spill] sm:$0xff] %v24519_v1  ;;  %29006 = vst [vmem:[#allocation148_spill] sm:$0xff] %v24522_v36  ;;  %v493_v19 = vsel %vm432_vm2, %v427_v2, 0  ;;  %v24574_v23 = vand.u32 4294901760, %v495_v44  ;;  %v24576_v8 = vand.u32 4294901760, %v840_v50  ;;  %v7911_v2 = vrot.slane %v24553_v53, 1  ;;  %19281 = vmatprep.mubr.f32.mxu1 %v24560_v39 }
  0x69   : > { %29007 = vst [vmem:[#allocation149_spill] sm:$0xff] %v24527_v61  ;;  %29008 = vst [vmem:[#allocation150_spill] sm:$0xff] %v24534_v14  ;;  %v24572_v1 = vand.u32 4294901760, %v493_v19  ;;  %v7913_v14 = vrot.slane %v24556_v20, 1  ;;  %20631 = vmatprep.mubr.f32.mxu0 %v24567_v27  ;;  %v24584_v57 = vand.u32 4294901760, %v24570_v15  ;;  %v850_v50 = vsub.f32 %v24543_v38, %v24567_v27 }
  0x6a   : > { %29009 = vst [vmem:[#allocation151_spill] sm:$0xff] %v24536_v52  ;;  %29010 = vst [vmem:[#allocation152_spill] sm:$0xff] %v24543_v38  ;;  %v24590_v36 = vsub.f32 %v495_v44, %v24574_v23  ;;  %19282 = vmatmul.mubr.f32.gmra.mrb[26].mxu1 %v24576_v8 }
  0x6b   : > { %29011 = vst [vmem:[#allocation153_spill] sm:$0xff] %v24545_v4  ;;  %29012 = vst [vmem:[#allocation154_spill] sm:$0xff] %v24550_v62  ;;  %v24587_v30 = vsub.f32 %v493_v19, %v24572_v1  ;;  %20632 = vmatmul.mubr.f32.gmra.mrb[26].mxu0 %v24584_v57  ;;  %v24604_v62 = vand.u32 4294901760, %v850_v50 }
  0x6c   : > { %29013 = vst [vmem:[#allocation155_spill] sm:$0xff] %v24553_v53  ;;  %29014 = vst [vmem:[#allocation156_spill] sm:$0xff] %v24556_v20  ;;  %v7912_v20 = vsel %vm349_vm1, %v7910_v29, %v7911_v2  ;;  %v7914_v53 = vsel %vm349_vm1, %v7911_v2, %v7913_v14  ;;  %v24602_v19 = vand.u32 4294901760, %v24590_v36 }
  0x6d   : > { %29015 = vst [vmem:[#allocation157_spill] sm:$0xff] %v24560_v39  ;;  %29016 = vst [vmem:[#allocation158_spill] sm:$0xff] %v24567_v27  ;;  %v24599_v52 = vand.u32 4294901760, %v24587_v30  ;;  %v7917_v44 = vsel %vm432_vm2, %v7912_v20, 0  ;;  %v860_v39 = vsub.f32 %v24570_v15, %v24584_v57  ;;  %v7919_v29 = vsel %vm432_vm2, %v7914_v53, 0  ;;  %19284 = vmatprep.mubr.f32.mxu1 %v24604_v62 }
  0x6e   : > { %29017 = vst [vmem:[#allocation159_spill] sm:$0xff] %v24570_v15  ;;  %29018 = vst [vmem:[#allocation160_spill] sm:$0xff] %v24572_v1  ;;  %v24607_v26 = vand.u32 4294901760, %v7917_v44  ;;  %v24614_v14 = vand.u32 4294901760, %v7919_v29  ;;  %v880_v50 = vsub.f32 %v24590_v36, %v24602_v19 }
  0x6f   : > { %29019 = vst [vmem:[#allocation161_spill] sm:$0xff] %v24574_v23  ;;  %29020 = vst [vmem:[#allocation162_spill] sm:$0xff] %v24576_v8  ;;  %20634 = vmatprep.mubr.f32.mxu0 %v24599_v52  ;;  %v870_v2 = vsub.f32 %v24587_v30, %v24599_v52 }
  0x70   : > { %29021 = vst [vmem:[#allocation163_spill] sm:$0xff] %v24584_v57  ;;  %29022 = vst [vmem:[#allocation164_spill] sm:$0xff] %v24587_v30  ;;  %v24622_v20 = vsub.f32 %v7917_v44, %v24607_v26  ;;  %v24624_v57 = vand.u32 4294901760, %v860_v39  ;;  %20635 = vmatmul.mubr.f32.gmra.mrb[28].mxu0 %v24602_v19  ;;  %v24628_v53 = vsub.f32 %v7919_v29, %v24614_v14  ;;  %v24642_v39 = vand.u32 4294901760, %v880_v50 }
  0x71   : > { %29023 = vst [vmem:[#allocation165_spill] sm:$0xff] %v24590_v36  ;;  %29024 = vst [vmem:[#allocation166_spill] sm:$0xff] %v24599_v52  ;;  %v24630_v8 = vand.u32 4294901760, %v870_v2  ;;  %v17446_v52 = vld [vmem:[%s27900_s1 + $0x14] sm:$0xf] }
  0x72   : > { %29025 = vst [vmem:[#allocation167_spill] sm:$0xff] %v24602_v19  ;;  %29026 = vst [vmem:[#allocation168_spill] sm:$0xff] %v24604_v62  ;;  %v24636_v27 = vand.u32 4294901760, %v24622_v20  ;;  %19285 = vmatmul.mubr.f32.gmra.mrb[28].mxu1 %v24624_v57  ;;  %v24640_v44 = vand.u32 4294901760, %v24628_v53  ;;  %v9747_v29 = vsel %vm497_vm0, %v17446_v52, 0  ;;  %v29049_v62 = vld [vmem:[#allocation98_spill] sm:$0xff] }
  0x73   : > { %29027 = vst [vmem:[#allocation169_spill] sm:$0xff] %v24607_v26  ;;  %29028 = vst [vmem:[#allocation170_spill] sm:$0xff] %v24614_v14  ;;  %19287 = vmatprep.mubr.f32.mxu1 %v24630_v8  ;;  %v24650_v2 = vand.u32 4294901760, %v9747_v29 }
  0x74   : > { %29029 = vst [vmem:[#allocation171_spill] sm:$0xff] %v24622_v20  ;;  %29030 = vst [vmem:[#allocation172_spill] sm:$0xff] %v24624_v57  ;;  %20637 = vmatprep.mubr.f32.mxu0 %v24636_v27  ;;  %v23686_v57 = vld [vmem:[%s23928_s13 + $0x40] sm:$0x3]  ;;  %v29048_v20 = vld [vmem:[#allocation90_spill] sm:$0xff] }
  0x75   : > { %29031 = vst [vmem:[#allocation173_spill] sm:$0xff] %v24628_v53  ;;  %29032 = vst [vmem:[#allocation174_spill] sm:$0xff] %v24630_v8  ;;  %20638 = vmatmul.mubr.f32.gmra.mrb[30].mxu0 %v24640_v44  ;;  %v29047_v53 = vld [vmem:[#allocation87_spill] sm:$0xff] }
  0x76   : > { %29033 = vst [vmem:[#allocation175_spill] sm:$0xff] %v24636_v27  ;;  %29034 = vst [vmem:[#allocation176_spill] sm:$0xff] %v24640_v44  ;;  %20642 = vmatprep.mubr.f32.mxu0 %v23957_v33  ;;  %19288 = vmatmul.mubr.f32.gmra.mrb[30].mxu1 %v24642_v39 }
  0x77   : > { %29035 = vst [vmem:[#allocation177_spill] sm:$0xff] %v24642_v39  ;;  %19292 = vmatprep.mubr.f32.mxu1 %v23962_v37  ;;  %v23685_v39 = vld [vmem:[%s23928_s13 + $0x38] sm:$0xff] }
  0x78   : > { %v4138_v8 = vrot.slane %v23685_v39, 2 }
  0x79   : > { %20643 = vmatmul.mubr.f32.vlgmr.msra.gmra.mrb[0].mxu0 %v23959_v34 }
  0x7a   : > { %20645 = vmatprep.mubr.f32.mxu0 %v23987_v51  ;;  %20691 = vmatpush3.msra.mxu0 %v23907_v3  ;;  %v29040_v3 = vld [vmem:[#allocation61_spill] sm:$0xff] }
  0x7b   : > { %19293 = vmatmul.mubr.f32.vlgmr.msra.gmra.mrb[0].mxu1 %v23994_v55  ;;  %20740 = vmatprep.subr.mxu0 %v24650_v2 }
  0x7c   : > { %19341 = vmatpush3.msra.mxu1 %v23923_v7  ;;  %19295 = vmatprep.mubr.f32.mxu1 %v23957_v33  ;;  %v24709_v7 = vsub.f32 %v9747_v29, %v24650_v2 }
  0x7d   : > { %20646 = vmatmul.mubr.f32.gmra.mrb[2].mxu0 %v24002_v59  ;;  %19390 = vmatprep.subr.mxu1 %v23913_v5 }
  0x7e   : > { %20648 = vmatprep.mubr.f32.mxu0 %v24034_v16  ;;  %v24716_v52 = vand.u32 4294901760, %v24709_v7 }
  0x7f   : > { %19296 = vmatmul.mubr.f32.gmra.mrb[2].mxu1 %v23959_v34 }
  0x80   : > { %19298 = vmatprep.mubr.f32.mxu1 %v23987_v51  ;;  %29036 = vst [vmem:[#allocation178_spill] sm:$0xff] %v24716_v52  ;;  %v10139_v50 = vsub.f32 %v24709_v7, %v24716_v52  ;;  %v29060_v52 = vld [vmem:[#allocation29_spill] sm:$0xff] }
  0x81   : > { %20649 = vmatmul.mubr.f32.gmra.mrb[4].mxu0 %v24062_v28 }
  0x82   : > { %20651 = vmatprep.mubr.f32.mxu0 %v24094_v60  ;;  %v24728_v29 = vand.u32 4294901760, %v10139_v50  ;;  %v29037_v50 = vld [vmem:[#allocation47_spill] sm:$0xff] }
  0x83   : > { %19299 = vmatmul.mubr.f32.gmra.mrb[4].mxu1 %v24002_v59 }
  0x84   : > { %19301 = vmatprep.mubr.f32.mxu1 %v24034_v16 }
  0x85   : > { %20652 = vmatmul.mubr.f32.gmra.mrb[6].mxu0 %v24105_v11 }
  0x86   : > { %20654 = vmatprep.mubr.f32.mxu0 %v24132_v42 }
  0x87   : > { %19302 = vmatmul.mubr.f32.gmra.mrb[6].mxu1 %v24062_v28 }
  0x88   : > { %19304 = vmatprep.mubr.f32.mxu1 %v24094_v60 }
  0x89   : > { %20655 = vmatmul.mubr.f32.gmra.mrb[8].mxu0 %v24148_v31 }
  0x8a   : > { %20657 = vmatprep.mubr.f32.mxu0 %v24157_v54 }
  0x8b   : > { %19305 = vmatmul.mubr.f32.gmra.mrb[8].mxu1 %v24105_v11 }
  0x8c   : > { %19307 = vmatprep.mubr.f32.mxu1 %v24132_v42 }
  0x8d   : > { %20658 = vmatmul.mubr.f32.gmra.mrb[10].mxu0 %v24199_v17 }
  0x8e   : > { %20660 = vmatprep.mubr.f32.mxu0 %v24208_v10 }
  0x8f   : > { %19308 = vmatmul.mubr.f32.gmra.mrb[10].mxu1 %v24148_v31 }
  0x90   : > { %19310 = vmatprep.mubr.f32.mxu1 %v24157_v54 }
  0x91   : > { %20661 = vmatmul.mubr.f32.gmra.mrb[12].mxu0 %v24248_v48 }
  0x92   : > { %20663 = vmatprep.mubr.f32.mxu0 %v24260_v49 }
  0x93   : > { %19311 = vmatmul.mubr.f32.gmra.mrb[12].mxu1 %v24199_v17 }
  0x94   : > { %19313 = vmatprep.mubr.f32.mxu1 %v24208_v10 }
  0x95   : > { %20664 = vmatmul.mubr.f32.gmra.mrb[14].mxu0 %v24271_v32 }
  0x96   : > { %20666 = vmatprep.mubr.f32.mxu0 %v24310_v0 }
  0x97   : > { %19314 = vmatmul.mubr.f32.gmra.mrb[14].mxu1 %v24248_v48 }
  0x98   : > { %19316 = vmatprep.mubr.f32.mxu1 %v24260_v49 }
  0x99   : > { %20667 = vmatmul.mubr.f32.gmra.mrb[16].mxu0 %v24316_v6 }
  0x9a   : > { %20669 = vmatprep.mubr.f32.mxu0 %v24342_v35 }
  0x9b   : > { %19317 = vmatmul.mubr.f32.gmra.mrb[16].mxu1 %v24271_v32 }
  0x9c   : > { %19319 = vmatprep.mubr.f32.mxu1 %v24310_v0 }
  0x9d   : > { %20670 = vmatmul.mubr.f32.gmra.mrb[18].mxu0 %v24369_v43 }
  0x9e   : > { %20672 = vmatprep.mubr.f32.mxu0 %v24405_v46 }
  0x9f   : > { %19320 = vmatmul.mubr.f32.gmra.mrb[18].mxu1 %v24316_v6 }
  0xa0   : > { %19322 = vmatprep.mubr.f32.mxu1 %v24342_v35 }
  0xa1   : > { %20673 = vmatmul.mubr.f32.gmra.mrb[20].mxu0 %v24413_v13 }
  0xa2   : > { %20675 = vmatprep.mubr.f32.mxu0 %v24423_v24 }
  0xa3   : > { %19323 = vmatmul.mubr.f32.gmra.mrb[20].mxu1 %v24369_v43 }
  0xa4   : > { %19325 = vmatprep.mubr.f32.mxu1 %v24405_v46 }
  0xa5   : > { %20676 = vmatmul.mubr.f32.gmra.mrb[22].mxu0 %v24455_v22 }
  0xa6   : > { %20678 = vmatprep.mubr.f32.mxu0 %v24476_v56 }
  0xa7   : > { %19326 = vmatmul.mubr.f32.gmra.mrb[22].mxu1 %v24413_v13 }
  0xa8   : > { %19328 = vmatprep.mubr.f32.mxu1 %v24423_v24 }
  0xa9   : > { %20679 = vmatmul.mubr.f32.gmra.mrb[24].mxu0 %v24502_v18 }
  0xaa   : > { %20681 = vmatprep.mubr.f32.mxu0 %v24527_v61 }
  0xab   : > { %19329 = vmatmul.mubr.f32.gmra.mrb[24].mxu1 %v24455_v22 }
  0xac   : > { %19331 = vmatprep.mubr.f32.mxu1 %v24476_v56 }
  0xad   : > { %20682 = vmatmul.mubr.f32.gmra.mrb[26].mxu0 %v24545_v4 }
  0xae   : > { %20684 = vmatprep.mubr.f32.mxu0 %v24572_v1 }
  0xaf   : > { %19332 = vmatmul.mubr.f32.gmra.mrb[26].mxu1 %v24502_v18 }
  0xb0   : > { %19334 = vmatprep.mubr.f32.mxu1 %v24527_v61 }
  0xb1   : > { %20685 = vmatmul.mubr.f32.gmra.mrb[28].mxu0 %v24574_v23 }
  0xb2   : > { %20687 = vmatprep.mubr.f32.mxu0 %v24607_v26 }
  0xb3   : > { %19335 = vmatmul.mubr.f32.gmra.mrb[28].mxu1 %v24545_v4 }
  0xb4   : > { %19337 = vmatprep.mubr.f32.mxu1 %v24572_v1 }
  0xb5   : > { %20688 = vmatmul.mubr.f32.gmra.mrb[30].mxu0 %v24614_v14 }
  0xb6   : > { %20692 = vmatprep.mubr.f32.mxu0 %v23957_v33 }
  0xb7   : > { %19338 = vmatmul.mubr.f32.gmra.mrb[30].mxu1 %v24574_v23 }
  0xb8   : > { %19342 = vmatprep.mubr.f32.mxu1 %v23976_v45 }
  0xb9   : > { %20693 = vmatmul.mubr.f32.vlgmr.msra.gmra.mrb[0].mxu0 %v23959_v34 }
  0xba   : > { %20695 = vmatprep.mubr.f32.mxu0 %v23987_v51  ;;  %20741 = vmatpush3.msra.mxu0 %v24650_v2 }
  0xbb   : > { %19343 = vmatmul.mubr.f32.vlgmr.msra.gmra.mrb[0].mxu1 %v24013_v63  ;;  %20790 = vmatprep.subr.mxu0 %v24728_v29 }
  0xbc   : > { %19391 = vmatpush3.msra.mxu1 %v23913_v5  ;;  %19345 = vmatprep.mubr.f32.mxu1 %v23966_v40  ;;  %v29039_v40 = vld [vmem:[#allocation58_spill] sm:$0xff] }
  0xbd   : > { %20696 = vmatmul.mubr.f32.gmra.mrb[2].mxu0 %v24002_v59  ;;  %19440 = vmatprep.subr.mxu1 %v23938_v12 }
  0xbe   : > { %20698 = vmatprep.mubr.f32.mxu0 %v24034_v16 }
  0xbf   : > { %19346 = vmatmul.mubr.f32.gmra.mrb[2].mxu1 %v23969_v41  ;;  %v29038_v41 = vld [vmem:[#allocation56_spill] sm:$0xff] }
  0xc0   : > { %19348 = vmatprep.mubr.f32.mxu1 %v24000_v58  ;;  %v29045_v58 = vld [vmem:[#allocation84_spill] sm:$0xff] }
  0xc1   : > { %20699 = vmatmul.mubr.f32.gmra.mrb[4].mxu0 %v24062_v28 }
  0xc2   : > { %20701 = vmatprep.mubr.f32.mxu0 %v24094_v60 }
  0xc3   : > { %19349 = vmatmul.mubr.f32.gmra.mrb[4].mxu1 %v24024_v9 }
  0xc4   : > { %19351 = vmatprep.mubr.f32.mxu1 %v24057_v25  ;;  %v23683_v25 = vld [vmem:[%s23928_s13 + $0x28] sm:$0x3] }
  0xc5   : > { %20702 = vmatmul.mubr.f32.gmra.mrb[6].mxu0 %v24105_v11  ;;  %v4135_v9 = vrot.slane %v23683_v25, 2  ;;  %v4140_v25 = vrot.slane %v23686_v57, 2 }
  0xc6   : > { %20704 = vmatprep.mubr.f32.mxu0 %v24132_v42 }
  0xc7   : > { %19352 = vmatmul.mubr.f32.gmra.mrb[6].mxu1 %v24084_v47  ;;  %v24770_v47 = vld [vmem:[%s23928_s13 + $0x20] sm:$0xff] }
  0xc8   : > { %19354 = vmatprep.mubr.f32.mxu1 %v24110_v21  ;;  %v29041_v21 = vld [vmem:[#allocation71_spill] sm:$0xff]  ;;  %29044 = vst [vmem:[#allocation180_spill] sm:$0xff] %v24770_v47 }
  0xc9   : > { %20705 = vmatmul.mubr.f32.gmra.mrb[8].mxu0 %v24148_v31 }
  0xca   : > { %20707 = vmatprep.mubr.f32.mxu0 %v24157_v54 }
  0xcb   : > { %19355 = vmatmul.mubr.f32.gmra.mrb[8].mxu1 %v29037_v50  ;;  %v29042_v50 = vld [vmem:[#allocation73_spill] sm:$0xff] }
  0xcc   : > { %19357 = vmatprep.mubr.f32.mxu1 %v29038_v41  ;;  %v24766_v41 = vld [vmem:[%s23928_s13 + $0x18] sm:$0xff] }
  0xcd   : > { %20708 = vmatmul.mubr.f32.gmra.mrb[10].mxu0 %v24199_v17  ;;  %29043 = vst [vmem:[#allocation179_spill] sm:$0xff] %v24766_v41 }
  0xce   : > { %20710 = vmatprep.mubr.f32.mxu0 %v24208_v10 }
  0xcf   : > { %19358 = vmatmul.mubr.f32.gmra.mrb[10].mxu1 %v29039_v40  ;;  %v4132_v40 = vrot.slane %v24766_v41, 2  ;;  %v29059_v41 = vld [vmem:[#allocation26_spill] sm:$0xff] }
  0xd0   : > { %19360 = vmatprep.mubr.f32.mxu1 %v29040_v3  ;;  %v4133_v3 = vrot.slane %v24770_v47, 2  ;;  %v29051_v47 = vld [vmem:[#allocation15_spill] sm:$0xff] }
  0xd1   : > { %20711 = vmatmul.mubr.f32.gmra.mrb[12].mxu0 %v24248_v48  ;;  %v29091_v48 = vld [vmem:[#allocation62_spill] sm:$0xff] }
  0xd2   : > { %20713 = vmatprep.mubr.f32.mxu0 %v24260_v49  ;;  %v4134_v44 = vsel %vm4126_vm3, %v4132_v40, %v4133_v3  ;;  %v4143_v40 = vrot.slane %v29051_v47, 2 }
  0xd3   : > { %19361 = vmatmul.mubr.f32.gmra.mrb[12].mxu1 %v29041_v21  ;;  %v24776_v21 = vld [vmem:[%s23928_s13 + $0x30] sm:$0xff]  ;;  %v4213_v39 = vsel %vm432_vm2, %v4134_v44, 0 }
  0xd4   : > { %19363 = vmatprep.mubr.f32.mxu1 %v29042_v50  ;;  %29046 = vst [vmem:[#allocation181_spill] sm:$0xff] %v24776_v21  ;;  %v4137_v50 = vrot.slane %v24776_v21, 2 }
  0xd5   : > { %20714 = vmatmul.mubr.f32.gmra.mrb[14].mxu0 %v24271_v32 }
  0xd6   : > { %20716 = vmatprep.mubr.f32.mxu0 %v24310_v0  ;;  %v4139_v27 = vsel %vm4126_vm3, %v4137_v50, %v4138_v8  ;;  %v29052_v50 = vld [vmem:[#allocation101_spill] sm:$0xff] }
  0xd7   : > { %19364 = vmatmul.mubr.f32.gmra.mrb[14].mxu1 %v29045_v58  ;;  %v4136_v58 = vsel %vm4126_vm3, %v4133_v3, %v4135_v9  ;;  %v4217_v3 = vsel %vm432_vm2, %v4139_v27, 0  ;;  %v4141_v9 = vsel %vm4126_vm3, %v4138_v8, %v4140_v25  ;;  %v29057_v27 = vld [vmem:[#allocation19_spill] sm:$0xff]  ;;  %v29058_v25 = vld [vmem:[#allocation22_spill] sm:$0xff] }
  0xd8   : > { %19366 = vmatprep.mubr.f32.mxu1 %v29047_v53  ;;  %v24792_v53 = vld [vmem:[%s23928_s13 + $0x48] sm:$0xff]  ;;  %v4215_v57 = vsel %vm432_vm2, %v4136_v58, 0  ;;  %v4219_v47 = vsel %vm432_vm2, %v4141_v9, 0  ;;  %v4145_v8 = vrot.slane %v29057_v27, 2 }
  0xd9   : > { %20717 = vmatmul.mubr.f32.gmra.mrb[16].mxu0 %v24316_v6  ;;  %29050 = vst [vmem:[#allocation182_spill] sm:$0xff] %v24792_v53  ;;  %v4142_v21 = vrot.slane %v24792_v53, 2  ;;  %v24805_v44 = vand.u32 4294901760, %v4215_v57  ;;  %v24807_v53 = vand.u32 4294901760, %v4217_v3 }
  0xda   : > { %20719 = vmatprep.mubr.f32.mxu0 %v24342_v35 }
  0xdb   : > { %19367 = vmatmul.mubr.f32.gmra.mrb[16].mxu1 %v29048_v20  ;;  %v24802_v20 = vand.u32 4294901760, %v4213_v39  ;;  %29055 = vst [vmem:[#allocation183_spill] sm:$0xff] %v24805_v44  ;;  %29056 = vst [vmem:[#allocation184_spill] sm:$0xff] %v24807_v53  ;;  %v4144_v58 = vsel %vm4126_vm3, %v4142_v21, %v4143_v40  ;;  %v29064_v21 = vld [vmem:[#allocation31_spill] sm:$0xff]  ;;  %v24826_v27 = vsub.f32 %v4215_v57, %v24805_v44 }
  0xdc   : > { %19369 = vmatprep.mubr.f32.mxu1 %v29049_v62  ;;  %v29053_v62 = vld [vmem:[#allocation110_spill] sm:$0xff]  ;;  %v4221_v9 = vsel %vm432_vm2, %v4144_v58, 0  ;;  %v4152_v6 = vrot.slane %v29064_v21, 2  ;;  %v29069_v21 = vld [vmem:[#allocation125_spill] sm:$0xff] }
  0xdd   : > { %20720 = vmatmul.mubr.f32.gmra.mrb[18].mxu0 %v24369_v43  ;;  %29054 = vst [vmem:[#allocation15_spill] sm:$0xff] %v24802_v20  ;;  %v29061_v43 = vld [vmem:[#allocation113_spill] sm:$0xff]  ;;  %v24819_v35 = vsub.f32 %v4213_v39, %v24802_v20  ;;  %29066 = vst [vmem:[#allocation22_spill] sm:$0xff] %v24826_v27  ;;  %v4146_v39 = vsel %vm4126_vm3, %v4143_v40, %v4145_v8 }
  0xde   : > { %20722 = vmatprep.mubr.f32.mxu0 %v24405_v46  ;;  %v4150_v46 = vrot.slane %v29060_v52, 2  ;;  %v24832_v52 = vsub.f32 %v4217_v3, %v24807_v53  ;;  %v29075_v40 = vld [vmem:[#allocation41_spill] sm:$0xff] }
  0xdf   : > { %19370 = vmatmul.mubr.f32.gmra.mrb[18].mxu1 %v29052_v50  ;;  %v4147_v50 = vrot.slane %v29058_v25, 2  ;;  %29063 = vst [vmem:[#allocation19_spill] sm:$0xff] %v24819_v35  ;;  %v4158_v8 = vrot.slane %v29075_v40, 2 }
  0xe0   : > { %19372 = vmatprep.mubr.f32.mxu1 %v29053_v62  ;;  %v4148_v62 = vrot.slane %v29059_v41, 2  ;;  %v24828_v41 = vand.u32 4294901760, %v4219_v47  ;;  %29068 = vst [vmem:[#allocation29_spill] sm:$0xff] %v24832_v52 }
  0xe1   : > { %20723 = vmatmul.mubr.f32.gmra.mrb[20].mxu0 %v24413_v13  ;;  %v29062_v13 = vld [vmem:[#allocation122_spill] sm:$0xff] }
  0xe2   : > { %20725 = vmatprep.mubr.f32.mxu0 %v24423_v24  ;;  %v29065_v24 = vld [vmem:[#allocation35_spill] sm:$0xff]  ;;  %29067 = vst [vmem:[#allocation26_spill] sm:$0xff] %v24828_v41  ;;  %v4149_v58 = vsel %vm4126_vm3, %v4147_v50, %v4148_v62  ;;  %v4151_v25 = vsel %vm4126_vm3, %v4148_v62, %v4150_v46  ;;  %v24850_v46 = vand.u32 4294901760, %v24826_v27  ;;  %v4223_v62 = vsel %vm432_vm2, %v4146_v39, 0 }
  0xe3   : > { %19373 = vmatmul.mubr.f32.gmra.mrb[20].mxu1 %v29061_v43  ;;  %v4153_v0 = vrot.slane %v29065_v24, 2  ;;  %v24838_v24 = vand.u32 4294901760, %v4221_v9  ;;  %v29072_v43 = vld [vmem:[#allocation129_spill] sm:$0xff]  ;;  %v4227_v50 = vsel %vm432_vm2, %v4151_v25, 0  ;;  %v24869_v25 = vand.u32 4294901760, %v4223_v62 }
  0xe4   : > { %19375 = vmatprep.mubr.f32.mxu1 %v29062_v13  ;;  %v29071_v13 = vld [vmem:[#allocation37_spill] sm:$0xff] }
  0xe5   : > { %20726 = vmatmul.mubr.f32.gmra.mrb[22].mxu0 %v24455_v22  ;;  %29070 = vst [vmem:[#allocation31_spill] sm:$0xff] %v24838_v24  ;;  %v4155_v57 = vrot.slane %v29071_v13, 2  ;;  %v24843_v22 = vand.u32 4294901760, %v24819_v35  ;;  %v4154_v3 = vsel %vm4126_vm3, %v4152_v6, %v4153_v0  ;;  %29076 = vst [vmem:[#allocation37_spill] sm:$0xff] %v24850_v46  ;;  %v4225_v13 = vsel %vm432_vm2, %v4149_v58, 0  ;;  %v29081_v58 = vld [vmem:[#allocation141_spill] sm:$0xff] }
  0xe6   : > { %20728 = vmatprep.mubr.f32.mxu0 %v24476_v56  ;;  %v29074_v56 = vld [vmem:[#allocation38_spill] sm:$0xff]  ;;  %v24860_v6 = vsub.f32 %v4219_v47, %v24828_v41  ;;  %v24864_v40 = vsub.f32 %v4221_v9, %v24838_v24  ;;  %29082 = vst [vmem:[#allocation186_spill] sm:$0xff] %v24869_v25 }
  0xe7   : > { %19376 = vmatmul.mubr.f32.gmra.mrb[22].mxu1 %v29069_v21  ;;  %29073 = vst [vmem:[#allocation35_spill] sm:$0xff] %v24843_v22  ;;  %v4157_v32 = vrot.slane %v29074_v56, 2  ;;  %v29079_v56 = vld [vmem:[#allocation135_spill] sm:$0xff]  ;;  %v4229_v21 = vsel %vm432_vm2, %v4154_v3, 0  ;;  %v4156_v39 = vsel %vm4126_vm3, %v4153_v0, %v4155_v57  ;;  %v4365_v9 = vsub.f32 %v24819_v35, %v24843_v22 }
  0xe8   : > { %19378 = vmatprep.mubr.f32.mxu1 %v29072_v43  ;;  %v24857_v43 = vand.u32 4294901760, %v24832_v52  ;;  %29078 = vst [vmem:[#allocation41_spill] sm:$0xff] %v24860_v6  ;;  %29080 = vst [vmem:[#allocation185_spill] sm:$0xff] %v24864_v40  ;;  %v4375_v3 = vsub.f32 %v24826_v27, %v24850_v46  ;;  %v24888_v49 = vand.u32 4294901760, %v4229_v21  ;;  %v29089_v35 = vld [vmem:[#allocation51_spill] sm:$0xff]  ;;  %v29090_v27 = vld [vmem:[#allocation52_spill] sm:$0xff] }
  0xe9   : > { %20729 = vmatmul.mubr.f32.gmra.mrb[24].mxu0 %v24502_v18  ;;  %v24873_v18 = vand.u32 4294901760, %v4227_v50  ;;  %v4159_v47 = vsel %vm4126_vm3, %v4157_v32, %v4158_v8  ;;  %v4231_v32 = vsel %vm432_vm2, %v4156_v39, 0  ;;  %v4162_v46 = vrot.slane %v29089_v35, 2 }
  0xea   : > { %20731 = vmatprep.mubr.f32.mxu0 %v24527_v61  ;;  %29077 = vst [vmem:[#allocation38_spill] sm:$0xff] %v24857_v43  ;;  %v24871_v61 = vand.u32 4294901760, %v4225_v13  ;;  %v4385_v57 = vsub.f32 %v24832_v52, %v24857_v43  ;;  %29087 = vst [vmem:[#allocation189_spill] sm:$0xff] %v24888_v49  ;;  %v4233_v22 = vsel %vm432_vm2, %v4159_v47, 0  ;;  %v24898_v43 = vand.u32 4294901760, %v24864_v40 }
  0xeb   : > { %19379 = vmatmul.mubr.f32.gmra.mrb[24].mxu1 %v29079_v56  ;;  %29084 = vst [vmem:[#allocation188_spill] sm:$0xff] %v24873_v18  ;;  %v29085_v56 = vld [vmem:[#allocation48_spill] sm:$0xff]  ;;  %v24901_v52 = vsub.f32 %v4223_v62, %v24869_v25  ;;  %v24910_v35 = vand.u32 4294901760, %v4231_v32  ;;  %v24916_v62 = vand.u32 4294901760, %v4365_v9  ;;  %v24918_v17 = vand.u32 4294901760, %v4375_v3 }
  0xec   : > { %19381 = vmatprep.mubr.f32.mxu1 %v29081_v58  ;;  %29083 = vst [vmem:[#allocation187_spill] sm:$0xff] %v24871_v61  ;;  %v4160_v0 = vrot.slane %v29085_v56, 2  ;;  %v24886_v58 = vand.u32 4294901760, %v24860_v6  ;;  %v4163_v56 = vrot.slane %v29090_v27, 2  ;;  %29092 = vst [vmem:[#allocation51_spill] sm:$0xff] %v24898_v43  ;;  %v24904_v39 = vsub.f32 %v4225_v13, %v24871_v61  ;;  %v29097_v27 = vld [vmem:[#allocation63_spill] sm:$0xff] }
  0xed   : > { %20732 = vmatmul.mubr.f32.gmra.mrb[26].mxu0 %v24545_v4  ;;  %v29088_v4 = vld [vmem:[#allocation148_spill] sm:$0xff]  ;;  %29093 = vst [vmem:[#allocation52_spill] sm:$0xff] %v24901_v52  ;;  %29096 = vst [vmem:[#allocation191_spill] sm:$0xff] %v24910_v35  ;;  %v4167_v47 = vrot.slane %v29097_v27, 2  ;;  %v24921_v13 = vsub.f32 %v4229_v21, %v24888_v49  ;;  %v24934_v9 = vand.u32 4294901760, %v24901_v52  ;;  %v29106_v27 = vld [vmem:[#allocation69_spill] sm:$0xff] }
  0xee   : > { %20734 = vmatprep.mubr.f32.mxu0 %v24572_v1  ;;  %29086 = vst [vmem:[#allocation48_spill] sm:$0xff] %v24886_v58  ;;  %v4165_v1 = vrot.slane %v29091_v48, 2  ;;  %29094 = vst [vmem:[#allocation62_spill] sm:$0xff] %v24904_v39  ;;  %v4161_v48 = vsel %vm4126_vm3, %v4158_v8, %v4160_v0  ;;  %v4395_v8 = vsub.f32 %v24860_v6, %v24886_v58  ;;  %v24937_v21 = vand.u32 4294901760, %v24904_v39  ;;  %v29114_v58 = vld [vmem:[#allocation78_spill] sm:$0xff] }
  0xef   : > { %19382 = vmatmul.mubr.f32.gmra.mrb[26].mxu1 %v29088_v4  ;;  %v24907_v4 = vsub.f32 %v4227_v50, %v24873_v18  ;;  %29099 = vst [vmem:[#allocation63_spill] sm:$0xff] %v24916_v62  ;;  %29101 = vst [vmem:[#allocation192_spill] sm:$0xff] %v24921_v13  ;;  %v24923_v50 = vand.u32 4294901760, %v4233_v22  ;;  %v4235_v3 = vsel %vm432_vm2, %v4161_v48, 0 }
  0xf0   : > { %19384 = vmatprep.mubr.f32.mxu1 %v24543_v38  ;;  %v29098_v38 = vld [vmem:[#allocation66_spill] sm:$0xff]  ;;  %v4166_v0 = vsel %vm4126_vm3, %v4163_v56, %v4165_v1  ;;  %29104 = vst [vmem:[#allocation195_spill] sm:$0xff] %v24934_v9  ;;  %29105 = vst [vmem:[#allocation196_spill] sm:$0xff] %v24937_v21  ;;  %v24948_v1 = vsub.f32 %v4231_v32, %v24910_v35  ;;  %v24963_v32 = vand.u32 4294901760, %v4235_v3 }
  0xf1   : > { %29095 = vst [vmem:[#allocation190_spill] sm:$0xff] %v24907_v4  ;;  %20735 = vmatmul.mubr.f32.gmra.mrb[28].mxu0 %v24574_v23  ;;  %v4168_v10 = vrot.slane %v29098_v38, 2  ;;  %29100 = vst [vmem:[#allocation66_spill] sm:$0xff] %v24918_v17  ;;  %v24926_v23 = vand.u32 4294901760, %v4385_v57  ;;  %v4164_v38 = vsel %vm4126_vm3, %v4162_v46, %v4163_v56  ;;  %v4170_v57 = vrot.slane %v29106_v27, 2 }
  0xf2   : > { %20737 = vmatprep.mubr.f32.mxu0 %v24607_v26  ;;  %29102 = vst [vmem:[#allocation193_spill] sm:$0xff] %v24923_v50  ;;  %v24945_v46 = vand.u32 4294901760, %v24907_v4  ;;  %29108 = vst [vmem:[#allocation197_spill] sm:$0xff] %v24948_v1  ;;  %v24956_v48 = vsub.f32 %v4233_v22, %v24923_v50  ;;  %v4237_v27 = vsel %vm432_vm2, %v4164_v38, 0  ;;  %v24961_v26 = vand.u32 4294901760, %v4395_v8 }
  0xf3   : > { %19385 = vmatmul.mubr.f32.gmra.mrb[28].mxu1 %v24570_v15  ;;  %29103 = vst [vmem:[#allocation194_spill] sm:$0xff] %v24926_v23  ;;  %v4405_v15 = vsub.f32 %v24864_v40, %v24898_v43  ;;  %v4169_v56 = vsel %vm4126_vm3, %v4167_v47, %v4168_v10  ;;  %29112 = vst [vmem:[#allocation201_spill] sm:$0xff] %v24963_v32  ;;  %v29113_v43 = vld [vmem:[#allocation75_spill] sm:$0xff]  ;;  %v29115_v40 = vand.u32 4294901760, %v23976_v45  ;;  %v24981_v45 = vand.u32 4294901760, %v4237_v27 }
  0xf4   : > { %19387 = vmatprep.mubr.f32.mxu1 %v24587_v30  ;;  %29107 = vst [vmem:[#allocation69_spill] sm:$0xff] %v24945_v46  ;;  %v24953_v30 = vand.u32 4294901760, %v24921_v13  ;;  %29110 = vst [vmem:[#allocation199_spill] sm:$0xff] %v24956_v48  ;;  %v4172_v47 = vrot.slane %v29113_v43, 2  ;;  %v4415_v22 = vsub.f32 %v24901_v52, %v24934_v9  ;;  %v4425_v38 = vsub.f32 %v24904_v39, %v24937_v21  ;;  %v29150_v52 = vld [vmem:[#allocation30_spill] sm:$0xff] }
  0xf5   : > { %20738 = vmatmul.mubr.f32.gmra.mrb[30].mxu0 %v24614_v14  ;;  %v4239_v14 = vsel %vm432_vm2, %v4166_v0, 0  ;;  %29111 = vst [vmem:[#allocation200_spill] sm:$0xff] %v24961_v26  ;;  %v4241_v0 = vsel %vm432_vm2, %v4169_v56, 0  ;;  %v4171_v8 = vsel %vm4126_vm3, %v4168_v10, %v4170_v57  ;;  %v4435_v43 = vsub.f32 %v24907_v4, %v24945_v46  ;;  %29117 = vst [vmem:[#allocation78_spill] sm:$0xff] %v24981_v45  ;;  %v29121_v56 = vld [vmem:[#allocation81_spill] sm:$0xff] }
  0xf6   : > { %20742 = vmatprep.mubr.f32.mxu0 %v24916_v62  ;;  %29109 = vst [vmem:[#allocation198_spill] sm:$0xff] %v24953_v30  ;;  %v4173_v62 = vrot.slane %v29114_v58, 2  ;;  %v24979_v58 = vand.u32 4294901760, %v24948_v1  ;;  %v4445_v10 = vsub.f32 %v24921_v13, %v24953_v30  ;;  %v24992_v57 = vand.u32 4294901760, %v24956_v48 }
  0xf7   : > { %19388 = vmatmul.mubr.f32.gmra.mrb[30].mxu1 %v24590_v36  ;;  %v24987_v36 = vand.u32 4294901760, %v4405_v15  ;;  %v29122_v46 = vand.u32 4294901760, %v24013_v63  ;;  %v24998_v21 = vsub.f32 %v4235_v3, %v24963_v32  ;;  %v25000_v9 = vand.u32 4294901760, %v4241_v0  ;;  %v29128_v63 = vld [vmem:[#allocation82_spill] sm:$0xff] }
  0xf8   : > { %19392 = vmatprep.mubr.f32.mxu1 %v29115_v40  ;;  %29116 = vst [vmem:[#allocation75_spill] sm:$0xff] %v24979_v58  ;;  %v24983_v40 = vand.u32 4294901760, %v4239_v14  ;;  %29120 = vst [vmem:[#allocation204_spill] sm:$0xff] %v24992_v57  ;;  %v4174_v15 = vsel %vm4126_vm3, %v4172_v47, %v4173_v62  ;;  %v25007_v30 = vand.u32 4294901760, %v4415_v22  ;;  %v29129_v3 = vld [vmem:[#allocation86_spill] sm:$0xff]  ;;  %v25014_v4 = vand.u32 4294901760, %v4435_v43 }
  0xf9   : > { %20743 = vmatmul.mubr.f32.vlgmr.msra.gmra.mrb[0].mxu0 %v24918_v17  ;;  %29119 = vst [vmem:[#allocation203_spill] sm:$0xff] %v24987_v36  ;;  %v4175_v17 = vrot.slane %v29121_v56, 2  ;;  %29123 = vst [vmem:[#allocation81_spill] sm:$0xff] %v24998_v21  ;;  %v25009_v56 = vand.u32 4294901760, %v4425_v38  ;;  %v4178_v13 = vrot.slane %v29129_v3, 2  ;;  %v4455_v47 = vsub.f32 %v24948_v1, %v24979_v58 }
  0xfa   : > { %29118 = vst [vmem:[#allocation202_spill] sm:$0xff] %v24983_v40  ;;  %20745 = vmatprep.mubr.f32.mxu0 %v24926_v23  ;;  %20791 = vmatpush3.msra.mxu0 %v24728_v29  ;;  %29124 = vst [vmem:[#allocation205_spill] sm:$0xff] %v25000_v9  ;;  %v4243_v29 = vsel %vm432_vm2, %v4171_v8, 0  ;;  %v29125_v23 = vld [vmem:[#allocation16_spill] sm:$0xff]  ;;  %v25019_v8 = vsub.f32 %v4237_v27, %v24981_v45  ;;  %v4245_v38 = vsel %vm432_vm2, %v4174_v15, 0  ;;  %v29140_v15 = vld [vmem:[#allocation97_spill] sm:$0xff] }
  0xfb   : > { %19393 = vmatmul.mubr.f32.vlgmr.msra.gmra.mrb[0].mxu1 %v29122_v46  ;;  %20840 = vmatprep.subr.mxu0 %v24709_v7  ;;  %29126 = vst [vmem:[#allocation16_spill] sm:$0xff] %v25007_v30  ;;  %29127 = vst [vmem:[#allocation206_spill] sm:$0xff] %v25009_v56  ;;  %v4177_v46 = vrot.slane %v29128_v63, 2  ;;  %v25028_v22 = vand.u32 4294901760, %v4243_v29  ;;  %v4176_v43 = vsel %vm4126_vm3, %v4173_v62, %v4175_v17  ;;  %v29135_v63 = vld [vmem:[#allocation17_spill] sm:$0xff]  ;;  %v4182_v1 = vrot.slane %v29140_v15, 2 }
  0xfc   : > { %19441 = vmatpush3.msra.mxu1 %v23938_v12  ;;  %19395 = vmatprep.mubr.f32.mxu1 %v29125_v23  ;;  %29130 = vst [vmem:[#allocation82_spill] sm:$0xff] %v25014_v4  ;;  %29131 = vst [vmem:[#allocation86_spill] sm:$0xff] %v25019_v8  ;;  %v25022_v12 = vsub.f32 %v4239_v14, %v24983_v40  ;;  %v25026_v23 = vand.u32 4294901760, %v4445_v10  ;;  %v4465_v27 = vsub.f32 %v24956_v48, %v24992_v57  ;;  %v29141_v17 = vld [vmem:[#allocation100_spill] sm:$0xff] }
  0xfd   : > { %20746 = vmatmul.mubr.f32.gmra.mrb[2].mxu0 %v24961_v26  ;;  %19490 = vmatprep.subr.mxu1 %v23913_v5  ;;  %29134 = vst [vmem:[#allocation209_spill] sm:$0xff] %v25028_v22  ;;  %v25036_v14 = vand.u32 4294901760, %v24998_v21  ;;  %v25039_v3 = vsub.f32 %v4241_v0, %v25000_v9  ;;  %v29139_v26 = vld [vmem:[#allocation23_spill] sm:$0xff]  ;;  %v4179_v58 = vsel %vm4126_vm3, %v4177_v46, %v4178_v13  ;;  %v4183_v62 = vrot.slane %v29141_v17, 2  ;;  %v29148_v17 = vld [vmem:[#allocation105_spill] sm:$0xff] }
  0xfe   : > { %29132 = vst [vmem:[#allocation207_spill] sm:$0xff] %v25022_v12  ;;  %20748 = vmatprep.mubr.f32.mxu0 %v24987_v36  ;;  %29133 = vst [vmem:[#allocation208_spill] sm:$0xff] %v25026_v23  ;;  %v29138_v36 = vld [vmem:[#allocation92_spill] sm:$0xff]  ;;  %v25049_v57 = vand.u32 4294901760, %v25019_v8  ;;  %v25052_v0 = vand.u32 4294901760, %v25022_v12  ;;  %v25054_v48 = vand.u32 4294901760, %v4245_v38  ;;  %v25061_v15 = vsub.f32 %v4243_v29, %v25028_v22 }
  0xff   : > { %19396 = vmatmul.mubr.f32.gmra.mrb[2].mxu1 %v29135_v63  ;;  %29136 = vst [vmem:[#allocation17_spill] sm:$0xff] %v25036_v14  ;;  %29137 = vst [vmem:[#allocation210_spill] sm:$0xff] %v25039_v3  ;;  %v4180_v10 = vrot.slane %v29138_v36, 2  ;;  %v29142_v63 = vld [vmem:[#allocation104_spill] sm:$0xff]  ;;  %v4247_v36 = vsel %vm432_vm2, %v4176_v43, 0  ;;  %v25058_v46 = vand.u32 4294901760, %v4455_v47  ;;  %v4475_v9 = vsub.f32 %v24998_v21, %v25036_v14 }
 0x100   : > { %19398 = vmatprep.mubr.f32.mxu1 %v29139_v26  ;;  %v4185_v39 = vrot.slane %v29142_v63, 2  ;;  %29143 = vst [vmem:[#allocation92_spill] sm:$0xff] %v25049_v57  ;;  %29144 = vst [vmem:[#allocation97_spill] sm:$0xff] %v25052_v0  ;;  %v4187_v63 = vrot.slane %v29148_v17, 2  ;;  %v29149_v26 = vld [vmem:[#allocation106_spill] sm:$0xff]  ;;  %v25066_v6 = vand.u32 4294901760, %v4465_v27  ;;  %v4485_v27 = vsub.f32 %v25019_v8, %v25049_v57 }
 0x101   : > { %20749 = vmatmul.mubr.f32.gmra.mrb[4].mxu0 %v25007_v30  ;;  %29145 = vst [vmem:[#allocation100_spill] sm:$0xff] %v25054_v48  ;;  %29146 = vst [vmem:[#allocation104_spill] sm:$0xff] %v25058_v46  ;;  %v4188_v30 = vrot.slane %v29149_v26, 2  ;;  %v4249_v43 = vsel %vm432_vm2, %v4179_v58, 0  ;;  %v29152_v47 = vld [vmem:[#allocation36_spill] sm:$0xff]  ;;  %v25074_v29 = vand.u32 4294901760, %v25039_v3  ;;  %v4184_v26 = vsel %vm4126_vm3, %v4182_v1, %v4183_v62 }
 0x102   : > { %20751 = vmatprep.mubr.f32.mxu0 %v25009_v56  ;;  %29147 = vst [vmem:[#allocation211_spill] sm:$0xff] %v25061_v15  ;;  %29151 = vst [vmem:[#allocation105_spill] sm:$0xff] %v25066_v6  ;;  %v4181_v56 = vsel %vm4126_vm3, %v4178_v13, %v4180_v10  ;;  %v25076_v22 = vand.u32 4294901760, %v4247_v36  ;;  %v4186_v17 = vsel %vm4126_vm3, %v4183_v62, %v4185_v39  ;;  %v29156_v10 = vld [vmem:[#allocation114_spill] sm:$0xff]  ;;  %v25093_v1 = vand.u32 4294901760, %v4249_v43  ;;  %v29160_v57 = vld [vmem:[#allocation116_spill] sm:$0xff] }
 0x103   : > { %19399 = vmatmul.mubr.f32.gmra.mrb[4].mxu1 %v29150_v52  ;;  %29153 = vst [vmem:[#allocation106_spill] sm:$0xff] %v25074_v29  ;;  %v4495_v58 = vsub.f32 %v25022_v12, %v25052_v0  ;;  %v25086_v13 = vsub.f32 %v4245_v38, %v25054_v48  ;;  %v25091_v52 = vand.u32 4294901760, %v25061_v15  ;;  %v4251_v39 = vsel %vm432_vm2, %v4181_v56, 0 }
 0x104   : > { %19401 = vmatprep.mubr.f32.mxu1 %v29152_v47  ;;  %29154 = vst [vmem:[#allocation212_spill] sm:$0xff] %v25076_v22  ;;  %v4190_v47 = vrot.slane %v29156_v10, 2  ;;  %29158 = vst [vmem:[#allocation214_spill] sm:$0xff] %v25093_v1  ;;  %v4189_v62 = vsel %vm4126_vm3, %v4187_v63, %v4188_v30  ;;  %v4253_v0 = vsel %vm432_vm2, %v4184_v26, 0  ;;  %v4255_v38 = vsel %vm432_vm2, %v4186_v17, 0  ;;  %v29161_v10 = vld [vmem:[#allocation120_spill] sm:$0xff] }
 0x105   : > { %20752 = vmatmul.mubr.f32.gmra.mrb[6].mxu0 %v25014_v4  ;;  %29155 = vst [vmem:[#allocation213_spill] sm:$0xff] %v25086_v13  ;;  %29157 = vst [vmem:[#allocation114_spill] sm:$0xff] %v25091_v52  ;;  %v29159_v4 = vld [vmem:[#allocation43_spill] sm:$0xff]  ;;  %v4192_v14 = vrot.slane %v29160_v57, 2  ;;  %v4193_v12 = vrot.slane %v29161_v10, 2  ;;  %v25103_v8 = vand.u32 4294901760, %v4475_v9  ;;  %v4505_v21 = vsub.f32 %v25039_v3, %v25074_v29 }
 0x106   : > { %20754 = vmatprep.mubr.f32.mxu0 %v25026_v23  ;;  %v29162_v23 = vld [vmem:[#allocation49_spill] sm:$0xff]  ;;  %v25108_v56 = vsub.f32 %v4247_v36, %v25076_v22  ;;  %v25112_v63 = vand.u32 4294901760, %v25086_v13  ;;  %v25114_v26 = vand.u32 4294901760, %v4251_v39  ;;  %v4257_v57 = vsel %vm432_vm2, %v4189_v62, 0  ;;  %v29176_v3 = vld [vmem:[#allocation127_spill] sm:$0xff] }
 0x107   : > { %19402 = vmatmul.mubr.f32.gmra.mrb[6].mxu1 %v29159_v4  ;;  %29163 = vst [vmem:[#allocation116_spill] sm:$0xff] %v25103_v8  ;;  %v4191_v17 = vsel %vm4126_vm3, %v4188_v30, %v4190_v47  ;;  %v25119_v9 = vand.u32 4294901760, %v4485_v27  ;;  %v25122_v10 = vsub.f32 %v4249_v43, %v25093_v1  ;;  %v25124_v36 = vand.u32 4294901760, %v4253_v0  ;;  %v29171_v4 = vld [vmem:[#allocation53_spill] sm:$0xff]  ;;  %v29173_v47 = vld [vmem:[#allocation124_spill] sm:$0xff]  ;;  %v29174_v27 = vld [vmem:[#allocation59_spill] sm:$0xff] }
 0x108   : > { %19404 = vmatprep.mubr.f32.mxu1 %v29162_v23  ;;  %29164 = vst [vmem:[#allocation120_spill] sm:$0xff] %v25108_v56  ;;  %29165 = vst [vmem:[#allocation215_spill] sm:$0xff] %v25112_v63  ;;  %v25126_v23 = vand.u32 4294901760, %v4255_v38  ;;  %v4515_v62 = vsub.f32 %v25061_v15, %v25091_v52  ;;  %v4194_v30 = vsel %vm4126_vm3, %v4192_v14, %v4193_v12  ;;  %v25136_v29 = vand.u32 4294901760, %v4257_v57  ;;  %v29177_v22 = vld [vmem:[#allocation133_spill] sm:$0xff]  ;;  %v29190_v15 = vld [vmem:[#allocation138_spill] sm:$0xff] }
 0x109   : > { %20755 = vmatmul.mubr.f32.gmra.mrb[8].mxu0 %v25058_v46  ;;  %29166 = vst [vmem:[#allocation216_spill] sm:$0xff] %v25114_v26  ;;  %29167 = vst [vmem:[#allocation217_spill] sm:$0xff] %v25119_v9  ;;  %v25129_v46 = vand.u32 4294901760, %v4495_v58  ;;  %v4259_v43 = vsel %vm432_vm2, %v4191_v17, 0  ;;  %v4197_v1 = vrot.slane %v29176_v3, 2  ;;  %v4198_v48 = vrot.slane %v29177_v22, 2 }
 0x10a   : > { %20757 = vmatprep.mubr.f32.mxu0 %v25066_v6  ;;  %29168 = vst [vmem:[#allocation218_spill] sm:$0xff] %v25122_v10  ;;  %29169 = vst [vmem:[#allocation219_spill] sm:$0xff] %v25124_v36  ;;  %v4195_v6 = vrot.slane %v29173_v47, 2  ;;  %v25142_v58 = vand.u32 4294901760, %v4505_v21  ;;  %v25147_v14 = vand.u32 4294901760, %v25108_v56  ;;  %v25150_v47 = vsub.f32 %v4251_v39, %v25114_v26  ;;  %v29203_v26 = vld [vmem:[#allocation155_spill] sm:$0xff] }
 0x10b   : > { %29170 = vst [vmem:[#allocation220_spill] sm:$0xff] %v25126_v23  ;;  %19405 = vmatmul.mubr.f32.gmra.mrb[8].mxu1 %v29171_v4  ;;  %29172 = vst [vmem:[#allocation221_spill] sm:$0xff] %v25129_v46  ;;  %v4525_v4 = vsub.f32 %v25086_v13, %v25112_v63  ;;  %v25154_v17 = vand.u32 4294901760, %v25122_v10  ;;  %v25157_v22 = vsub.f32 %v4253_v0, %v25124_v36  ;;  %v4261_v3 = vsel %vm432_vm2, %v4194_v30, 0  ;;  %v29188_v13 = vld [vmem:[#allocation67_spill] sm:$0xff]  ;;  %v29191_v30 = vld [vmem:[#allocation144_spill] sm:$0xff] }
 0x10c   : > { %19407 = vmatprep.mubr.f32.mxu1 %v29174_v27  ;;  %29175 = vst [vmem:[#allocation124_spill] sm:$0xff] %v25136_v29  ;;  %29178 = vst [vmem:[#allocation127_spill] sm:$0xff] %v25142_v58  ;;  %v25160_v21 = vsub.f32 %v4255_v38, %v25126_v23  ;;  %v29184_v27 = vld [vmem:[#allocation64_spill] sm:$0xff]  ;;  %v25166_v63 = vand.u32 4294901760, %v4259_v43  ;;  %v4196_v39 = vsel %vm4126_vm3, %v4193_v12, %v4195_v6  ;;  %v4202_v23 = vrot.slane %v29190_v15, 2 }
 0x10d   : > { %20758 = vmatmul.mubr.f32.gmra.mrb[10].mxu0 %v25103_v8  ;;  %29179 = vst [vmem:[#allocation133_spill] sm:$0xff] %v25147_v14  ;;  %29180 = vst [vmem:[#allocation222_spill] sm:$0xff] %v25150_v47  ;;  %v25164_v8 = vand.u32 4294901760, %v4515_v62  ;;  %v25172_v0 = vsub.f32 %v4257_v57, %v25136_v29  ;;  %v4199_v38 = vsel %vm4126_vm3, %v4197_v1, %v4198_v48  ;;  %v4203_v36 = vrot.slane %v29191_v30, 2  ;;  %v29197_v30 = vld [vmem:[#allocation76_spill] sm:$0xff]  ;;  %v29202_v29 = vld [vmem:[#allocation154_spill] sm:$0xff] }
 0x10e   : > { %20760 = vmatprep.mubr.f32.mxu0 %v25119_v9  ;;  %29181 = vst [vmem:[#allocation223_spill] sm:$0xff] %v25154_v17  ;;  %29182 = vst [vmem:[#allocation224_spill] sm:$0xff] %v25157_v22  ;;  %v29187_v9 = vld [vmem:[#allocation137_spill] sm:$0xff]  ;;  %v25178_v62 = vand.u32 4294901760, %v4525_v4  ;;  %v4535_v6 = vsub.f32 %v25108_v56, %v25147_v14  ;;  %v25183_v12 = vand.u32 4294901760, %v25150_v47  ;;  %v4545_v1 = vsub.f32 %v25122_v10, %v25154_v17  ;;  %v29200_v17 = vld [vmem:[#allocation79_spill] sm:$0xff] }
 0x10f   : > { %29183 = vst [vmem:[#allocation225_spill] sm:$0xff] %v25160_v21  ;;  %19408 = vmatmul.mubr.f32.gmra.mrb[10].mxu1 %v29184_v27  ;;  %29185 = vst [vmem:[#allocation226_spill] sm:$0xff] %v25164_v8  ;;  %v4200_v52 = vrot.slane %v29187_v9, 2  ;;  %v25185_v9 = vand.u32 4294901760, %v4261_v3  ;;  %v25191_v15 = vand.u32 4294901760, %v25157_v22  ;;  %v25194_v57 = vand.u32 4294901760, %v25160_v21 }
 0x110   : > { %29186 = vst [vmem:[#allocation227_spill] sm:$0xff] %v25166_v63  ;;  %19410 = vmatprep.mubr.f32.mxu1 %v29188_v13  ;;  %29189 = vst [vmem:[#allocation137_spill] sm:$0xff] %v25172_v0  ;;  %v4263_v4 = vsel %vm432_vm2, %v4196_v39, 0  ;;  %v25199_v13 = vsub.f32 %v4259_v43, %v25166_v63  ;;  %v4265_v27 = vsel %vm432_vm2, %v4199_v38, 0  ;;  %v25206_v10 = vand.u32 4294901760, %v25172_v0 }
 0x111   : > { %20761 = vmatmul.mubr.f32.gmra.mrb[12].mxu0 %v25129_v46  ;;  %29192 = vst [vmem:[#allocation138_spill] sm:$0xff] %v25178_v62  ;;  %29193 = vst [vmem:[#allocation144_spill] sm:$0xff] %v25183_v12  ;;  %v29199_v46 = vld [vmem:[#allocation145_spill] sm:$0xff]  ;;  %v4204_v56 = vsel %vm4126_vm3, %v4202_v23, %v4203_v36  ;;  %v9735_v39 = vrot.slane %v29202_v29, 2  ;;  %v25212_v43 = vand.u32 4294901760, %v4535_v6  ;;  %v25222_v38 = vand.u32 4294901760, %v4545_v1 }
 0x112   : > { %29194 = vst [vmem:[#allocation228_spill] sm:$0xff] %v25185_v9  ;;  %20763 = vmatprep.mubr.f32.mxu0 %v25142_v58  ;;  %29195 = vst [vmem:[#allocation229_spill] sm:$0xff] %v25191_v15  ;;  %v4201_v58 = vsel %vm4126_vm3, %v4198_v48, %v4200_v52  ;;  %v4205_v14 = vrot.slane %v29199_v46, 2  ;;  %v4555_v52 = vsub.f32 %v25150_v47, %v25183_v12  ;;  %v25219_v46 = vand.u32 4294901760, %v4263_v4  ;;  %v29209_v6 = vld [vmem:[#allocation89_spill] sm:$0xff] }
 0x113   : > { %29196 = vst [vmem:[#allocation230_spill] sm:$0xff] %v25194_v57  ;;  %19411 = vmatmul.mubr.f32.gmra.mrb[12].mxu1 %v29197_v30  ;;  %29198 = vst [vmem:[#allocation231_spill] sm:$0xff] %v25199_v13  ;;  %v9736_v30 = vrot.slane %v29203_v26, 2  ;;  %v25217_v48 = vsub.f32 %v4261_v3, %v25185_v9  ;;  %v4565_v23 = vsub.f32 %v25157_v22, %v25191_v15  ;;  %v25226_v29 = vand.u32 4294901760, %v4265_v27  ;;  %v29211_v47 = vld [vmem:[#allocation93_spill] sm:$0xff] }
 0x114   : > { %19413 = vmatprep.mubr.f32.mxu1 %v29200_v17  ;;  %29201 = vst [vmem:[#allocation145_spill] sm:$0xff] %v25206_v10  ;;  %29204 = vst [vmem:[#allocation154_spill] sm:$0xff] %v25212_v43  ;;  %v4267_v26 = vsel %vm432_vm2, %v4201_v58, 0  ;;  %v4269_v17 = vsel %vm432_vm2, %v4204_v56, 0  ;;  %v4206_v3 = vsel %vm4126_vm3, %v4203_v36, %v4205_v14  ;;  %v4575_v1 = vsub.f32 %v25160_v21, %v25194_v57  ;;  %v29221_v57 = vld [vmem:[#allocation107_spill] sm:$0xff] }
 0x115   : > { %20764 = vmatmul.mubr.f32.gmra.mrb[14].mxu0 %v25164_v8  ;;  %29205 = vst [vmem:[#allocation155_spill] sm:$0xff] %v25217_v48  ;;  %29206 = vst [vmem:[#allocation232_spill] sm:$0xff] %v25219_v46  ;;  %v29210_v8 = vld [vmem:[#allocation156_spill] sm:$0xff]  ;;  %v25239_v15 = vand.u32 4294901760, %v25199_v13  ;;  %v9737_v58 = vsel %vm4126_vm3, %v9735_v39, %v9736_v30  ;;  %v25243_v56 = vand.u32 4294901760, %v4555_v52  ;;  %v25246_v36 = vand.u32 4294901760, %v25217_v48 }
 0x116   : > { %20766 = vmatprep.mubr.f32.mxu0 %v25178_v62  ;;  %29207 = vst [vmem:[#allocation233_spill] sm:$0xff] %v25222_v38  ;;  %29208 = vst [vmem:[#allocation234_spill] sm:$0xff] %v25226_v29  ;;  %v9738_v12 = vrot.slane %v29210_v8, 2  ;;  %v4585_v62 = vsub.f32 %v25172_v0, %v25206_v10  ;;  %v25249_v8 = vsub.f32 %v4263_v4, %v25219_v46  ;;  %v25251_v14 = vand.u32 4294901760, %v4267_v26 }
 0x117   : > { %19414 = vmatmul.mubr.f32.gmra.mrb[14].mxu1 %v29209_v6  ;;  %29212 = vst [vmem:[#allocation156_spill] sm:$0xff] %v25239_v15  ;;  %29213 = vst [vmem:[#allocation235_spill] sm:$0xff] %v25243_v56  ;;  %v25257_v6 = vsub.f32 %v4265_v27, %v25226_v29  ;;  %v25259_v39 = vand.u32 4294901760, %v4269_v17  ;;  %v4271_v52 = vsel %vm432_vm2, %v4206_v3, 0  ;;  %v9742_v10 = vsel %vm432_vm2, %v9737_v58, 0 }
 0x118   : > { %19416 = vmatprep.mubr.f32.mxu1 %v29211_v47  ;;  %29214 = vst [vmem:[#allocation236_spill] sm:$0xff] %v25246_v36  ;;  %29215 = vst [vmem:[#allocation237_spill] sm:$0xff] %v25249_v8  ;;  %v25254_v47 = vand.u32 4294901760, %v4565_v23  ;;  %v9739_v4 = vsel %vm4126_vm3, %v9736_v30, %v9738_v12  ;;  %v25266_v0 = vand.u32 4294901760, %v4575_v1  ;;  %v4595_v27 = vsub.f32 %v25199_v13, %v25239_v15 }
 0x119   : > { %20767 = vmatmul.mubr.f32.gmra.mrb[16].mxu0 %v25212_v43  ;;  %29216 = vst [vmem:[#allocation238_spill] sm:$0xff] %v25251_v14  ;;  %29218 = vst [vmem:[#allocation240_spill] sm:$0xff] %v25257_v6  ;;  %v29220_v43 = vld [vmem:[#allocation94_spill] sm:$0xff]  ;;  %v4605_v23 = vsub.f32 %v25217_v48, %v25246_v36  ;;  %v25276_v3 = vand.u32 4294901760, %v25249_v8  ;;  %v25279_v58 = vsub.f32 %v4267_v26, %v25251_v14  ;;  %v25281_v12 = vand.u32 4294901760, %v4271_v52 }
 0x11a   : > { %20769 = vmatprep.mubr.f32.mxu0 %v25222_v38  ;;  %29217 = vst [vmem:[#allocation239_spill] sm:$0xff] %v25254_v47  ;;  %29219 = vst [vmem:[#allocation241_spill] sm:$0xff] %v25259_v39  ;;  %v25268_v38 = vand.u32 4294901760, %v4585_v62  ;;  %v25285_v62 = vand.u32 4294901760, %v25257_v6  ;;  %v25288_v30 = vsub.f32 %v4269_v17, %v25259_v39  ;;  %v25290_v1 = vand.u32 4294901760, %v9742_v10 }
 0x11b   : > { %19417 = vmatmul.mubr.f32.gmra.mrb[16].mxu1 %v29220_v43  ;;  %29222 = vst [vmem:[#allocation242_spill] sm:$0xff] %v25266_v0  ;;  %29224 = vst [vmem:[#allocation244_spill] sm:$0xff] %v25276_v3  ;;  %v29230_v43 = vld [vmem:[#allocation109_spill] sm:$0xff]  ;;  %v25295_v26 = vand.u32 4294901760, %v4595_v27  ;;  %v25301_v36 = vand.u32 4294901760, %v25279_v58  ;;  %v25304_v17 = vsub.f32 %v4271_v52, %v25281_v12 }
 0x11c   : > { %19419 = vmatprep.mubr.f32.mxu1 %v29221_v57  ;;  %29223 = vst [vmem:[#allocation243_spill] sm:$0xff] %v25268_v38  ;;  %29225 = vst [vmem:[#allocation245_spill] sm:$0xff] %v25279_v58  ;;  %v9744_v57 = vsel %vm432_vm2, %v9739_v4, 0  ;;  %v25309_v4 = vand.u32 4294901760, %v4605_v23  ;;  %v4625_v27 = vsub.f32 %v25257_v6, %v25285_v62 }
 0x11d   : > { %20770 = vmatmul.mubr.f32.gmra.mrb[18].mxu0 %v25243_v56  ;;  %29226 = vst [vmem:[#allocation246_spill] sm:$0xff] %v25281_v12  ;;  %29227 = vst [vmem:[#allocation247_spill] sm:$0xff] %v25285_v62  ;;  %v29231_v56 = vld [vmem:[#allocation112_spill] sm:$0xff]  ;;  %v25306_v15 = vand.u32 4294901760, %v9744_v57  ;;  %v4635_v23 = vsub.f32 %v25279_v58, %v25301_v36 }
 0x11e   : > { %20772 = vmatprep.mubr.f32.mxu0 %v25254_v47  ;;  %29228 = vst [vmem:[#allocation248_spill] sm:$0xff] %v25288_v30  ;;  %29229 = vst [vmem:[#allocation249_spill] sm:$0xff] %v25290_v1  ;;  %v4615_v47 = vsub.f32 %v25249_v8, %v25276_v3  ;;  %v29240_v3 = vld [vmem:[#allocation128_spill] sm:$0xff] }
 0x11f   : > { %19420 = vmatmul.mubr.f32.gmra.mrb[18].mxu1 %v29230_v43  ;;  %29232 = vst [vmem:[#allocation250_spill] sm:$0xff] %v25295_v26  ;;  %29233 = vst [vmem:[#allocation251_spill] sm:$0xff] %v25301_v36  ;;  %v25317_v43 = vsub.f32 %v9742_v10, %v25290_v1  ;;  %v25330_v62 = vsub.f32 %v9744_v57, %v25306_v15  ;;  %v25333_v10 = vand.u32 4294901760, %v4625_v27  ;;  %v25343_v36 = vand.u32 4294901760, %v4635_v23 }
 0x120   : > { %19422 = vmatprep.mubr.f32.mxu1 %v29231_v56  ;;  %29234 = vst [vmem:[#allocation252_spill] sm:$0xff] %v25304_v17  ;;  %29235 = vst [vmem:[#allocation253_spill] sm:$0xff] %v25306_v15  ;;  %v25314_v56 = vand.u32 4294901760, %v25288_v30  ;;  %v25322_v52 = vand.u32 4294901760, %v4615_v47  ;;  %v29246_v47 = vld [vmem:[#allocation131_spill] sm:$0xff] }
 0x121   : > { %20773 = vmatmul.mubr.f32.gmra.mrb[20].mxu0 %v25266_v0  ;;  %29236 = vst [vmem:[#allocation254_spill] sm:$0xff] %v25309_v4  ;;  %29238 = vst [vmem:[#allocation256_spill] sm:$0xff] %v25317_v43  ;;  %v29239_v0 = vld [vmem:[#allocation117_spill] sm:$0xff]  ;;  %v25348_v27 = vand.u32 4294901760, %v25330_v62 }
 0x122   : > { %20775 = vmatprep.mubr.f32.mxu0 %v25268_v38  ;;  %29237 = vst [vmem:[#allocation255_spill] sm:$0xff] %v25314_v56  ;;  %29241 = vst [vmem:[#allocation257_spill] sm:$0xff] %v25322_v52  ;;  %v25327_v38 = vand.u32 4294901760, %v25304_v17 }
 0x123   : > { %19423 = vmatmul.mubr.f32.gmra.mrb[20].mxu1 %v29239_v0  ;;  %29243 = vst [vmem:[#allocation259_spill] sm:$0xff] %v25330_v62  ;;  %29244 = vst [vmem:[#allocation260_spill] sm:$0xff] %v25333_v10  ;;  %v25338_v0 = vand.u32 4294901760, %v25317_v43 }
 0x124   : > { %19425 = vmatprep.mubr.f32.mxu1 %v29240_v3  ;;  %29242 = vst [vmem:[#allocation258_spill] sm:$0xff] %v25327_v38  ;;  %v4645_v3 = vsub.f32 %v25288_v30, %v25314_v56  ;;  %29248 = vst [vmem:[#allocation262_spill] sm:$0xff] %v25343_v36  ;;  %v4655_v57 = vsub.f32 %v25304_v17, %v25327_v38 }
 0x125   : > { %20776 = vmatmul.mubr.f32.gmra.mrb[22].mxu0 %v25295_v26  ;;  %29245 = vst [vmem:[#allocation261_spill] sm:$0xff] %v25338_v0  ;;  %v29247_v26 = vld [vmem:[#allocation134_spill] sm:$0xff]  ;;  %29249 = vst [vmem:[#allocation263_spill] sm:$0xff] %v25348_v27  ;;  %v10118_v56 = vsub.f32 %v25317_v43, %v25338_v0 }
 0x126   : > { %20778 = vmatprep.mubr.f32.mxu0 %v25309_v4  ;;  %v25351_v4 = vand.u32 4294901760, %v4645_v3  ;;  %v25358_v23 = vand.u32 4294901760, %v4655_v57  ;;  %v29255_v3 = vld [vmem:[#allocation150_spill] sm:$0xff]  ;;  %v300_v57 = vld [vmem:[%s27900_s1] sm:$0xf] }
 0x127   : > { %19426 = vmatmul.mubr.f32.gmra.mrb[22].mxu1 %v29246_v47  ;;  %v29251_v47 = vld [vmem:[#allocation140_spill] sm:$0xff]  ;;  %v25363_v38 = vand.u32 4294901760, %v10118_v56  ;;  %v2345_v56 = vsel %vm497_vm0, %v300_v57, 0  ;;  %v29262_v57 = vld [vmem:[#allocation70_spill] sm:$0xff] }
 0x128   : > { %19428 = vmatprep.mubr.f32.mxu1 %v29247_v26  ;;  %29250 = vst [vmem:[#allocation264_spill] sm:$0xff] %v25351_v4  ;;  %v29252_v26 = vld [vmem:[#allocation147_spill] sm:$0xff]  ;;  %29253 = vst [vmem:[#allocation265_spill] sm:$0xff] %v25358_v23 }
 0x129   : > { %20779 = vmatmul.mubr.f32.gmra.mrb[24].mxu0 %v25322_v52  ;;  %v10128_v52 = vsub.f32 %v25330_v62, %v25348_v27  ;;  %29254 = vst [vmem:[#allocation266_spill] sm:$0xff] %v25363_v38 }
 0x12a   : > { %20781 = vmatprep.mubr.f32.mxu0 %v25333_v10  ;;  %v29256_v10 = vld [vmem:[#allocation158_spill] sm:$0xff] }
 0x12b   : > { %19429 = vmatmul.mubr.f32.gmra.mrb[24].mxu1 %v29251_v47  ;;  %v25368_v47 = vand.u32 4294901760, %v10128_v52  ;;  %v25382_v52 = vand.u32 4294901760, %v2345_v56 }
 0x12c   : > { %19431 = vmatprep.mubr.f32.mxu1 %v29252_v26  ;;  %v29258_v26 = vld [vmem:[#allocation163_spill] sm:$0xff] }
 0x12d   : > { %20782 = vmatmul.mubr.f32.gmra.mrb[26].mxu0 %v25343_v36  ;;  %29257 = vst [vmem:[#allocation267_spill] sm:$0xff] %v25368_v47  ;;  %v29259_v36 = vld [vmem:[#allocation166_spill] sm:$0xff] }
 0x12e   : > { %20784 = vmatprep.mubr.f32.mxu0 %v25351_v4  ;;  %v29271_v4 = vld [vmem:[#allocation216_spill] sm:$0xff] }
 0x12f   : > { %19432 = vmatmul.mubr.f32.gmra.mrb[26].mxu1 %v29255_v3  ;;  %v29269_v3 = vld [vmem:[#allocation85_spill] sm:$0xff] }
 0x130   : > { %19434 = vmatprep.mubr.f32.mxu1 %v29256_v10  ;;  %v29268_v10 = vld [vmem:[#allocation214_spill] sm:$0xff] }
 0x131   : > { %20785 = vmatmul.mubr.f32.gmra.mrb[28].mxu0 %v25358_v23  ;;  %v29270_v23 = vld [vmem:[#allocation95_spill] sm:$0xff] }
 0x132   : > { %20787 = vmatprep.mubr.f32.mxu0 %v25363_v38  ;;  %v29264_v38 = vld [vmem:[#allocation100_spill] sm:$0xff] }
 0x133   : > { %19435 = vmatmul.mubr.f32.gmra.mrb[28].mxu1 %v29258_v26  ;;  %v29267_v26 = vld [vmem:[#allocation212_spill] sm:$0xff] }
 0x134   : > { %19437 = vmatprep.mubr.f32.mxu1 %v29259_v36  ;;  %v29266_v36 = vld [vmem:[#allocation83_spill] sm:$0xff] }
 0x135   : > { %20788 = vmatmul.mubr.f32.gmra.mrb[30].mxu0 %v25368_v47  ;;  %v29263_v47 = vld [vmem:[#allocation209_spill] sm:$0xff] }
 0x136   : > { %20792 = vmatprep.mubr.f32.mxu0 %v24802_v20 }
 0x137   : > { %19438 = vmatmul.mubr.f32.gmra.mrb[30].mxu1 %v24602_v19  ;;  %v29265_v19 = vld [vmem:[#allocation80_spill] sm:$0xff] }
 0x138   : > { %19442 = vmatprep.mubr.f32.mxu1 %v23962_v37 }
 0x139   : > { %20793 = vmatmul.mubr.f32.vlgmr.msra.gmra.mrb[0].mxu0 %v24805_v44 }
 0x13a   : > { %20795 = vmatprep.mubr.f32.mxu0 %v24807_v53  ;;  %20841 = vmatpush3.msra.mxu0 %v24709_v7  ;;  %v29261_v7 = vld [vmem:[#allocation68_spill] sm:$0xff] }
 0x13b   : > { %19443 = vmatmul.mubr.f32.vlgmr.msra.gmra.mrb[0].mxu1 %v23994_v55  ;;  %20890 = vmatprep.subr.mxu0 %v24650_v2 }
 0x13c   : > { %19491 = vmatpush3.msra.mxu1 %v23913_v5  ;;  %19445 = vmatprep.mubr.f32.mxu1 %v23957_v33  ;;  %v29260_v5 = vld [vmem:[#allocation205_spill] sm:$0xff] }
 0x13d   : > { %20796 = vmatmul.mubr.f32.gmra.mrb[2].mxu0 %v24828_v41  ;;  %19540 = vmatprep.subr.mxu1 %v25382_v52 }
 0x13e   : > { %20798 = vmatprep.mubr.f32.mxu0 %v24838_v24 }
 0x13f   : > { %19446 = vmatmul.mubr.f32.gmra.mrb[2].mxu1 %v23959_v34 }
 0x140   : > { %19448 = vmatprep.mubr.f32.mxu1 %v23987_v51 }
 0x141   : > { %20799 = vmatmul.mubr.f32.gmra.mrb[4].mxu0 %v24869_v25 }
 0x142   : > { %20801 = vmatprep.mubr.f32.mxu0 %v24871_v61 }
 0x143   : > { %19449 = vmatmul.mubr.f32.gmra.mrb[4].mxu1 %v24002_v59 }
 0x144   : > { %19451 = vmatprep.mubr.f32.mxu1 %v24034_v16 }
 0x145   : > { %20802 = vmatmul.mubr.f32.gmra.mrb[6].mxu0 %v24873_v18 }
 0x146   : > { %20804 = vmatprep.mubr.f32.mxu0 %v24888_v49 }
 0x147   : > { %19452 = vmatmul.mubr.f32.gmra.mrb[6].mxu1 %v24062_v28 }
 0x148   : > { %19454 = vmatprep.mubr.f32.mxu1 %v24094_v60 }
 0x149   : > { %20805 = vmatmul.mubr.f32.gmra.mrb[8].mxu0 %v24910_v35 }
 0x14a   : > { %20807 = vmatprep.mubr.f32.mxu0 %v24923_v50  ;;  %v29287_v50 = vld [vmem:[#allocation160_spill] sm:$0xff] }
 0x14b   : > { %19455 = vmatmul.mubr.f32.gmra.mrb[8].mxu1 %v24105_v11 }
 0x14c   : > { %19457 = vmatprep.mubr.f32.mxu1 %v24132_v42 }
 0x14d   : > { %20808 = vmatmul.mubr.f32.gmra.mrb[10].mxu0 %v24963_v32  ;;  %v29277_v32 = vld [vmem:[#allocation111_spill] sm:$0xff] }
 0x14e   : > { %20810 = vmatprep.mubr.f32.mxu0 %v24981_v45  ;;  %v29276_v45 = vld [vmem:[#allocation124_spill] sm:$0xff] }
 0x14f   : > { %19458 = vmatmul.mubr.f32.gmra.mrb[10].mxu1 %v24148_v31 }
 0x150   : > { %19460 = vmatprep.mubr.f32.mxu1 %v24157_v54 }
 0x151   : > { %20811 = vmatmul.mubr.f32.gmra.mrb[12].mxu0 %v24983_v40  ;;  %v29273_v40 = vld [vmem:[#allocation96_spill] sm:$0xff] }
 0x152   : > { %20813 = vmatprep.mubr.f32.mxu0 %v29260_v5  ;;  %v29272_v5 = vld [vmem:[#allocation219_spill] sm:$0xff] }
 0x153   : > { %19461 = vmatmul.mubr.f32.gmra.mrb[12].mxu1 %v29261_v7 }
 0x154   : > { %19463 = vmatprep.mubr.f32.mxu1 %v29262_v57 }
 0x155   : > { %20814 = vmatmul.mubr.f32.gmra.mrb[14].mxu0 %v29263_v47  ;;  %v29274_v47 = vld [vmem:[#allocation103_spill] sm:$0xff] }
 0x156   : > { %20816 = vmatprep.mubr.f32.mxu0 %v29264_v38  ;;  %v29275_v38 = vld [vmem:[#allocation220_spill] sm:$0xff] }
 0x157   : > { %19464 = vmatmul.mubr.f32.gmra.mrb[14].mxu1 %v29265_v19 }
 0x158   : > { %19466 = vmatprep.mubr.f32.mxu1 %v29266_v36 }
 0x159   : > { %20817 = vmatmul.mubr.f32.gmra.mrb[16].mxu0 %v29267_v26  ;;  %v29278_v26 = vld [vmem:[#allocation118_spill] sm:$0xff] }
 0x15a   : > { %20819 = vmatprep.mubr.f32.mxu0 %v29268_v10  ;;  %v29279_v10 = vld [vmem:[#allocation121_spill] sm:$0xff] }
 0x15b   : > { %19467 = vmatmul.mubr.f32.gmra.mrb[16].mxu1 %v29269_v3 }
 0x15c   : > { %19469 = vmatprep.mubr.f32.mxu1 %v29270_v23 }
 0x15d   : > { %20820 = vmatmul.mubr.f32.gmra.mrb[18].mxu0 %v29271_v4  ;;  %v29280_v4 = vld [vmem:[#allocation123_spill] sm:$0xff] }
 0x15e   : > { %20822 = vmatprep.mubr.f32.mxu0 %v29272_v5  ;;  %v29281_v5 = vld [vmem:[#allocation132_spill] sm:$0xff] }
 0x15f   : > { %19470 = vmatmul.mubr.f32.gmra.mrb[18].mxu1 %v29273_v40 }
 0x160   : > { %19472 = vmatprep.mubr.f32.mxu1 %v29274_v47 }
 0x161   : > { %20823 = vmatmul.mubr.f32.gmra.mrb[20].mxu0 %v29275_v38  ;;  %v29282_v38 = vld [vmem:[#allocation136_spill] sm:$0xff] }
 0x162   : > { %20825 = vmatprep.mubr.f32.mxu0 %v29276_v45  ;;  %v25441_v45 = vsub.f32 %v2345_v56, %v25382_v52 }
 0x163   : > { %19473 = vmatmul.mubr.f32.gmra.mrb[20].mxu1 %v29277_v32 }
 0x164   : > { %19475 = vmatprep.mubr.f32.mxu1 %v29278_v26 }
 0x165   : > { %20826 = vmatmul.mubr.f32.gmra.mrb[22].mxu0 %v25166_v63  ;;  %v29284_v63 = vld [vmem:[#allocation149_spill] sm:$0xff] }
 0x166   : > { %20828 = vmatprep.mubr.f32.mxu0 %v25185_v9  ;;  %v29283_v9 = vld [vmem:[#allocation143_spill] sm:$0xff] }
 0x167   : > { %19476 = vmatmul.mubr.f32.gmra.mrb[22].mxu1 %v29279_v10 }
 0x168   : > { %19478 = vmatprep.mubr.f32.mxu1 %v29280_v4 }
 0x169   : > { %20829 = vmatmul.mubr.f32.gmra.mrb[24].mxu0 %v25219_v46  ;;  %v25448_v46 = vand.u32 4294901760, %v25441_v45 }
 0x16a   : > { %20831 = vmatprep.mubr.f32.mxu0 %v25226_v29  ;;  %v29286_v29 = vld [vmem:[#allocation153_spill] sm:$0xff] }
 0x16b   : > { %19479 = vmatmul.mubr.f32.gmra.mrb[24].mxu1 %v29281_v5  ;;  %29285 = vst [vmem:[#allocation268_spill] sm:$0xff] %v25448_v46  ;;  %v2737_v56 = vsub.f32 %v25441_v45, %v25448_v46  ;;  %v29413_v46 = vld [vmem:[#allocation215_spill] sm:$0xff] }
 0x16c   : > { %19481 = vmatprep.mubr.f32.mxu1 %v29282_v38 }
 0x16d   : > { %20832 = vmatmul.mubr.f32.gmra.mrb[26].mxu0 %v25251_v14  ;;  %v29289_v14 = vld [vmem:[#allocation161_spill] sm:$0xff]  ;;  %v25460_v35 = vand.u32 4294901760, %v2737_v56  ;;  %v29295_v56 = vld [vmem:[#allocation52_spill] sm:$0xff] }
 0x16e   : > { %20834 = vmatprep.mubr.f32.mxu0 %v25259_v39  ;;  %v29288_v39 = vld [vmem:[#allocation19_spill] sm:$0xff] }
 0x16f   : > { %19482 = vmatmul.mubr.f32.gmra.mrb[26].mxu1 %v29283_v9 }
 0x170   : > { %19484 = vmatprep.mubr.f32.mxu1 %v29284_v63 }
 0x171   : > { %20835 = vmatmul.mubr.f32.gmra.mrb[28].mxu0 %v25281_v12  ;;  %v29290_v12 = vld [vmem:[#allocation22_spill] sm:$0xff] }
 0x172   : > { %20837 = vmatprep.mubr.f32.mxu0 %v25290_v1  ;;  %v29291_v1 = vld [vmem:[#allocation29_spill] sm:$0xff] }
 0x173   : > { %19485 = vmatmul.mubr.f32.gmra.mrb[28].mxu1 %v29286_v29 }
 0x174   : > { %19487 = vmatprep.mubr.f32.mxu1 %v29287_v50 }
 0x175   : > { %20838 = vmatmul.mubr.f32.gmra.mrb[30].mxu0 %v25306_v15  ;;  %v29292_v15 = vld [vmem:[#allocation178_spill] sm:$0xff] }
 0x176   : > { %20842 = vmatprep.mubr.f32.mxu0 %v29288_v39  ;;  %v29293_v39 = vld [vmem:[#allocation41_spill] sm:$0xff] }
 0x177   : > { %19488 = vmatmul.mubr.f32.gmra.mrb[30].mxu1 %v29289_v14 }
 0x178   : > { %19492 = vmatprep.mubr.f32.mxu1 %v23962_v37  ;;  %v29294_v37 = vld [vmem:[#allocation185_spill] sm:$0xff] }
 0x179   : > { %20843 = vmatmul.mubr.f32.vlgmr.msra.gmra.mrb[0].mxu0 %v29290_v12  ;;  %v29362_v12 = vld [vmem:[#allocation195_spill] sm:$0xff] }
 0x17a   : > { %20845 = vmatprep.mubr.f32.mxu0 %v29291_v1  ;;  %20891 = vmatpush3.msra.mxu0 %v24650_v2  ;;  %v29296_v1 = vld [vmem:[#allocation62_spill] sm:$0xff] }
 0x17b   : > { %19493 = vmatmul.mubr.f32.vlgmr.msra.gmra.mrb[0].mxu1 %v23994_v55  ;;  %20940 = vmatprep.subr.mxu0 %v29292_v15  ;;  %v29297_v55 = vld [vmem:[#allocation190_spill] sm:$0xff] }
 0x17c   : > { %19541 = vmatpush3.msra.mxu1 %v25382_v52  ;;  %19495 = vmatprep.mubr.f32.mxu1 %v23957_v33  ;;  %v29298_v33 = vld [vmem:[#allocation192_spill] sm:$0xff] }
 0x17d   : > { %20846 = vmatmul.mubr.f32.gmra.mrb[2].mxu0 %v29293_v39  ;;  %19590 = vmatprep.subr.mxu1 %v25460_v35 }
 0x17e   : > { %20848 = vmatprep.mubr.f32.mxu0 %v29294_v37  ;;  %v29299_v37 = vld [vmem:[#allocation197_spill] sm:$0xff] }
 0x17f   : > { %19496 = vmatmul.mubr.f32.gmra.mrb[2].mxu1 %v23959_v34  ;;  %v29300_v34 = vld [vmem:[#allocation199_spill] sm:$0xff] }
 0x180   : > { %19498 = vmatprep.mubr.f32.mxu1 %v23987_v51  ;;  %v29301_v51 = vld [vmem:[#allocation81_spill] sm:$0xff] }
 0x181   : > { %20849 = vmatmul.mubr.f32.gmra.mrb[4].mxu0 %v29295_v56 }
 0x182   : > { %20851 = vmatprep.mubr.f32.mxu0 %v29296_v1 }
 0x183   : > { %19499 = vmatmul.mubr.f32.gmra.mrb[4].mxu1 %v24002_v59  ;;  %v29302_v59 = vld [vmem:[#allocation86_spill] sm:$0xff] }
 0x184   : > { %19501 = vmatprep.mubr.f32.mxu1 %v24034_v16  ;;  %v29303_v16 = vld [vmem:[#allocation207_spill] sm:$0xff] }
 0x185   : > { %20852 = vmatmul.mubr.f32.gmra.mrb[6].mxu0 %v29297_v55 }
 0x186   : > { %20854 = vmatprep.mubr.f32.mxu0 %v29298_v33 }
 0x187   : > { %19502 = vmatmul.mubr.f32.gmra.mrb[6].mxu1 %v24062_v28  ;;  %v29304_v28 = vld [vmem:[#allocation210_spill] sm:$0xff] }
 0x188   : > { %19504 = vmatprep.mubr.f32.mxu1 %v24094_v60  ;;  %v23689_v60 = vld [vmem:[%s23928_s13 + $0x8] sm:$0xff] }
 0x189   : > { %20855 = vmatmul.mubr.f32.gmra.mrb[8].mxu0 %v29299_v37 }
 0x18a   : > { %20857 = vmatprep.mubr.f32.mxu0 %v29300_v34 }
 0x18b   : > { %19505 = vmatmul.mubr.f32.gmra.mrb[8].mxu1 %v24105_v11  ;;  %v29305_v11 = vld [vmem:[#allocation211_spill] sm:$0xff] }
 0x18c   : > { %19507 = vmatprep.mubr.f32.mxu1 %v24132_v42  ;;  %v29306_v42 = vld [vmem:[#allocation213_spill] sm:$0xff] }
 0x18d   : > { %20858 = vmatmul.mubr.f32.gmra.mrb[10].mxu0 %v29301_v51 }
 0x18e   : > { %20860 = vmatprep.mubr.f32.mxu0 %v29302_v59  ;;  %v23696_v59 = vld [vmem:[%s23928_s13 + $0x90] sm:$0xff] }
 0x18f   : > { %19508 = vmatmul.mubr.f32.gmra.mrb[10].mxu1 %v24148_v31  ;;  %v29307_v31 = vld [vmem:[#allocation120_spill] sm:$0xff]  ;;  %v2304_v51 = vsel %vm432_vm2, %v23696_v59, 0 }
 0x190   : > { %19510 = vmatprep.mubr.f32.mxu1 %v24157_v54  ;;  %v29308_v54 = vld [vmem:[#allocation218_spill] sm:$0xff]  ;;  %v25666_v33 = vand.u32 4294901760, %v2304_v51 }
 0x191   : > { %20861 = vmatmul.mubr.f32.gmra.mrb[12].mxu0 %v29303_v16 }
 0x192   : > { %20863 = vmatprep.mubr.f32.mxu0 %v29304_v28  ;;  %29351 = vst [vmem:[#allocation295_spill] sm:$0xff] %v25666_v33 }
 0x193   : > { %19511 = vmatmul.mubr.f32.gmra.mrb[12].mxu1 %v29261_v7  ;;  %v29309_v7 = vld [vmem:[#allocation222_spill] sm:$0xff] }
 0x194   : > { %19513 = vmatprep.mubr.f32.mxu1 %v29262_v57  ;;  %v23688_v57 = vld [vmem:[%s23928_s13] sm:$0xff] }
 0x195   : > { %20864 = vmatmul.mubr.f32.gmra.mrb[14].mxu0 %v29305_v11 }
 0x196   : > { %20866 = vmatprep.mubr.f32.mxu0 %v29306_v42 }
 0x197   : > { %19514 = vmatmul.mubr.f32.gmra.mrb[14].mxu1 %v29265_v19  ;;  %v2280_v19 = vsel %vm432_vm2, %v23688_v57, 0 }
 0x198   : > { %19516 = vmatprep.mubr.f32.mxu1 %v29266_v36  ;;  %v29310_v36 = vld [vmem:[#allocation137_spill] sm:$0xff] }
 0x199   : > { %20867 = vmatmul.mubr.f32.gmra.mrb[16].mxu0 %v29307_v31  ;;  %v29334_v31 = vld [vmem:[#allocation35_spill] sm:$0xff] }
 0x19a   : > { %20869 = vmatprep.mubr.f32.mxu0 %v29308_v54  ;;  %v23694_v54 = vld [vmem:[%s23928_s13 + $0x78] sm:$0xff] }
 0x19b   : > { %19517 = vmatmul.mubr.f32.gmra.mrb[16].mxu1 %v29269_v3  ;;  %v2282_v3 = vsel %vm432_vm2, %v23689_v60, 0 }
 0x19c   : > { %19519 = vmatprep.mubr.f32.mxu1 %v29270_v23  ;;  %v25512_v23 = vand.u32 4294901760, %v2280_v19 }
 0x19d   : > { %20870 = vmatmul.mubr.f32.gmra.mrb[18].mxu0 %v29309_v7 }
 0x19e   : > { %20872 = vmatprep.mubr.f32.mxu0 %v25157_v22  ;;  %v29311_v22 = vld [vmem:[#allocation179_spill] sm:$0xff]  ;;  %v25523_v60 = vsub.f32 %v2280_v19, %v25512_v23 }
 0x19f   : > { %19520 = vmatmul.mubr.f32.gmra.mrb[18].mxu1 %v29273_v40  ;;  %v2284_v40 = vsel %vm432_vm2, %v29311_v22, 0  ;;  %v29315_v22 = vld [vmem:[#allocation181_spill] sm:$0xff] }
 0x1a0   : > { %19522 = vmatprep.mubr.f32.mxu1 %v29274_v47  ;;  %v25518_v47 = vand.u32 4294901760, %v2282_v3  ;;  %29312 = vst [vmem:[#allocation178_spill] sm:$0xff] %v25523_v60  ;;  %v25525_v57 = vand.u32 4294901760, %v2284_v40 }
 0x1a1   : > { %20873 = vmatmul.mubr.f32.gmra.mrb[20].mxu0 %v25160_v21 }
 0x1a2   : > { %20875 = vmatprep.mubr.f32.mxu0 %v29310_v36  ;;  %29313 = vst [vmem:[#allocation179_spill] sm:$0xff] %v25525_v57 }
 0x1a3   : > { %19523 = vmatmul.mubr.f32.gmra.mrb[20].mxu1 %v29277_v32  ;;  %v29314_v32 = vld [vmem:[#allocation180_spill] sm:$0xff] }
 0x1a4   : > { %19525 = vmatprep.mubr.f32.mxu1 %v29278_v26  ;;  %v2286_v26 = vsel %vm432_vm2, %v29314_v32, 0  ;;  %v25542_v32 = vsub.f32 %v2284_v40, %v25525_v57 }
 0x1a5   : > { %20876 = vmatmul.mubr.f32.gmra.mrb[22].mxu0 %v25199_v13  ;;  %v2288_v13 = vsel %vm432_vm2, %v29315_v22, 0  ;;  %v23690_v22 = vld [vmem:[%s23928_s13 + $0x38] sm:$0xff] }
 0x1a6   : > { %20878 = vmatprep.mubr.f32.mxu0 %v25217_v48  ;;  %v25535_v48 = vsub.f32 %v2282_v3, %v25518_v47  ;;  %29318 = vst [vmem:[#allocation269_spill] sm:$0xff] %v25542_v32  ;;  %v29320_v3 = vld [vmem:[#allocation182_spill] sm:$0xff] }
 0x1a7   : > { %19526 = vmatmul.mubr.f32.gmra.mrb[22].mxu1 %v29279_v10  ;;  %v25537_v10 = vand.u32 4294901760, %v2286_v26 }
 0x1a8   : > { %19528 = vmatprep.mubr.f32.mxu1 %v29280_v4  ;;  %29316 = vst [vmem:[#allocation180_spill] sm:$0xff] %v25535_v48  ;;  %v25544_v4 = vand.u32 4294901760, %v2288_v13  ;;  %v29330_v21 = vand.u32 4294901760, %v25535_v48 }
 0x1a9   : > { %20879 = vmatmul.mubr.f32.gmra.mrb[24].mxu0 %v25249_v8  ;;  %29317 = vst [vmem:[#allocation181_spill] sm:$0xff] %v25537_v10  ;;  %v2290_v8 = vsel %vm432_vm2, %v23690_v22, 0  ;;  %v25555_v40 = vsub.f32 %v2286_v26, %v25537_v10  ;;  %v29323_v22 = vand.u32 4294901760, %v25523_v60 }
 0x1aa   : > { %20881 = vmatprep.mubr.f32.mxu0 %v25257_v6  ;;  %29319 = vst [vmem:[#allocation270_spill] sm:$0xff] %v25544_v4  ;;  %v2292_v6 = vsel %vm432_vm2, %v29320_v3, 0  ;;  %v25567_v3 = vsub.f32 %v2288_v13, %v25544_v4 }
 0x1ab   : > { %19529 = vmatmul.mubr.f32.gmra.mrb[24].mxu1 %v29281_v5  ;;  %29321 = vst [vmem:[#allocation182_spill] sm:$0xff] %v25555_v40  ;;  %v25557_v5 = vand.u32 4294901760, %v2290_v8  ;;  %v25572_v26 = vand.u32 4294901760, %v2292_v6  ;;  %v25579_v36 = vand.u32 4294901760, %v25555_v40 }
 0x1ac   : > { %19531 = vmatprep.mubr.f32.mxu1 %v29282_v38  ;;  %v2416_v38 = vsub.f32 %v25523_v60, %v29323_v22  ;;  %29325 = vst [vmem:[#allocation273_spill] sm:$0xff] %v25567_v3  ;;  %v29433_v60 = vld [vmem:[#allocation229_spill] sm:$0xff] }
 0x1ad   : > { %20882 = vmatmul.mubr.f32.gmra.mrb[26].mxu0 %v25279_v58  ;;  %29322 = vst [vmem:[#allocation271_spill] sm:$0xff] %v25557_v5  ;;  %v25564_v58 = vand.u32 4294901760, %v25542_v32  ;;  %29326 = vst [vmem:[#allocation274_spill] sm:$0xff] %v25572_v26  ;;  %v25582_v13 = vsub.f32 %v2290_v8, %v25557_v5  ;;  %v25597_v8 = vsub.f32 %v2292_v6, %v25572_v26 }
 0x1ae   : > { %20884 = vmatprep.mubr.f32.mxu0 %v25288_v30  ;;  %v23691_v30 = vld [vmem:[%s23928_s13 + $0x50] sm:$0xff]  ;;  %29327 = vst [vmem:[#allocation275_spill] sm:$0xff] %v25579_v36 }
 0x1af   : > { %19532 = vmatmul.mubr.f32.gmra.mrb[26].mxu1 %v29283_v9  ;;  %29324 = vst [vmem:[#allocation272_spill] sm:$0xff] %v25564_v58  ;;  %v2294_v19 = vsel %vm432_vm2, %v23691_v30, 0  ;;  %v23692_v9 = vld [vmem:[%s23928_s13 + $0x60] sm:$0xff]  ;;  %29328 = vst [vmem:[#allocation276_spill] sm:$0xff] %v25582_v13  ;;  %v25610_v42 = vand.u32 4294901760, %v25582_v13 }
 0x1b0   : > { %19534 = vmatprep.mubr.f32.mxu1 %v29284_v63  ;;  %v2296_v22 = vsel %vm432_vm2, %v23692_v9, 0  ;;  %v25584_v30 = vand.u32 4294901760, %v2294_v19  ;;  %v2417_v63 = vand.u32 4294901760, %v2416_v38  ;;  %v2436_v9 = vsub.f32 %v25542_v32, %v25564_v58  ;;  %29332 = vst [vmem:[#allocation279_spill] sm:$0xff] %v25597_v8 }
 0x1b1   : > { %20885 = vmatmul.mubr.f32.gmra.mrb[28].mxu0 %v25304_v17  ;;  %v2426_v17 = vsub.f32 %v25535_v48, %v29330_v21  ;;  %v25599_v7 = vand.u32 4294901760, %v2296_v22  ;;  %v2300_v21 = vsel %vm432_vm2, %v23694_v54, 0  ;;  %29335 = vst [vmem:[#allocation281_spill] sm:$0xff] %v25610_v42  ;;  %v29422_v48 = vld [vmem:[#allocation133_spill] sm:$0xff] }
 0x1b2   : > { %20887 = vmatprep.mubr.f32.mxu0 %v25317_v43  ;;  %29329 = vst [vmem:[#allocation277_spill] sm:$0xff] %v25584_v30  ;;  %v25593_v43 = vand.u32 4294901760, %v25567_v3  ;;  %v25613_v6 = vsub.f32 %v2294_v19, %v25584_v30  ;;  %v25618_v54 = vand.u32 4294901760, %v2300_v21  ;;  %v25622_v28 = vand.u32 4294901760, %v2436_v9 }
 0x1b3   : > { %19535 = vmatmul.mubr.f32.gmra.mrb[28].mxu1 %v29286_v29  ;;  %29333 = vst [vmem:[#allocation280_spill] sm:$0xff] %v25599_v7  ;;  %v23693_v29 = vld [vmem:[%s23928_s13 + $0x68] sm:$0xff]  ;;  %v25627_v19 = vand.u32 4294901760, %v25597_v8  ;;  %v2466_v9 = vsub.f32 %v25582_v13, %v25610_v42  ;;  %v29363_v42 = vld [vmem:[#allocation196_spill] sm:$0xff] }
 0x1b4   : > { %29331 = vst [vmem:[#allocation278_spill] sm:$0xff] %v25593_v43  ;;  %19537 = vmatprep.mubr.f32.mxu1 %v29287_v50  ;;  %v2298_v38 = vsel %vm432_vm2, %v23693_v29, 0  ;;  %v2446_v50 = vsub.f32 %v25555_v40, %v25579_v36  ;;  %29336 = vst [vmem:[#allocation282_spill] sm:$0xff] %v25613_v6  ;;  %v2427_v29 = vand.u32 4294901760, %v2426_v17  ;;  %v2456_v16 = vsub.f32 %v25567_v3, %v25593_v43  ;;  %v23701_v36 = vld [vmem:[%s23928_s13 + $0xc8] sm:$0xff]  ;;  %v29403_v3 = vld [vmem:[#allocation106_spill] sm:$0xff] }
 0x1b5   : > { %20888 = vmatmul.mubr.f32.gmra.mrb[30].mxu0 %v25330_v62  ;;  %v25616_v11 = vand.u32 4294901760, %v2298_v38  ;;  %29338 = vst [vmem:[#allocation284_spill] sm:$0xff] %v25618_v54  ;;  %v23695_v62 = vld [vmem:[%s23928_s13 + $0x80] sm:$0xff]  ;;  %29339 = vst [vmem:[#allocation285_spill] sm:$0xff] %v25622_v28  ;;  %v25630_v17 = vsub.f32 %v2296_v22, %v25599_v7  ;;  %v25642_v34 = vand.u32 4294901760, %v25613_v6  ;;  %v25650_v59 = vsub.f32 %v2300_v21, %v25618_v54  ;;  %v29412_v40 = vld [vmem:[#allocation114_spill] sm:$0xff] }
 0x1b6   : > { %20892 = vmatprep.mubr.f32.mxu0 %v29334_v31  ;;  %v2302_v31 = vsel %vm432_vm2, %v23695_v62, 0  ;;  %29340 = vst [vmem:[#allocation286_spill] sm:$0xff] %v25627_v19  ;;  %v29343_v62 = vld [vmem:[#allocation38_spill] sm:$0xff]  ;;  %v2314_v58 = vsel %vm432_vm2, %v23701_v36, 0 }
 0x1b7   : > { %19538 = vmatmul.mubr.f32.gmra.mrb[30].mxu1 %v29289_v14  ;;  %29337 = vst [vmem:[#allocation283_spill] sm:$0xff] %v25616_v11  ;;  %29341 = vst [vmem:[#allocation287_spill] sm:$0xff] %v25630_v17  ;;  %v29342_v14 = vld [vmem:[#allocation37_spill] sm:$0xff]  ;;  %v25644_v37 = vand.u32 4294901760, %v2302_v31  ;;  %v25647_v22 = vsub.f32 %v2298_v38, %v25616_v11  ;;  %v2476_v38 = vsub.f32 %v25597_v8, %v25627_v19  ;;  %v25664_v21 = vand.u32 4294901760, %v25630_v17 }
 0x1b8   : > { %19542 = vmatprep.mubr.f32.mxu1 %v2417_v63  ;;  %v25637_v63 = vand.u32 4294901760, %v2446_v50  ;;  %29345 = vst [vmem:[#allocation289_spill] sm:$0xff] %v25642_v34  ;;  %29348 = vst [vmem:[#allocation292_spill] sm:$0xff] %v25650_v59  ;;  %v23698_v50 = vld [vmem:[%s23928_s13 + $0xa8] sm:$0xff]  ;;  %v2486_v1 = vsub.f32 %v25613_v6, %v25642_v34  ;;  %v23700_v34 = vld [vmem:[%s23928_s13 + $0xc0] sm:$0xff] }
 0x1b9   : > { %20893 = vmatmul.mubr.f32.vlgmr.msra.gmra.mrb[0].mxu0 %v29342_v14  ;;  %29346 = vst [vmem:[#allocation290_spill] sm:$0xff] %v25644_v37  ;;  %29347 = vst [vmem:[#allocation291_spill] sm:$0xff] %v25647_v22  ;;  %v2308_v14 = vsel %vm432_vm2, %v23698_v50, 0  ;;  %v29353_v50 = vld [vmem:[#allocation51_spill] sm:$0xff]  ;;  %v2496_v39 = vsub.f32 %v25630_v17, %v25664_v21  ;;  %v2312_v19 = vsel %vm432_vm2, %v23700_v34, 0  ;;  %v29383_v17 = vld [vmem:[#allocation204_spill] sm:$0xff] }
 0x1ba   : > { %20895 = vmatprep.mubr.f32.mxu0 %v29343_v62  ;;  %20941 = vmatpush3.msra.mxu0 %v29292_v15  ;;  %29344 = vst [vmem:[#allocation288_spill] sm:$0xff] %v25637_v63  ;;  %v23697_v62 = vld [vmem:[%s23928_s13 + $0x98] sm:$0xff]  ;;  %29350 = vst [vmem:[#allocation294_spill] sm:$0xff] %v25664_v21  ;;  %v25678_v55 = vand.u32 4294901760, %v2308_v14 }
 0x1bb   : > { %19543 = vmatmul.mubr.f32.vlgmr.msra.gmra.mrb[0].mxu1 %v2427_v29  ;;  %v2306_v15 = vsel %vm432_vm2, %v23697_v62, 0  ;;  %20990 = vmatprep.subr.mxu0 %v24650_v2  ;;  %v25659_v29 = vand.u32 4294901760, %v2456_v16  ;;  %v29352_v62 = vld [vmem:[#allocation48_spill] sm:$0xff]  ;;  %v25674_v16 = vsub.f32 %v2302_v31, %v25644_v37  ;;  %v25692_v31 = vand.u32 4294901760, %v2476_v38 }
 0x1bc   : > { %19591 = vmatpush3.msra.mxu1 %v25460_v35  ;;  %19545 = vmatprep.mubr.f32.mxu1 %v25622_v28  ;;  %v25671_v35 = vand.u32 4294901760, %v2466_v9  ;;  %v25676_v28 = vand.u32 4294901760, %v2306_v15  ;;  %29357 = vst [vmem:[#allocation299_spill] sm:$0xff] %v25678_v55  ;;  %v23699_v9 = vld [vmem:[%s23928_s13 + $0xb0] sm:$0xff]  ;;  %v25710_v21 = vsub.f32 %v2308_v14, %v25678_v55  ;;  %v25722_v43 = vand.u32 4294901760, %v2496_v39 }
 0x1bd   : > { %29349 = vst [vmem:[#allocation293_spill] sm:$0xff] %v25659_v29  ;;  %20896 = vmatmul.mubr.f32.gmra.mrb[2].mxu0 %v29352_v62  ;;  %19640 = vmatprep.subr.mxu1 %v25441_v45  ;;  %29355 = vst [vmem:[#allocation297_spill] sm:$0xff] %v25674_v16  ;;  %v25684_v62 = vand.u32 4294901760, %v25647_v22  ;;  %v2310_v56 = vsel %vm432_vm2, %v23699_v9, 0  ;;  %v25704_v9 = vand.u32 4294901760, %v25674_v16  ;;  %v25727_v14 = vand.u32 4294901760, %v2312_v19 }
 0x1be   : > { %20898 = vmatprep.mubr.f32.mxu0 %v29353_v50  ;;  %29354 = vst [vmem:[#allocation296_spill] sm:$0xff] %v25671_v35  ;;  %29356 = vst [vmem:[#allocation298_spill] sm:$0xff] %v25676_v28  ;;  %v25687_v50 = vand.u32 4294901760, %v25650_v59  ;;  %v25707_v38 = vsub.f32 %v2306_v15, %v25676_v28 }
 0x1bf   : > { %19546 = vmatmul.mubr.f32.gmra.mrb[2].mxu1 %v25637_v63  ;;  %29358 = vst [vmem:[#allocation300_spill] sm:$0xff] %v25684_v62  ;;  %29360 = vst [vmem:[#allocation302_spill] sm:$0xff] %v25692_v31  ;;  %v25697_v63 = vsub.f32 %v2304_v51, %v25666_v33  ;;  %v25712_v51 = vand.u32 4294901760, %v2310_v56  ;;  %v2506_v34 = vsub.f32 %v25647_v22, %v25684_v62 }
 0x1c0   : > { %29359 = vst [vmem:[#allocation301_spill] sm:$0xff] %v25687_v50  ;;  %19548 = vmatprep.mubr.f32.mxu1 %v25659_v29  ;;  %29364 = vst [vmem:[#allocation304_spill] sm:$0xff] %v25704_v9  ;;  %v29373_v29 = vld [vmem:[#allocation198_spill] sm:$0xff]  ;;  %v2526_v39 = vsub.f32 %v25674_v16, %v25704_v9  ;;  %v25757_v16 = vsub.f32 %v2312_v19, %v25727_v14 }
 0x1c1   : > { %29361 = vst [vmem:[#allocation303_spill] sm:$0xff] %v25697_v63  ;;  %20899 = vmatmul.mubr.f32.gmra.mrb[4].mxu0 %v29362_v12  ;;  %29365 = vst [vmem:[#allocation305_spill] sm:$0xff] %v25707_v38  ;;  %v25715_v12 = vand.u32 4294901760, %v2486_v1  ;;  %v25725_v15 = vand.u32 4294901760, %v25697_v63  ;;  %v29372_v1 = vld [vmem:[#allocation69_spill] sm:$0xff]  ;;  %v25744_v36 = vsub.f32 %v2310_v56, %v25712_v51  ;;  %v23703_v56 = vld [vmem:[%s23928_s13 + $0xe0] sm:$0xff] }
 0x1c2   : > { %20901 = vmatprep.mubr.f32.mxu0 %v29363_v42  ;;  %29366 = vst [vmem:[#allocation306_spill] sm:$0xff] %v25710_v21  ;;  %29367 = vst [vmem:[#allocation307_spill] sm:$0xff] %v25712_v51  ;;  %v2516_v42 = vsub.f32 %v25650_v59, %v25687_v50  ;;  %v25738_v50 = vand.u32 4294901760, %v25707_v38 }
 0x1c3   : > { %19549 = vmatmul.mubr.f32.gmra.mrb[4].mxu1 %v25671_v35  ;;  %29368 = vst [vmem:[#allocation308_spill] sm:$0xff] %v25715_v12  ;;  %29369 = vst [vmem:[#allocation309_spill] sm:$0xff] %v25722_v43  ;;  %v23702_v35 = vld [vmem:[%s23928_s13 + $0xd8] sm:$0xff]  ;;  %v2536_v9 = vsub.f32 %v25697_v63, %v25725_v15  ;;  %v25774_v63 = vand.u32 4294901760, %v25744_v36 }
 0x1c4   : > { %19551 = vmatprep.mubr.f32.mxu1 %v25692_v31  ;;  %29370 = vst [vmem:[#allocation310_spill] sm:$0xff] %v25725_v15  ;;  %29371 = vst [vmem:[#allocation311_spill] sm:$0xff] %v25727_v14  ;;  %v2316_v62 = vsel %vm432_vm2, %v23702_v35, 0  ;;  %v25741_v31 = vand.u32 4294901760, %v25710_v21  ;;  %v25749_v35 = vand.u32 4294901760, %v2516_v42  ;;  %v23704_v42 = vld [vmem:[%s23928_s13 + $0xf0] sm:$0xff]  ;;  %v2546_v15 = vsub.f32 %v25707_v38, %v25738_v50 }
 0x1c5   : > { %20902 = vmatmul.mubr.f32.gmra.mrb[6].mxu0 %v29372_v1  ;;  %29374 = vst [vmem:[#allocation312_spill] sm:$0xff] %v25738_v50  ;;  %29376 = vst [vmem:[#allocation314_spill] sm:$0xff] %v25744_v36  ;;  %v25747_v1 = vand.u32 4294901760, %v2506_v34  ;;  %v25759_v59 = vand.u32 4294901760, %v2316_v62  ;;  %v2318_v34 = vsel %vm432_vm2, %v23703_v56, 0  ;;  %v2320_v22 = vsel %vm432_vm2, %v23704_v42, 0 }
 0x1c6   : > { %20904 = vmatprep.mubr.f32.mxu0 %v29373_v29  ;;  %29375 = vst [vmem:[#allocation313_spill] sm:$0xff] %v25741_v31  ;;  %29378 = vst [vmem:[#allocation316_spill] sm:$0xff] %v25749_v35  ;;  %v25751_v29 = vand.u32 4294901760, %v2314_v58  ;;  %v2556_v19 = vsub.f32 %v25710_v21, %v25741_v31  ;;  %v23705_v42 = vld [vmem:[%s23928_s13 + $0xf8] sm:$0xff]  ;;  %v25787_v31 = vand.u32 4294901760, %v2536_v9  ;;  %v25790_v50 = vand.u32 4294901760, %v25757_v16 }
 0x1c7   : > { %19552 = vmatmul.mubr.f32.gmra.mrb[6].mxu1 %v25715_v12  ;;  %29377 = vst [vmem:[#allocation315_spill] sm:$0xff] %v25747_v1  ;;  %29380 = vst [vmem:[#allocation318_spill] sm:$0xff] %v25757_v16  ;;  %v29382_v12 = vld [vmem:[#allocation75_spill] sm:$0xff]  ;;  %v29392_v21 = vld [vmem:[#allocation17_spill] sm:$0xff] }
 0x1c8   : > { %29379 = vst [vmem:[#allocation317_spill] sm:$0xff] %v25751_v29  ;;  %19554 = vmatprep.mubr.f32.mxu1 %v25722_v43  ;;  %29381 = vst [vmem:[#allocation319_spill] sm:$0xff] %v25759_v59  ;;  %v25767_v43 = vand.u32 4294901760, %v2526_v39  ;;  %v25778_v56 = vsub.f32 %v2314_v58, %v25751_v29  ;;  %v2322_v39 = vsel %vm432_vm2, %v23705_v42, 0  ;;  %v25795_v58 = vand.u32 4294901760, %v2320_v22  ;;  %v29393_v38 = vld [vmem:[#allocation92_spill] sm:$0xff] }
 0x1c9   : > { %20905 = vmatmul.mubr.f32.gmra.mrb[8].mxu0 %v29382_v12  ;;  %29385 = vst [vmem:[#allocation321_spill] sm:$0xff] %v25774_v63  ;;  %v25780_v12 = vand.u32 4294901760, %v2318_v34  ;;  %29388 = vst [vmem:[#allocation324_spill] sm:$0xff] %v25787_v31  ;;  %v25799_v42 = vand.u32 4294901760, %v2546_v15  ;;  %v25803_v9 = vand.u32 4294901760, %v2322_v39 }
 0x1ca   : > { %20907 = vmatprep.mubr.f32.mxu0 %v29383_v17  ;;  %29384 = vst [vmem:[#allocation320_spill] sm:$0xff] %v25767_v43  ;;  %29386 = vst [vmem:[#allocation322_spill] sm:$0xff] %v25778_v56  ;;  %v23706_v17 = vld [vmem:[%s23928_s13 + $0x108] sm:$0xff]  ;;  %v25811_v8 = vand.u32 4294901760, %v25778_v56 }
 0x1cb   : > { %19555 = vmatmul.mubr.f32.gmra.mrb[8].mxu1 %v25747_v1  ;;  %29387 = vst [vmem:[#allocation323_spill] sm:$0xff] %v25780_v12  ;;  %v2324_v6 = vsel %vm432_vm2, %v23706_v17, 0  ;;  %29389 = vst [vmem:[#allocation325_spill] sm:$0xff] %v25790_v50  ;;  %v25793_v1 = vsub.f32 %v2316_v62, %v25759_v59  ;;  %v2566_v17 = vsub.f32 %v25744_v36, %v25774_v63  ;;  %v25808_v62 = vand.u32 4294901760, %v2556_v19 }
 0x1cc   : > { %19557 = vmatprep.mubr.f32.mxu1 %v25749_v35  ;;  %29391 = vst [vmem:[#allocation327_spill] sm:$0xff] %v25795_v58  ;;  %29394 = vst [vmem:[#allocation328_spill] sm:$0xff] %v25799_v42  ;;  %v25805_v35 = vand.u32 4294901760, %v2324_v6  ;;  %v2576_v63 = vsub.f32 %v25757_v16, %v25790_v50  ;;  %v25825_v19 = vsub.f32 %v2320_v22, %v25795_v58 }
 0x1cd   : > { %29390 = vst [vmem:[#allocation326_spill] sm:$0xff] %v25793_v1  ;;  %20908 = vmatmul.mubr.f32.gmra.mrb[10].mxu0 %v29392_v21  ;;  %29395 = vst [vmem:[#allocation329_spill] sm:$0xff] %v25803_v9  ;;  %v25814_v21 = vsub.f32 %v2318_v34, %v25780_v12  ;;  %v25822_v36 = vand.u32 4294901760, %v25793_v1  ;;  %v29402_v34 = vld [vmem:[#allocation97_spill] sm:$0xff]  ;;  %v25840_v22 = vand.u32 4294901760, %v2566_v17 }
 0x1ce   : > { %20910 = vmatprep.mubr.f32.mxu0 %v29393_v38  ;;  %29396 = vst [vmem:[#allocation330_spill] sm:$0xff] %v25805_v35  ;;  %29397 = vst [vmem:[#allocation331_spill] sm:$0xff] %v25808_v62  ;;  %v23707_v38 = vld [vmem:[%s23928_s13 + $0x110] sm:$0xff]  ;;  %v25835_v50 = vsub.f32 %v2324_v6, %v25805_v35  ;;  %v25855_v16 = vand.u32 4294901760, %v25825_v19  ;;  %v23709_v17 = vld [vmem:[%s23928_s13 + $0x128] sm:$0xff] }
 0x1cf   : > { %19558 = vmatmul.mubr.f32.gmra.mrb[10].mxu1 %v25767_v43  ;;  %29398 = vst [vmem:[#allocation332_spill] sm:$0xff] %v25811_v8  ;;  %29399 = vst [vmem:[#allocation333_spill] sm:$0xff] %v25814_v21  ;;  %v2326_v15 = vsel %vm432_vm2, %v23707_v38, 0  ;;  %v23708_v43 = vld [vmem:[%s23928_s13 + $0x120] sm:$0xff]  ;;  %v25832_v38 = vsub.f32 %v2322_v39, %v25803_v9  ;;  %v25850_v39 = vand.u32 4294901760, %v2576_v63  ;;  %v2596_v6 = vsub.f32 %v25793_v1, %v25822_v36 }
 0x1d0   : > { %19560 = vmatprep.mubr.f32.mxu1 %v25787_v31  ;;  %29400 = vst [vmem:[#allocation334_spill] sm:$0xff] %v25822_v36  ;;  %29401 = vst [vmem:[#allocation335_spill] sm:$0xff] %v25825_v19  ;;  %v2328_v13 = vsel %vm432_vm2, %v23708_v43, 0  ;;  %v25837_v31 = vand.u32 4294901760, %v2326_v15  ;;  %v2586_v43 = vsub.f32 %v25778_v56, %v25811_v8  ;;  %v23710_v8 = vld [vmem:[%s23928_s13 + $0x138] sm:$0xff]  ;;  %v25867_v36 = vand.u32 4294901760, %v25835_v50 }
 0x1d1   : > { %20911 = vmatmul.mubr.f32.gmra.mrb[12].mxu0 %v29402_v34  ;;  %29404 = vst [vmem:[#allocation336_spill] sm:$0xff] %v25832_v38  ;;  %29405 = vst [vmem:[#allocation337_spill] sm:$0xff] %v25835_v50  ;;  %v25845_v34 = vand.u32 4294901760, %v25814_v21  ;;  %v2332_v56 = vsel %vm432_vm2, %v23710_v8, 0  ;;  %v25864_v63 = vand.u32 4294901760, %v25832_v38  ;;  %v25883_v1 = vand.u32 4294901760, %v2596_v6 }
 0x1d2   : > { %20913 = vmatprep.mubr.f32.mxu0 %v29403_v3  ;;  %29406 = vst [vmem:[#allocation338_spill] sm:$0xff] %v25837_v31  ;;  %29407 = vst [vmem:[#allocation339_spill] sm:$0xff] %v25840_v22  ;;  %v25847_v3 = vand.u32 4294901760, %v2328_v13  ;;  %v25887_v32 = vand.u32 4294901760, %v2332_v56 }
 0x1d3   : > { %19561 = vmatmul.mubr.f32.gmra.mrb[12].mxu1 %v25799_v42  ;;  %29408 = vst [vmem:[#allocation340_spill] sm:$0xff] %v25845_v34  ;;  %29410 = vst [vmem:[#allocation342_spill] sm:$0xff] %v25850_v39  ;;  %v2330_v42 = vsel %vm432_vm2, %v23709_v17, 0  ;;  %v25873_v17 = vand.u32 4294901760, %v2586_v43  ;;  %v2626_v6 = vsub.f32 %v25832_v38, %v25864_v63  ;;  %v29432_v38 = vld [vmem:[#allocation144_spill] sm:$0xff] }
 0x1d4   : > { %29409 = vst [vmem:[#allocation341_spill] sm:$0xff] %v25847_v3  ;;  %19563 = vmatprep.mubr.f32.mxu1 %v25808_v62  ;;  %29411 = vst [vmem:[#allocation343_spill] sm:$0xff] %v25855_v16  ;;  %v25870_v62 = vsub.f32 %v2326_v15, %v25837_v31  ;;  %v25878_v8 = vsub.f32 %v2328_v13, %v25847_v3  ;;  %v2616_v15 = vsub.f32 %v25825_v19, %v25855_v16  ;;  %v23714_v19 = vld [vmem:[%s23928_s13 + $0x168] sm:$0xff] }
 0x1d5   : > { %20914 = vmatmul.mubr.f32.gmra.mrb[14].mxu0 %v29412_v40  ;;  %29414 = vst [vmem:[#allocation344_spill] sm:$0xff] %v25864_v63  ;;  %29415 = vst [vmem:[#allocation345_spill] sm:$0xff] %v25867_v36  ;;  %v2606_v40 = vsub.f32 %v25814_v21, %v25845_v34  ;;  %v23712_v34 = vld [vmem:[%s23928_s13 + $0x150] sm:$0xff]  ;;  %v29423_v21 = vld [vmem:[#allocation223_spill] sm:$0xff]  ;;  %v2636_v16 = vsub.f32 %v25835_v50, %v25867_v36  ;;  %v25917_v36 = vsub.f32 %v2332_v56, %v25887_v32 }
 0x1d6   : > { %20916 = vmatprep.mubr.f32.mxu0 %v29413_v46  ;;  %29416 = vst [vmem:[#allocation346_spill] sm:$0xff] %v25870_v62  ;;  %29417 = vst [vmem:[#allocation347_spill] sm:$0xff] %v25873_v17  ;;  %v25880_v46 = vand.u32 4294901760, %v2330_v42  ;;  %v2336_v13 = vsel %vm432_vm2, %v23712_v34, 0  ;;  %v25914_v63 = vand.u32 4294901760, %v2616_v15 }
 0x1d7   : > { %19564 = vmatmul.mubr.f32.gmra.mrb[14].mxu1 %v25840_v22  ;;  %29418 = vst [vmem:[#allocation348_spill] sm:$0xff] %v25878_v8  ;;  %29420 = vst [vmem:[#allocation350_spill] sm:$0xff] %v25883_v1  ;;  %v23711_v22 = vld [vmem:[%s23928_s13 + $0x140] sm:$0xff]  ;;  %v25919_v50 = vand.u32 4294901760, %v2336_v13  ;;  %v25929_v15 = vand.u32 4294901760, %v2636_v16  ;;  %v25946_v16 = vand.u32 4294901760, %v25917_v36 }
 0x1d8   : > { %29419 = vst [vmem:[#allocation349_spill] sm:$0xff] %v25880_v46  ;;  %19566 = vmatprep.mubr.f32.mxu1 %v25850_v39  ;;  %29421 = vst [vmem:[#allocation351_spill] sm:$0xff] %v25887_v32  ;;  %v2334_v43 = vsel %vm432_vm2, %v23711_v22, 0  ;;  %v25900_v39 = vand.u32 4294901760, %v25870_v62  ;;  %v25903_v22 = vand.u32 4294901760, %v2606_v40  ;;  %v25909_v34 = vsub.f32 %v2330_v42, %v25880_v46 }
 0x1d9   : > { %20917 = vmatmul.mubr.f32.gmra.mrb[16].mxu0 %v29422_v48  ;;  %v25906_v48 = vand.u32 4294901760, %v25878_v8  ;;  %29429 = vst [vmem:[#allocation357_spill] sm:$0xff] %v25914_v63  ;;  %29430 = vst [vmem:[#allocation358_spill] sm:$0xff] %v25917_v36  ;;  %v2340_v42 = vsel %vm432_vm2, %v23714_v19, 0  ;;  %v25927_v46 = vand.u32 4294901760, %v2626_v6  ;;  %v25949_v6 = vsub.f32 %v2336_v13, %v25919_v50 }
 0x1da   : > { %20919 = vmatprep.mubr.f32.mxu0 %v29423_v21  ;;  %29424 = vst [vmem:[#allocation352_spill] sm:$0xff] %v25900_v39  ;;  %29425 = vst [vmem:[#allocation353_spill] sm:$0xff] %v25903_v22  ;;  %v25911_v21 = vand.u32 4294901760, %v2334_v43  ;;  %v2646_v56 = vsub.f32 %v25870_v62, %v25900_v39  ;;  %v23715_v39 = vld [vmem:[%s23928_s13 + $0x170] sm:$0xff] }
 0x1db   : > { %19567 = vmatmul.mubr.f32.gmra.mrb[16].mxu1 %v25873_v17  ;;  %29426 = vst [vmem:[#allocation354_spill] sm:$0xff] %v25906_v48  ;;  %29427 = vst [vmem:[#allocation355_spill] sm:$0xff] %v25909_v34  ;;  %v23713_v17 = vld [vmem:[%s23928_s13 + $0x158] sm:$0xff] }
 0x1dc   : > { %29428 = vst [vmem:[#allocation356_spill] sm:$0xff] %v25911_v21  ;;  %19569 = vmatprep.mubr.f32.mxu1 %v25883_v1  ;;  %29431 = vst [vmem:[#allocation359_spill] sm:$0xff] %v25919_v50  ;;  %v2338_v40 = vsel %vm432_vm2, %v23713_v17, 0  ;;  %v2656_v17 = vsub.f32 %v25878_v8, %v25906_v48  ;;  %v25940_v1 = vsub.f32 %v2334_v43, %v25911_v21  ;;  %v2342_v48 = vsel %vm432_vm2, %v23715_v39, 0  ;;  %v29443_v8 = vld [vmem:[#allocation145_spill] sm:$0xff] }
 0x1dd   : > { %20920 = vmatmul.mubr.f32.gmra.mrb[18].mxu0 %v29432_v38  ;;  %29434 = vst [vmem:[#allocation360_spill] sm:$0xff] %v25927_v46  ;;  %29435 = vst [vmem:[#allocation361_spill] sm:$0xff] %v25929_v15  ;;  %v25937_v38 = vand.u32 4294901760, %v25909_v34  ;;  %v25942_v19 = vand.u32 4294901760, %v2338_v40  ;;  %v25957_v43 = vand.u32 4294901760, %v2646_v56  ;;  %v25968_v50 = vand.u32 4294901760, %v2342_v48 }
 0x1de   : > { %20922 = vmatprep.mubr.f32.mxu0 %v29433_v60  ;;  %29437 = vst [vmem:[#allocation363_spill] sm:$0xff] %v25940_v1  ;;  %29439 = vst [vmem:[#allocation365_spill] sm:$0xff] %v25946_v16  ;;  %v25951_v60 = vand.u32 4294901760, %v2340_v42  ;;  %v25963_v62 = vand.u32 4294901760, %v25940_v1  ;;  %v25971_v39 = vand.u32 4294901760, %v2656_v17  ;;  %v2676_v56 = vsub.f32 %v25917_v36, %v25946_v16 }
 0x1df   : > { %19570 = vmatmul.mubr.f32.gmra.mrb[18].mxu1 %v25903_v22  ;;  %29436 = vst [vmem:[#allocation362_spill] sm:$0xff] %v25937_v38  ;;  %29438 = vst [vmem:[#allocation364_spill] sm:$0xff] %v25942_v19  ;;  %v29442_v22 = vld [vmem:[#allocation230_spill] sm:$0xff]  ;;  %v25966_v13 = vsub.f32 %v2338_v40, %v25942_v19  ;;  %v25992_v16 = vsub.f32 %v2342_v48, %v25968_v50 }
 0x1e0   : > { %19572 = vmatprep.mubr.f32.mxu1 %v25914_v63  ;;  %29440 = vst [vmem:[#allocation366_spill] sm:$0xff] %v25949_v6  ;;  %29441 = vst [vmem:[#allocation367_spill] sm:$0xff] %v25951_v60  ;;  %v2666_v63 = vsub.f32 %v25909_v34, %v25937_v38  ;;  %v29451_v38 = vld [vmem:[#allocation156_spill] sm:$0xff]  ;;  %v2686_v17 = vsub.f32 %v25940_v1, %v25963_v62 }
 0x1e1   : > { %20923 = vmatmul.mubr.f32.gmra.mrb[20].mxu0 %v29442_v22  ;;  %29444 = vst [vmem:[#allocation368_spill] sm:$0xff] %v25957_v43  ;;  %29445 = vst [vmem:[#allocation369_spill] sm:$0xff] %v25963_v62  ;;  %v25979_v22 = vsub.f32 %v2340_v42, %v25951_v60  ;;  %v25995_v42 = vand.u32 4294901760, %v2676_v56  ;;  %v26010_v56 = vand.u32 4294901760, %v25992_v16 }
 0x1e2   : > { %20925 = vmatprep.mubr.f32.mxu0 %v29443_v8  ;;  %29446 = vst [vmem:[#allocation370_spill] sm:$0xff] %v25966_v13  ;;  %29447 = vst [vmem:[#allocation371_spill] sm:$0xff] %v25968_v50  ;;  %v25976_v8 = vand.u32 4294901760, %v25949_v6  ;;  %v25984_v40 = vand.u32 4294901760, %v2666_v63  ;;  %v29458_v63 = vld [vmem:[#allocation244_spill] sm:$0xff]  ;;  %v26005_v62 = vand.u32 4294901760, %v2686_v17 }
 0x1e3   : > { %19573 = vmatmul.mubr.f32.gmra.mrb[20].mxu1 %v25927_v46  ;;  %29448 = vst [vmem:[#allocation372_spill] sm:$0xff] %v25971_v39  ;;  %29450 = vst [vmem:[#allocation374_spill] sm:$0xff] %v25979_v22  ;;  %v29452_v46 = vld [vmem:[#allocation236_spill] sm:$0xff] }
 0x1e4   : > { %19575 = vmatprep.mubr.f32.mxu1 %v25929_v15  ;;  %29449 = vst [vmem:[#allocation373_spill] sm:$0xff] %v25976_v8  ;;  %29453 = vst [vmem:[#allocation375_spill] sm:$0xff] %v25984_v40  ;;  %v25989_v15 = vand.u32 4294901760, %v25966_v13 }
 0x1e5   : > { %20926 = vmatmul.mubr.f32.gmra.mrb[22].mxu0 %v29451_v38  ;;  %29455 = vst [vmem:[#allocation377_spill] sm:$0xff] %v25992_v16  ;;  %29456 = vst [vmem:[#allocation378_spill] sm:$0xff] %v25995_v42  ;;  %v26000_v38 = vand.u32 4294901760, %v25979_v22 }
 0x1e6   : > { %20928 = vmatprep.mubr.f32.mxu0 %v29452_v46  ;;  %29454 = vst [vmem:[#allocation376_spill] sm:$0xff] %v25989_v15  ;;  %v2696_v46 = vsub.f32 %v25949_v6, %v25976_v8  ;;  %29460 = vst [vmem:[#allocation380_spill] sm:$0xff] %v26005_v62  ;;  %v2706_v48 = vsub.f32 %v25966_v13, %v25989_v15  ;;  %v2726_v15 = vsub.f32 %v25992_v16, %v26010_v56 }
 0x1e7   : > { %19576 = vmatmul.mubr.f32.gmra.mrb[22].mxu1 %v25957_v43  ;;  %29457 = vst [vmem:[#allocation379_spill] sm:$0xff] %v26000_v38  ;;  %v29459_v43 = vld [vmem:[#allocation247_spill] sm:$0xff]  ;;  %29461 = vst [vmem:[#allocation381_spill] sm:$0xff] %v26010_v56 }
 0x1e8   : > { %19578 = vmatprep.mubr.f32.mxu1 %v25971_v39  ;;  %v26013_v8 = vand.u32 4294901760, %v2696_v46  ;;  %v2716_v39 = vsub.f32 %v25979_v22, %v26000_v38  ;;  %v26020_v17 = vand.u32 4294901760, %v2706_v48  ;;  %v29467_v46 = vld [vmem:[#allocation258_spill] sm:$0xff]  ;;  %v17447_v38 = vld [vmem:[%s27900_s1 + $0x18] sm:$0xf] }
 0x1e9   : > { %20929 = vmatmul.mubr.f32.gmra.mrb[24].mxu0 %v29458_v63  ;;  %v29463_v63 = vld [vmem:[#allocation251_spill] sm:$0xff]  ;;  %v11569_v48 = vsel %vm497_vm0, %v17447_v38, 0  ;;  %v29471_v38 = vld [vmem:[#allocation201_spill] sm:$0xff] }
 0x1ea   : > { %20931 = vmatprep.mubr.f32.mxu0 %v29459_v43  ;;  %29462 = vst [vmem:[#allocation382_spill] sm:$0xff] %v26013_v8  ;;  %v29464_v43 = vld [vmem:[#allocation255_spill] sm:$0xff]  ;;  %29465 = vst [vmem:[#allocation383_spill] sm:$0xff] %v26020_v17 }
 0x1eb   : > { %19579 = vmatmul.mubr.f32.gmra.mrb[24].mxu1 %v25984_v40  ;;  %v26025_v40 = vand.u32 4294901760, %v2716_v39  ;;  %v26040_v39 = vand.u32 4294901760, %v11569_v48 }
 0x1ec   : > { %19581 = vmatprep.mubr.f32.mxu1 %v25995_v42 }
 0x1ed   : > { %20932 = vmatmul.mubr.f32.gmra.mrb[26].mxu0 %v29463_v63  ;;  %29466 = vst [vmem:[#allocation384_spill] sm:$0xff] %v26025_v40  ;;  %v29476_v63 = vld [vmem:[#allocation100_spill] sm:$0xff] }
 0x1ee   : > { %20934 = vmatprep.mubr.f32.mxu0 %v29464_v43  ;;  %v26033_v43 = vand.u32 4294901760, %v2726_v15  ;;  %v29472_v15 = vld [vmem:[#allocation78_spill] sm:$0xff] }
 0x1ef   : > { %19582 = vmatmul.mubr.f32.gmra.mrb[26].mxu1 %v26005_v62 }
 0x1f0   : > { %19584 = vmatprep.mubr.f32.mxu1 %v26013_v8  ;;  %29468 = vst [vmem:[#allocation385_spill] sm:$0xff] %v26033_v43 }
 0x1f1   : > { %20935 = vmatmul.mubr.f32.gmra.mrb[28].mxu0 %v29467_v46  ;;  %v29475_v46 = vld [vmem:[#allocation209_spill] sm:$0xff] }
 0x1f2   : > { %20937 = vmatprep.mubr.f32.mxu0 %v25338_v0  ;;  %v29474_v0 = vld [vmem:[#allocation205_spill] sm:$0xff] }
 0x1f3   : > { %19585 = vmatmul.mubr.f32.gmra.mrb[28].mxu1 %v26020_v17 }
 0x1f4   : > { %19587 = vmatprep.mubr.f32.mxu1 %v26025_v40 }
 0x1f5   : > { %20938 = vmatmul.mubr.f32.gmra.mrb[30].mxu0 %v25348_v27  ;;  %v29473_v27 = vld [vmem:[#allocation202_spill] sm:$0xff] }
 0x1f6   : > { %20942 = vmatprep.mubr.f32.mxu0 %v24802_v20 }
 0x1f7   : > { %19588 = vmatmul.mubr.f32.gmra.mrb[30].mxu1 %v26033_v43 }
 0x1f8   : > { %19592 = vmatprep.mubr.f32.mxu1 %v25512_v23 }
 0x1f9   : > { %20943 = vmatmul.mubr.f32.vlgmr.msra.gmra.mrb[0].mxu0 %v24805_v44 }
 0x1fa   : > { %20945 = vmatprep.mubr.f32.mxu0 %v24807_v53  ;;  %20991 = vmatpush3.msra.mxu0 %v24650_v2  ;;  %v29469_v2 = vld [vmem:[#allocation191_spill] sm:$0xff] }
 0x1fb   : > { %19593 = vmatmul.mubr.f32.vlgmr.msra.gmra.mrb[0].mxu1 %v25518_v47  ;;  %21040 = vmatprep.subr.mxu0 %v26040_v39 }
 0x1fc   : > { %19641 = vmatpush3.msra.mxu1 %v25441_v45  ;;  %19595 = vmatprep.mubr.f32.mxu1 %v25525_v57  ;;  %v29470_v45 = vld [vmem:[#allocation193_spill] sm:$0xff] }
 0x1fd   : > { %20946 = vmatmul.mubr.f32.gmra.mrb[2].mxu0 %v24828_v41  ;;  %19690 = vmatprep.subr.mxu1 %v25382_v52 }
 0x1fe   : > { %20948 = vmatprep.mubr.f32.mxu0 %v24838_v24 }
 0x1ff   : > { %19596 = vmatmul.mubr.f32.gmra.mrb[2].mxu1 %v25537_v10  ;;  %v29492_v10 = vld [vmem:[#allocation246_spill] sm:$0xff] }
 0x200   : > { %19598 = vmatprep.mubr.f32.mxu1 %v25544_v4 }
 0x201   : > { %20949 = vmatmul.mubr.f32.gmra.mrb[4].mxu0 %v24869_v25 }
 0x202   : > { %20951 = vmatprep.mubr.f32.mxu0 %v24871_v61 }
 0x203   : > { %19599 = vmatmul.mubr.f32.gmra.mrb[4].mxu1 %v25557_v5 }
 0x204   : > { %19601 = vmatprep.mubr.f32.mxu1 %v25572_v26 }
 0x205   : > { %20952 = vmatmul.mubr.f32.gmra.mrb[6].mxu0 %v24873_v18 }
 0x206   : > { %20954 = vmatprep.mubr.f32.mxu0 %v24888_v49 }
 0x207   : > { %19602 = vmatmul.mubr.f32.gmra.mrb[6].mxu1 %v25584_v30 }
 0x208   : > { %19604 = vmatprep.mubr.f32.mxu1 %v25599_v7  ;;  %v29493_v7 = vld [vmem:[#allocation249_spill] sm:$0xff] }
 0x209   : > { %20955 = vmatmul.mubr.f32.gmra.mrb[8].mxu0 %v29469_v2 }
 0x20a   : > { %20957 = vmatprep.mubr.f32.mxu0 %v29470_v45 }
 0x20b   : > { %19605 = vmatmul.mubr.f32.gmra.mrb[8].mxu1 %v25616_v11  ;;  %v26099_v11 = vsub.f32 %v11569_v48, %v26040_v39 }
 0x20c   : > { %19607 = vmatprep.mubr.f32.mxu1 %v25618_v54  ;;  %v29477_v54 = vld [vmem:[#allocation212_spill] sm:$0xff] }
 0x20d   : > { %20958 = vmatmul.mubr.f32.gmra.mrb[10].mxu0 %v29471_v38 }
 0x20e   : > { %20960 = vmatprep.mubr.f32.mxu0 %v29472_v15 }
 0x20f   : > { %19608 = vmatmul.mubr.f32.gmra.mrb[10].mxu1 %v25644_v37  ;;  %v29478_v37 = vld [vmem:[#allocation214_spill] sm:$0xff] }
 0x210   : > { %19610 = vmatprep.mubr.f32.mxu1 %v25666_v33  ;;  %v29479_v33 = vld [vmem:[#allocation216_spill] sm:$0xff] }
 0x211   : > { %20961 = vmatmul.mubr.f32.gmra.mrb[12].mxu0 %v29473_v27 }
 0x212   : > { %20963 = vmatprep.mubr.f32.mxu0 %v29474_v0 }
 0x213   : > { %19611 = vmatmul.mubr.f32.gmra.mrb[12].mxu1 %v25676_v28  ;;  %v29480_v28 = vld [vmem:[#allocation219_spill] sm:$0xff] }
 0x214   : > { %19613 = vmatprep.mubr.f32.mxu1 %v25678_v55  ;;  %v29481_v55 = vld [vmem:[#allocation220_spill] sm:$0xff] }
 0x215   : > { %20964 = vmatmul.mubr.f32.gmra.mrb[14].mxu0 %v29475_v46 }
 0x216   : > { %20966 = vmatprep.mubr.f32.mxu0 %v29476_v63 }
 0x217   : > { %19614 = vmatmul.mubr.f32.gmra.mrb[14].mxu1 %v25712_v51  ;;  %v29482_v51 = vld [vmem:[#allocation124_spill] sm:$0xff] }
 0x218   : > { %19616 = vmatprep.mubr.f32.mxu1 %v25727_v14  ;;  %v29483_v14 = vld [vmem:[#allocation227_spill] sm:$0xff] }
 0x219   : > { %20967 = vmatmul.mubr.f32.gmra.mrb[16].mxu0 %v29477_v54 }
 0x21a   : > { %20969 = vmatprep.mubr.f32.mxu0 %v29478_v37 }
 0x21b   : > { %19617 = vmatmul.mubr.f32.gmra.mrb[16].mxu1 %v25751_v29  ;;  %v29484_v29 = vld [vmem:[#allocation228_spill] sm:$0xff] }
 0x21c   : > { %19619 = vmatprep.mubr.f32.mxu1 %v25759_v59  ;;  %v29485_v59 = vld [vmem:[#allocation232_spill] sm:$0xff] }
 0x21d   : > { %20970 = vmatmul.mubr.f32.gmra.mrb[18].mxu0 %v29479_v33 }
 0x21e   : > { %20972 = vmatprep.mubr.f32.mxu0 %v29480_v28 }
 0x21f   : > { %19620 = vmatmul.mubr.f32.gmra.mrb[18].mxu1 %v25780_v12  ;;  %v29486_v12 = vld [vmem:[#allocation234_spill] sm:$0xff] }
 0x220   : > { %19622 = vmatprep.mubr.f32.mxu1 %v25795_v58  ;;  %v29487_v58 = vld [vmem:[#allocation349_spill] sm:$0xff] }
 0x221   : > { %20973 = vmatmul.mubr.f32.gmra.mrb[20].mxu0 %v29481_v55 }
 0x222   : > { %20975 = vmatprep.mubr.f32.mxu0 %v29482_v51 }
 0x223   : > { %19623 = vmatmul.mubr.f32.gmra.mrb[20].mxu1 %v25803_v9  ;;  %v29489_v9 = vld [vmem:[#allocation241_spill] sm:$0xff] }
 0x224   : > { %19625 = vmatprep.mubr.f32.mxu1 %v25805_v35  ;;  %v29488_v35 = vld [vmem:[#allocation238_spill] sm:$0xff] }
 0x225   : > { %20976 = vmatmul.mubr.f32.gmra.mrb[22].mxu0 %v29483_v14 }
 0x226   : > { %20978 = vmatprep.mubr.f32.mxu0 %v29484_v29 }
 0x227   : > { %19626 = vmatmul.mubr.f32.gmra.mrb[22].mxu1 %v25837_v31  ;;  %v26106_v31 = vand.u32 4294901760, %v26099_v11 }
 0x228   : > { %19628 = vmatprep.mubr.f32.mxu1 %v25847_v3  ;;  %v29491_v3 = vld [vmem:[#allocation359_spill] sm:$0xff] }
 0x229   : > { %20979 = vmatmul.mubr.f32.gmra.mrb[24].mxu0 %v29485_v59  ;;  %29490 = vst [vmem:[#allocation386_spill] sm:$0xff] %v26106_v31  ;;  %v11961_v48 = vsub.f32 %v26099_v11, %v26106_v31  ;;  %v29497_v31 = vld [vmem:[#allocation269_spill] sm:$0xff] }
 0x22a   : > { %20981 = vmatprep.mubr.f32.mxu0 %v29486_v12 }
 0x22b   : > { %19629 = vmatmul.mubr.f32.gmra.mrb[24].mxu1 %v29487_v58 }
 0x22c   : > { %19631 = vmatprep.mubr.f32.mxu1 %v25887_v32  ;;  %v29494_v32 = vld [vmem:[#allocation253_spill] sm:$0xff] }
 0x22d   : > { %20982 = vmatmul.mubr.f32.gmra.mrb[26].mxu0 %v29488_v35 }
 0x22e   : > { %20984 = vmatprep.mubr.f32.mxu0 %v29489_v9 }
 0x22f   : > { %19632 = vmatmul.mubr.f32.gmra.mrb[26].mxu1 %v25911_v21  ;;  %v26118_v21 = vand.u32 4294901760, %v11961_v48  ;;  %v29498_v48 = vld [vmem:[#allocation268_spill] sm:$0xff] }
 0x230   : > { %19634 = vmatprep.mubr.f32.mxu1 %v29491_v3  ;;  %v29495_v3 = vld [vmem:[#allocation178_spill] sm:$0xff] }
 0x231   : > { %20985 = vmatmul.mubr.f32.gmra.mrb[28].mxu0 %v29492_v10 }
 0x232   : > { %20987 = vmatprep.mubr.f32.mxu0 %v29493_v7 }
 0x233   : > { %19635 = vmatmul.mubr.f32.gmra.mrb[28].mxu1 %v25942_v19  ;;  %v29496_v19 = vld [vmem:[#allocation180_spill] sm:$0xff] }
 0x234   : > { %19637 = vmatprep.mubr.f32.mxu1 %v25951_v60 }
 0x235   : > { %20988 = vmatmul.mubr.f32.gmra.mrb[30].mxu0 %v29494_v32 }
 0x236   : > { %20992 = vmatprep.mubr.f32.mxu0 %v24802_v20  ;;  %v29499_v20 = vld [vmem:[#allocation182_spill] sm:$0xff] }
 0x237   : > { %19638 = vmatmul.mubr.f32.gmra.mrb[30].mxu1 %v25968_v50  ;;  %v29502_v50 = vld [vmem:[#allocation279_spill] sm:$0xff] }
 0x238   : > { %19642 = vmatprep.mubr.f32.mxu1 %v29495_v3 }
 0x239   : > { %20993 = vmatmul.mubr.f32.vlgmr.msra.gmra.mrb[0].mxu0 %v24805_v44  ;;  %v29500_v44 = vld [vmem:[#allocation273_spill] sm:$0xff] }
 0x23a   : > { %20995 = vmatprep.mubr.f32.mxu0 %v24807_v53  ;;  %21041 = vmatpush3.msra.mxu0 %v26040_v39  ;;  %v29501_v53 = vld [vmem:[#allocation276_spill] sm:$0xff] }
 0x23b   : > { %19643 = vmatmul.mubr.f32.vlgmr.msra.gmra.mrb[0].mxu1 %v29496_v19  ;;  %21090 = vmatprep.subr.mxu0 %v26118_v21 }
 0x23c   : > { %19691 = vmatpush3.msra.mxu1 %v25382_v52  ;;  %19645 = vmatprep.mubr.f32.mxu1 %v29497_v31  ;;  %v29503_v31 = vld [vmem:[#allocation282_spill] sm:$0xff] }
 0x23d   : > { %20996 = vmatmul.mubr.f32.gmra.mrb[2].mxu0 %v24828_v41  ;;  %19740 = vmatprep.subr.mxu1 %v29498_v48  ;;  %v29504_v41 = vld [vmem:[#allocation287_spill] sm:$0xff] }
 0x23e   : > { %20998 = vmatprep.mubr.f32.mxu0 %v24838_v24  ;;  %v29552_v24 = vld [vmem:[#allocation357_spill] sm:$0xff] }
 0x23f   : > { %19646 = vmatmul.mubr.f32.gmra.mrb[2].mxu1 %v29499_v20  ;;  %v29505_v20 = vld [vmem:[#allocation291_spill] sm:$0xff] }
 0x240   : > { %19648 = vmatprep.mubr.f32.mxu1 %v29500_v44 }
 0x241   : > { %20999 = vmatmul.mubr.f32.gmra.mrb[4].mxu0 %v24869_v25  ;;  %v29506_v25 = vld [vmem:[#allocation292_spill] sm:$0xff] }
 0x242   : > { %21001 = vmatprep.mubr.f32.mxu0 %v24871_v61  ;;  %v29507_v61 = vld [vmem:[#allocation297_spill] sm:$0xff] }
 0x243   : > { %19649 = vmatmul.mubr.f32.gmra.mrb[4].mxu1 %v29501_v53 }
 0x244   : > { %19651 = vmatprep.mubr.f32.mxu1 %v29502_v50 }
 0x245   : > { %21002 = vmatmul.mubr.f32.gmra.mrb[6].mxu0 %v24873_v18  ;;  %v29508_v18 = vld [vmem:[#allocation303_spill] sm:$0xff] }
 0x246   : > { %21004 = vmatprep.mubr.f32.mxu0 %v24888_v49  ;;  %v29509_v49 = vld [vmem:[#allocation305_spill] sm:$0xff] }
 0x247   : > { %19652 = vmatmul.mubr.f32.gmra.mrb[6].mxu1 %v29503_v31 }
 0x248   : > { %19654 = vmatprep.mubr.f32.mxu1 %v29504_v41 }
 0x249   : > { %21005 = vmatmul.mubr.f32.gmra.mrb[8].mxu0 %v29469_v2  ;;  %v29510_v2 = vld [vmem:[#allocation306_spill] sm:$0xff] }
 0x24a   : > { %21007 = vmatprep.mubr.f32.mxu0 %v29470_v45  ;;  %v29511_v45 = vld [vmem:[#allocation314_spill] sm:$0xff] }
 0x24b   : > { %19655 = vmatmul.mubr.f32.gmra.mrb[8].mxu1 %v29505_v20 }
 0x24c   : > { %19657 = vmatprep.mubr.f32.mxu1 %v29506_v25 }
 0x24d   : > { %21008 = vmatmul.mubr.f32.gmra.mrb[10].mxu0 %v29471_v38  ;;  %v29512_v38 = vld [vmem:[#allocation318_spill] sm:$0xff] }
 0x24e   : > { %21010 = vmatprep.mubr.f32.mxu0 %v29472_v15  ;;  %v29513_v15 = vld [vmem:[#allocation322_spill] sm:$0xff] }
 0x24f   : > { %19658 = vmatmul.mubr.f32.gmra.mrb[10].mxu1 %v29507_v61 }
 0x250   : > { %19660 = vmatprep.mubr.f32.mxu1 %v29508_v18 }
 0x251   : > { %21011 = vmatmul.mubr.f32.gmra.mrb[12].mxu0 %v29473_v27  ;;  %v29514_v27 = vld [vmem:[#allocation326_spill] sm:$0xff] }
 0x252   : > { %21013 = vmatprep.mubr.f32.mxu0 %v29474_v0  ;;  %v29515_v0 = vld [vmem:[#allocation333_spill] sm:$0xff] }
 0x253   : > { %19661 = vmatmul.mubr.f32.gmra.mrb[12].mxu1 %v29509_v49 }
 0x254   : > { %19663 = vmatprep.mubr.f32.mxu1 %v29510_v2 }
 0x255   : > { %21014 = vmatmul.mubr.f32.gmra.mrb[14].mxu0 %v29475_v46  ;;  %v29516_v46 = vld [vmem:[#allocation335_spill] sm:$0xff] }
 0x256   : > { %21016 = vmatprep.mubr.f32.mxu0 %v29476_v63  ;;  %v29517_v63 = vld [vmem:[#allocation336_spill] sm:$0xff] }
 0x257   : > { %19664 = vmatmul.mubr.f32.gmra.mrb[14].mxu1 %v29511_v45 }
 0x258   : > { %19666 = vmatprep.mubr.f32.mxu1 %v29512_v38 }
 0x259   : > { %21017 = vmatmul.mubr.f32.gmra.mrb[16].mxu0 %v29477_v54  ;;  %v29518_v54 = vld [vmem:[#allocation337_spill] sm:$0xff] }
 0x25a   : > { %21019 = vmatprep.mubr.f32.mxu0 %v29478_v37  ;;  %v29519_v37 = vld [vmem:[#allocation346_spill] sm:$0xff] }
 0x25b   : > { %19667 = vmatmul.mubr.f32.gmra.mrb[16].mxu1 %v29513_v15 }
 0x25c   : > { %19669 = vmatprep.mubr.f32.mxu1 %v29514_v27 }
 0x25d   : > { %21020 = vmatmul.mubr.f32.gmra.mrb[18].mxu0 %v29479_v33  ;;  %v29520_v33 = vld [vmem:[#allocation348_spill] sm:$0xff] }
 0x25e   : > { %21022 = vmatprep.mubr.f32.mxu0 %v29480_v28  ;;  %v29551_v28 = vld [vmem:[#allocation353_spill] sm:$0xff] }
 0x25f   : > { %19670 = vmatmul.mubr.f32.gmra.mrb[18].mxu1 %v29515_v0 }
 0x260   : > { %19672 = vmatprep.mubr.f32.mxu1 %v29516_v46 }
 0x261   : > { %21023 = vmatmul.mubr.f32.gmra.mrb[20].mxu0 %v29481_v55  ;;  %v29548_v55 = vld [vmem:[#allocation350_spill] sm:$0xff] }
 0x262   : > { %21025 = vmatprep.mubr.f32.mxu0 %v29482_v51  ;;  %v29547_v51 = vld [vmem:[#allocation347_spill] sm:$0xff] }
 0x263   : > { %19673 = vmatmul.mubr.f32.gmra.mrb[20].mxu1 %v29517_v63 }
 0x264   : > { %19675 = vmatprep.mubr.f32.mxu1 %v29518_v54 }
 0x265   : > { %21026 = vmatmul.mubr.f32.gmra.mrb[22].mxu0 %v29483_v14  ;;  %v29544_v14 = vld [vmem:[#allocation342_spill] sm:$0xff] }
 0x266   : > { %21028 = vmatprep.mubr.f32.mxu0 %v29484_v29  ;;  %v29543_v29 = vld [vmem:[#allocation339_spill] sm:$0xff] }
 0x267   : > { %19676 = vmatmul.mubr.f32.gmra.mrb[22].mxu1 %v29519_v37 }
 0x268   : > { %19678 = vmatprep.mubr.f32.mxu1 %v29520_v33 }
 0x269   : > { %21029 = vmatmul.mubr.f32.gmra.mrb[24].mxu0 %v29485_v59  ;;  %v29524_v59 = vld [vmem:[#allocation302_spill] sm:$0xff] }
 0x26a   : > { %21031 = vmatprep.mubr.f32.mxu0 %v29486_v12  ;;  %v29521_v12 = vld [vmem:[#allocation293_spill] sm:$0xff] }
 0x26b   : > { %19679 = vmatmul.mubr.f32.gmra.mrb[24].mxu1 %v25909_v34 }
 0x26c   : > { %19681 = vmatprep.mubr.f32.mxu1 %v25917_v36 }
 0x26d   : > { %21032 = vmatmul.mubr.f32.gmra.mrb[26].mxu0 %v29488_v35  ;;  %v29523_v35 = vld [vmem:[#allocation296_spill] sm:$0xff] }
 0x26e   : > { %21034 = vmatprep.mubr.f32.mxu0 %v29489_v9  ;;  %v29522_v9 = vand.u32 4294901760, %v29495_v3  ;;  %v29528_v3 = vld [vmem:[#allocation309_spill] sm:$0xff] }
 0x26f   : > { %19682 = vmatmul.mubr.f32.gmra.mrb[26].mxu1 %v25940_v1 }
 0x270   : > { %19684 = vmatprep.mubr.f32.mxu1 %v25949_v6 }
 0x271   : > { %21035 = vmatmul.mubr.f32.gmra.mrb[28].mxu0 %v29492_v10  ;;  %v29538_v10 = vld [vmem:[#allocation294_spill] sm:$0xff] }
 0x272   : > { %21037 = vmatprep.mubr.f32.mxu0 %v29493_v7  ;;  %v29525_v7 = vand.u32 4294901760, %v29496_v19  ;;  %v29532_v19 = vld [vmem:[#allocation316_spill] sm:$0xff] }
 0x273   : > { %19685 = vmatmul.mubr.f32.gmra.mrb[28].mxu1 %v25966_v13  ;;  %v29609_v13 = vld [vmem:[#allocation371_spill] sm:$0xff] }
 0x274   : > { %19687 = vmatprep.mubr.f32.mxu1 %v25979_v22  ;;  %v29608_v22 = vld [vmem:[#allocation364_spill] sm:$0xff] }
 0x275   : > { %21038 = vmatmul.mubr.f32.gmra.mrb[30].mxu0 %v29494_v32  ;;  %v29526_v32 = vld [vmem:[#allocation272_spill] sm:$0xff] }
 0x276   : > { %21042 = vmatprep.mubr.f32.mxu0 %v29521_v12  ;;  %v29527_v12 = vld [vmem:[#allocation308_spill] sm:$0xff] }
 0x277   : > { %19688 = vmatmul.mubr.f32.gmra.mrb[30].mxu1 %v25992_v16  ;;  %v29607_v16 = vld [vmem:[#allocation359_spill] sm:$0xff] }
 0x278   : > { %19692 = vmatprep.mubr.f32.mxu1 %v29522_v9  ;;  %v29529_v9 = vld [vmem:[#allocation275_spill] sm:$0xff] }
 0x279   : > { %21043 = vmatmul.mubr.f32.vlgmr.msra.gmra.mrb[0].mxu0 %v29523_v35  ;;  %v29534_v35 = vld [vmem:[#allocation286_spill] sm:$0xff] }
 0x27a   : > { %21045 = vmatprep.mubr.f32.mxu0 %v29524_v59  ;;  %21091 = vmatpush3.msra.mxu0 %v26118_v21  ;;  %v29530_v59 = vld [vmem:[#allocation278_spill] sm:$0xff]  ;;  %v29531_v21 = vld [vmem:[#allocation315_spill] sm:$0xff] }
 0x27b   : > { %19693 = vmatmul.mubr.f32.vlgmr.msra.gmra.mrb[0].mxu1 %v29525_v7  ;;  %21140 = vmatprep.subr.mxu0 %v26099_v11  ;;  %v29533_v7 = vld [vmem:[#allocation281_spill] sm:$0xff] }
 0x27c   : > { %19741 = vmatpush3.msra.mxu1 %v29498_v48  ;;  %19695 = vmatprep.mubr.f32.mxu1 %v29526_v32  ;;  %v29535_v48 = vld [vmem:[#allocation320_spill] sm:$0xff] }
 0x27d   : > { %21046 = vmatmul.mubr.f32.gmra.mrb[2].mxu0 %v29527_v12  ;;  %19790 = vmatprep.subr.mxu1 %v25382_v52  ;;  %v29536_v32 = vld [vmem:[#allocation324_spill] sm:$0xff]  ;;  %v29537_v12 = vld [vmem:[#allocation289_spill] sm:$0xff] }
 0x27e   : > { %21048 = vmatprep.mubr.f32.mxu0 %v29528_v3  ;;  %v29539_v3 = vld [vmem:[#allocation328_spill] sm:$0xff] }
 0x27f   : > { %19696 = vmatmul.mubr.f32.gmra.mrb[2].mxu1 %v29529_v9  ;;  %v29540_v9 = vld [vmem:[#allocation331_spill] sm:$0xff] }
 0x280   : > { %19698 = vmatprep.mubr.f32.mxu1 %v29530_v59  ;;  %v29602_v59 = vld [vmem:[#allocation330_spill] sm:$0xff] }
 0x281   : > { %21049 = vmatmul.mubr.f32.gmra.mrb[4].mxu0 %v29531_v21  ;;  %v29541_v21 = vld [vmem:[#allocation300_spill] sm:$0xff] }
 0x282   : > { %21051 = vmatprep.mubr.f32.mxu0 %v29532_v19  ;;  %v29542_v19 = vld [vmem:[#allocation301_spill] sm:$0xff] }
 0x283   : > { %19699 = vmatmul.mubr.f32.gmra.mrb[4].mxu1 %v29533_v7  ;;  %v29601_v7 = vld [vmem:[#allocation329_spill] sm:$0xff] }
 0x284   : > { %19701 = vmatprep.mubr.f32.mxu1 %v29534_v35  ;;  %v29568_v35 = vld [vmem:[#allocation375_spill] sm:$0xff] }
 0x285   : > { %21052 = vmatmul.mubr.f32.gmra.mrb[6].mxu0 %v29535_v48  ;;  %v29545_v48 = vld [vmem:[#allocation304_spill] sm:$0xff] }
 0x286   : > { %21054 = vmatprep.mubr.f32.mxu0 %v29536_v32  ;;  %v29546_v32 = vld [vmem:[#allocation310_spill] sm:$0xff] }
 0x287   : > { %19702 = vmatmul.mubr.f32.gmra.mrb[6].mxu1 %v29537_v12 }
 0x288   : > { %19704 = vmatprep.mubr.f32.mxu1 %v29538_v10 }
 0x289   : > { %21055 = vmatmul.mubr.f32.gmra.mrb[8].mxu0 %v29539_v3  ;;  %v29549_v3 = vld [vmem:[#allocation312_spill] sm:$0xff] }
 0x28a   : > { %21057 = vmatprep.mubr.f32.mxu0 %v29540_v9  ;;  %v29550_v9 = vld [vmem:[#allocation313_spill] sm:$0xff] }
 0x28b   : > { %19705 = vmatmul.mubr.f32.gmra.mrb[8].mxu1 %v29541_v21  ;;  %v29559_v21 = vld [vmem:[#allocation332_spill] sm:$0xff] }
 0x28c   : > { %19707 = vmatprep.mubr.f32.mxu1 %v29542_v19  ;;  %v29554_v19 = vld [vmem:[#allocation325_spill] sm:$0xff] }
 0x28d   : > { %21058 = vmatmul.mubr.f32.gmra.mrb[10].mxu0 %v29543_v29  ;;  %v29553_v29 = vld [vmem:[#allocation321_spill] sm:$0xff] }
 0x28e   : > { %21060 = vmatprep.mubr.f32.mxu0 %v29544_v14  ;;  %v23716_v14 = vld [vmem:[%s23928_s13 + $0x180] sm:$0xff] }
 0x28f   : > { %19708 = vmatmul.mubr.f32.gmra.mrb[10].mxu1 %v29545_v48  ;;  %v6090_v48 = vsel %vm432_vm2, %v23716_v14, 0  ;;  %v29561_v14 = vld [vmem:[#allocation334_spill] sm:$0xff] }
 0x290   : > { %19710 = vmatprep.mubr.f32.mxu1 %v29546_v32  ;;  %v26230_v32 = vld [vmem:[%s23928_s13 + $0x198] sm:$0xff] }
 0x291   : > { %21061 = vmatmul.mubr.f32.gmra.mrb[12].mxu0 %v29547_v51  ;;  %29555 = vst [vmem:[#allocation178_spill] sm:$0xff] %v26230_v32  ;;  %v29556_v51 = vld [vmem:[#allocation360_spill] sm:$0xff] }
 0x292   : > { %21063 = vmatprep.mubr.f32.mxu0 %v29548_v55  ;;  %v29557_v55 = vld [vmem:[#allocation361_spill] sm:$0xff] }
 0x293   : > { %19711 = vmatmul.mubr.f32.gmra.mrb[12].mxu1 %v29549_v3  ;;  %v26234_v3 = vand.u32 4294901760, %v6090_v48 }
 0x294   : > { %19713 = vmatprep.mubr.f32.mxu1 %v29550_v9  ;;  %v23717_v9 = vld [vmem:[%s23928_s13 + $0x188] sm:$0xff] }
 0x295   : > { %21064 = vmatmul.mubr.f32.gmra.mrb[14].mxu0 %v29551_v28  ;;  %29558 = vst [vmem:[#allocation180_spill] sm:$0xff] %v26234_v3  ;;  %v6093_v28 = vsel %vm432_vm2, %v23717_v9, 0 }
 0x296   : > { %21066 = vmatprep.mubr.f32.mxu0 %v29552_v24  ;;  %v11563_v24 = vsel %vm432_vm2, %v26230_v32, 0  ;;  %v26246_v10 = vand.u32 4294901760, %v6093_v28  ;;  %v29567_v32 = vld [vmem:[#allocation343_spill] sm:$0xff] }
 0x297   : > { %19714 = vmatmul.mubr.f32.gmra.mrb[14].mxu1 %v29553_v29  ;;  %v26242_v29 = vld [vmem:[%s23928_s13 + $0x1a0] sm:$0xff]  ;;  %v26252_v12 = vand.u32 4294901760, %v11563_v24 }
 0x298   : > { %19716 = vmatprep.mubr.f32.mxu1 %v29554_v19  ;;  %29560 = vst [vmem:[#allocation268_spill] sm:$0xff] %v26242_v29  ;;  %v29562_v19 = vld [vmem:[#allocation368_spill] sm:$0xff]  ;;  %29563 = vst [vmem:[#allocation387_spill] sm:$0xff] %v26246_v10  ;;  %v11566_v9 = vsel %vm432_vm2, %v26242_v29, 0 }
 0x299   : > { %21067 = vmatmul.mubr.f32.gmra.mrb[16].mxu0 %v29556_v51  ;;  %v29564_v51 = vld [vmem:[#allocation372_spill] sm:$0xff] }
 0x29a   : > { %21069 = vmatprep.mubr.f32.mxu0 %v29557_v55  ;;  %v26250_v55 = vsub.f32 %v6090_v48, %v26234_v3  ;;  %v29573_v29 = vld [vmem:[#allocation344_spill] sm:$0xff] }
 0x29b   : > { %19717 = vmatmul.mubr.f32.gmra.mrb[16].mxu1 %v29559_v21  ;;  %v29566_v21 = vld [vmem:[#allocation340_spill] sm:$0xff] }
 0x29c   : > { %19719 = vmatprep.mubr.f32.mxu1 %v29561_v14  ;;  %29565 = vst [vmem:[#allocation388_spill] sm:$0xff] %v26250_v55  ;;  %v26262_v14 = vand.u32 4294901760, %v11566_v9  ;;  %v26266_v48 = vand.u32 4294901760, %v26250_v55 }
 0x29d   : > { %21070 = vmatmul.mubr.f32.gmra.mrb[18].mxu0 %v29562_v19  ;;  %v26260_v19 = vsub.f32 %v6093_v28, %v26246_v10 }
 0x29e   : > { %21072 = vmatprep.mubr.f32.mxu0 %v29564_v51  ;;  %29570 = vst [vmem:[#allocation390_spill] sm:$0xff] %v26262_v14  ;;  %29571 = vst [vmem:[#allocation391_spill] sm:$0xff] %v26266_v48  ;;  %v26269_v51 = vsub.f32 %v11563_v24, %v26252_v12  ;;  %v26278_v28 = vsub.f32 %v11566_v9, %v26262_v14 }
 0x29f   : > { %19720 = vmatmul.mubr.f32.gmra.mrb[18].mxu1 %v29566_v21  ;;  %29569 = vst [vmem:[#allocation389_spill] sm:$0xff] %v26260_v19  ;;  %v29574_v21 = vld [vmem:[#allocation345_spill] sm:$0xff] }
 0x2a0   : > { %19722 = vmatprep.mubr.f32.mxu1 %v29567_v32  ;;  %29572 = vst [vmem:[#allocation392_spill] sm:$0xff] %v26269_v51  ;;  %29576 = vst [vmem:[#allocation394_spill] sm:$0xff] %v26278_v28  ;;  %v28710_v24 = vand.u32 4294901760, %v26269_v51  ;;  %v29577_v32 = vld [vmem:[#allocation352_spill] sm:$0xff] }
 0x2a1   : > { %21073 = vmatmul.mubr.f32.gmra.mrb[20].mxu0 %v29568_v35  ;;  %v26275_v35 = vand.u32 4294901760, %v26260_v19 }
 0x2a2   : > { %21075 = vmatprep.mubr.f32.mxu0 %v25995_v42  ;;  %v6467_v42 = vsub.f32 %v26250_v55, %v26266_v48  ;;  %v29580_v48 = vld [vmem:[#allocation362_spill] sm:$0xff]  ;;  %v29606_v55 = vld [vmem:[#allocation356_spill] sm:$0xff] }
 0x2a3   : > { %19723 = vmatmul.mubr.f32.gmra.mrb[20].mxu1 %v29573_v29  ;;  %29575 = vst [vmem:[#allocation393_spill] sm:$0xff] %v26275_v35  ;;  %v29578_v29 = vld [vmem:[#allocation354_spill] sm:$0xff] }
 0x2a4   : > { %19725 = vmatprep.mubr.f32.mxu1 %v29574_v21  ;;  %v28712_v21 = vand.u32 4294901760, %v26278_v28  ;;  %v26291_v9 = vand.u32 4294901760, %v6467_v42 }
 0x2a5   : > { %21076 = vmatmul.mubr.f32.gmra.mrb[22].mxu0 %v26005_v62  ;;  %v6477_v62 = vsub.f32 %v26260_v19, %v26275_v35  ;;  %v29605_v19 = vld [vmem:[#allocation351_spill] sm:$0xff] }
 0x2a6   : > { %21078 = vmatprep.mubr.f32.mxu0 %v26013_v8  ;;  %29579 = vst [vmem:[#allocation395_spill] sm:$0xff] %v26291_v9  ;;  %v11940_v8 = vsub.f32 %v26269_v51, %v28710_v24  ;;  %v11950_v35 = vsub.f32 %v26278_v28, %v28712_v21  ;;  %v29592_v21 = vld [vmem:[#allocation295_spill] sm:$0xff]  ;;  %v29603_v28 = vld [vmem:[#allocation338_spill] sm:$0xff]  ;;  %v29604_v51 = vld [vmem:[#allocation341_spill] sm:$0xff] }
 0x2a7   : > { %19726 = vmatmul.mubr.f32.gmra.mrb[22].mxu1 %v29577_v32  ;;  %v29581_v32 = vld [vmem:[#allocation365_spill] sm:$0xff] }
 0x2a8   : > { %19728 = vmatprep.mubr.f32.mxu1 %v29578_v29  ;;  %v11941_v42 = vand.u32 4294901760, %v11940_v8  ;;  %v29584_v29 = vld [vmem:[#allocation373_spill] sm:$0xff]  ;;  %v11951_v24 = vand.u32 4294901760, %v11950_v35 }
 0x2a9   : > { %21079 = vmatmul.mubr.f32.gmra.mrb[24].mxu0 %v26020_v17  ;;  %v26299_v17 = vand.u32 4294901760, %v6477_v62  ;;  %v17443_v62 = vld [vmem:[%s27900_s1 + $0x8] sm:$0xf] }
 0x2aa   : > { %21081 = vmatprep.mubr.f32.mxu0 %v26025_v40  ;;  %v29583_v40 = vld [vmem:[#allocation369_spill] sm:$0xff]  ;;  %v4274_v8 = vsel %vm497_vm0, %v17443_v62, 0  ;;  %v29589_v62 = vld [vmem:[#allocation283_spill] sm:$0xff] }
 0x2ab   : > { %19729 = vmatmul.mubr.f32.gmra.mrb[24].mxu1 %v29580_v48  ;;  %29582 = vst [vmem:[#allocation396_spill] sm:$0xff] %v26299_v17  ;;  %v26318_v35 = vand.u32 4294901760, %v4274_v8  ;;  %v29600_v48 = vld [vmem:[#allocation327_spill] sm:$0xff] }
 0x2ac   : > { %19731 = vmatprep.mubr.f32.mxu1 %v29581_v32  ;;  %v29585_v32 = vld [vmem:[#allocation376_spill] sm:$0xff] }
 0x2ad   : > { %21082 = vmatmul.mubr.f32.gmra.mrb[26].mxu0 %v26033_v43  ;;  %v29586_v43 = vld [vmem:[#allocation379_spill] sm:$0xff]  ;;  %v26377_v6 = vsub.f32 %v4274_v8, %v26318_v35 }
 0x2ae   : > { %21084 = vmatprep.mubr.f32.mxu0 %v26291_v9  ;;  %v29594_v9 = vld [vmem:[#allocation299_spill] sm:$0xff] }
 0x2af   : > { %19732 = vmatmul.mubr.f32.gmra.mrb[26].mxu1 %v29583_v40  ;;  %v29599_v40 = vld [vmem:[#allocation323_spill] sm:$0xff] }
 0x2b0   : > { %19734 = vmatprep.mubr.f32.mxu1 %v29584_v29  ;;  %v29598_v29 = vld [vmem:[#allocation319_spill] sm:$0xff] }
 0x2b1   : > { %21085 = vmatmul.mubr.f32.gmra.mrb[28].mxu0 %v26299_v17  ;;  %v29593_v17 = vld [vmem:[#allocation298_spill] sm:$0xff] }
 0x2b2   : > { %21087 = vmatprep.mubr.f32.mxu0 %v11941_v42  ;;  %v29588_v42 = vld [vmem:[#allocation181_spill] sm:$0xff] }
 0x2b3   : > { %19735 = vmatmul.mubr.f32.gmra.mrb[28].mxu1 %v29585_v32  ;;  %v29597_v32 = vld [vmem:[#allocation317_spill] sm:$0xff] }
 0x2b4   : > { %19737 = vmatprep.mubr.f32.mxu1 %v29586_v43  ;;  %v29596_v43 = vld [vmem:[#allocation311_spill] sm:$0xff] }
 0x2b5   : > { %21088 = vmatmul.mubr.f32.gmra.mrb[30].mxu0 %v11951_v24  ;;  %v29587_v24 = vld [vmem:[#allocation280_spill] sm:$0xff] }
 0x2b6   : > { %21092 = vmatprep.mubr.f32.mxu0 %v25544_v4 }
 0x2b7   : > { %19738 = vmatmul.mubr.f32.gmra.mrb[30].mxu1 %v26010_v56  ;;  %v29595_v56 = vld [vmem:[#allocation307_spill] sm:$0xff] }
 0x2b8   : > { %19742 = vmatprep.mubr.f32.mxu1 %v25512_v23 }
 0x2b9   : > { %21093 = vmatmul.mubr.f32.vlgmr.msra.gmra.mrb[0].mxu0 %v25557_v5 }
 0x2ba   : > { %21095 = vmatprep.mubr.f32.mxu0 %v25572_v26  ;;  %21141 = vmatpush3.msra.mxu0 %v26099_v11  ;;  %v29590_v11 = vld [vmem:[#allocation284_spill] sm:$0xff] }
 0x2bb   : > { %19743 = vmatmul.mubr.f32.vlgmr.msra.gmra.mrb[0].mxu1 %v25518_v47  ;;  %21190 = vmatprep.subr.mxu0 %v26040_v39 }
 0x2bc   : > { %19791 = vmatpush3.msra.mxu1 %v25382_v52  ;;  %19745 = vmatprep.mubr.f32.mxu1 %v25525_v57  ;;  %v29591_v52 = vld [vmem:[#allocation290_spill] sm:$0xff] }
 0x2bd   : > { %21096 = vmatmul.mubr.f32.gmra.mrb[2].mxu0 %v25584_v30  ;;  %19840 = vmatprep.subr.mxu1 %v26318_v35 }
 0x2be   : > { %21098 = vmatprep.mubr.f32.mxu0 %v29587_v24 }
 0x2bf   : > { %19746 = vmatmul.mubr.f32.gmra.mrb[2].mxu1 %v29588_v42 }
 0x2c0   : > { %19748 = vmatprep.mubr.f32.mxu1 %v25544_v4 }
 0x2c1   : > { %21099 = vmatmul.mubr.f32.gmra.mrb[4].mxu0 %v29589_v62 }
 0x2c2   : > { %21101 = vmatprep.mubr.f32.mxu0 %v29590_v11 }
 0x2c3   : > { %19749 = vmatmul.mubr.f32.gmra.mrb[4].mxu1 %v25557_v5 }
 0x2c4   : > { %19751 = vmatprep.mubr.f32.mxu1 %v25572_v26 }
 0x2c5   : > { %21102 = vmatmul.mubr.f32.gmra.mrb[6].mxu0 %v29591_v52 }
 0x2c6   : > { %21104 = vmatprep.mubr.f32.mxu0 %v29592_v21 }
 0x2c7   : > { %19752 = vmatmul.mubr.f32.gmra.mrb[6].mxu1 %v25584_v30 }
 0x2c8   : > { %19754 = vmatprep.mubr.f32.mxu1 %v29587_v24 }
 0x2c9   : > { %21105 = vmatmul.mubr.f32.gmra.mrb[8].mxu0 %v29593_v17 }
 0x2ca   : > { %21107 = vmatprep.mubr.f32.mxu0 %v29594_v9 }
 0x2cb   : > { %19755 = vmatmul.mubr.f32.gmra.mrb[8].mxu1 %v29589_v62 }
 0x2cc   : > { %19757 = vmatprep.mubr.f32.mxu1 %v29590_v11 }
 0x2cd   : > { %21108 = vmatmul.mubr.f32.gmra.mrb[10].mxu0 %v29595_v56 }
 0x2ce   : > { %21110 = vmatprep.mubr.f32.mxu0 %v29596_v43 }
 0x2cf   : > { %19758 = vmatmul.mubr.f32.gmra.mrb[10].mxu1 %v29591_v52 }
 0x2d0   : > { %19760 = vmatprep.mubr.f32.mxu1 %v29592_v21 }
 0x2d1   : > { %21111 = vmatmul.mubr.f32.gmra.mrb[12].mxu0 %v29597_v32 }
 0x2d2   : > { %21113 = vmatprep.mubr.f32.mxu0 %v29598_v29 }
 0x2d3   : > { %19761 = vmatmul.mubr.f32.gmra.mrb[12].mxu1 %v29593_v17 }
 0x2d4   : > { %19763 = vmatprep.mubr.f32.mxu1 %v29594_v9 }
 0x2d5   : > { %21114 = vmatmul.mubr.f32.gmra.mrb[14].mxu0 %v29599_v40 }
 0x2d6   : > { %21116 = vmatprep.mubr.f32.mxu0 %v29600_v48 }
 0x2d7   : > { %19764 = vmatmul.mubr.f32.gmra.mrb[14].mxu1 %v29595_v56 }
 0x2d8   : > { %19766 = vmatprep.mubr.f32.mxu1 %v29596_v43 }
 0x2d9   : > { %21117 = vmatmul.mubr.f32.gmra.mrb[16].mxu0 %v29601_v7 }
 0x2da   : > { %21119 = vmatprep.mubr.f32.mxu0 %v29602_v59 }
 0x2db   : > { %19767 = vmatmul.mubr.f32.gmra.mrb[16].mxu1 %v29597_v32 }
 0x2dc   : > { %19769 = vmatprep.mubr.f32.mxu1 %v29598_v29 }
 0x2dd   : > { %21120 = vmatmul.mubr.f32.gmra.mrb[18].mxu0 %v29603_v28 }
 0x2de   : > { %21122 = vmatprep.mubr.f32.mxu0 %v29604_v51 }
 0x2df   : > { %19770 = vmatmul.mubr.f32.gmra.mrb[18].mxu1 %v29599_v40 }
 0x2e0   : > { %19772 = vmatprep.mubr.f32.mxu1 %v29600_v48 }
 0x2e1   : > { %21123 = vmatmul.mubr.f32.gmra.mrb[20].mxu0 %v29487_v58 }
 0x2e2   : > { %21125 = vmatprep.mubr.f32.mxu0 %v29605_v19 }
 0x2e3   : > { %19773 = vmatmul.mubr.f32.gmra.mrb[20].mxu1 %v29601_v7 }
 0x2e4   : > { %19775 = vmatprep.mubr.f32.mxu1 %v29602_v59 }
 0x2e5   : > { %21126 = vmatmul.mubr.f32.gmra.mrb[22].mxu0 %v29606_v55 }
 0x2e6   : > { %21128 = vmatprep.mubr.f32.mxu0 %v29607_v16 }
 0x2e7   : > { %19776 = vmatmul.mubr.f32.gmra.mrb[22].mxu1 %v29603_v28 }
 0x2e8   : > { %19778 = vmatprep.mubr.f32.mxu1 %v29604_v51  ;;  %v26384_v51 = vand.u32 4294901760, %v26377_v6 }
 0x2e9   : > { %21129 = vmatmul.mubr.f32.gmra.mrb[24].mxu0 %v29608_v22 }
 0x2ea   : > { %21131 = vmatprep.mubr.f32.mxu0 %v25951_v60  ;;  %v4666_v8 = vsub.f32 %v26377_v6, %v26384_v51 }
 0x2eb   : > { %19779 = vmatmul.mubr.f32.gmra.mrb[24].mxu1 %v29487_v58 }
 0x2ec   : > { %19781 = vmatprep.mubr.f32.mxu1 %v29605_v19 }
 0x2ed   : > { %21132 = vmatmul.mubr.f32.gmra.mrb[26].mxu0 %v29609_v13 }
 0x2ee   : > { %21134 = vmatprep.mubr.f32.mxu0 %v26234_v3 }
 0x2ef   : > { %19782 = vmatmul.mubr.f32.gmra.mrb[26].mxu1 %v29606_v55 }
 0x2f0   : > { %19784 = vmatprep.mubr.f32.mxu1 %v29607_v16 }
 0x2f1   : > { %21135 = vmatmul.mubr.f32.gmra.mrb[28].mxu0 %v26246_v10  ;;  %v26396_v10 = vand.u32 4294901760, %v4666_v8  ;;  %v23719_v8 = vld [vmem:[%s23928_s13 + $0x8] sm:$0xff] }
 0x2f2   : > { %21137 = vmatprep.mubr.f32.mxu0 %v26252_v12 }
 0x2f3   : > { %19785 = vmatmul.mubr.f32.gmra.mrb[28].mxu1 %v29608_v22 }
 0x2f4   : > { %19787 = vmatprep.mubr.f32.mxu1 %v25951_v60 }
 0x2f5   : > { %21138 = vmatmul.mubr.f32.gmra.mrb[30].mxu0 %v26262_v14  ;;  %v29610_v14 = vld [vmem:[#allocation386_spill] sm:$0xff] }
 0x2f6   : > { %21142 = vmatprep.mubr.f32.mxu0 %v29500_v44 }
 0x2f7   : > { %19788 = vmatmul.mubr.f32.gmra.mrb[30].mxu1 %v29609_v13 }
 0x2f8   : > { %19792 = vmatprep.mubr.f32.mxu1 %v25512_v23 }
 0x2f9   : > { %21143 = vmatmul.mubr.f32.vlgmr.msra.gmra.mrb[0].mxu0 %v29501_v53  ;;  %v29703_v53 = vld [vmem:[#allocation268_spill] sm:$0xff] }
 0x2fa   : > { %21145 = vmatprep.mubr.f32.mxu0 %v29502_v50  ;;  %21191 = vmatpush3.msra.mxu0 %v26040_v39  ;;  %v28767_v44 = vrot.slane %v29703_v53, 1 }
 0x2fb   : > { %19793 = vmatmul.mubr.f32.vlgmr.msra.gmra.mrb[0].mxu1 %v25518_v47  ;;  %21240 = vmatprep.subr.mxu0 %v29610_v14  ;;  %v23718_v47 = vld [vmem:[%s23928_s13] sm:$0xff] }
 0x2fc   : > { %19841 = vmatpush3.msra.mxu1 %v26318_v35  ;;  %19795 = vmatprep.mubr.f32.mxu1 %v25525_v57  ;;  %v4127_v23 = vrot.slane %v23718_v47, 2  ;;  %v29705_v57 = vld [vmem:[#allocation220_spill] sm:$0xff] }
 0x2fd   : > { %21146 = vmatmul.mubr.f32.gmra.mrb[2].mxu0 %v29503_v31  ;;  %19890 = vmatprep.subr.mxu1 %v26396_v10  ;;  %v29702_v31 = vld [vmem:[#allocation178_spill] sm:$0xff] }
 0x2fe   : > { %21148 = vmatprep.mubr.f32.mxu0 %v29504_v41  ;;  %v29701_v41 = vld [vmem:[#allocation216_spill] sm:$0xff]  ;;  %v13383_v50 = vrot.slane %v29702_v31, 1  ;;  %v29707_v31 = vld [vmem:[#allocation227_spill] sm:$0xff] }
 0x2ff   : > { %19796 = vmatmul.mubr.f32.gmra.mrb[2].mxu1 %v29588_v42  ;;  %v29704_v42 = vld [vmem:[#allocation219_spill] sm:$0xff] }
 0x300   : > { %19798 = vmatprep.mubr.f32.mxu1 %v25544_v4 }
 0x301   : > { %21149 = vmatmul.mubr.f32.gmra.mrb[4].mxu0 %v29505_v20  ;;  %v29700_v20 = vld [vmem:[#allocation214_spill] sm:$0xff] }
 0x302   : > { %21151 = vmatprep.mubr.f32.mxu0 %v29506_v25  ;;  %v29699_v25 = vld [vmem:[#allocation212_spill] sm:$0xff] }
 0x303   : > { %19799 = vmatmul.mubr.f32.gmra.mrb[4].mxu1 %v25557_v5 }
 0x304   : > { %19801 = vmatprep.mubr.f32.mxu1 %v25572_v26 }
 0x305   : > { %21152 = vmatmul.mubr.f32.gmra.mrb[6].mxu0 %v29507_v61  ;;  %v29698_v61 = vld [vmem:[#allocation100_spill] sm:$0xff] }
 0x306   : > { %21154 = vmatprep.mubr.f32.mxu0 %v29508_v18  ;;  %v29697_v18 = vld [vmem:[#allocation209_spill] sm:$0xff] }
 0x307   : > { %19802 = vmatmul.mubr.f32.gmra.mrb[6].mxu1 %v25584_v30 }
 0x308   : > { %19804 = vmatprep.mubr.f32.mxu1 %v29587_v24 }
 0x309   : > { %21155 = vmatmul.mubr.f32.gmra.mrb[8].mxu0 %v29509_v49  ;;  %v29696_v49 = vld [vmem:[#allocation205_spill] sm:$0xff] }
 0x30a   : > { %21157 = vmatprep.mubr.f32.mxu0 %v29510_v2  ;;  %v29695_v2 = vld [vmem:[#allocation202_spill] sm:$0xff] }
 0x30b   : > { %19805 = vmatmul.mubr.f32.gmra.mrb[8].mxu1 %v29589_v62 }
 0x30c   : > { %19807 = vmatprep.mubr.f32.mxu1 %v29590_v11 }
 0x30d   : > { %21158 = vmatmul.mubr.f32.gmra.mrb[10].mxu0 %v29511_v45  ;;  %v29635_v45 = vld [vmem:[#allocation206_spill] sm:$0xff] }
 0x30e   : > { %21160 = vmatprep.mubr.f32.mxu0 %v29512_v38  ;;  %v29622_v38 = vld [vmem:[#allocation286_spill] sm:$0xff] }
 0x30f   : > { %19808 = vmatmul.mubr.f32.gmra.mrb[10].mxu1 %v29591_v52 }
 0x310   : > { %19810 = vmatprep.mubr.f32.mxu1 %v29592_v21 }
 0x311   : > { %21161 = vmatmul.mubr.f32.gmra.mrb[12].mxu0 %v29513_v15  ;;  %v23720_v15 = vld [vmem:[%s23928_s13 + $0x10] sm:$0x3] }
 0x312   : > { %21163 = vmatprep.mubr.f32.mxu0 %v29514_v27  ;;  %v4128_v27 = vrot.slane %v23719_v8, 2 }
 0x313   : > { %19811 = vmatmul.mubr.f32.gmra.mrb[12].mxu1 %v29593_v17 }
 0x314   : > { %19813 = vmatprep.mubr.f32.mxu1 %v29594_v9 }
 0x315   : > { %21164 = vmatmul.mubr.f32.gmra.mrb[14].mxu0 %v29515_v0  ;;  %v4130_v0 = vrot.slane %v23720_v15, 2 }
 0x316   : > { %21166 = vmatprep.mubr.f32.mxu0 %v29516_v46  ;;  %v4129_v46 = vsel %vm4126_vm3, %v4127_v23, %v4128_v27 }
 0x317   : > { %19814 = vmatmul.mubr.f32.gmra.mrb[14].mxu1 %v29595_v56  ;;  %v4209_v47 = vsel %vm432_vm2, %v4129_v46, 0  ;;  %v4131_v8 = vsel %vm4126_vm3, %v4128_v27, %v4130_v0  ;;  %v29612_v46 = vld [vmem:[#allocation341_spill] sm:$0xff]  ;;  %v29613_v27 = vld [vmem:[#allocation370_spill] sm:$0xff] }
 0x318   : > { %19816 = vmatprep.mubr.f32.mxu1 %v29596_v43  ;;  %v26451_v15 = vand.u32 4294901760, %v4209_v47  ;;  %v4211_v23 = vsel %vm432_vm2, %v4131_v8, 0 }
 0x319   : > { %21167 = vmatmul.mubr.f32.gmra.mrb[16].mxu0 %v29517_v63  ;;  %v29620_v63 = vld [vmem:[#allocation278_spill] sm:$0xff] }
 0x31a   : > { %21169 = vmatprep.mubr.f32.mxu0 %v29518_v54  ;;  %v26461_v0 = vsub.f32 %v4209_v47, %v26451_v15  ;;  %v29619_v54 = vld [vmem:[#allocation394_spill] sm:$0xff] }
 0x31b   : > { %19817 = vmatmul.mubr.f32.gmra.mrb[16].mxu1 %v29597_v32 }
 0x31c   : > { %19819 = vmatprep.mubr.f32.mxu1 %v29598_v29 }
 0x31d   : > { %21170 = vmatmul.mubr.f32.gmra.mrb[18].mxu0 %v29519_v37  ;;  %v29616_v37 = vld [vmem:[#allocation388_spill] sm:$0xff] }
 0x31e   : > { %21172 = vmatprep.mubr.f32.mxu0 %v29520_v33  ;;  %v29611_v33 = vld [vmem:[#allocation366_spill] sm:$0xff] }
 0x31f   : > { %19820 = vmatmul.mubr.f32.gmra.mrb[18].mxu1 %v29599_v40 }
 0x320   : > { %19822 = vmatprep.mubr.f32.mxu1 %v29600_v48 }
 0x321   : > { %21173 = vmatmul.mubr.f32.gmra.mrb[20].mxu0 %v25909_v34  ;;  %v26457_v34 = vand.u32 4294901760, %v4211_v23 }
 0x322   : > { %21175 = vmatprep.mubr.f32.mxu0 %v25917_v36  ;;  %v29614_v36 = vld [vmem:[#allocation374_spill] sm:$0xff] }
 0x323   : > { %19823 = vmatmul.mubr.f32.gmra.mrb[20].mxu1 %v29601_v7  ;;  %v26467_v8 = vsub.f32 %v4211_v23, %v26457_v34  ;;  %v29617_v23 = vld [vmem:[#allocation389_spill] sm:$0xff] }
 0x324   : > { %19825 = vmatprep.mubr.f32.mxu1 %v29602_v59 }
 0x325   : > { %21176 = vmatmul.mubr.f32.gmra.mrb[22].mxu0 %v25940_v1  ;;  %v29615_v1 = vld [vmem:[#allocation377_spill] sm:$0xff]  ;;  %v28751_v47 = vand.u32 4294901760, %v26467_v8 }
 0x326   : > { %21178 = vmatprep.mubr.f32.mxu0 %v29611_v33  ;;  %v28749_v33 = vand.u32 4294901760, %v26461_v0 }
 0x327   : > { %19826 = vmatmul.mubr.f32.gmra.mrb[22].mxu1 %v29603_v28 }
 0x328   : > { %19828 = vmatprep.mubr.f32.mxu1 %v29612_v46 }
 0x329   : > { %21179 = vmatmul.mubr.f32.gmra.mrb[24].mxu0 %v29613_v27  ;;  %v29618_v27 = vld [vmem:[#allocation392_spill] sm:$0xff] }
 0x32a   : > { %21181 = vmatprep.mubr.f32.mxu0 %v29614_v36  ;;  %v4345_v36 = vsub.f32 %v26461_v0, %v28749_v33 }
 0x32b   : > { %19829 = vmatmul.mubr.f32.gmra.mrb[24].mxu1 %v29487_v58 }
 0x32c   : > { %19831 = vmatprep.mubr.f32.mxu1 %v29605_v19 }
 0x32d   : > { %21182 = vmatmul.mubr.f32.gmra.mrb[26].mxu0 %v29615_v1  ;;  %v4346_v1 = vand.u32 4294901760, %v4345_v36  ;;  %v29623_v36 = vld [vmem:[#allocation63_spill] sm:$0xff] }
 0x32e   : > { %21184 = vmatprep.mubr.f32.mxu0 %v29616_v37  ;;  %v4355_v37 = vsub.f32 %v26467_v8, %v28751_v47  ;;  %v29624_v47 = vld [vmem:[#allocation289_spill] sm:$0xff] }
 0x32f   : > { %19832 = vmatmul.mubr.f32.gmra.mrb[26].mxu1 %v29606_v55 }
 0x330   : > { %19834 = vmatprep.mubr.f32.mxu1 %v29607_v16  ;;  %v4356_v33 = vand.u32 4294901760, %v4355_v37  ;;  %v29626_v37 = vld [vmem:[#allocation66_spill] sm:$0xff] }
 0x331   : > { %21185 = vmatmul.mubr.f32.gmra.mrb[28].mxu0 %v29617_v23  ;;  %v29621_v23 = vld [vmem:[#allocation281_spill] sm:$0xff] }
 0x332   : > { %21187 = vmatprep.mubr.f32.mxu0 %v29618_v27 }
 0x333   : > { %19835 = vmatmul.mubr.f32.gmra.mrb[28].mxu1 %v29608_v22 }
 0x334   : > { %19837 = vmatprep.mubr.f32.mxu1 %v25951_v60 }
 0x335   : > { %21188 = vmatmul.mubr.f32.gmra.mrb[30].mxu0 %v29619_v54 }
 0x336   : > { %21192 = vmatprep.mubr.f32.mxu0 %v29620_v63  ;;  %v29625_v63 = vld [vmem:[#allocation294_spill] sm:$0xff] }
 0x337   : > { %19838 = vmatmul.mubr.f32.gmra.mrb[30].mxu1 %v29609_v13 }
 0x338   : > { %19842 = vmatprep.mubr.f32.mxu1 %v4346_v1  ;;  %v29627_v1 = vld [vmem:[#allocation194_spill] sm:$0xff] }
 0x339   : > { %21193 = vmatmul.mubr.f32.vlgmr.msra.gmra.mrb[0].mxu0 %v29621_v23  ;;  %v29631_v23 = vld [vmem:[#allocation203_spill] sm:$0xff] }
 0x33a   : > { %21195 = vmatprep.mubr.f32.mxu0 %v29622_v38  ;;  %21241 = vmatpush3.msra.mxu0 %v29610_v14  ;;  %v29628_v38 = vld [vmem:[#allocation300_spill] sm:$0xff]  ;;  %v29629_v14 = vld [vmem:[#allocation301_spill] sm:$0xff] }
 0x33b   : > { %19843 = vmatmul.mubr.f32.vlgmr.msra.gmra.mrb[0].mxu1 %v4356_v33  ;;  %21290 = vmatprep.subr.mxu0 %v26040_v39  ;;  %v29630_v33 = vld [vmem:[#allocation200_spill] sm:$0xff] }
 0x33c   : > { %19891 = vmatpush3.msra.mxu1 %v26396_v10  ;;  %19845 = vmatprep.mubr.f32.mxu1 %v29623_v36  ;;  %v29632_v10 = vld [vmem:[#allocation304_spill] sm:$0xff]  ;;  %v29633_v36 = vld [vmem:[#allocation310_spill] sm:$0xff] }
 0x33d   : > { %21196 = vmatmul.mubr.f32.gmra.mrb[2].mxu0 %v29624_v47  ;;  %19940 = vmatprep.subr.mxu1 %v26377_v6  ;;  %v29634_v47 = vld [vmem:[#allocation16_spill] sm:$0xff] }
 0x33e   : > { %21198 = vmatprep.mubr.f32.mxu0 %v29625_v63  ;;  %v29636_v63 = vld [vmem:[#allocation312_spill] sm:$0xff] }
 0x33f   : > { %19846 = vmatmul.mubr.f32.gmra.mrb[2].mxu1 %v29626_v37  ;;  %v29637_v37 = vld [vmem:[#allocation313_spill] sm:$0xff] }
 0x340   : > { %19848 = vmatprep.mubr.f32.mxu1 %v29627_v1  ;;  %v29638_v1 = vld [vmem:[#allocation82_spill] sm:$0xff] }
 0x341   : > { %21199 = vmatmul.mubr.f32.gmra.mrb[4].mxu0 %v29628_v38  ;;  %v29639_v38 = vld [vmem:[#allocation208_spill] sm:$0xff] }
 0x342   : > { %21201 = vmatprep.mubr.f32.mxu0 %v29629_v14  ;;  %v29640_v14 = vld [vmem:[#allocation321_spill] sm:$0xff] }
 0x343   : > { %19849 = vmatmul.mubr.f32.gmra.mrb[4].mxu1 %v29630_v33  ;;  %v29641_v33 = vld [vmem:[#allocation325_spill] sm:$0xff] }
 0x344   : > { %19851 = vmatprep.mubr.f32.mxu1 %v29631_v23  ;;  %v29642_v23 = vld [vmem:[#allocation104_spill] sm:$0xff] }
 0x345   : > { %21202 = vmatmul.mubr.f32.gmra.mrb[6].mxu0 %v29632_v10  ;;  %v29643_v10 = vld [vmem:[#allocation105_spill] sm:$0xff] }
 0x346   : > { %21204 = vmatprep.mubr.f32.mxu0 %v29633_v36  ;;  %v29644_v36 = vld [vmem:[#allocation332_spill] sm:$0xff] }
 0x347   : > { %19852 = vmatmul.mubr.f32.gmra.mrb[6].mxu1 %v29634_v47  ;;  %v29645_v47 = vld [vmem:[#allocation334_spill] sm:$0xff] }
 0x348   : > { %19854 = vmatprep.mubr.f32.mxu1 %v29635_v45  ;;  %v29646_v45 = vld [vmem:[#allocation116_spill] sm:$0xff] }
 0x349   : > { %21205 = vmatmul.mubr.f32.gmra.mrb[8].mxu0 %v29636_v63  ;;  %v29647_v63 = vld [vmem:[#allocation217_spill] sm:$0xff] }
 0x34a   : > { %21207 = vmatprep.mubr.f32.mxu0 %v29637_v37  ;;  %v29648_v37 = vld [vmem:[#allocation340_spill] sm:$0xff] }
 0x34b   : > { %19855 = vmatmul.mubr.f32.gmra.mrb[8].mxu1 %v29638_v1  ;;  %v29649_v1 = vld [vmem:[#allocation343_spill] sm:$0xff] }
 0x34c   : > { %19857 = vmatprep.mubr.f32.mxu1 %v29639_v38  ;;  %v29650_v38 = vld [vmem:[#allocation221_spill] sm:$0xff] }
 0x34d   : > { %21208 = vmatmul.mubr.f32.gmra.mrb[10].mxu0 %v29640_v14  ;;  %v29651_v14 = vld [vmem:[#allocation127_spill] sm:$0xff] }
 0x34e   : > { %21210 = vmatprep.mubr.f32.mxu0 %v29641_v33  ;;  %v29652_v33 = vld [vmem:[#allocation344_spill] sm:$0xff] }
 0x34f   : > { %19858 = vmatmul.mubr.f32.gmra.mrb[10].mxu1 %v29642_v23  ;;  %v29653_v23 = vld [vmem:[#allocation345_spill] sm:$0xff] }
 0x350   : > { %19860 = vmatprep.mubr.f32.mxu1 %v29643_v10  ;;  %v29654_v10 = vld [vmem:[#allocation226_spill] sm:$0xff] }
 0x351   : > { %21211 = vmatmul.mubr.f32.gmra.mrb[12].mxu0 %v29644_v36  ;;  %v29655_v36 = vld [vmem:[#allocation138_spill] sm:$0xff] }
 0x352   : > { %21213 = vmatprep.mubr.f32.mxu0 %v29645_v47  ;;  %v29656_v47 = vld [vmem:[#allocation352_spill] sm:$0xff] }
 0x353   : > { %19861 = vmatmul.mubr.f32.gmra.mrb[12].mxu1 %v29646_v45  ;;  %v29657_v45 = vld [vmem:[#allocation354_spill] sm:$0xff] }
 0x354   : > { %19863 = vmatprep.mubr.f32.mxu1 %v29647_v63  ;;  %v29658_v63 = vld [vmem:[#allocation154_spill] sm:$0xff] }
 0x355   : > { %21214 = vmatmul.mubr.f32.gmra.mrb[14].mxu0 %v29648_v37  ;;  %v29659_v37 = vld [vmem:[#allocation233_spill] sm:$0xff] }
 0x356   : > { %21216 = vmatprep.mubr.f32.mxu0 %v29649_v1  ;;  %v29660_v1 = vld [vmem:[#allocation362_spill] sm:$0xff] }
 0x357   : > { %19864 = vmatmul.mubr.f32.gmra.mrb[14].mxu1 %v29650_v38  ;;  %v29661_v38 = vld [vmem:[#allocation365_spill] sm:$0xff] }
 0x358   : > { %19866 = vmatprep.mubr.f32.mxu1 %v29651_v14  ;;  %v29662_v14 = vld [vmem:[#allocation235_spill] sm:$0xff] }
 0x359   : > { %21217 = vmatmul.mubr.f32.gmra.mrb[16].mxu0 %v29652_v33  ;;  %v29663_v33 = vld [vmem:[#allocation239_spill] sm:$0xff] }
 0x35a   : > { %21219 = vmatprep.mubr.f32.mxu0 %v29653_v23  ;;  %v29664_v23 = vld [vmem:[#allocation369_spill] sm:$0xff] }
 0x35b   : > { %19867 = vmatmul.mubr.f32.gmra.mrb[16].mxu1 %v29654_v10  ;;  %v29665_v10 = vld [vmem:[#allocation373_spill] sm:$0xff] }
 0x35c   : > { %19869 = vmatprep.mubr.f32.mxu1 %v29655_v36  ;;  %v29666_v36 = vld [vmem:[#allocation242_spill] sm:$0xff] }
 0x35d   : > { %21220 = vmatmul.mubr.f32.gmra.mrb[18].mxu0 %v29656_v47  ;;  %v29667_v47 = vld [vmem:[#allocation243_spill] sm:$0xff] }
 0x35e   : > { %21222 = vmatprep.mubr.f32.mxu0 %v29657_v45  ;;  %v29668_v45 = vld [vmem:[#allocation376_spill] sm:$0xff] }
 0x35f   : > { %19870 = vmatmul.mubr.f32.gmra.mrb[18].mxu1 %v29658_v63  ;;  %v29669_v63 = vld [vmem:[#allocation379_spill] sm:$0xff] }
 0x360   : > { %19872 = vmatprep.mubr.f32.mxu1 %v29659_v37  ;;  %v29670_v37 = vld [vmem:[#allocation250_spill] sm:$0xff] }
 0x361   : > { %21223 = vmatmul.mubr.f32.gmra.mrb[20].mxu0 %v29660_v1  ;;  %v29671_v1 = vld [vmem:[#allocation254_spill] sm:$0xff] }
 0x362   : > { %21225 = vmatprep.mubr.f32.mxu0 %v29661_v38  ;;  %v29672_v38 = vld [vmem:[#allocation381_spill] sm:$0xff] }
 0x363   : > { %19873 = vmatmul.mubr.f32.gmra.mrb[20].mxu1 %v29662_v14  ;;  %v29673_v14 = vld [vmem:[#allocation391_spill] sm:$0xff] }
 0x364   : > { %19875 = vmatprep.mubr.f32.mxu1 %v29663_v33  ;;  %v29674_v33 = vld [vmem:[#allocation257_spill] sm:$0xff] }
 0x365   : > { %21226 = vmatmul.mubr.f32.gmra.mrb[22].mxu0 %v29664_v23  ;;  %v29675_v23 = vld [vmem:[#allocation260_spill] sm:$0xff] }
 0x366   : > { %21228 = vmatprep.mubr.f32.mxu0 %v29665_v10  ;;  %v29676_v10 = vld [vmem:[#allocation393_spill] sm:$0xff] }
 0x367   : > { %19876 = vmatmul.mubr.f32.gmra.mrb[22].mxu1 %v29666_v36  ;;  %v29694_v36 = vld [vmem:[#allocation78_spill] sm:$0xff] }
 0x368   : > { %19878 = vmatprep.mubr.f32.mxu1 %v29667_v47  ;;  %v29693_v47 = vld [vmem:[#allocation201_spill] sm:$0xff] }
 0x369   : > { %21229 = vmatmul.mubr.f32.gmra.mrb[24].mxu0 %v29668_v45  ;;  %v17448_v45 = vld [vmem:[%s27900_s1 + $0x1c] sm:$0xf] }
 0x36a   : > { %21231 = vmatprep.mubr.f32.mxu0 %v29669_v63  ;;  %v29677_v63 = vand.u32 4294901760, %v29618_v27  ;;  %v29686_v27 = vld [vmem:[#allocation31_spill] sm:$0xff] }
 0x36b   : > { %19879 = vmatmul.mubr.f32.gmra.mrb[24].mxu1 %v29670_v37  ;;  %v29678_v37 = vld [vmem:[#allocation262_spill] sm:$0xff] }
 0x36c   : > { %19881 = vmatprep.mubr.f32.mxu1 %v29671_v1  ;;  %v29679_v1 = vld [vmem:[#allocation264_spill] sm:$0xff] }
 0x36d   : > { %21232 = vmatmul.mubr.f32.gmra.mrb[26].mxu0 %v29672_v38  ;;  %v26557_v38 = vsel %vm497_vm0, %v17448_v45, 0  ;;  %v29684_v45 = vld [vmem:[#allocation184_spill] sm:$0xff] }
 0x36e   : > { %21234 = vmatprep.mubr.f32.mxu0 %v29673_v14  ;;  %v29680_v14 = vand.u32 4294901760, %v29619_v54  ;;  %v29682_v54 = vld [vmem:[#allocation15_spill] sm:$0xff] }
 0x36f   : > { %19882 = vmatmul.mubr.f32.gmra.mrb[26].mxu1 %v29674_v33  ;;  %v29692_v33 = vld [vmem:[#allocation193_spill] sm:$0xff] }
 0x370   : > { %19884 = vmatprep.mubr.f32.mxu1 %v29675_v23  ;;  %v26564_v23 = vand.u32 4294901760, %v26557_v38 }
 0x371   : > { %21235 = vmatmul.mubr.f32.gmra.mrb[28].mxu0 %v29676_v10  ;;  %v29681_v10 = vld [vmem:[#allocation265_spill] sm:$0xff] }
 0x372   : > { %21237 = vmatprep.mubr.f32.mxu0 %v29677_v63  ;;  %v29683_v63 = vld [vmem:[#allocation183_spill] sm:$0xff] }
 0x373   : > { %19885 = vmatmul.mubr.f32.gmra.mrb[28].mxu1 %v29678_v37  ;;  %v29691_v37 = vld [vmem:[#allocation191_spill] sm:$0xff] }
 0x374   : > { %19887 = vmatprep.mubr.f32.mxu1 %v29679_v1  ;;  %v29690_v1 = vld [vmem:[#allocation189_spill] sm:$0xff] }
 0x375   : > { %21238 = vmatmul.mubr.f32.gmra.mrb[30].mxu0 %v29680_v14  ;;  %v29688_v14 = vld [vmem:[#allocation187_spill] sm:$0xff] }
 0x376   : > { %21242 = vmatprep.mubr.f32.mxu0 %v25544_v4 }
 0x377   : > { %19888 = vmatmul.mubr.f32.gmra.mrb[30].mxu1 %v29681_v10  ;;  %v29689_v10 = vld [vmem:[#allocation188_spill] sm:$0xff] }
 0x378   : > { %19892 = vmatprep.mubr.f32.mxu1 %v26451_v15 }
 0x379   : > { %21243 = vmatmul.mubr.f32.vlgmr.msra.gmra.mrb[0].mxu0 %v25557_v5 }
 0x37a   : > { %21245 = vmatprep.mubr.f32.mxu0 %v25572_v26  ;;  %21291 = vmatpush3.msra.mxu0 %v26040_v39  ;;  %v29685_v39 = vld [vmem:[#allocation26_spill] sm:$0xff] }
 0x37b   : > { %19893 = vmatmul.mubr.f32.vlgmr.msra.gmra.mrb[0].mxu1 %v26457_v34  ;;  %21340 = vmatprep.subr.mxu0 %v26564_v23 }
 0x37c   : > { %19941 = vmatpush3.msra.mxu1 %v26377_v6  ;;  %19895 = vmatprep.mubr.f32.mxu1 %v29682_v54  ;;  %v29687_v6 = vld [vmem:[#allocation186_spill] sm:$0xff] }
 0x37d   : > { %21246 = vmatmul.mubr.f32.gmra.mrb[2].mxu0 %v25584_v30  ;;  %19990 = vmatprep.subr.mxu1 %v26318_v35 }
 0x37e   : > { %21248 = vmatprep.mubr.f32.mxu0 %v29587_v24 }
 0x37f   : > { %19896 = vmatmul.mubr.f32.gmra.mrb[2].mxu1 %v29683_v63 }
 0x380   : > { %19898 = vmatprep.mubr.f32.mxu1 %v29684_v45 }
 0x381   : > { %21249 = vmatmul.mubr.f32.gmra.mrb[4].mxu0 %v29589_v62 }
 0x382   : > { %21251 = vmatprep.mubr.f32.mxu0 %v29590_v11 }
 0x383   : > { %19899 = vmatmul.mubr.f32.gmra.mrb[4].mxu1 %v29685_v39 }
 0x384   : > { %19901 = vmatprep.mubr.f32.mxu1 %v29686_v27 }
 0x385   : > { %21252 = vmatmul.mubr.f32.gmra.mrb[6].mxu0 %v29591_v52 }
 0x386   : > { %21254 = vmatprep.mubr.f32.mxu0 %v29592_v21 }
 0x387   : > { %19902 = vmatmul.mubr.f32.gmra.mrb[6].mxu1 %v29687_v6 }
 0x388   : > { %19904 = vmatprep.mubr.f32.mxu1 %v29688_v14 }
 0x389   : > { %21255 = vmatmul.mubr.f32.gmra.mrb[8].mxu0 %v29593_v17 }
 0x38a   : > { %21257 = vmatprep.mubr.f32.mxu0 %v29594_v9 }
 0x38b   : > { %19905 = vmatmul.mubr.f32.gmra.mrb[8].mxu1 %v29689_v10 }
 0x38c   : > { %19907 = vmatprep.mubr.f32.mxu1 %v29690_v1 }
 0x38d   : > { %21258 = vmatmul.mubr.f32.gmra.mrb[10].mxu0 %v29595_v56 }
 0x38e   : > { %21260 = vmatprep.mubr.f32.mxu0 %v29596_v43 }
 0x38f   : > { %19908 = vmatmul.mubr.f32.gmra.mrb[10].mxu1 %v29691_v37 }
 0x390   : > { %19910 = vmatprep.mubr.f32.mxu1 %v29692_v33 }
 0x391   : > { %21261 = vmatmul.mubr.f32.gmra.mrb[12].mxu0 %v29597_v32 }
 0x392   : > { %21263 = vmatprep.mubr.f32.mxu0 %v29598_v29 }
 0x393   : > { %19911 = vmatmul.mubr.f32.gmra.mrb[12].mxu1 %v29693_v47 }
 0x394   : > { %19913 = vmatprep.mubr.f32.mxu1 %v29694_v36 }
 0x395   : > { %21264 = vmatmul.mubr.f32.gmra.mrb[14].mxu0 %v29599_v40 }
 0x396   : > { %21266 = vmatprep.mubr.f32.mxu0 %v29600_v48 }
 0x397   : > { %19914 = vmatmul.mubr.f32.gmra.mrb[14].mxu1 %v29695_v2 }
 0x398   : > { %19916 = vmatprep.mubr.f32.mxu1 %v29696_v49 }
 0x399   : > { %21267 = vmatmul.mubr.f32.gmra.mrb[16].mxu0 %v29601_v7 }
 0x39a   : > { %21269 = vmatprep.mubr.f32.mxu0 %v29602_v59 }
 0x39b   : > { %19917 = vmatmul.mubr.f32.gmra.mrb[16].mxu1 %v29697_v18 }
 0x39c   : > { %19919 = vmatprep.mubr.f32.mxu1 %v29698_v61  ;;  %v29715_v61 = vld [vmem:[#allocation390_spill] sm:$0xff] }
 0x39d   : > { %21270 = vmatmul.mubr.f32.gmra.mrb[18].mxu0 %v29603_v28 }
 0x39e   : > { %21272 = vmatprep.mubr.f32.mxu0 %v29612_v46 }
 0x39f   : > { %19920 = vmatmul.mubr.f32.gmra.mrb[18].mxu1 %v29699_v25  ;;  %v29706_v25 = vld [vmem:[#allocation124_spill] sm:$0xff] }
 0x3a0   : > { %19922 = vmatprep.mubr.f32.mxu1 %v29700_v20  ;;  %v26624_v20 = vsel %vm349_vm1, %v13383_v50, %v28767_v44  ;;  %v29711_v44 = vld [vmem:[#allocation234_spill] sm:$0xff] }
 0x3a1   : > { %21273 = vmatmul.mubr.f32.gmra.mrb[20].mxu0 %v29487_v58 }
 0x3a2   : > { %21275 = vmatprep.mubr.f32.mxu0 %v29605_v19 }
 0x3a3   : > { %19923 = vmatmul.mubr.f32.gmra.mrb[20].mxu1 %v29701_v41  ;;  %v29708_v41 = vld [vmem:[#allocation228_spill] sm:$0xff] }
 0x3a4   : > { %19925 = vmatprep.mubr.f32.mxu1 %v29704_v42  ;;  %v26631_v42 = vsub.f32 %v26557_v38, %v26564_v23 }
 0x3a5   : > { %21276 = vmatmul.mubr.f32.gmra.mrb[22].mxu0 %v29606_v55 }
 0x3a6   : > { %21278 = vmatprep.mubr.f32.mxu0 %v29607_v16  ;;  %v26638_v50 = vand.u32 4294901760, %v26631_v42 }
 0x3a7   : > { %19926 = vmatmul.mubr.f32.gmra.mrb[22].mxu1 %v29705_v57  ;;  %v29712_v57 = vld [vmem:[#allocation387_spill] sm:$0xff] }
 0x3a8   : > { %19928 = vmatprep.mubr.f32.mxu1 %v29706_v25  ;;  %v29709_v25 = vld [vmem:[#allocation232_spill] sm:$0xff]  ;;  %29710 = vst [vmem:[#allocation280_spill] sm:$0xff] %v26638_v50  ;;  %v13787_v38 = vsub.f32 %v26631_v42, %v26638_v50  ;;  %v29717_v50 = vld [vmem:[#allocation19_spill] sm:$0xff] }
 0x3a9   : > { %21279 = vmatmul.mubr.f32.gmra.mrb[24].mxu0 %v29608_v22 }
 0x3aa   : > { %21281 = vmatprep.mubr.f32.mxu0 %v25951_v60  ;;  %v26650_v18 = vand.u32 4294901760, %v13787_v38  ;;  %v29718_v38 = vld [vmem:[#allocation22_spill] sm:$0xff] }
 0x3ab   : > { %19929 = vmatmul.mubr.f32.gmra.mrb[24].mxu1 %v29707_v31  ;;  %v29713_v31 = vld [vmem:[#allocation238_spill] sm:$0xff] }
 0x3ac   : > { %19931 = vmatprep.mubr.f32.mxu1 %v29708_v41  ;;  %v29714_v41 = vld [vmem:[#allocation241_spill] sm:$0xff] }
 0x3ad   : > { %21282 = vmatmul.mubr.f32.gmra.mrb[26].mxu0 %v29609_v13 }
 0x3ae   : > { %21284 = vmatprep.mubr.f32.mxu0 %v26234_v3 }
 0x3af   : > { %19932 = vmatmul.mubr.f32.gmra.mrb[26].mxu1 %v29709_v25  ;;  %v29716_v25 = vld [vmem:[#allocation246_spill] sm:$0xff] }
 0x3b0   : > { %19934 = vmatprep.mubr.f32.mxu1 %v29711_v44 }
 0x3b1   : > { %21285 = vmatmul.mubr.f32.gmra.mrb[28].mxu0 %v29712_v57 }
 0x3b2   : > { %21287 = vmatprep.mubr.f32.mxu0 %v26252_v12 }
 0x3b3   : > { %19935 = vmatmul.mubr.f32.gmra.mrb[28].mxu1 %v29713_v31 }
 0x3b4   : > { %19937 = vmatprep.mubr.f32.mxu1 %v29714_v41 }
 0x3b5   : > { %21288 = vmatmul.mubr.f32.gmra.mrb[30].mxu0 %v29715_v61 }
 0x3b6   : > { %21292 = vmatprep.mubr.f32.mxu0 %v25544_v4  ;;  %v29721_v4 = vld [vmem:[#allocation185_spill] sm:$0xff] }
 0x3b7   : > { %19938 = vmatmul.mubr.f32.gmra.mrb[30].mxu1 %v29716_v25 }
 0x3b8   : > { %19942 = vmatprep.mubr.f32.mxu1 %v26461_v0 }
 0x3b9   : > { %21293 = vmatmul.mubr.f32.vlgmr.msra.gmra.mrb[0].mxu0 %v25557_v5  ;;  %v29719_v5 = vld [vmem:[#allocation29_spill] sm:$0xff] }
 0x3ba   : > { %21295 = vmatprep.mubr.f32.mxu0 %v25572_v26  ;;  %21341 = vmatpush3.msra.mxu0 %v26564_v23  ;;  %v29720_v26 = vld [vmem:[#allocation41_spill] sm:$0xff] }
 0x3bb   : > { %19943 = vmatmul.mubr.f32.vlgmr.msra.gmra.mrb[0].mxu1 %v26467_v8  ;;  %21390 = vmatprep.subr.mxu0 %v26650_v18 }
 0x3bc   : > { %19991 = vmatpush3.msra.mxu1 %v26318_v35  ;;  %19945 = vmatprep.mubr.f32.mxu1 %v29717_v50  ;;  %v29722_v50 = vld [vmem:[#allocation52_spill] sm:$0xff] }
 0x3bd   : > { %21296 = vmatmul.mubr.f32.gmra.mrb[2].mxu0 %v25584_v30  ;;  %20040 = vmatprep.subr.mxu1 %v26384_v51  ;;  %v29723_v30 = vld [vmem:[#allocation62_spill] sm:$0xff] }
 0x3be   : > { %21298 = vmatprep.mubr.f32.mxu0 %v29587_v24 }
 0x3bf   : > { %19946 = vmatmul.mubr.f32.gmra.mrb[2].mxu1 %v29718_v38  ;;  %v29724_v38 = vld [vmem:[#allocation190_spill] sm:$0xff] }
 0x3c0   : > { %19948 = vmatprep.mubr.f32.mxu1 %v29719_v5  ;;  %v29725_v5 = vld [vmem:[#allocation192_spill] sm:$0xff] }
 0x3c1   : > { %21299 = vmatmul.mubr.f32.gmra.mrb[4].mxu0 %v29589_v62 }
 0x3c2   : > { %21301 = vmatprep.mubr.f32.mxu0 %v29590_v11 }
 0x3c3   : > { %19949 = vmatmul.mubr.f32.gmra.mrb[4].mxu1 %v29720_v26  ;;  %v29727_v26 = vld [vmem:[#allocation199_spill] sm:$0xff] }
 0x3c4   : > { %19951 = vmatprep.mubr.f32.mxu1 %v29721_v4  ;;  %v29726_v4 = vld [vmem:[#allocation197_spill] sm:$0xff] }
 0x3c5   : > { %21302 = vmatmul.mubr.f32.gmra.mrb[6].mxu0 %v29591_v52 }
 0x3c6   : > { %21304 = vmatprep.mubr.f32.mxu0 %v29592_v21  ;;  %v29857_v21 = vld [vmem:[#allocation170_spill] sm:$0xff] }
 0x3c7   : > { %19952 = vmatmul.mubr.f32.gmra.mrb[6].mxu1 %v29722_v50  ;;  %v29729_v50 = vld [vmem:[#allocation86_spill] sm:$0xff] }
 0x3c8   : > { %19954 = vmatprep.mubr.f32.mxu1 %v29723_v30  ;;  %v29728_v30 = vld [vmem:[#allocation81_spill] sm:$0xff] }
 0x3c9   : > { %21305 = vmatmul.mubr.f32.gmra.mrb[8].mxu0 %v29593_v17  ;;  %v29851_v17 = vld [vmem:[#allocation160_spill] sm:$0xff] }
 0x3ca   : > { %21307 = vmatprep.mubr.f32.mxu0 %v29594_v9  ;;  %v29848_v9 = vld [vmem:[#allocation220_spill] sm:$0xff] }
 0x3cb   : > { %19955 = vmatmul.mubr.f32.gmra.mrb[8].mxu1 %v29724_v38  ;;  %v29731_v38 = vld [vmem:[#allocation210_spill] sm:$0xff] }
 0x3cc   : > { %19957 = vmatprep.mubr.f32.mxu1 %v29725_v5  ;;  %v29730_v5 = vld [vmem:[#allocation207_spill] sm:$0xff] }
 0x3cd   : > { %21308 = vmatmul.mubr.f32.gmra.mrb[10].mxu0 %v29595_v56  ;;  %v29843_v56 = vld [vmem:[#allocation136_spill] sm:$0xff] }
 0x3ce   : > { %21310 = vmatprep.mubr.f32.mxu0 %v29596_v43  ;;  %v29840_v43 = vld [vmem:[#allocation212_spill] sm:$0xff] }
 0x3cf   : > { %19958 = vmatmul.mubr.f32.gmra.mrb[10].mxu1 %v29726_v4  ;;  %v29733_v4 = vld [vmem:[#allocation213_spill] sm:$0xff] }
 0x3d0   : > { %19960 = vmatprep.mubr.f32.mxu1 %v29727_v26  ;;  %v29732_v26 = vld [vmem:[#allocation211_spill] sm:$0xff] }
 0x3d1   : > { %21311 = vmatmul.mubr.f32.gmra.mrb[12].mxu0 %v29597_v32  ;;  %v29839_v32 = vld [vmem:[#allocation123_spill] sm:$0xff] }
 0x3d2   : > { %21313 = vmatprep.mubr.f32.mxu0 %v29598_v29  ;;  %v29838_v29 = vld [vmem:[#allocation121_spill] sm:$0xff] }
 0x3d3   : > { %19961 = vmatmul.mubr.f32.gmra.mrb[12].mxu1 %v29728_v30  ;;  %v29735_v30 = vld [vmem:[#allocation218_spill] sm:$0xff] }
 0x3d4   : > { %19963 = vmatprep.mubr.f32.mxu1 %v29729_v50  ;;  %v29734_v50 = vld [vmem:[#allocation120_spill] sm:$0xff] }
 0x3d5   : > { %21314 = vmatmul.mubr.f32.gmra.mrb[14].mxu0 %v29599_v40  ;;  %v29837_v40 = vld [vmem:[#allocation100_spill] sm:$0xff] }
 0x3d6   : > { %21316 = vmatprep.mubr.f32.mxu0 %v29600_v48  ;;  %v29836_v48 = vld [vmem:[#allocation209_spill] sm:$0xff] }
 0x3d7   : > { %19964 = vmatmul.mubr.f32.gmra.mrb[14].mxu1 %v29730_v5  ;;  %v29737_v5 = vld [vmem:[#allocation224_spill] sm:$0xff] }
 0x3d8   : > { %19966 = vmatprep.mubr.f32.mxu1 %v29731_v38  ;;  %v29736_v38 = vld [vmem:[#allocation222_spill] sm:$0xff] }
 0x3d9   : > { %21317 = vmatmul.mubr.f32.gmra.mrb[16].mxu0 %v29601_v7  ;;  %v29835_v7 = vld [vmem:[#allocation118_spill] sm:$0xff] }
 0x3da   : > { %21319 = vmatprep.mubr.f32.mxu0 %v29602_v59  ;;  %v29834_v59 = vld [vmem:[#allocation111_spill] sm:$0xff] }
 0x3db   : > { %19967 = vmatmul.mubr.f32.gmra.mrb[16].mxu1 %v29732_v26  ;;  %v29739_v26 = vld [vmem:[#allocation137_spill] sm:$0xff] }
 0x3dc   : > { %19969 = vmatprep.mubr.f32.mxu1 %v29733_v4  ;;  %v29738_v4 = vld [vmem:[#allocation225_spill] sm:$0xff] }
 0x3dd   : > { %21320 = vmatmul.mubr.f32.gmra.mrb[18].mxu0 %v29603_v28  ;;  %v29833_v28 = vld [vmem:[#allocation103_spill] sm:$0xff] }
 0x3de   : > { %21322 = vmatprep.mubr.f32.mxu0 %v29612_v46  ;;  %v29832_v46 = vld [vmem:[#allocation96_spill] sm:$0xff] }
 0x3df   : > { %19970 = vmatmul.mubr.f32.gmra.mrb[18].mxu1 %v29734_v50  ;;  %v29741_v50 = vld [vmem:[#allocation155_spill] sm:$0xff] }
 0x3e0   : > { %19972 = vmatprep.mubr.f32.mxu1 %v29735_v30  ;;  %v29740_v30 = vld [vmem:[#allocation231_spill] sm:$0xff] }
 0x3e1   : > { %21323 = vmatmul.mubr.f32.gmra.mrb[20].mxu0 %v29487_v58  ;;  %v29831_v58 = vld [vmem:[#allocation95_spill] sm:$0xff] }
 0x3e2   : > { %21325 = vmatprep.mubr.f32.mxu0 %v29605_v19  ;;  %v29830_v19 = vld [vmem:[#allocation85_spill] sm:$0xff] }
 0x3e3   : > { %19973 = vmatmul.mubr.f32.gmra.mrb[20].mxu1 %v29736_v38  ;;  %v29743_v38 = vld [vmem:[#allocation240_spill] sm:$0xff] }
 0x3e4   : > { %19975 = vmatprep.mubr.f32.mxu1 %v29737_v5  ;;  %v29742_v5 = vld [vmem:[#allocation237_spill] sm:$0xff] }
 0x3e5   : > { %21326 = vmatmul.mubr.f32.gmra.mrb[22].mxu0 %v29606_v55  ;;  %v29813_v55 = vld [vmem:[#allocation247_spill] sm:$0xff] }
 0x3e6   : > { %21328 = vmatprep.mubr.f32.mxu0 %v29607_v16 }
 0x3e7   : > { %19976 = vmatmul.mubr.f32.gmra.mrb[22].mxu1 %v29738_v4  ;;  %v29745_v4 = vld [vmem:[#allocation248_spill] sm:$0xff] }
 0x3e8   : > { %19978 = vmatprep.mubr.f32.mxu1 %v29739_v26  ;;  %v29744_v26 = vld [vmem:[#allocation245_spill] sm:$0xff] }
 0x3e9   : > { %21329 = vmatmul.mubr.f32.gmra.mrb[24].mxu0 %v29608_v22  ;;  %v29808_v22 = vld [vmem:[#allocation156_spill] sm:$0xff] }
 0x3ea   : > { %21331 = vmatprep.mubr.f32.mxu0 %v25951_v60 }
 0x3eb   : > { %19979 = vmatmul.mubr.f32.gmra.mrb[24].mxu1 %v29740_v30  ;;  %v29746_v30 = vld [vmem:[#allocation34_spill] sm:$0xff] }
 0x3ec   : > { %19981 = vmatprep.mubr.f32.mxu1 %v29741_v50  ;;  %v29747_v50 = vld [vmem:[#allocation252_spill] sm:$0xff] }
 0x3ed   : > { %21332 = vmatmul.mubr.f32.gmra.mrb[26].mxu0 %v29609_v13 }
 0x3ee   : > { %21334 = vmatprep.mubr.f32.mxu0 %v26234_v3  ;;  %v29748_v3 = vand.u32 4294901760, %v26461_v0  ;;  %v29755_v0 = vld [vmem:[#allocation37_spill] sm:$0xff] }
 0x3ef   : > { %19982 = vmatmul.mubr.f32.gmra.mrb[26].mxu1 %v29742_v5  ;;  %v29749_v5 = vld [vmem:[#allocation40_spill] sm:$0xff] }
 0x3f0   : > { %19984 = vmatprep.mubr.f32.mxu1 %v29743_v38  ;;  %v29750_v38 = vld [vmem:[#allocation46_spill] sm:$0xff] }
 0x3f1   : > { %21335 = vmatmul.mubr.f32.gmra.mrb[28].mxu0 %v29712_v57  ;;  %v29803_v57 = vld [vmem:[#allocation172_spill] sm:$0xff] }
 0x3f2   : > { %21337 = vmatprep.mubr.f32.mxu0 %v26252_v12  ;;  %v29751_v12 = vand.u32 4294901760, %v26467_v8  ;;  %v29758_v8 = vld [vmem:[#allocation72_spill] sm:$0xff] }
 0x3f3   : > { %19985 = vmatmul.mubr.f32.gmra.mrb[28].mxu1 %v29744_v26  ;;  %v29792_v26 = vld [vmem:[#allocation151_spill] sm:$0xff] }
 0x3f4   : > { %19987 = vmatprep.mubr.f32.mxu1 %v29745_v4  ;;  %v29788_v4 = vld [vmem:[#allocation146_spill] sm:$0xff] }
 0x3f5   : > { %21338 = vmatmul.mubr.f32.gmra.mrb[30].mxu0 %v29715_v61  ;;  %v29752_v61 = vld [vmem:[#allocation35_spill] sm:$0xff] }
 0x3f6   : > { %21342 = vmatprep.mubr.f32.mxu0 %v29746_v30  ;;  %v29753_v30 = vld [vmem:[#allocation54_spill] sm:$0xff] }
 0x3f7   : > { %19988 = vmatmul.mubr.f32.gmra.mrb[30].mxu1 %v29747_v50  ;;  %v29772_v50 = vld [vmem:[#allocation204_spill] sm:$0xff] }
 0x3f8   : > { %19992 = vmatprep.mubr.f32.mxu1 %v29748_v3  ;;  %v29754_v3 = vld [vmem:[#allocation60_spill] sm:$0xff] }
 0x3f9   : > { %21343 = vmatmul.mubr.f32.vlgmr.msra.gmra.mrb[0].mxu0 %v29749_v5  ;;  %v29760_v5 = vld [vmem:[#allocation51_spill] sm:$0xff] }
 0x3fa   : > { %21345 = vmatprep.mubr.f32.mxu0 %v29750_v38  ;;  %21391 = vmatpush3.msra.mxu0 %v26650_v18  ;;  %v29756_v38 = vld [vmem:[#allocation38_spill] sm:$0xff]  ;;  %v29757_v18 = vld [vmem:[#allocation65_spill] sm:$0xff] }
 0x3fb   : > { %19993 = vmatmul.mubr.f32.vlgmr.msra.gmra.mrb[0].mxu1 %v29751_v12  ;;  %21440 = vmatprep.subr.mxu0 %v26631_v42  ;;  %v29759_v12 = vld [vmem:[#allocation48_spill] sm:$0xff] }
 0x3fc   : > { %20041 = vmatpush3.msra.mxu1 %v26384_v51  ;;  %19995 = vmatprep.mubr.f32.mxu1 %v29752_v61  ;;  %v29761_v51 = vld [vmem:[#allocation74_spill] sm:$0xff]  ;;  %v29762_v61 = vld [vmem:[#allocation77_spill] sm:$0xff] }
 0x3fd   : > { %21346 = vmatmul.mubr.f32.gmra.mrb[2].mxu0 %v29753_v30  ;;  %20090 = vmatprep.subr.mxu1 %v26318_v35  ;;  %v29763_v30 = vld [vmem:[#allocation195_spill] sm:$0xff] }
 0x3fe   : > { %21348 = vmatprep.mubr.f32.mxu0 %v29754_v3  ;;  %v29764_v3 = vld [vmem:[#allocation196_spill] sm:$0xff] }
 0x3ff   : > { %19996 = vmatmul.mubr.f32.gmra.mrb[2].mxu1 %v29755_v0  ;;  %v29765_v0 = vld [vmem:[#allocation88_spill] sm:$0xff] }
 0x400   : > { %19998 = vmatprep.mubr.f32.mxu1 %v29756_v38  ;;  %v29766_v38 = vld [vmem:[#allocation91_spill] sm:$0xff] }
 0x401   : > { %21349 = vmatmul.mubr.f32.gmra.mrb[4].mxu0 %v29757_v18  ;;  %v29767_v18 = vld [vmem:[#allocation69_spill] sm:$0xff] }
 0x402   : > { %21351 = vmatprep.mubr.f32.mxu0 %v29758_v8  ;;  %v29768_v8 = vld [vmem:[#allocation198_spill] sm:$0xff] }
 0x403   : > { %19999 = vmatmul.mubr.f32.gmra.mrb[4].mxu1 %v29759_v12  ;;  %v29769_v12 = vld [vmem:[#allocation99_spill] sm:$0xff] }
 0x404   : > { %20001 = vmatprep.mubr.f32.mxu1 %v29760_v5  ;;  %v29770_v5 = vld [vmem:[#allocation102_spill] sm:$0xff] }
 0x405   : > { %21352 = vmatmul.mubr.f32.gmra.mrb[6].mxu0 %v29761_v51  ;;  %v29771_v51 = vld [vmem:[#allocation75_spill] sm:$0xff] }
 0x406   : > { %21354 = vmatprep.mubr.f32.mxu0 %v29762_v61  ;;  %v29773_v61 = vld [vmem:[#allocation108_spill] sm:$0xff] }
 0x407   : > { %20002 = vmatmul.mubr.f32.gmra.mrb[6].mxu1 %v29763_v30  ;;  %v29774_v30 = vld [vmem:[#allocation115_spill] sm:$0xff] }
 0x408   : > { %20004 = vmatprep.mubr.f32.mxu1 %v29764_v3  ;;  %v29775_v3 = vld [vmem:[#allocation17_spill] sm:$0xff] }
 0x409   : > { %21355 = vmatmul.mubr.f32.gmra.mrb[8].mxu0 %v29765_v0  ;;  %v29776_v0 = vld [vmem:[#allocation92_spill] sm:$0xff] }
 0x40a   : > { %21357 = vmatprep.mubr.f32.mxu0 %v29766_v38  ;;  %v26756_v38 = vld [vmem:[%s23928_s13 + $0x1a8] sm:$0x3] }
 0x40b   : > { %20005 = vmatmul.mubr.f32.gmra.mrb[8].mxu1 %v29767_v18  ;;  %29777 = vst [vmem:[#allocation283_spill] sm:$0xff] %v26756_v38  ;;  %v29778_v18 = vld [vmem:[#allocation119_spill] sm:$0xff] }
 0x40c   : > { %20007 = vmatprep.mubr.f32.mxu1 %v29768_v8  ;;  %v29779_v8 = vld [vmem:[#allocation126_spill] sm:$0xff] }
 0x40d   : > { %21358 = vmatmul.mubr.f32.gmra.mrb[10].mxu0 %v29769_v12  ;;  %v29780_v12 = vld [vmem:[#allocation97_spill] sm:$0xff] }
 0x40e   : > { %21360 = vmatprep.mubr.f32.mxu0 %v29770_v5  ;;  %v13386_v5 = vrot.slane %v26756_v38, 1 }
 0x40f   : > { %20008 = vmatmul.mubr.f32.gmra.mrb[10].mxu1 %v29771_v51  ;;  %v29781_v51 = vld [vmem:[#allocation106_spill] sm:$0xff] }
 0x410   : > { %20010 = vmatprep.mubr.f32.mxu1 %v29772_v50  ;;  %v29782_v50 = vld [vmem:[#allocation130_spill] sm:$0xff] }
 0x411   : > { %21361 = vmatmul.mubr.f32.gmra.mrb[12].mxu0 %v29773_v61  ;;  %v29783_v61 = vld [vmem:[#allocation139_spill] sm:$0xff] }
 0x412   : > { %21363 = vmatprep.mubr.f32.mxu0 %v29774_v30  ;;  %v29784_v30 = vld [vmem:[#allocation114_spill] sm:$0xff] }
 0x413   : > { %20011 = vmatmul.mubr.f32.gmra.mrb[12].mxu1 %v29775_v3  ;;  %v29785_v3 = vrot.slane %v29703_v53, 1  ;;  %v29794_v53 = vld [vmem:[#allocation157_spill] sm:$0xff] }
 0x414   : > { %20013 = vmatprep.mubr.f32.mxu1 %v29776_v0  ;;  %v13390_v0 = vsel %vm432_vm2, %v26624_v20, 0 }
 0x415   : > { %21364 = vmatmul.mubr.f32.gmra.mrb[14].mxu0 %v29778_v18  ;;  %v13387_v18 = vsel %vm349_vm1, %v29785_v3, %v13386_v5  ;;  %v29795_v3 = vld [vmem:[#allocation144_spill] sm:$0xff] }
 0x416   : > { %21366 = vmatprep.mubr.f32.mxu0 %v29779_v8  ;;  %v29786_v8 = vld [vmem:[#allocation215_spill] sm:$0xff] }
 0x417   : > { %20014 = vmatmul.mubr.f32.gmra.mrb[14].mxu1 %v29780_v12  ;;  %v29787_v12 = vld [vmem:[#allocation142_spill] sm:$0xff] }
 0x418   : > { %20016 = vmatprep.mubr.f32.mxu1 %v29781_v51  ;;  %v26774_v51 = vand.u32 4294901760, %v13390_v0 }
 0x419   : > { %21367 = vmatmul.mubr.f32.gmra.mrb[16].mxu0 %v29782_v50  ;;  %v13392_v50 = vsel %vm432_vm2, %v13387_v18, 0 }
 0x41a   : > { %21369 = vmatprep.mubr.f32.mxu0 %v29783_v61  ;;  %29789 = vst [vmem:[#allocation284_spill] sm:$0xff] %v26774_v51  ;;  %v29790_v61 = vld [vmem:[#allocation133_spill] sm:$0xff]  ;;  %v26780_v20 = vand.u32 4294901760, %v13392_v50  ;;  %v26784_v5 = vsub.f32 %v13390_v0, %v26774_v51 }
 0x41b   : > { %20017 = vmatmul.mubr.f32.gmra.mrb[16].mxu1 %v29784_v30  ;;  %v29791_v30 = vld [vmem:[#allocation223_spill] sm:$0xff]  ;;  %v29802_v0 = vld [vmem:[#allocation145_spill] sm:$0xff] }
 0x41c   : > { %20019 = vmatprep.mubr.f32.mxu1 %v29786_v8  ;;  %29793 = vst [vmem:[#allocation386_spill] sm:$0xff] %v26780_v20  ;;  %v26790_v18 = vsub.f32 %v13392_v50, %v26780_v20  ;;  %v28788_v38 = vand.u32 4294901760, %v26784_v5  ;;  %v29806_v50 = vld [vmem:[#allocation174_spill] sm:$0xff] }
 0x41d   : > { %21370 = vmatmul.mubr.f32.gmra.mrb[18].mxu0 %v29787_v12  ;;  %v29797_v12 = vld [vmem:[#allocation162_spill] sm:$0xff] }
 0x41e   : > { %21372 = vmatprep.mubr.f32.mxu0 %v29788_v4  ;;  %v29796_v4 = vld [vmem:[#allocation229_spill] sm:$0xff] }
 0x41f   : > { %20020 = vmatmul.mubr.f32.gmra.mrb[18].mxu1 %v29790_v61  ;;  %v29798_v61 = vld [vmem:[#allocation168_spill] sm:$0xff] }
 0x420   : > { %20022 = vmatprep.mubr.f32.mxu1 %v29791_v30  ;;  %v29799_v30 = vld [vmem:[#allocation175_spill] sm:$0xff] }
 0x421   : > { %21373 = vmatmul.mubr.f32.gmra.mrb[20].mxu0 %v29792_v26  ;;  %v29800_v26 = vld [vmem:[#allocation171_spill] sm:$0xff] }
 0x422   : > { %21375 = vmatprep.mubr.f32.mxu0 %v29794_v53  ;;  %v8293_v8 = vsub.f32 %v29800_v26, %v29799_v30  ;;  %v29801_v53 = vld [vmem:[#allocation230_spill] sm:$0xff] }
 0x423   : > { %20023 = vmatmul.mubr.f32.gmra.mrb[20].mxu1 %v29795_v3  ;;  %v29804_v3 = vld [vmem:[#allocation176_spill] sm:$0xff] }
 0x424   : > { %20025 = vmatprep.mubr.f32.mxu1 %v29796_v4  ;;  %v29805_v4 = vld [vmem:[#allocation173_spill] sm:$0xff]  ;;  %v26803_v60 = vand.u32 4294901760, %v8293_v8 }
 0x425   : > { %21376 = vmatmul.mubr.f32.gmra.mrb[22].mxu0 %v29797_v12  ;;  %v8303_v13 = vsub.f32 %v29805_v4, %v29804_v3  ;;  %v28789_v12 = vand.u32 4294901760, %v26790_v18 }
 0x426   : > { %21378 = vmatprep.mubr.f32.mxu0 %v29798_v61  ;;  %29807 = vst [vmem:[#allocation392_spill] sm:$0xff] %v26803_v60  ;;  %v13766_v61 = vsub.f32 %v26784_v5, %v28788_v38 }
 0x427   : > { %20026 = vmatmul.mubr.f32.gmra.mrb[22].mxu1 %v29801_v53  ;;  %v29809_v53 = vld [vmem:[#allocation236_spill] sm:$0xff]  ;;  %v13776_v16 = vsub.f32 %v26790_v18, %v28789_v12  ;;  %v29816_v12 = vld [vmem:[#allocation18_spill] sm:$0xff] }
 0x428   : > { %20028 = vmatprep.mubr.f32.mxu1 %v29802_v0  ;;  %v29810_v0 = vld [vmem:[#allocation177_spill] sm:$0xff]  ;;  %v13767_v8 = vand.u32 4294901760, %v13766_v61 }
 0x429   : > { %21379 = vmatmul.mubr.f32.gmra.mrb[24].mxu0 %v29803_v57  ;;  %v26811_v57 = vand.u32 4294901760, %v8303_v13  ;;  %v13777_v38 = vand.u32 4294901760, %v13776_v16  ;;  %v17444_v13 = vld [vmem:[%s27900_s1 + $0xc] sm:$0xf] }
 0x42a   : > { %21381 = vmatprep.mubr.f32.mxu0 %v29806_v50  ;;  %v29812_v50 = vld [vmem:[#allocation244_spill] sm:$0xff]  ;;  %v6096_v61 = vsel %vm497_vm0, %v17444_v13, 0  ;;  %v29821_v13 = vld [vmem:[#allocation42_spill] sm:$0xff] }
 0x42b   : > { %20029 = vmatmul.mubr.f32.gmra.mrb[24].mxu1 %v29808_v22  ;;  %29811 = vst [vmem:[#allocation394_spill] sm:$0xff] %v26811_v57  ;;  %v26830_v16 = vand.u32 4294901760, %v6096_v61  ;;  %v29829_v22 = vld [vmem:[#allocation83_spill] sm:$0xff] }
 0x42c   : > { %20031 = vmatprep.mubr.f32.mxu1 %v29809_v53  ;;  %v29814_v53 = vld [vmem:[#allocation251_spill] sm:$0xff] }
 0x42d   : > { %21382 = vmatmul.mubr.f32.gmra.mrb[26].mxu0 %v29810_v0  ;;  %v29815_v0 = vld [vmem:[#allocation255_spill] sm:$0xff] }
 0x42e   : > { %21384 = vmatprep.mubr.f32.mxu0 %v26803_v60  ;;  %v29817_v60 = vld [vmem:[#allocation258_spill] sm:$0xff] }
 0x42f   : > { %20032 = vmatmul.mubr.f32.gmra.mrb[26].mxu1 %v29812_v50  ;;  %v29828_v50 = vld [vmem:[#allocation80_spill] sm:$0xff] }
 0x430   : > { %20034 = vmatprep.mubr.f32.mxu1 %v29813_v55  ;;  %v29827_v55 = vld [vmem:[#allocation70_spill] sm:$0xff] }
 0x431   : > { %21385 = vmatmul.mubr.f32.gmra.mrb[28].mxu0 %v26811_v57  ;;  %v29818_v57 = vld [vmem:[#allocation21_spill] sm:$0xff] }
 0x432   : > { %21387 = vmatprep.mubr.f32.mxu0 %v13767_v8  ;;  %v29819_v8 = vld [vmem:[#allocation27_spill] sm:$0xff] }
 0x433   : > { %20035 = vmatmul.mubr.f32.gmra.mrb[28].mxu1 %v29814_v53  ;;  %v29826_v53 = vld [vmem:[#allocation68_spill] sm:$0xff] }
 0x434   : > { %20037 = vmatprep.mubr.f32.mxu1 %v29815_v0  ;;  %v29825_v0 = vld [vmem:[#allocation57_spill] sm:$0xff] }
 0x435   : > { %21388 = vmatmul.mubr.f32.gmra.mrb[30].mxu0 %v13777_v38  ;;  %v29820_v38 = vld [vmem:[#allocation33_spill] sm:$0xff] }
 0x436   : > { %21392 = vmatprep.mubr.f32.mxu0 %v29816_v12 }
 0x437   : > { %20038 = vmatmul.mubr.f32.gmra.mrb[30].mxu1 %v29817_v60  ;;  %v29822_v60 = vld [vmem:[#allocation44_spill] sm:$0xff] }
 0x438   : > { %20042 = vmatprep.mubr.f32.mxu1 %v26451_v15 }
 0x439   : > { %21393 = vmatmul.mubr.f32.vlgmr.msra.gmra.mrb[0].mxu0 %v29818_v57 }
 0x43a   : > { %21395 = vmatprep.mubr.f32.mxu0 %v29819_v8  ;;  %21441 = vmatpush3.msra.mxu0 %v26631_v42  ;;  %v29823_v42 = vld [vmem:[#allocation50_spill] sm:$0xff] }
 0x43b   : > { %20043 = vmatmul.mubr.f32.vlgmr.msra.gmra.mrb[0].mxu1 %v26457_v34  ;;  %21490 = vmatprep.subr.mxu0 %v26564_v23 }
 0x43c   : > { %20091 = vmatpush3.msra.mxu1 %v26318_v35  ;;  %20045 = vmatprep.mubr.f32.mxu1 %v29682_v54  ;;  %v29824_v35 = vld [vmem:[#allocation55_spill] sm:$0xff] }
 0x43d   : > { %21396 = vmatmul.mubr.f32.gmra.mrb[2].mxu0 %v29820_v38  ;;  %20140 = vmatprep.subr.mxu1 %v26830_v16 }
 0x43e   : > { %21398 = vmatprep.mubr.f32.mxu0 %v29821_v13 }
 0x43f   : > { %20046 = vmatmul.mubr.f32.gmra.mrb[2].mxu1 %v29683_v63 }
 0x440   : > { %20048 = vmatprep.mubr.f32.mxu1 %v29684_v45 }
 0x441   : > { %21399 = vmatmul.mubr.f32.gmra.mrb[4].mxu0 %v29822_v60 }
 0x442   : > { %21401 = vmatprep.mubr.f32.mxu0 %v29823_v42 }
 0x443   : > { %20049 = vmatmul.mubr.f32.gmra.mrb[4].mxu1 %v29685_v39 }
 0x444   : > { %20051 = vmatprep.mubr.f32.mxu1 %v29686_v27 }
 0x445   : > { %21402 = vmatmul.mubr.f32.gmra.mrb[6].mxu0 %v29824_v35 }
 0x446   : > { %21404 = vmatprep.mubr.f32.mxu0 %v29825_v0 }
 0x447   : > { %20052 = vmatmul.mubr.f32.gmra.mrb[6].mxu1 %v29687_v6 }
 0x448   : > { %20054 = vmatprep.mubr.f32.mxu1 %v29688_v14 }
 0x449   : > { %21405 = vmatmul.mubr.f32.gmra.mrb[8].mxu0 %v29826_v53 }
 0x44a   : > { %21407 = vmatprep.mubr.f32.mxu0 %v29827_v55 }
 0x44b   : > { %20055 = vmatmul.mubr.f32.gmra.mrb[8].mxu1 %v29689_v10 }
 0x44c   : > { %20057 = vmatprep.mubr.f32.mxu1 %v29690_v1 }
 0x44d   : > { %21408 = vmatmul.mubr.f32.gmra.mrb[10].mxu0 %v29828_v50  ;;  %v26889_v50 = vsub.f32 %v6096_v61, %v26830_v16 }
 0x44e   : > { %21410 = vmatprep.mubr.f32.mxu0 %v29829_v22  ;;  %v29852_v22 = vld [vmem:[#allocation227_spill] sm:$0xff] }
 0x44f   : > { %20058 = vmatmul.mubr.f32.gmra.mrb[10].mxu1 %v29691_v37 }
 0x450   : > { %20060 = vmatprep.mubr.f32.mxu1 %v29692_v33 }
 0x451   : > { %21411 = vmatmul.mubr.f32.gmra.mrb[12].mxu0 %v29830_v19  ;;  %v29847_v19 = vld [vmem:[#allocation149_spill] sm:$0xff] }
 0x452   : > { %21413 = vmatprep.mubr.f32.mxu0 %v29831_v58  ;;  %v29844_v58 = vld [vmem:[#allocation216_spill] sm:$0xff] }
 0x453   : > { %20061 = vmatmul.mubr.f32.gmra.mrb[12].mxu1 %v29693_v47 }
 0x454   : > { %20063 = vmatprep.mubr.f32.mxu1 %v29694_v36 }
 0x455   : > { %21414 = vmatmul.mubr.f32.gmra.mrb[14].mxu0 %v29832_v46  ;;  %v29841_v46 = vld [vmem:[#allocation214_spill] sm:$0xff] }
 0x456   : > { %21416 = vmatprep.mubr.f32.mxu0 %v29833_v28  ;;  %v29842_v28 = vld [vmem:[#allocation132_spill] sm:$0xff] }
 0x457   : > { %20064 = vmatmul.mubr.f32.gmra.mrb[14].mxu1 %v29695_v2 }
 0x458   : > { %20066 = vmatprep.mubr.f32.mxu1 %v29696_v49 }
 0x459   : > { %21417 = vmatmul.mubr.f32.gmra.mrb[16].mxu0 %v29834_v59  ;;  %v29845_v59 = vld [vmem:[#allocation219_spill] sm:$0xff] }
 0x45a   : > { %21419 = vmatprep.mubr.f32.mxu0 %v29835_v7  ;;  %v29846_v7 = vld [vmem:[#allocation143_spill] sm:$0xff] }
 0x45b   : > { %20067 = vmatmul.mubr.f32.gmra.mrb[16].mxu1 %v29836_v48 }
 0x45c   : > { %20069 = vmatprep.mubr.f32.mxu1 %v29837_v40 }
 0x45d   : > { %21420 = vmatmul.mubr.f32.gmra.mrb[18].mxu0 %v29838_v29  ;;  %v29849_v29 = vld [vmem:[#allocation124_spill] sm:$0xff] }
 0x45e   : > { %21422 = vmatprep.mubr.f32.mxu0 %v29839_v32  ;;  %v29850_v32 = vld [vmem:[#allocation153_spill] sm:$0xff] }
 0x45f   : > { %20070 = vmatmul.mubr.f32.gmra.mrb[18].mxu1 %v29840_v43 }
 0x460   : > { %20072 = vmatprep.mubr.f32.mxu1 %v29841_v46 }
 0x461   : > { %21423 = vmatmul.mubr.f32.gmra.mrb[20].mxu0 %v29842_v28  ;;  %v29853_v28 = vld [vmem:[#allocation228_spill] sm:$0xff] }
 0x462   : > { %21425 = vmatprep.mubr.f32.mxu0 %v29843_v56  ;;  %v29854_v56 = vld [vmem:[#allocation161_spill] sm:$0xff] }
 0x463   : > { %20073 = vmatmul.mubr.f32.gmra.mrb[20].mxu1 %v29844_v58 }
 0x464   : > { %20075 = vmatprep.mubr.f32.mxu1 %v29845_v59 }
 0x465   : > { %21426 = vmatmul.mubr.f32.gmra.mrb[22].mxu0 %v29846_v7  ;;  %v29855_v7 = vld [vmem:[#allocation169_spill] sm:$0xff] }
 0x466   : > { %21428 = vmatprep.mubr.f32.mxu0 %v29847_v19  ;;  %v29856_v19 = vld [vmem:[#allocation232_spill] sm:$0xff] }
 0x467   : > { %20076 = vmatmul.mubr.f32.gmra.mrb[22].mxu1 %v29848_v9 }
 0x468   : > { %20078 = vmatprep.mubr.f32.mxu1 %v29849_v29 }
 0x469   : > { %21429 = vmatmul.mubr.f32.gmra.mrb[24].mxu0 %v29850_v32  ;;  %v26896_v32 = vand.u32 4294901760, %v26889_v50 }
 0x46a   : > { %21431 = vmatprep.mubr.f32.mxu0 %v29851_v17 }
 0x46b   : > { %20079 = vmatmul.mubr.f32.gmra.mrb[24].mxu1 %v29852_v22  ;;  %v6488_v61 = vsub.f32 %v26889_v50, %v26896_v32 }
 0x46c   : > { %20081 = vmatprep.mubr.f32.mxu1 %v29853_v28 }
 0x46d   : > { %21432 = vmatmul.mubr.f32.gmra.mrb[26].mxu0 %v29854_v56  ;;  %v26908_v56 = vand.u32 4294901760, %v6488_v61  ;;  %v29864_v61 = vld [vmem:[#allocation47_spill] sm:$0xff] }
 0x46e   : > { %21434 = vmatprep.mubr.f32.mxu0 %v29855_v7  ;;  %v29858_v7 = vld [vmem:[#allocation20_spill] sm:$0xff] }
 0x46f   : > { %20082 = vmatmul.mubr.f32.gmra.mrb[26].mxu1 %v29856_v19 }
 0x470   : > { %20084 = vmatprep.mubr.f32.mxu1 %v29711_v44 }
 0x471   : > { %21435 = vmatmul.mubr.f32.gmra.mrb[28].mxu0 %v29857_v21  ;;  %v29859_v21 = vld [vmem:[#allocation24_spill] sm:$0xff] }
 0x472   : > { %21437 = vmatprep.mubr.f32.mxu0 %v26774_v51  ;;  %v29860_v51 = vld [vmem:[#allocation32_spill] sm:$0xff] }
 0x473   : > { %20085 = vmatmul.mubr.f32.gmra.mrb[28].mxu1 %v29713_v31 }
 0x474   : > { %20087 = vmatprep.mubr.f32.mxu1 %v29714_v41 }
 0x475   : > { %21438 = vmatmul.mubr.f32.gmra.mrb[30].mxu0 %v26780_v20  ;;  %v29861_v20 = vld [vmem:[#allocation280_spill] sm:$0xff] }
 0x476   : > { %21442 = vmatprep.mubr.f32.mxu0 %v29858_v7  ;;  %v29862_v7 = vld [vmem:[#allocation39_spill] sm:$0xff] }
 0x477   : > { %20088 = vmatmul.mubr.f32.gmra.mrb[30].mxu1 %v29716_v25 }
 0x478   : > { %20092 = vmatprep.mubr.f32.mxu1 %v26451_v15  ;;  %v29863_v15 = vld [vmem:[#allocation45_spill] sm:$0xff] }
 0x479   : > { %21443 = vmatmul.mubr.f32.vlgmr.msra.gmra.mrb[0].mxu0 %v29859_v21  ;;  %v29964_v21 = vld [vmem:[#allocation96_spill] sm:$0xff] }
 0x47a   : > { %21445 = vmatprep.mubr.f32.mxu0 %v29860_v51  ;;  %21491 = vmatpush3.msra.mxu0 %v26564_v23  ;;  %v29865_v51 = vld [vmem:[#allocation56_spill] sm:$0xff] }
 0x47b   : > { %20093 = vmatmul.mubr.f32.vlgmr.msra.gmra.mrb[0].mxu1 %v26457_v34  ;;  %21540 = vmatprep.subr.mxu0 %v29861_v20  ;;  %v29866_v34 = vld [vmem:[#allocation58_spill] sm:$0xff] }
 0x47c   : > { %20141 = vmatpush3.msra.mxu1 %v26830_v16  ;;  %20095 = vmatprep.mubr.f32.mxu1 %v29682_v54  ;;  %v29867_v54 = vld [vmem:[#allocation61_spill] sm:$0xff] }
 0x47d   : > { %21446 = vmatmul.mubr.f32.gmra.mrb[2].mxu0 %v29862_v7  ;;  %20190 = vmatprep.subr.mxu1 %v26908_v56  ;;  %v29904_v7 = vld [vmem:[#allocation316_spill] sm:$0xff] }
 0x47e   : > { %21448 = vmatprep.mubr.f32.mxu0 %v29863_v15  ;;  %v29868_v15 = vld [vmem:[#allocation71_spill] sm:$0xff] }
 0x47f   : > { %20096 = vmatmul.mubr.f32.gmra.mrb[2].mxu1 %v29683_v63  ;;  %v29869_v63 = vld [vmem:[#allocation73_spill] sm:$0xff] }
 0x480   : > { %20098 = vmatprep.mubr.f32.mxu1 %v29684_v45 }
 0x481   : > { %21449 = vmatmul.mubr.f32.gmra.mrb[4].mxu0 %v29864_v61  ;;  %v29871_v61 = vld [vmem:[#allocation87_spill] sm:$0xff] }
 0x482   : > { %21451 = vmatprep.mubr.f32.mxu0 %v29865_v51  ;;  %v29870_v51 = vld [vmem:[#allocation84_spill] sm:$0xff] }
 0x483   : > { %20099 = vmatmul.mubr.f32.gmra.mrb[4].mxu1 %v29685_v39 }
 0x484   : > { %20101 = vmatprep.mubr.f32.mxu1 %v29686_v27 }
 0x485   : > { %21452 = vmatmul.mubr.f32.gmra.mrb[6].mxu0 %v29866_v34  ;;  %v29873_v34 = vld [vmem:[#allocation98_spill] sm:$0xff] }
 0x486   : > { %21454 = vmatprep.mubr.f32.mxu0 %v29867_v54  ;;  %v29872_v54 = vld [vmem:[#allocation90_spill] sm:$0xff] }
 0x487   : > { %20102 = vmatmul.mubr.f32.gmra.mrb[6].mxu1 %v29687_v6 }
 0x488   : > { %20104 = vmatprep.mubr.f32.mxu1 %v29688_v14 }
 0x489   : > { %21455 = vmatmul.mubr.f32.gmra.mrb[8].mxu0 %v29868_v15  ;;  %v29875_v15 = vld [vmem:[#allocation110_spill] sm:$0xff] }
 0x48a   : > { %21457 = vmatprep.mubr.f32.mxu0 %v29869_v63  ;;  %v29874_v63 = vld [vmem:[#allocation101_spill] sm:$0xff] }
 0x48b   : > { %20105 = vmatmul.mubr.f32.gmra.mrb[8].mxu1 %v29689_v10 }
 0x48c   : > { %20107 = vmatprep.mubr.f32.mxu1 %v29690_v1 }
 0x48d   : > { %21458 = vmatmul.mubr.f32.gmra.mrb[10].mxu0 %v29870_v51  ;;  %v29877_v51 = vld [vmem:[#allocation122_spill] sm:$0xff] }
 0x48e   : > { %21460 = vmatprep.mubr.f32.mxu0 %v29871_v61  ;;  %v29876_v61 = vld [vmem:[#allocation113_spill] sm:$0xff] }
 0x48f   : > { %20108 = vmatmul.mubr.f32.gmra.mrb[10].mxu1 %v29691_v37 }
 0x490   : > { %20110 = vmatprep.mubr.f32.mxu1 %v29692_v33 }
 0x491   : > { %21461 = vmatmul.mubr.f32.gmra.mrb[12].mxu0 %v29872_v54  ;;  %v29879_v54 = vld [vmem:[#allocation129_spill] sm:$0xff] }
 0x492   : > { %21463 = vmatprep.mubr.f32.mxu0 %v29873_v34  ;;  %v29878_v34 = vld [vmem:[#allocation125_spill] sm:$0xff] }
 0x493   : > { %20111 = vmatmul.mubr.f32.gmra.mrb[12].mxu1 %v29693_v47 }
 0x494   : > { %20113 = vmatprep.mubr.f32.mxu1 %v29694_v36 }
 0x495   : > { %21464 = vmatmul.mubr.f32.gmra.mrb[14].mxu0 %v29874_v63  ;;  %v29881_v63 = vld [vmem:[#allocation141_spill] sm:$0xff] }
 0x496   : > { %21466 = vmatprep.mubr.f32.mxu0 %v29875_v15  ;;  %v29880_v15 = vld [vmem:[#allocation135_spill] sm:$0xff] }
 0x497   : > { %20114 = vmatmul.mubr.f32.gmra.mrb[14].mxu1 %v29695_v2  ;;  %v29992_v2 = vld [vmem:[#allocation170_spill] sm:$0xff] }
 0x498   : > { %20116 = vmatprep.mubr.f32.mxu1 %v29696_v49  ;;  %v29989_v49 = vld [vmem:[#allocation364_spill] sm:$0xff] }
 0x499   : > { %21467 = vmatmul.mubr.f32.gmra.mrb[16].mxu0 %v29876_v61  ;;  %v29883_v61 = vld [vmem:[#allocation152_spill] sm:$0xff] }
 0x49a   : > { %21469 = vmatprep.mubr.f32.mxu0 %v29877_v51  ;;  %v29882_v51 = vld [vmem:[#allocation148_spill] sm:$0xff] }
 0x49b   : > { %20117 = vmatmul.mubr.f32.gmra.mrb[16].mxu1 %v29836_v48  ;;  %v29981_v48 = vld [vmem:[#allocation149_spill] sm:$0xff] }
 0x49c   : > { %20119 = vmatprep.mubr.f32.mxu1 %v29837_v40  ;;  %v29980_v40 = vld [vmem:[#allocation143_spill] sm:$0xff] }
 0x49d   : > { %21470 = vmatmul.mubr.f32.gmra.mrb[18].mxu0 %v29878_v34  ;;  %v29885_v34 = vld [vmem:[#allocation164_spill] sm:$0xff] }
 0x49e   : > { %21472 = vmatprep.mubr.f32.mxu0 %v29879_v54  ;;  %v29884_v54 = vld [vmem:[#allocation159_spill] sm:$0xff] }
 0x49f   : > { %20120 = vmatmul.mubr.f32.gmra.mrb[18].mxu1 %v29840_v43  ;;  %v23721_v43 = vld [vmem:[%s23928_s13 + $0x198] sm:$0xff] }
 0x4a0   : > { %20122 = vmatprep.mubr.f32.mxu1 %v29841_v46  ;;  %v29976_v46 = vld [vmem:[#allocation132_spill] sm:$0xff] }
 0x4a1   : > { %21473 = vmatmul.mubr.f32.gmra.mrb[20].mxu0 %v29880_v15  ;;  %v29900_v15 = vld [vmem:[#allocation309_spill] sm:$0xff] }
 0x4a2   : > { %21475 = vmatprep.mubr.f32.mxu0 %v29881_v63  ;;  %v29886_v63 = vld [vmem:[#allocation165_spill] sm:$0xff] }
 0x4a3   : > { %20123 = vmatmul.mubr.f32.gmra.mrb[20].mxu1 %v29844_v58  ;;  %v29975_v58 = vld [vmem:[#allocation330_spill] sm:$0xff] }
 0x4a4   : > { %20125 = vmatprep.mubr.f32.mxu1 %v29845_v59  ;;  %v29974_v59 = vld [vmem:[#allocation329_spill] sm:$0xff] }
 0x4a5   : > { %21476 = vmatmul.mubr.f32.gmra.mrb[22].mxu0 %v29882_v51  ;;  %v29893_v51 = vld [vmem:[#allocation43_spill] sm:$0xff] }
 0x4a6   : > { %21478 = vmatprep.mubr.f32.mxu0 %v29883_v61  ;;  %v29892_v61 = vld [vmem:[#allocation293_spill] sm:$0xff] }
 0x4a7   : > { %20126 = vmatmul.mubr.f32.gmra.mrb[22].mxu1 %v29848_v9  ;;  %v29973_v9 = vld [vmem:[#allocation123_spill] sm:$0xff] }
 0x4a8   : > { %20128 = vmatprep.mubr.f32.mxu1 %v29849_v29  ;;  %v29972_v29 = vld [vmem:[#allocation121_spill] sm:$0xff] }
 0x4a9   : > { %21479 = vmatmul.mubr.f32.gmra.mrb[24].mxu0 %v29884_v54  ;;  %v29890_v54 = vld [vmem:[#allocation36_spill] sm:$0xff] }
 0x4aa   : > { %21481 = vmatprep.mubr.f32.mxu0 %v29885_v34  ;;  %v29887_v34 = vld [vmem:[#allocation23_spill] sm:$0xff] }
 0x4ab   : > { %20129 = vmatmul.mubr.f32.gmra.mrb[24].mxu1 %v29852_v22  ;;  %v29971_v22 = vld [vmem:[#allocation327_spill] sm:$0xff] }
 0x4ac   : > { %20131 = vmatprep.mubr.f32.mxu1 %v29853_v28  ;;  %v29970_v28 = vld [vmem:[#allocation323_spill] sm:$0xff] }
 0x4ad   : > { %21482 = vmatmul.mubr.f32.gmra.mrb[26].mxu0 %v29886_v63  ;;  %v29888_v63 = vld [vmem:[#allocation285_spill] sm:$0xff] }
 0x4ae   : > { %21484 = vmatprep.mubr.f32.mxu0 %v29800_v26  ;;  %v29889_v26 = vld [vmem:[#allocation30_spill] sm:$0xff] }
 0x4af   : > { %20132 = vmatmul.mubr.f32.gmra.mrb[26].mxu1 %v29856_v19  ;;  %v29969_v19 = vld [vmem:[#allocation118_spill] sm:$0xff] }
 0x4b0   : > { %20134 = vmatprep.mubr.f32.mxu1 %v29711_v44  ;;  %v29968_v44 = vld [vmem:[#allocation111_spill] sm:$0xff] }
 0x4b1   : > { %21485 = vmatmul.mubr.f32.gmra.mrb[28].mxu0 %v29805_v4  ;;  %v29891_v4 = vld [vmem:[#allocation288_spill] sm:$0xff] }
 0x4b2   : > { %21487 = vmatprep.mubr.f32.mxu0 %v26784_v5 }
 0x4b3   : > { %20135 = vmatmul.mubr.f32.gmra.mrb[28].mxu1 %v29713_v31  ;;  %v29967_v31 = vld [vmem:[#allocation319_spill] sm:$0xff] }
 0x4b4   : > { %20137 = vmatprep.mubr.f32.mxu1 %v29714_v41  ;;  %v29966_v41 = vld [vmem:[#allocation317_spill] sm:$0xff] }
 0x4b5   : > { %21488 = vmatmul.mubr.f32.gmra.mrb[30].mxu0 %v26790_v18 }
 0x4b6   : > { %21492 = vmatprep.mubr.f32.mxu0 %v29887_v34  ;;  %v29894_v34 = vld [vmem:[#allocation49_spill] sm:$0xff] }
 0x4b7   : > { %20138 = vmatmul.mubr.f32.gmra.mrb[30].mxu1 %v29716_v25  ;;  %v29965_v25 = vld [vmem:[#allocation103_spill] sm:$0xff] }
 0x4b8   : > { %20142 = vmatprep.mubr.f32.mxu1 %v29888_v63  ;;  %v29895_v63 = vld [vmem:[#allocation296_spill] sm:$0xff] }
 0x4b9   : > { %21493 = vmatmul.mubr.f32.vlgmr.msra.gmra.mrb[0].mxu0 %v29889_v26  ;;  %v29896_v26 = vld [vmem:[#allocation302_spill] sm:$0xff] }
 0x4ba   : > { %21495 = vmatprep.mubr.f32.mxu0 %v29890_v54  ;;  %21541 = vmatpush3.msra.mxu0 %v29861_v20  ;;  %v29897_v54 = vld [vmem:[#allocation53_spill] sm:$0xff]  ;;  %v29898_v20 = vld [vmem:[#allocation59_spill] sm:$0xff] }
 0x4bb   : > { %20143 = vmatmul.mubr.f32.vlgmr.msra.gmra.mrb[0].mxu1 %v29891_v4  ;;  %21590 = vmatprep.subr.mxu0 %v26564_v23  ;;  %v29899_v4 = vld [vmem:[#allocation308_spill] sm:$0xff] }
 0x4bc   : > { %20191 = vmatpush3.msra.mxu1 %v26908_v56  ;;  %20145 = vmatprep.mubr.f32.mxu1 %v29892_v61  ;;  %v29901_v56 = vld [vmem:[#allocation64_spill] sm:$0xff]  ;;  %v29902_v61 = vld [vmem:[#allocation67_spill] sm:$0xff] }
 0x4bd   : > { %21496 = vmatmul.mubr.f32.gmra.mrb[2].mxu0 %v29893_v51  ;;  %20240 = vmatprep.subr.mxu1 %v26889_v50  ;;  %v29903_v51 = vld [vmem:[#allocation315_spill] sm:$0xff] }
 0x4be   : > { %21498 = vmatprep.mubr.f32.mxu0 %v29894_v34  ;;  %v29905_v34 = vld [vmem:[#allocation76_spill] sm:$0xff] }
 0x4bf   : > { %20146 = vmatmul.mubr.f32.gmra.mrb[2].mxu1 %v29895_v63  ;;  %v29906_v63 = vld [vmem:[#allocation79_spill] sm:$0xff] }
 0x4c0   : > { %20148 = vmatprep.mubr.f32.mxu1 %v29896_v26  ;;  %v29907_v26 = vld [vmem:[#allocation320_spill] sm:$0xff] }
 0x4c1   : > { %21499 = vmatmul.mubr.f32.gmra.mrb[4].mxu0 %v29897_v54  ;;  %v29908_v54 = vld [vmem:[#allocation324_spill] sm:$0xff] }
 0x4c2   : > { %21501 = vmatprep.mubr.f32.mxu0 %v29898_v20  ;;  %v29909_v20 = vld [vmem:[#allocation89_spill] sm:$0xff] }
 0x4c3   : > { %20149 = vmatmul.mubr.f32.gmra.mrb[4].mxu1 %v29899_v4  ;;  %v29910_v4 = vld [vmem:[#allocation93_spill] sm:$0xff] }
 0x4c4   : > { %20151 = vmatprep.mubr.f32.mxu1 %v29900_v15  ;;  %v29911_v15 = vld [vmem:[#allocation328_spill] sm:$0xff] }
 0x4c5   : > { %21502 = vmatmul.mubr.f32.gmra.mrb[6].mxu0 %v29901_v56  ;;  %v29912_v56 = vld [vmem:[#allocation331_spill] sm:$0xff] }
 0x4c6   : > { %21504 = vmatprep.mubr.f32.mxu0 %v29902_v61  ;;  %v29913_v61 = vld [vmem:[#allocation94_spill] sm:$0xff] }
 0x4c7   : > { %20152 = vmatmul.mubr.f32.gmra.mrb[6].mxu1 %v29903_v51  ;;  %v29914_v51 = vld [vmem:[#allocation107_spill] sm:$0xff] }
 0x4c8   : > { %20154 = vmatprep.mubr.f32.mxu1 %v29904_v7  ;;  %v29915_v7 = vld [vmem:[#allocation339_spill] sm:$0xff] }
 0x4c9   : > { %21505 = vmatmul.mubr.f32.gmra.mrb[8].mxu0 %v29905_v34  ;;  %v29916_v34 = vld [vmem:[#allocation342_spill] sm:$0xff] }
 0x4ca   : > { %21507 = vmatprep.mubr.f32.mxu0 %v29906_v63  ;;  %v29917_v63 = vld [vmem:[#allocation109_spill] sm:$0xff] }
 0x4cb   : > { %20155 = vmatmul.mubr.f32.gmra.mrb[8].mxu1 %v29907_v26  ;;  %v29918_v26 = vld [vmem:[#allocation112_spill] sm:$0xff] }
 0x4cc   : > { %20157 = vmatprep.mubr.f32.mxu1 %v29908_v54  ;;  %v29919_v54 = vld [vmem:[#allocation347_spill] sm:$0xff] }
 0x4cd   : > { %21508 = vmatmul.mubr.f32.gmra.mrb[10].mxu0 %v29909_v20  ;;  %v29920_v20 = vld [vmem:[#allocation350_spill] sm:$0xff] }
 0x4ce   : > { %21510 = vmatprep.mubr.f32.mxu0 %v29910_v4  ;;  %v29921_v4 = vld [vmem:[#allocation117_spill] sm:$0xff] }
 0x4cf   : > { %20158 = vmatmul.mubr.f32.gmra.mrb[10].mxu1 %v29911_v15  ;;  %v29922_v15 = vld [vmem:[#allocation128_spill] sm:$0xff] }
 0x4d0   : > { %20160 = vmatprep.mubr.f32.mxu1 %v29912_v56  ;;  %v29923_v56 = vld [vmem:[#allocation353_spill] sm:$0xff] }
 0x4d1   : > { %21511 = vmatmul.mubr.f32.gmra.mrb[12].mxu0 %v29913_v61  ;;  %v29924_v61 = vld [vmem:[#allocation357_spill] sm:$0xff] }
 0x4d2   : > { %21513 = vmatprep.mubr.f32.mxu0 %v29914_v51  ;;  %v29925_v51 = vld [vmem:[#allocation131_spill] sm:$0xff] }
 0x4d3   : > { %20161 = vmatmul.mubr.f32.gmra.mrb[12].mxu1 %v29915_v7  ;;  %v29926_v7 = vld [vmem:[#allocation134_spill] sm:$0xff] }
 0x4d4   : > { %20163 = vmatprep.mubr.f32.mxu1 %v29916_v34  ;;  %v29927_v34 = vld [vmem:[#allocation360_spill] sm:$0xff] }
 0x4d5   : > { %21514 = vmatmul.mubr.f32.gmra.mrb[14].mxu0 %v29917_v63  ;;  %v29928_v63 = vld [vmem:[#allocation361_spill] sm:$0xff] }
 0x4d6   : > { %21516 = vmatprep.mubr.f32.mxu0 %v29918_v26  ;;  %v29929_v26 = vld [vmem:[#allocation140_spill] sm:$0xff] }
 0x4d7   : > { %20164 = vmatmul.mubr.f32.gmra.mrb[14].mxu1 %v29919_v54  ;;  %v29930_v54 = vld [vmem:[#allocation147_spill] sm:$0xff] }
 0x4d8   : > { %20166 = vmatprep.mubr.f32.mxu1 %v29920_v20  ;;  %v29931_v20 = vld [vmem:[#allocation368_spill] sm:$0xff] }
 0x4d9   : > { %21517 = vmatmul.mubr.f32.gmra.mrb[16].mxu0 %v29921_v4  ;;  %v29932_v4 = vld [vmem:[#allocation372_spill] sm:$0xff] }
 0x4da   : > { %21519 = vmatprep.mubr.f32.mxu0 %v29922_v15  ;;  %v29933_v15 = vld [vmem:[#allocation150_spill] sm:$0xff] }
 0x4db   : > { %20167 = vmatmul.mubr.f32.gmra.mrb[16].mxu1 %v29923_v56  ;;  %v29934_v56 = vld [vmem:[#allocation158_spill] sm:$0xff] }
 0x4dc   : > { %20169 = vmatprep.mubr.f32.mxu1 %v29924_v61  ;;  %v29935_v61 = vld [vmem:[#allocation375_spill] sm:$0xff] }
 0x4dd   : > { %21520 = vmatmul.mubr.f32.gmra.mrb[18].mxu0 %v29925_v51  ;;  %v29936_v51 = vld [vmem:[#allocation378_spill] sm:$0xff] }
 0x4de   : > { %21522 = vmatprep.mubr.f32.mxu0 %v29926_v7  ;;  %v29937_v7 = vld [vmem:[#allocation163_spill] sm:$0xff] }
 0x4df   : > { %20170 = vmatmul.mubr.f32.gmra.mrb[18].mxu1 %v29927_v34  ;;  %v29938_v34 = vld [vmem:[#allocation166_spill] sm:$0xff] }
 0x4e0   : > { %20172 = vmatprep.mubr.f32.mxu1 %v29928_v63  ;;  %v29939_v63 = vld [vmem:[#allocation380_spill] sm:$0xff] }
 0x4e1   : > { %21523 = vmatmul.mubr.f32.gmra.mrb[20].mxu0 %v29929_v26  ;;  %v29940_v26 = vld [vmem:[#allocation382_spill] sm:$0xff] }
 0x4e2   : > { %21525 = vmatprep.mubr.f32.mxu0 %v29930_v54  ;;  %v29941_v54 = vld [vmem:[#allocation167_spill] sm:$0xff] }
 0x4e3   : > { %20173 = vmatmul.mubr.f32.gmra.mrb[20].mxu1 %v29931_v20  ;;  %v29942_v20 = vld [vmem:[#allocation383_spill] sm:$0xff] }
 0x4e4   : > { %20175 = vmatprep.mubr.f32.mxu1 %v29932_v4  ;;  %v29943_v4 = vld [vmem:[#allocation384_spill] sm:$0xff] }
 0x4e5   : > { %21526 = vmatmul.mubr.f32.gmra.mrb[22].mxu0 %v29933_v15  ;;  %v17449_v15 = vld [vmem:[%s27900_s1 + $0x20] sm:$0xf] }
 0x4e6   : > { %21528 = vmatprep.mubr.f32.mxu0 %v29934_v56  ;;  %v29944_v56 = vand.u32 4294901760, %v26784_v5  ;;  %v29950_v5 = vld [vmem:[#allocation181_spill] sm:$0xff] }
 0x4e7   : > { %20176 = vmatmul.mubr.f32.gmra.mrb[22].mxu1 %v29935_v61  ;;  %v29945_v61 = vld [vmem:[#allocation385_spill] sm:$0xff] }
 0x4e8   : > { %20178 = vmatprep.mubr.f32.mxu1 %v29936_v51  ;;  %v29946_v51 = vld [vmem:[#allocation395_spill] sm:$0xff] }
 0x4e9   : > { %21529 = vmatmul.mubr.f32.gmra.mrb[24].mxu0 %v29937_v7  ;;  %v27046_v7 = vsel %vm497_vm0, %v17449_v15, 0  ;;  %v29958_v15 = vld [vmem:[#allocation298_spill] sm:$0xff] }
 0x4ea   : > { %21531 = vmatprep.mubr.f32.mxu0 %v29938_v34  ;;  %v27053_v34 = vand.u32 4294901760, %v27046_v7 }
 0x4eb   : > { %20179 = vmatmul.mubr.f32.gmra.mrb[24].mxu1 %v29939_v63  ;;  %v29949_v63 = vld [vmem:[#allocation179_spill] sm:$0xff] }
 0x4ec   : > { %20181 = vmatprep.mubr.f32.mxu1 %v29940_v26  ;;  %v29952_v26 = vld [vmem:[#allocation271_spill] sm:$0xff] }
 0x4ed   : > { %21532 = vmatmul.mubr.f32.gmra.mrb[26].mxu0 %v29941_v54  ;;  %v29953_v54 = vld [vmem:[#allocation274_spill] sm:$0xff] }
 0x4ee   : > { %21534 = vmatprep.mubr.f32.mxu0 %v29799_v30  ;;  %v29947_v30 = vand.u32 4294901760, %v26790_v18  ;;  %v29951_v18 = vld [vmem:[#allocation270_spill] sm:$0xff] }
 0x4ef   : > { %20182 = vmatmul.mubr.f32.gmra.mrb[26].mxu1 %v29942_v20  ;;  %v29956_v20 = vld [vmem:[#allocation80_spill] sm:$0xff] }
 0x4f0   : > { %20184 = vmatprep.mubr.f32.mxu1 %v29943_v4  ;;  %v29957_v4 = vld [vmem:[#allocation83_spill] sm:$0xff] }
 0x4f1   : > { %21535 = vmatmul.mubr.f32.gmra.mrb[28].mxu0 %v29804_v3  ;;  %v29948_v3 = vld [vmem:[#allocation396_spill] sm:$0xff] }
 0x4f2   : > { %21537 = vmatprep.mubr.f32.mxu0 %v29944_v56  ;;  %v29959_v56 = vld [vmem:[#allocation299_spill] sm:$0xff] }
 0x4f3   : > { %20185 = vmatmul.mubr.f32.gmra.mrb[28].mxu1 %v29945_v61  ;;  %v29960_v61 = vld [vmem:[#allocation85_spill] sm:$0xff] }
 0x4f4   : > { %20187 = vmatprep.mubr.f32.mxu1 %v29946_v51  ;;  %v29961_v51 = vld [vmem:[#allocation95_spill] sm:$0xff] }
 0x4f5   : > { %21538 = vmatmul.mubr.f32.gmra.mrb[30].mxu0 %v29947_v30  ;;  %v29962_v30 = vld [vmem:[#allocation307_spill] sm:$0xff] }
 0x4f6   : > { %21542 = vmatprep.mubr.f32.mxu0 %v29816_v12 }
 0x4f7   : > { %20188 = vmatmul.mubr.f32.gmra.mrb[30].mxu1 %v29948_v3  ;;  %v29963_v3 = vld [vmem:[#allocation311_spill] sm:$0xff] }
 0x4f8   : > { %20192 = vmatprep.mubr.f32.mxu1 %v29949_v63 }
 0x4f9   : > { %21543 = vmatmul.mubr.f32.vlgmr.msra.gmra.mrb[0].mxu0 %v29818_v57 }
 0x4fa   : > { %21545 = vmatprep.mubr.f32.mxu0 %v29819_v8  ;;  %21591 = vmatpush3.msra.mxu0 %v26564_v23  ;;  %v29954_v23 = vld [vmem:[#allocation277_spill] sm:$0xff] }
 0x4fb   : > { %20193 = vmatmul.mubr.f32.vlgmr.msra.gmra.mrb[0].mxu1 %v29950_v5  ;;  %21640 = vmatprep.subr.mxu0 %v27053_v34 }
 0x4fc   : > { %20241 = vmatpush3.msra.mxu1 %v26889_v50  ;;  %20195 = vmatprep.mubr.f32.mxu1 %v29951_v18  ;;  %v29955_v50 = vld [vmem:[#allocation295_spill] sm:$0xff] }
 0x4fd   : > { %21546 = vmatmul.mubr.f32.gmra.mrb[2].mxu0 %v29820_v38  ;;  %20290 = vmatprep.subr.mxu1 %v26830_v16 }
 0x4fe   : > { %21548 = vmatprep.mubr.f32.mxu0 %v29821_v13 }
 0x4ff   : > { %20196 = vmatmul.mubr.f32.gmra.mrb[2].mxu1 %v29952_v26 }
 0x500   : > { %20198 = vmatprep.mubr.f32.mxu1 %v29953_v54 }
 0x501   : > { %21549 = vmatmul.mubr.f32.gmra.mrb[4].mxu0 %v29822_v60 }
 0x502   : > { %21551 = vmatprep.mubr.f32.mxu0 %v29823_v42 }
 0x503   : > { %20199 = vmatmul.mubr.f32.gmra.mrb[4].mxu1 %v29954_v23 }
 0x504   : > { %20201 = vmatprep.mubr.f32.mxu1 %v29587_v24 }
 0x505   : > { %21552 = vmatmul.mubr.f32.gmra.mrb[6].mxu0 %v29824_v35 }
 0x506   : > { %21554 = vmatprep.mubr.f32.mxu0 %v29825_v0 }
 0x507   : > { %20202 = vmatmul.mubr.f32.gmra.mrb[6].mxu1 %v29589_v62 }
 0x508   : > { %20204 = vmatprep.mubr.f32.mxu1 %v29590_v11 }
 0x509   : > { %21555 = vmatmul.mubr.f32.gmra.mrb[8].mxu0 %v29826_v53 }
 0x50a   : > { %21557 = vmatprep.mubr.f32.mxu0 %v29827_v55 }
 0x50b   : > { %20205 = vmatmul.mubr.f32.gmra.mrb[8].mxu1 %v29591_v52  ;;  %v29996_v52 = vld [vmem:[#allocation386_spill] sm:$0xff] }
 0x50c   : > { %20207 = vmatprep.mubr.f32.mxu1 %v29955_v50  ;;  %v29994_v50 = vld [vmem:[#allocation371_spill] sm:$0xff] }
 0x50d   : > { %21558 = vmatmul.mubr.f32.gmra.mrb[10].mxu0 %v29956_v20 }
 0x50e   : > { %21560 = vmatprep.mubr.f32.mxu0 %v29957_v4 }
 0x50f   : > { %20208 = vmatmul.mubr.f32.gmra.mrb[10].mxu1 %v29958_v15  ;;  %v29986_v15 = vld [vmem:[#allocation359_spill] sm:$0xff] }
 0x510   : > { %20210 = vmatprep.mubr.f32.mxu1 %v29959_v56  ;;  %v29985_v56 = vld [vmem:[#allocation356_spill] sm:$0xff] }
 0x511   : > { %21561 = vmatmul.mubr.f32.gmra.mrb[12].mxu0 %v29960_v61 }
 0x512   : > { %21563 = vmatprep.mubr.f32.mxu0 %v29961_v51 }
 0x513   : > { %20211 = vmatmul.mubr.f32.gmra.mrb[12].mxu1 %v29962_v30  ;;  %v27105_v30 = vld [vmem:[%s23928_s13 + $0x1a0] sm:$0xff]  ;;  %s17457_s13 = sshll.u32 %s23910_s9, 8  ;;  %s27813_s9 = sand.u32 1, %s23809_s19  }
 0x514   : > { %20213 = vmatprep.mubr.f32.mxu1 %v29963_v3  ;;  %v15208_v3 = vrot.slane %v23721_v43, 2  ;;  %v29984_v43 = vld [vmem:[#allocation153_spill] sm:$0xff]  ;;  %s27651_s23 = scalar_lea.vmem %s27902_s3, %s17457_s13  ;;  %s17437_s25 = sshll.u32 %s27813_s9, 3 }
 0x515   : > { %21564 = vmatmul.mubr.f32.gmra.mrb[14].mxu0 %v29964_v21  ;;  %s228_s30 = scalar_lea.vmem [#allocation2], %s17437_s25  ;;  %s27818_s7 = scalar_lea.vmem [#allocation4], %s17437_s25 }
 0x516   : > { %21566 = vmatprep.mubr.f32.mxu0 %v29965_v25  ;;  %s17304_s6 = sshll.u32 %s228_s30, 4  ;;  %s17317_s8 = sshll.u32 %s27818_s7, 4  ;;  %s27826_s6 = int_to_ptr.vmem [resolvable:$true] %s17304_s6  ;;  %s27834_s8 = int_to_ptr.vmem [resolvable:$true] %s17317_s8 }
 0x517   : > { %20214 = vmatmul.mubr.f32.gmra.mrb[14].mxu1 %v29966_v41  ;;  %v29977_v41 = vld [vmem:[#allocation136_spill] sm:$0xff]  ;;  %s17283_s15 = scalar_lea.sflag [#allocation3], %s27813_s9  ;;  %s23723_s16 = scalar_lea.vmem %s27826_s6, 128 }
 0x518   : > { %20216 = vmatprep.mubr.f32.mxu1 %v29967_v31  ;;  %v29978_v31 = vld [vmem:[#allocation338_spill] sm:$0xff]  ;;  %p23724_p11 = scmp.ne.s32.totalorder %s27826_s6, %s23723_s16 }
 0x519   : > { %21567 = vmatmul.mubr.f32.gmra.mrb[16].mxu0 %v29968_v44 }
 0x51a   : > { %21569 = vmatprep.mubr.f32.mxu0 %v29969_v19  ;;  %p23725_p12 = pnand %p23724_p11, %p23889_p5 }
 0x51b   : > { %20217 = vmatmul.mubr.f32.gmra.mrb[16].mxu1 %v29970_v28  ;;  %v29979_v28 = vld [vmem:[#allocation341_spill] sm:$0xff] }
 0x51c   : > { %20219 = vmatprep.mubr.f32.mxu1 %v29971_v22  ;;  %v28829_v22 = vrot.slane %v27105_v30, 2  ;;  %p23726_p13 = pneg %p23725_p12 }
 0x51d   : > { %21570 = vmatmul.mubr.f32.gmra.mrb[18].mxu0 %v29972_v29 }
 0x51e   : > { %21572 = vmatprep.mubr.f32.mxu0 %v29973_v9 }
 0x51f   : > { %20220 = vmatmul.mubr.f32.gmra.mrb[18].mxu1 %v29974_v59  ;;  %v29982_v59 = vld [vmem:[#allocation349_spill] sm:$0xff] }
 0x520   : > { %20222 = vmatprep.mubr.f32.mxu1 %v29975_v58  ;;  %v29983_v58 = vld [vmem:[#allocation351_spill] sm:$0xff] }
 0x521   : > { %21573 = vmatmul.mubr.f32.gmra.mrb[20].mxu0 %v29976_v46 }
 0x522   : > { %21575 = vmatprep.mubr.f32.mxu0 %v29977_v41 }
 0x523   : > { %20223 = vmatmul.mubr.f32.gmra.mrb[20].mxu1 %v29978_v31  ;;  %v27116_v31 = vsel %vm4126_vm3, %v15208_v3, %v28829_v22  ;;  %v29991_v22 = vld [vmem:[#allocation367_spill] sm:$0xff] }
 0x524   : > { %20225 = vmatprep.mubr.f32.mxu1 %v29979_v28  ;;  %v27123_v28 = vsub.f32 %v27046_v7, %v27053_v34 }
 0x525   : > { %21576 = vmatmul.mubr.f32.gmra.mrb[22].mxu0 %v29980_v40 }
 0x526   : > { %21578 = vmatprep.mubr.f32.mxu0 %v29981_v48  ;;  %v27130_v3 = vand.u32 4294901760, %v27123_v28 }
 0x527   : > { %20226 = vmatmul.mubr.f32.gmra.mrb[22].mxu1 %v29982_v59  ;;  %v29987_v59 = vld [vmem:[#allocation161_spill] sm:$0xff] }
 0x528   : > { %20228 = vmatprep.mubr.f32.mxu1 %v29983_v58  ;;  %v29988_v58 = vld [vmem:[#allocation169_spill] sm:$0xff]  ;;  %29990 = vst [vmem:[#allocation63_spill] sm:$0xff] %v27130_v3  ;;  %v15612_v7 = vsub.f32 %v27123_v28, %v27130_v3 }
 0x529   : > { %21579 = vmatmul.mubr.f32.gmra.mrb[24].mxu0 %v29984_v43  ;;  %v30000_v3 = vld [vmem:[#allocation273_spill] sm:$0xff] }
 0x52a   : > { %21581 = vmatprep.mubr.f32.mxu0 %v29851_v17  ;;  %v27142_v36 = vand.u32 4294901760, %v15612_v7  ;;  %v30002_v7 = vld [vmem:[#allocation279_spill] sm:$0xff] }
 0x52b   : > { %20229 = vmatmul.mubr.f32.gmra.mrb[24].mxu1 %v29985_v56  ;;  %v29993_v56 = vld [vmem:[#allocation284_spill] sm:$0xff] }
 0x52c   : > { %20231 = vmatprep.mubr.f32.mxu1 %v29986_v15  ;;  %v29995_v15 = vld [vmem:[#allocation180_spill] sm:$0xff] }
 0x52d   : > { %21582 = vmatmul.mubr.f32.gmra.mrb[26].mxu0 %v29987_v59 }
 0x52e   : > { %21584 = vmatprep.mubr.f32.mxu0 %v29988_v58 }
 0x52f   : > { %20232 = vmatmul.mubr.f32.gmra.mrb[26].mxu1 %v29989_v49  ;;  %v29997_v49 = vld [vmem:[#allocation387_spill] sm:$0xff] }
 0x530   : > { %20234 = vmatprep.mubr.f32.mxu1 %v29991_v22  ;;  %v29998_v22 = vld [vmem:[#allocation269_spill] sm:$0xff] }
 0x531   : > { %21585 = vmatmul.mubr.f32.gmra.mrb[28].mxu0 %v29992_v2 }
 0x532   : > { %21587 = vmatprep.mubr.f32.mxu0 %v29993_v56 }
 0x533   : > { %20235 = vmatmul.mubr.f32.gmra.mrb[28].mxu1 %v29994_v50  ;;  %v29999_v50 = vld [vmem:[#allocation182_spill] sm:$0xff] }
 0x534   : > { %20237 = vmatprep.mubr.f32.mxu1 %v29995_v15 }
 0x535   : > { %21588 = vmatmul.mubr.f32.gmra.mrb[30].mxu0 %v29996_v52 }
 0x536   : > { %21592 = vmatprep.mubr.f32.mxu0 %v29816_v12 }
 0x537   : > { %20238 = vmatmul.mubr.f32.gmra.mrb[30].mxu1 %v29997_v49 }
 0x538   : > { %20242 = vmatprep.mubr.f32.mxu1 %v29998_v22  ;;  %v30001_v22 = vld [vmem:[#allocation276_spill] sm:$0xff] }
 0x539   : > { %21593 = vmatmul.mubr.f32.vlgmr.msra.gmra.mrb[0].mxu0 %v29818_v57 }
 0x53a   : > { %21595 = vmatprep.mubr.f32.mxu0 %v29819_v8  ;;  %21641 = vmatpush3.msra.mxu0 %v27053_v34  ;;  %v30004_v8 = vld [vmem:[#allocation287_spill] sm:$0xff] }
 0x53b   : > { %20243 = vmatmul.mubr.f32.vlgmr.msra.gmra.mrb[0].mxu1 %v29999_v50  ;;  %21690 = vmatprep.subr.mxu0 %v27142_v36  ;;  %v30003_v50 = vld [vmem:[#allocation282_spill] sm:$0xff] }
 0x53c   : > { %20291 = vmatpush3.msra.mxu1 %v26830_v16  ;;  %20245 = vmatprep.mubr.f32.mxu1 %v30000_v3  ;;  %v30005_v3 = vld [vmem:[#allocation291_spill] sm:$0xff] }
 0x53d   : > { %21596 = vmatmul.mubr.f32.gmra.mrb[2].mxu0 %v29820_v38  ;;  %20340 = vmatprep.subr.mxu1 %v26896_v32  ;;  %v30006_v38 = vld [vmem:[#allocation292_spill] sm:$0xff] }
 0x53e   : > { %21598 = vmatprep.mubr.f32.mxu0 %v29821_v13 }
 0x53f   : > { %20246 = vmatmul.mubr.f32.gmra.mrb[2].mxu1 %v30001_v22  ;;  %v30007_v22 = vld [vmem:[#allocation297_spill] sm:$0xff] }
 0x540   : > { %20248 = vmatprep.mubr.f32.mxu1 %v30002_v7  ;;  %v30008_v7 = vld [vmem:[#allocation303_spill] sm:$0xff] }
 0x541   : > { %21599 = vmatmul.mubr.f32.gmra.mrb[4].mxu0 %v29822_v60 }
 0x542   : > { %21601 = vmatprep.mubr.f32.mxu0 %v29823_v42 }
 0x543   : > { %20249 = vmatmul.mubr.f32.gmra.mrb[4].mxu1 %v30003_v50  ;;  %v30010_v50 = vld [vmem:[#allocation306_spill] sm:$0xff] }
 0x544   : > { %20251 = vmatprep.mubr.f32.mxu1 %v30004_v8  ;;  %v30009_v8 = vld [vmem:[#allocation305_spill] sm:$0xff] }
 0x545   : > { %21602 = vmatmul.mubr.f32.gmra.mrb[6].mxu0 %v29824_v35 }
 0x546   : > { %21604 = vmatprep.mubr.f32.mxu0 %v29825_v0 }
 0x547   : > { %20252 = vmatmul.mubr.f32.gmra.mrb[6].mxu1 %v30005_v3  ;;  %v30012_v3 = vld [vmem:[#allocation318_spill] sm:$0xff] }
 0x548   : > { %20254 = vmatprep.mubr.f32.mxu1 %v30006_v38  ;;  %v30011_v38 = vld [vmem:[#allocation314_spill] sm:$0xff] }
 0x549   : > { %21605 = vmatmul.mubr.f32.gmra.mrb[8].mxu0 %v29826_v53 }
 0x54a   : > { %21607 = vmatprep.mubr.f32.mxu0 %v29827_v55  ;;  %v30137_v55 = vld [vmem:[#allocation371_spill] sm:$0xff] }
 0x54b   : > { %20255 = vmatmul.mubr.f32.gmra.mrb[8].mxu1 %v30007_v22  ;;  %v30013_v22 = vld [vmem:[#allocation322_spill] sm:$0xff] }
 0x54c   : > { %20257 = vmatprep.mubr.f32.mxu1 %v30008_v7  ;;  %v30014_v7 = vld [vmem:[#allocation326_spill] sm:$0xff] }
 0x54d   : > { %21608 = vmatmul.mubr.f32.gmra.mrb[10].mxu0 %v29956_v20  ;;  %v30130_v20 = vld [vmem:[#allocation356_spill] sm:$0xff] }
 0x54e   : > { %21610 = vmatprep.mubr.f32.mxu0 %v29957_v4  ;;  %v30129_v4 = vld [vmem:[#allocation241_spill] sm:$0xff] }
 0x54f   : > { %20258 = vmatmul.mubr.f32.gmra.mrb[10].mxu1 %v30009_v8  ;;  %v30015_v8 = vld [vmem:[#allocation333_spill] sm:$0xff] }
 0x550   : > { %20260 = vmatprep.mubr.f32.mxu1 %v30010_v50  ;;  %v30016_v50 = vld [vmem:[#allocation335_spill] sm:$0xff] }
 0x551   : > { %21611 = vmatmul.mubr.f32.gmra.mrb[12].mxu0 %v29960_v61  ;;  %v30122_v61 = vld [vmem:[#allocation338_spill] sm:$0xff] }
 0x552   : > { %21613 = vmatprep.mubr.f32.mxu0 %v29961_v51  ;;  %v30121_v51 = vld [vmem:[#allocation228_spill] sm:$0xff] }
 0x553   : > { %20261 = vmatmul.mubr.f32.gmra.mrb[12].mxu1 %v30011_v38  ;;  %v30017_v38 = vld [vmem:[#allocation336_spill] sm:$0xff] }
 0x554   : > { %20263 = vmatprep.mubr.f32.mxu1 %v30012_v3  ;;  %v30018_v3 = vld [vmem:[#allocation337_spill] sm:$0xff] }
 0x555   : > { %21614 = vmatmul.mubr.f32.gmra.mrb[14].mxu0 %v29964_v21  ;;  %v30120_v21 = vld [vmem:[#allocation227_spill] sm:$0xff] }
 0x556   : > { %21616 = vmatprep.mubr.f32.mxu0 %v29965_v25  ;;  %v30119_v25 = vld [vmem:[#allocation330_spill] sm:$0xff] }
 0x557   : > { %20264 = vmatmul.mubr.f32.gmra.mrb[14].mxu1 %v30013_v22  ;;  %v30019_v22 = vld [vmem:[#allocation346_spill] sm:$0xff] }
 0x558   : > { %20266 = vmatprep.mubr.f32.mxu1 %v30014_v7  ;;  %v30020_v7 = vld [vmem:[#allocation348_spill] sm:$0xff] }
 0x559   : > { %21617 = vmatmul.mubr.f32.gmra.mrb[16].mxu0 %v29968_v44  ;;  %v30118_v44 = vld [vmem:[#allocation329_spill] sm:$0xff] }
 0x55a   : > { %21619 = vmatprep.mubr.f32.mxu0 %v29969_v19  ;;  %v30117_v19 = vld [vmem:[#allocation124_spill] sm:$0xff] }
 0x55b   : > { %20267 = vmatmul.mubr.f32.gmra.mrb[16].mxu1 %v30015_v8  ;;  %v30021_v8 = vld [vmem:[#allocation355_spill] sm:$0xff] }
 0x55c   : > { %20269 = vmatprep.mubr.f32.mxu1 %v30016_v50  ;;  %v30022_v50 = vld [vmem:[#allocation358_spill] sm:$0xff] }
 0x55d   : > { %21620 = vmatmul.mubr.f32.gmra.mrb[18].mxu0 %v29972_v29  ;;  %v30116_v29 = vld [vmem:[#allocation220_spill] sm:$0xff] }
 0x55e   : > { %21622 = vmatprep.mubr.f32.mxu0 %v29973_v9  ;;  %v30115_v9 = vld [vmem:[#allocation327_spill] sm:$0xff] }
 0x55f   : > { %20270 = vmatmul.mubr.f32.gmra.mrb[18].mxu1 %v30017_v38  ;;  %v30023_v38 = vld [vmem:[#allocation363_spill] sm:$0xff] }
 0x560   : > { %20272 = vmatprep.mubr.f32.mxu1 %v30018_v3  ;;  %v30024_v3 = vld [vmem:[#allocation366_spill] sm:$0xff] }
 0x561   : > { %21623 = vmatmul.mubr.f32.gmra.mrb[20].mxu0 %v29976_v46  ;;  %v30114_v46 = vld [vmem:[#allocation323_spill] sm:$0xff] }
 0x562   : > { %21625 = vmatprep.mubr.f32.mxu0 %v29977_v41  ;;  %v30113_v41 = vld [vmem:[#allocation219_spill] sm:$0xff] }
 0x563   : > { %20273 = vmatmul.mubr.f32.gmra.mrb[20].mxu1 %v30019_v22  ;;  %v30025_v22 = vld [vmem:[#allocation370_spill] sm:$0xff] }
 0x564   : > { %20275 = vmatprep.mubr.f32.mxu1 %v30020_v7  ;;  %v30026_v7 = vld [vmem:[#allocation374_spill] sm:$0xff] }
 0x565   : > { %21626 = vmatmul.mubr.f32.gmra.mrb[22].mxu0 %v29980_v40  ;;  %v30112_v40 = vld [vmem:[#allocation216_spill] sm:$0xff] }
 0x566   : > { %21628 = vmatprep.mubr.f32.mxu0 %v29981_v48  ;;  %v30111_v48 = vld [vmem:[#allocation319_spill] sm:$0xff] }
 0x567   : > { %20276 = vmatmul.mubr.f32.gmra.mrb[22].mxu1 %v30021_v8  ;;  %v30027_v8 = vld [vmem:[#allocation377_spill] sm:$0xff] }
 0x568   : > { %20278 = vmatprep.mubr.f32.mxu1 %v30022_v50  ;;  %v30028_v50 = vld [vmem:[#allocation388_spill] sm:$0xff] }
 0x569   : > { %21629 = vmatmul.mubr.f32.gmra.mrb[24].mxu0 %v29984_v43  ;;  %v30110_v43 = vld [vmem:[#allocation317_spill] sm:$0xff] }
 0x56a   : > { %21631 = vmatprep.mubr.f32.mxu0 %v29851_v17  ;;  %v30092_v17 = vld [vmem:[#allocation267_spill] sm:$0xff] }
 0x56b   : > { %20279 = vmatmul.mubr.f32.gmra.mrb[24].mxu1 %v30023_v38  ;;  %v30029_v38 = vld [vmem:[#allocation194_spill] sm:$0xff] }
 0x56c   : > { %20281 = vmatprep.mubr.f32.mxu1 %v30024_v3  ;;  %v30030_v3 = vld [vmem:[#allocation389_spill] sm:$0xff] }
 0x56d   : > { %21632 = vmatmul.mubr.f32.gmra.mrb[26].mxu0 %v29987_v59  ;;  %v30031_v59 = vld [vmem:[#allocation272_spill] sm:$0xff] }
 0x56e   : > { %21634 = vmatprep.mubr.f32.mxu0 %v29988_v58  ;;  %v30032_v58 = vld [vmem:[#allocation200_spill] sm:$0xff] }
 0x56f   : > { %20282 = vmatmul.mubr.f32.gmra.mrb[26].mxu1 %v30025_v22  ;;  %v30033_v22 = vld [vmem:[#allocation203_spill] sm:$0xff] }
 0x570   : > { %20284 = vmatprep.mubr.f32.mxu1 %v30026_v7  ;;  %v30034_v7 = vld [vmem:[#allocation275_spill] sm:$0xff] }
 0x571   : > { %21635 = vmatmul.mubr.f32.gmra.mrb[28].mxu0 %v29992_v2  ;;  %v30090_v2 = vld [vmem:[#allocation376_spill] sm:$0xff] }
 0x572   : > { %21637 = vmatprep.mubr.f32.mxu0 %v29993_v56  ;;  %v30035_v56 = vld [vmem:[#allocation278_spill] sm:$0xff] }
 0x573   : > { %20285 = vmatmul.mubr.f32.gmra.mrb[28].mxu1 %v30027_v8  ;;  %v30037_v8 = vld [vmem:[#allocation206_spill] sm:$0xff] }
 0x574   : > { %20287 = vmatprep.mubr.f32.mxu1 %v30028_v50  ;;  %v30040_v50 = vld [vmem:[#allocation82_spill] sm:$0xff] }
 0x575   : > { %21638 = vmatmul.mubr.f32.gmra.mrb[30].mxu0 %v29996_v52  ;;  %v30036_v52 = vld [vmem:[#allocation16_spill] sm:$0xff] }
 0x576   : > { %21642 = vmatprep.mubr.f32.mxu0 %v30029_v38  ;;  %v30042_v38 = vld [vmem:[#allocation289_spill] sm:$0xff] }
 0x577   : > { %20288 = vmatmul.mubr.f32.gmra.mrb[30].mxu1 %v30030_v3  ;;  %v30043_v3 = vld [vmem:[#allocation294_spill] sm:$0xff] }
 0x578   : > { %20292 = vmatprep.mubr.f32.mxu1 %v30031_v59  ;;  %v30038_v59 = vld [vmem:[#allocation281_spill] sm:$0xff] }
 0x579   : > { %21643 = vmatmul.mubr.f32.vlgmr.msra.gmra.mrb[0].mxu0 %v30032_v58  ;;  %v30039_v58 = vld [vmem:[#allocation286_spill] sm:$0xff] }
 0x57a   : > { %21645 = vmatprep.mubr.f32.mxu0 %v30033_v22  ;;  %21691 = vmatpush3.msra.mxu0 %v27142_v36  ;;  %v30041_v36 = vld [vmem:[#allocation208_spill] sm:$0xff]  ;;  %v30045_v22 = vld [vmem:[#allocation105_spill] sm:$0xff] }
 0x57b   : > { %20293 = vmatmul.mubr.f32.vlgmr.msra.gmra.mrb[0].mxu1 %v30034_v7  ;;  %21740 = vmatprep.subr.mxu0 %v27123_v28  ;;  %v30046_v7 = vld [vmem:[#allocation300_spill] sm:$0xff] }
 0x57c   : > { %20341 = vmatpush3.msra.mxu1 %v26896_v32  ;;  %20295 = vmatprep.mubr.f32.mxu1 %v30035_v56  ;;  %v30044_v32 = vld [vmem:[#allocation104_spill] sm:$0xff]  ;;  %v30047_v56 = vld [vmem:[#allocation301_spill] sm:$0xff] }
 0x57d   : > { %21646 = vmatmul.mubr.f32.gmra.mrb[2].mxu0 %v30036_v52  ;;  %20390 = vmatprep.subr.mxu1 %v26830_v16  ;;  %v30048_v52 = vld [vmem:[#allocation116_spill] sm:$0xff] }
 0x57e   : > { %21648 = vmatprep.mubr.f32.mxu0 %v30037_v8  ;;  %v30049_v8 = vld [vmem:[#allocation217_spill] sm:$0xff] }
 0x57f   : > { %20296 = vmatmul.mubr.f32.gmra.mrb[2].mxu1 %v30038_v59  ;;  %v30050_v59 = vld [vmem:[#allocation304_spill] sm:$0xff] }
 0x580   : > { %20298 = vmatprep.mubr.f32.mxu1 %v30039_v58  ;;  %v30051_v58 = vld [vmem:[#allocation310_spill] sm:$0xff] }
 0x581   : > { %21649 = vmatmul.mubr.f32.gmra.mrb[4].mxu0 %v30040_v50  ;;  %v30052_v50 = vld [vmem:[#allocation221_spill] sm:$0xff] }
 0x582   : > { %21651 = vmatprep.mubr.f32.mxu0 %v30041_v36  ;;  %v30053_v36 = vld [vmem:[#allocation127_spill] sm:$0xff] }
 0x583   : > { %20299 = vmatmul.mubr.f32.gmra.mrb[4].mxu1 %v30042_v38  ;;  %v30054_v38 = vld [vmem:[#allocation312_spill] sm:$0xff] }
 0x584   : > { %20301 = vmatprep.mubr.f32.mxu1 %v30043_v3  ;;  %v30055_v3 = vld [vmem:[#allocation313_spill] sm:$0xff] }
 0x585   : > { %21652 = vmatmul.mubr.f32.gmra.mrb[6].mxu0 %v30044_v32  ;;  %v30056_v32 = vld [vmem:[#allocation226_spill] sm:$0xff] }
 0x586   : > { %21654 = vmatprep.mubr.f32.mxu0 %v30045_v22  ;;  %v30057_v22 = vld [vmem:[#allocation138_spill] sm:$0xff] }
 0x587   : > { %20302 = vmatmul.mubr.f32.gmra.mrb[6].mxu1 %v30046_v7  ;;  %v30058_v7 = vld [vmem:[#allocation321_spill] sm:$0xff] }
 0x588   : > { %20304 = vmatprep.mubr.f32.mxu1 %v30047_v56  ;;  %v30059_v56 = vld [vmem:[#allocation325_spill] sm:$0xff] }
 0x589   : > { %21655 = vmatmul.mubr.f32.gmra.mrb[8].mxu0 %v30048_v52  ;;  %v30060_v52 = vld [vmem:[#allocation154_spill] sm:$0xff] }
 0x58a   : > { %21657 = vmatprep.mubr.f32.mxu0 %v30049_v8  ;;  %v30061_v8 = vld [vmem:[#allocation233_spill] sm:$0xff] }
 0x58b   : > { %20305 = vmatmul.mubr.f32.gmra.mrb[8].mxu1 %v30050_v59  ;;  %v30062_v59 = vld [vmem:[#allocation332_spill] sm:$0xff] }
 0x58c   : > { %20307 = vmatprep.mubr.f32.mxu1 %v30051_v58  ;;  %v30063_v58 = vld [vmem:[#allocation283_spill] sm:$0xff] }
 0x58d   : > { %21658 = vmatmul.mubr.f32.gmra.mrb[10].mxu0 %v30052_v50  ;;  %v15211_v50 = vrot.slane %v30063_v58, 2 }
 0x58e   : > { %21660 = vmatprep.mubr.f32.mxu0 %v30053_v36  ;;  %v30064_v36 = vld [vmem:[#allocation334_spill] sm:$0xff] }
 0x58f   : > { %20308 = vmatmul.mubr.f32.gmra.mrb[10].mxu1 %v30054_v38  ;;  %v30065_v38 = vld [vmem:[#allocation235_spill] sm:$0xff] }
 0x590   : > { %20310 = vmatprep.mubr.f32.mxu1 %v30055_v3  ;;  %v30066_v3 = vld [vmem:[#allocation239_spill] sm:$0xff] }
 0x591   : > { %21661 = vmatmul.mubr.f32.gmra.mrb[12].mxu0 %v30056_v32  ;;  %v30067_v32 = vld [vmem:[#allocation340_spill] sm:$0xff] }
 0x592   : > { %21663 = vmatprep.mubr.f32.mxu0 %v30057_v22  ;;  %v15215_v22 = vsel %vm432_vm2, %v27116_v31, 0 }
 0x593   : > { %20311 = vmatmul.mubr.f32.gmra.mrb[12].mxu1 %v30058_v7  ;;  %v30068_v7 = vrot.slane %v27105_v30, 2  ;;  %v27261_v58 = vand.u32 4294901760, %v15215_v22  ;;  %v30077_v30 = vld [vmem:[#allocation254_spill] sm:$0xff] }
 0x594   : > { %20313 = vmatprep.mubr.f32.mxu1 %v30059_v56 }
 0x595   : > { %21664 = vmatmul.mubr.f32.gmra.mrb[14].mxu0 %v30060_v52  ;;  %v15212_v56 = vsel %vm4126_vm3, %v30068_v7, %v15211_v50  ;;  %v30069_v52 = vld [vmem:[#allocation343_spill] sm:$0xff]  ;;  %30072 = vst [vmem:[#allocation66_spill] sm:$0xff] %v27261_v58  ;;  %v27271_v50 = vsub.f32 %v15215_v22, %v27261_v58  ;;  %v30078_v7 = vld [vmem:[#allocation352_spill] sm:$0xff] }
 0x596   : > { %21666 = vmatprep.mubr.f32.mxu0 %v30061_v8  ;;  %v30070_v8 = vld [vmem:[#allocation242_spill] sm:$0xff] }
 0x597   : > { %20314 = vmatmul.mubr.f32.gmra.mrb[14].mxu1 %v30062_v59  ;;  %v30071_v59 = vld [vmem:[#allocation243_spill] sm:$0xff] }
 0x598   : > { %20316 = vmatprep.mubr.f32.mxu1 %v30064_v36  ;;  %v15217_v36 = vsel %vm432_vm2, %v15212_v56, 0 }
 0x599   : > { %21667 = vmatmul.mubr.f32.gmra.mrb[16].mxu0 %v30065_v38  ;;  %v30073_v38 = vld [vmem:[#allocation344_spill] sm:$0xff]  ;;  %v27267_v31 = vand.u32 4294901760, %v15217_v36 }
 0x59a   : > { %21669 = vmatprep.mubr.f32.mxu0 %v30066_v3  ;;  %v30074_v3 = vld [vmem:[#allocation345_spill] sm:$0xff] }
 0x59b   : > { %20317 = vmatmul.mubr.f32.gmra.mrb[16].mxu1 %v30067_v32  ;;  %v30075_v32 = vld [vmem:[#allocation250_spill] sm:$0xff]  ;;  %30076 = vst [vmem:[#allocation15_spill] sm:$0xff] %v27267_v31  ;;  %v27277_v56 = vsub.f32 %v15217_v36, %v27267_v31  ;;  %v30086_v36 = vld [vmem:[#allocation369_spill] sm:$0xff] }
 0x59c   : > { %20319 = vmatprep.mubr.f32.mxu1 %v30069_v52  ;;  %v30079_v52 = vld [vmem:[#allocation354_spill] sm:$0xff] }
 0x59d   : > { %21670 = vmatmul.mubr.f32.gmra.mrb[18].mxu0 %v30070_v8  ;;  %v30080_v8 = vld [vmem:[#allocation257_spill] sm:$0xff]  ;;  %v28842_v22 = vand.u32 4294901760, %v27277_v56 }
 0x59e   : > { %21672 = vmatprep.mubr.f32.mxu0 %v30071_v59  ;;  %v30081_v59 = vld [vmem:[#allocation260_spill] sm:$0xff] }
 0x59f   : > { %20320 = vmatmul.mubr.f32.gmra.mrb[18].mxu1 %v30073_v38  ;;  %v28841_v38 = vand.u32 4294901760, %v27271_v50 }
 0x5a0   : > { %20322 = vmatprep.mubr.f32.mxu1 %v30074_v3  ;;  %v30082_v3 = vld [vmem:[#allocation362_spill] sm:$0xff] }
 0x5a1   : > { %21673 = vmatmul.mubr.f32.gmra.mrb[20].mxu0 %v30075_v32  ;;  %v30083_v32 = vld [vmem:[#allocation365_spill] sm:$0xff] }
 0x5a2   : > { %21675 = vmatprep.mubr.f32.mxu0 %v30077_v30  ;;  %v30084_v30 = vld [vmem:[#allocation262_spill] sm:$0xff] }
 0x5a3   : > { %20323 = vmatmul.mubr.f32.gmra.mrb[20].mxu1 %v30078_v7  ;;  %v30085_v7 = vld [vmem:[#allocation264_spill] sm:$0xff] }
 0x5a4   : > { %20325 = vmatprep.mubr.f32.mxu1 %v30079_v52  ;;  %v15591_v52 = vsub.f32 %v27271_v50, %v28841_v38 }
 0x5a5   : > { %21676 = vmatmul.mubr.f32.gmra.mrb[22].mxu0 %v30080_v8  ;;  %v30087_v8 = vld [vmem:[#allocation373_spill] sm:$0xff] }
 0x5a6   : > { %21678 = vmatprep.mubr.f32.mxu0 %v30081_v59  ;;  %v30088_v59 = vld [vmem:[#allocation265_spill] sm:$0xff] }
 0x5a7   : > { %20326 = vmatmul.mubr.f32.gmra.mrb[22].mxu1 %v30082_v3  ;;  %v15601_v3 = vsub.f32 %v27277_v56, %v28842_v22  ;;  %v30109_v22 = vld [vmem:[#allocation214_spill] sm:$0xff] }
 0x5a8   : > { %20328 = vmatprep.mubr.f32.mxu1 %v30083_v32  ;;  %v30089_v32 = vld [vmem:[#allocation266_spill] sm:$0xff] }
 0x5a9   : > { %21679 = vmatmul.mubr.f32.gmra.mrb[24].mxu0 %v30084_v30  ;;  %v15592_v30 = vand.u32 4294901760, %v15591_v52  ;;  %v15602_v38 = vand.u32 4294901760, %v15601_v3  ;;  %v30101_v52 = vld [vmem:[#allocation205_spill] sm:$0xff]  ;;  %v30102_v3 = vld [vmem:[#allocation298_spill] sm:$0xff] }
 0x5aa   : > { %21681 = vmatprep.mubr.f32.mxu0 %v30085_v7  ;;  %v30091_v7 = vld [vmem:[#allocation379_spill] sm:$0xff] }
 0x5ab   : > { %20329 = vmatmul.mubr.f32.gmra.mrb[24].mxu1 %v30086_v36  ;;  %v30093_v36 = vld [vmem:[#allocation381_spill] sm:$0xff] }
 0x5ac   : > { %20331 = vmatprep.mubr.f32.mxu1 %v30087_v8  ;;  %v30094_v8 = vld [vmem:[#allocation391_spill] sm:$0xff] }
 0x5ad   : > { %21682 = vmatmul.mubr.f32.gmra.mrb[26].mxu0 %v30088_v59  ;;  %v30095_v59 = vld [vmem:[#allocation393_spill] sm:$0xff] }
 0x5ae   : > { %21684 = vmatprep.mubr.f32.mxu0 %v30089_v32  ;;  %v30103_v32 = vld [vmem:[#allocation299_spill] sm:$0xff] }
 0x5af   : > { %20332 = vmatmul.mubr.f32.gmra.mrb[26].mxu1 %v30090_v2  ;;  %v30097_v2 = vld [vmem:[#allocation78_spill] sm:$0xff] }
 0x5b0   : > { %20334 = vmatprep.mubr.f32.mxu1 %v30091_v7  ;;  %v30105_v7 = vld [vmem:[#allocation100_spill] sm:$0xff] }
 0x5b1   : > { %21685 = vmatmul.mubr.f32.gmra.mrb[28].mxu0 %v30092_v17  ;;  %v30096_v17 = vld [vmem:[#allocation8_spill] sm:$0xff] }
 0x5b2   : > { %21687 = vmatprep.mubr.f32.mxu0 %v15592_v30  ;;  %v30104_v30 = vld [vmem:[#allocation209_spill] sm:$0xff] }
 0x5b3   : > { %20335 = vmatmul.mubr.f32.gmra.mrb[28].mxu1 %v30093_v36  ;;  %v30106_v36 = vld [vmem:[#allocation307_spill] sm:$0xff] }
 0x5b4   : > { %20337 = vmatprep.mubr.f32.mxu1 %v30094_v8  ;;  %v30107_v8 = vld [vmem:[#allocation311_spill] sm:$0xff] }
 0x5b5   : > { %21688 = vmatmul.mubr.f32.gmra.mrb[30].mxu0 %v15602_v38  ;;  %v30100_v38 = vld [vmem:[#allocation202_spill] sm:$0xff] }
 0x5b6   : > { %21692 = vmatprep.mubr.f32.mxu0 %v29684_v45 }
 0x5b7   : > { %20338 = vmatmul.mubr.f32.gmra.mrb[30].mxu1 %v30095_v59  ;;  %v30108_v59 = vld [vmem:[#allocation212_spill] sm:$0xff] }
 0x5b8   : > { %20342 = vmatprep.mubr.f32.mxu1 %v29949_v63 }
 0x5b9   : > { %21693 = vmatmul.mubr.f32.vlgmr.msra.gmra.mrb[0].mxu0 %v29685_v39 }
 0x5ba   : > { %21695 = vmatprep.mubr.f32.mxu0 %v29686_v27  ;;  %21741 = vmatpush3.msra.mxu0 %v27123_v28  ;;  %v30098_v28 = vld [vmem:[#allocation290_spill] sm:$0xff] }
 0x5bb   : > { %20343 = vmatmul.mubr.f32.vlgmr.msra.gmra.mrb[0].mxu1 %v29950_v5  ;;  %21790 = vmatprep.subr.mxu0 %v27053_v34 }
 0x5bc   : > { %20391 = vmatpush3.msra.mxu1 %v26830_v16  ;;  %20345 = vmatprep.mubr.f32.mxu1 %v29951_v18  ;;  %v30099_v16 = vld [vmem:[#allocation295_spill] sm:$0xff] }
 0x5bd   : > { %21696 = vmatmul.mubr.f32.gmra.mrb[2].mxu0 %v29687_v6  ;;  %20440 = vmatprep.subr.mxu1 %v30096_v17 }
 0x5be   : > { %21698 = vmatprep.mubr.f32.mxu0 %v29688_v14 }
 0x5bf   : > { %20346 = vmatmul.mubr.f32.gmra.mrb[2].mxu1 %v29952_v26 }
 0x5c0   : > { %20348 = vmatprep.mubr.f32.mxu1 %v29953_v54 }
 0x5c1   : > { %21699 = vmatmul.mubr.f32.gmra.mrb[4].mxu0 %v29689_v10 }
 0x5c2   : > { %21701 = vmatprep.mubr.f32.mxu0 %v29690_v1 }
 0x5c3   : > { %20349 = vmatmul.mubr.f32.gmra.mrb[4].mxu1 %v29954_v23 }
 0x5c4   : > { %20351 = vmatprep.mubr.f32.mxu1 %v29587_v24 }
 0x5c5   : > { %21702 = vmatmul.mubr.f32.gmra.mrb[6].mxu0 %v29691_v37 }
 0x5c6   : > { %21704 = vmatprep.mubr.f32.mxu0 %v29692_v33 }
 0x5c7   : > { %20352 = vmatmul.mubr.f32.gmra.mrb[6].mxu1 %v29589_v62 }
 0x5c8   : > { %20354 = vmatprep.mubr.f32.mxu1 %v29590_v11 }
 0x5c9   : > { %21705 = vmatmul.mubr.f32.gmra.mrb[8].mxu0 %v29693_v47 }
 0x5ca   : > { %21707 = vmatprep.mubr.f32.mxu0 %v30097_v2 }
 0x5cb   : > { %20355 = vmatmul.mubr.f32.gmra.mrb[8].mxu1 %v30098_v28 }
 0x5cc   : > { %20357 = vmatprep.mubr.f32.mxu1 %v30099_v16 }
 0x5cd   : > { %21708 = vmatmul.mubr.f32.gmra.mrb[10].mxu0 %v30100_v38 }
 0x5ce   : > { %21710 = vmatprep.mubr.f32.mxu0 %v30101_v52 }
 0x5cf   : > { %20358 = vmatmul.mubr.f32.gmra.mrb[10].mxu1 %v30102_v3 }
 0x5d0   : > { %20360 = vmatprep.mubr.f32.mxu1 %v30103_v32 }
 0x5d1   : > { %21711 = vmatmul.mubr.f32.gmra.mrb[12].mxu0 %v30104_v30  ;;  %v30134_v30 = vld [vmem:[#allocation364_spill] sm:$0xff] }
 0x5d2   : > { %21713 = vmatprep.mubr.f32.mxu0 %v30105_v7  ;;  %v30133_v7 = vld [vmem:[#allocation249_spill] sm:$0xff] }
 0x5d3   : > { %20361 = vmatmul.mubr.f32.gmra.mrb[12].mxu1 %v30106_v36 }
 0x5d4   : > { %20363 = vmatprep.mubr.f32.mxu1 %v30107_v8 }
 0x5d5   : > { %21714 = vmatmul.mubr.f32.gmra.mrb[14].mxu0 %v30108_v59  ;;  %v30126_v59 = vld [vmem:[#allocation349_spill] sm:$0xff] }
 0x5d6   : > { %21716 = vmatprep.mubr.f32.mxu0 %v30109_v22  ;;  %v30125_v22 = vld [vmem:[#allocation234_spill] sm:$0xff] }
 0x5d7   : > { %20364 = vmatmul.mubr.f32.gmra.mrb[14].mxu1 %v30110_v43 }
 0x5d8   : > { %20366 = vmatprep.mubr.f32.mxu1 %v30111_v48 }
 0x5d9   : > { %21717 = vmatmul.mubr.f32.gmra.mrb[16].mxu0 %v30112_v40  ;;  %v30123_v40 = vld [vmem:[#allocation341_spill] sm:$0xff] }
 0x5da   : > { %21719 = vmatprep.mubr.f32.mxu0 %v30113_v41  ;;  %v30124_v41 = vld [vmem:[#allocation232_spill] sm:$0xff] }
 0x5db   : > { %20367 = vmatmul.mubr.f32.gmra.mrb[16].mxu1 %v30114_v46 }
 0x5dc   : > { %20369 = vmatprep.mubr.f32.mxu1 %v30115_v9 }
 0x5dd   : > { %21720 = vmatmul.mubr.f32.gmra.mrb[18].mxu0 %v30116_v29  ;;  %v30127_v29 = vld [vmem:[#allocation351_spill] sm:$0xff] }
 0x5de   : > { %21722 = vmatprep.mubr.f32.mxu0 %v30117_v19  ;;  %v30128_v19 = vld [vmem:[#allocation238_spill] sm:$0xff] }
 0x5df   : > { %20370 = vmatmul.mubr.f32.gmra.mrb[18].mxu1 %v30118_v44 }
 0x5e0   : > { %20372 = vmatprep.mubr.f32.mxu1 %v30119_v25 }
 0x5e1   : > { %21723 = vmatmul.mubr.f32.gmra.mrb[20].mxu0 %v30120_v21  ;;  %v30131_v21 = vld [vmem:[#allocation359_spill] sm:$0xff] }
 0x5e2   : > { %21725 = vmatprep.mubr.f32.mxu0 %v30121_v51  ;;  %v30132_v51 = vld [vmem:[#allocation246_spill] sm:$0xff] }
 0x5e3   : > { %20373 = vmatmul.mubr.f32.gmra.mrb[20].mxu1 %v30122_v61 }
 0x5e4   : > { %20375 = vmatprep.mubr.f32.mxu1 %v30123_v40 }
 0x5e5   : > { %21726 = vmatmul.mubr.f32.gmra.mrb[22].mxu0 %v30124_v41  ;;  %v30135_v41 = vld [vmem:[#allocation367_spill] sm:$0xff] }
 0x5e6   : > { %21728 = vmatprep.mubr.f32.mxu0 %v30125_v22  ;;  %v30136_v22 = vld [vmem:[#allocation253_spill] sm:$0xff] }
 0x5e7   : > { %20376 = vmatmul.mubr.f32.gmra.mrb[22].mxu1 %v30126_v59 }
 0x5e8   : > { %20378 = vmatprep.mubr.f32.mxu1 %v30127_v29 }
 0x5e9   : > { %21729 = vmatmul.mubr.f32.gmra.mrb[24].mxu0 %v30128_v19  ;;  %v30139_v19 = vld [vmem:[#allocation9_spill] sm:$0xff] }
 0x5ea   : > { %21731 = vmatprep.mubr.f32.mxu0 %v30129_v4  ;;  %v30138_v4 = vld [vmem:[#allocation10_spill] sm:$0xff] }
 0x5eb   : > { %20379 = vmatmul.mubr.f32.gmra.mrb[24].mxu1 %v30130_v20  ;;  %v8314_v53 = vsub.f32 %v30139_v19, %v30138_v4  ;;  %v30144_v4 = vld [vmem:[#allocation52_spill] sm:$0xff] }
 0x5ec   : > { %20381 = vmatprep.mubr.f32.mxu1 %v30131_v21 }
 0x5ed   : > { %21732 = vmatmul.mubr.f32.gmra.mrb[26].mxu0 %v30132_v51  ;;  %v30140_v51 = vld [vmem:[#allocation29_spill] sm:$0xff] }
 0x5ee   : > { %21734 = vmatprep.mubr.f32.mxu0 %v30133_v7  ;;  %v30141_v7 = vld [vmem:[#allocation41_spill] sm:$0xff] }
 0x5ef   : > { %20382 = vmatmul.mubr.f32.gmra.mrb[26].mxu1 %v30134_v30 }
 0x5f0   : > { %20384 = vmatprep.mubr.f32.mxu1 %v30135_v41 }
 0x5f1   : > { %21735 = vmatmul.mubr.f32.gmra.mrb[28].mxu0 %v30136_v22  ;;  %v27375_v22 = vand.u32 4294901760, %v8314_v53  ;;  %v30146_v53 = vld [vmem:[#allocation190_spill] sm:$0xff] }
 0x5f2   : > { %21737 = vmatprep.mubr.f32.mxu0 %v27261_v58  ;;  %v30142_v58 = vld [vmem:[#allocation185_spill] sm:$0xff] }
 0x5f3   : > { %20385 = vmatmul.mubr.f32.gmra.mrb[28].mxu1 %v30137_v55 }
 0x5f4   : > { %20387 = vmatprep.mubr.f32.mxu1 %v29995_v15 }
 0x5f5   : > { %21738 = vmatmul.mubr.f32.gmra.mrb[30].mxu0 %v27267_v31  ;;  %v30143_v31 = vld [vmem:[#allocation63_spill] sm:$0xff] }
 0x5f6   : > { %21742 = vmatprep.mubr.f32.mxu0 %v30140_v51  ;;  %v30147_v51 = vld [vmem:[#allocation192_spill] sm:$0xff] }
 0x5f7   : > { %20388 = vmatmul.mubr.f32.gmra.mrb[30].mxu1 %v29997_v49 }
 0x5f8   : > { %20392 = vmatprep.mubr.f32.mxu1 %v29949_v63  ;;  %v30145_v63 = vld [vmem:[#allocation62_spill] sm:$0xff] }
 0x5f9   : > { %21743 = vmatmul.mubr.f32.vlgmr.msra.gmra.mrb[0].mxu0 %v30141_v7  ;;  %v30162_v7 = vld [vmem:[#allocation231_spill] sm:$0xff] }
 0x5fa   : > { %21745 = vmatprep.mubr.f32.mxu0 %v30142_v58  ;;  %21791 = vmatpush3.msra.mxu0 %v27053_v34  ;;  %v30150_v58 = vld [vmem:[#allocation81_spill] sm:$0xff] }
 0x5fb   : > { %20393 = vmatmul.mubr.f32.vlgmr.msra.gmra.mrb[0].mxu1 %v29950_v5  ;;  %21840 = vmatprep.subr.mxu0 %v30143_v31  ;;  %v30148_v5 = vld [vmem:[#allocation197_spill] sm:$0xff] }
 0x5fc   : > { %20441 = vmatpush3.msra.mxu1 %v30096_v17  ;;  %20395 = vmatprep.mubr.f32.mxu1 %v29951_v18  ;;  %v30149_v18 = vld [vmem:[#allocation199_spill] sm:$0xff]  ;;  %v30157_v17 = vld [vmem:[#allocation218_spill] sm:$0xff] }
 0x5fd   : > { %21746 = vmatmul.mubr.f32.gmra.mrb[2].mxu0 %v30144_v4  ;;  %20490 = vmatprep.subr.mxu1 %v27375_v22  ;;  %v30183_v4 = vld [vmem:[#allocation54_spill] sm:$0xff] }
 0x5fe   : > { %21748 = vmatprep.mubr.f32.mxu0 %v30145_v63  ;;  %v30184_v63 = vld [vmem:[#allocation60_spill] sm:$0xff] }
 0x5ff   : > { %20396 = vmatmul.mubr.f32.gmra.mrb[2].mxu1 %v29952_v26  ;;  %v30151_v26 = vld [vmem:[#allocation86_spill] sm:$0xff] }
 0x600   : > { %20398 = vmatprep.mubr.f32.mxu1 %v29953_v54  ;;  %v30152_v54 = vld [vmem:[#allocation207_spill] sm:$0xff] }
 0x601   : > { %21749 = vmatmul.mubr.f32.gmra.mrb[4].mxu0 %v30146_v53  ;;  %v30186_v53 = vld [vmem:[#allocation204_spill] sm:$0xff] }
 0x602   : > { %21751 = vmatprep.mubr.f32.mxu0 %v30147_v51  ;;  %v30187_v51 = vld [vmem:[#allocation65_spill] sm:$0xff] }
 0x603   : > { %20399 = vmatmul.mubr.f32.gmra.mrb[4].mxu1 %v29954_v23  ;;  %v30153_v23 = vld [vmem:[#allocation210_spill] sm:$0xff] }
 0x604   : > { %20401 = vmatprep.mubr.f32.mxu1 %v29587_v24  ;;  %v30154_v24 = vld [vmem:[#allocation211_spill] sm:$0xff] }
 0x605   : > { %21752 = vmatmul.mubr.f32.gmra.mrb[6].mxu0 %v30148_v5  ;;  %v30188_v5 = vld [vmem:[#allocation72_spill] sm:$0xff] }
 0x606   : > { %21754 = vmatprep.mubr.f32.mxu0 %v30149_v18  ;;  %v30189_v18 = vld [vmem:[#allocation17_spill] sm:$0xff] }
 0x607   : > { %20402 = vmatmul.mubr.f32.gmra.mrb[6].mxu1 %v29589_v62  ;;  %v30155_v62 = vld [vmem:[#allocation213_spill] sm:$0xff] }
 0x608   : > { %20404 = vmatprep.mubr.f32.mxu1 %v29590_v11  ;;  %v30156_v11 = vld [vmem:[#allocation120_spill] sm:$0xff] }
 0x609   : > { %21755 = vmatmul.mubr.f32.gmra.mrb[8].mxu0 %v30150_v58  ;;  %v30190_v58 = vld [vmem:[#allocation92_spill] sm:$0xff] }
 0x60a   : > { %21757 = vmatprep.mubr.f32.mxu0 %v30151_v26  ;;  %v30191_v26 = vld [vmem:[#allocation74_spill] sm:$0xff] }
 0x60b   : > { %20405 = vmatmul.mubr.f32.gmra.mrb[8].mxu1 %v30098_v28  ;;  %v30158_v28 = vld [vmem:[#allocation222_spill] sm:$0xff] }
 0x60c   : > { %20407 = vmatprep.mubr.f32.mxu1 %v30099_v16  ;;  %v30159_v16 = vld [vmem:[#allocation224_spill] sm:$0xff] }
 0x60d   : > { %21758 = vmatmul.mubr.f32.gmra.mrb[10].mxu0 %v30152_v54  ;;  %v30192_v54 = vld [vmem:[#allocation77_spill] sm:$0xff] }
 0x60e   : > { %21760 = vmatprep.mubr.f32.mxu0 %v30153_v23  ;;  %v30193_v23 = vld [vmem:[#allocation97_spill] sm:$0xff] }
 0x60f   : > { %20408 = vmatmul.mubr.f32.gmra.mrb[10].mxu1 %v30102_v3  ;;  %v30160_v3 = vld [vmem:[#allocation225_spill] sm:$0xff] }
 0x610   : > { %20410 = vmatprep.mubr.f32.mxu1 %v30103_v32  ;;  %v30161_v32 = vld [vmem:[#allocation137_spill] sm:$0xff] }
 0x611   : > { %21761 = vmatmul.mubr.f32.gmra.mrb[12].mxu0 %v30154_v24  ;;  %v30194_v24 = vld [vmem:[#allocation106_spill] sm:$0xff] }
 0x612   : > { %21763 = vmatprep.mubr.f32.mxu0 %v30155_v62  ;;  %v30195_v62 = vld [vmem:[#allocation88_spill] sm:$0xff] }
 0x613   : > { %20411 = vmatmul.mubr.f32.gmra.mrb[12].mxu1 %v30106_v36  ;;  %v30179_v36 = vld [vmem:[#allocation40_spill] sm:$0xff] }
 0x614   : > { %20413 = vmatprep.mubr.f32.mxu1 %v30107_v8  ;;  %v30180_v8 = vld [vmem:[#allocation46_spill] sm:$0xff] }
 0x615   : > { %21764 = vmatmul.mubr.f32.gmra.mrb[14].mxu0 %v30156_v11  ;;  %v30196_v11 = vld [vmem:[#allocation91_spill] sm:$0xff] }
 0x616   : > { %21766 = vmatprep.mubr.f32.mxu0 %v30157_v17  ;;  %v30197_v17 = vld [vmem:[#allocation114_spill] sm:$0xff] }
 0x617   : > { %20414 = vmatmul.mubr.f32.gmra.mrb[14].mxu1 %v30110_v43  ;;  %v30163_v43 = vld [vmem:[#allocation155_spill] sm:$0xff] }
 0x618   : > { %20416 = vmatprep.mubr.f32.mxu1 %v30111_v48  ;;  %v30164_v48 = vld [vmem:[#allocation237_spill] sm:$0xff] }
 0x619   : > { %21767 = vmatmul.mubr.f32.gmra.mrb[16].mxu0 %v30158_v28  ;;  %v30198_v28 = vld [vmem:[#allocation215_spill] sm:$0xff] }
 0x61a   : > { %21769 = vmatprep.mubr.f32.mxu0 %v30159_v16  ;;  %v30199_v16 = vld [vmem:[#allocation99_spill] sm:$0xff] }
 0x61b   : > { %20417 = vmatmul.mubr.f32.gmra.mrb[16].mxu1 %v30114_v46  ;;  %v30165_v46 = vld [vmem:[#allocation240_spill] sm:$0xff] }
 0x61c   : > { %20419 = vmatprep.mubr.f32.mxu1 %v30115_v9  ;;  %v30166_v9 = vld [vmem:[#allocation245_spill] sm:$0xff] }
 0x61d   : > { %21770 = vmatmul.mubr.f32.gmra.mrb[18].mxu0 %v30160_v3  ;;  %v30200_v3 = vld [vmem:[#allocation102_spill] sm:$0xff] }
 0x61e   : > { %21772 = vmatprep.mubr.f32.mxu0 %v30161_v32  ;;  %v30201_v32 = vld [vmem:[#allocation133_spill] sm:$0xff] }
 0x61f   : > { %20420 = vmatmul.mubr.f32.gmra.mrb[18].mxu1 %v30118_v44  ;;  %v30167_v44 = vld [vmem:[#allocation248_spill] sm:$0xff] }
 0x620   : > { %20422 = vmatprep.mubr.f32.mxu1 %v30119_v25  ;;  %v30168_v25 = vld [vmem:[#allocation252_spill] sm:$0xff] }
 0x621   : > { %21773 = vmatmul.mubr.f32.gmra.mrb[20].mxu0 %v30162_v7  ;;  %v30202_v7 = vld [vmem:[#allocation223_spill] sm:$0xff] }
 0x622   : > { %21775 = vmatprep.mubr.f32.mxu0 %v30163_v43  ;;  %v30203_v43 = vld [vmem:[#allocation108_spill] sm:$0xff] }
 0x623   : > { %20423 = vmatmul.mubr.f32.gmra.mrb[20].mxu1 %v30122_v61  ;;  %v30169_v61 = vld [vmem:[#allocation256_spill] sm:$0xff] }
 0x624   : > { %20425 = vmatprep.mubr.f32.mxu1 %v30123_v40  ;;  %v30170_v40 = vld [vmem:[#allocation259_spill] sm:$0xff] }
 0x625   : > { %21776 = vmatmul.mubr.f32.gmra.mrb[22].mxu0 %v30164_v48  ;;  %v30204_v48 = vld [vmem:[#allocation115_spill] sm:$0xff] }
 0x626   : > { %21778 = vmatprep.mubr.f32.mxu0 %v30165_v46  ;;  %v30205_v46 = vld [vmem:[#allocation144_spill] sm:$0xff] }
 0x627   : > { %20426 = vmatmul.mubr.f32.gmra.mrb[22].mxu1 %v30126_v59  ;;  %v30181_v59 = vld [vmem:[#allocation69_spill] sm:$0xff] }
 0x628   : > { %20428 = vmatprep.mubr.f32.mxu1 %v30127_v29  ;;  %v30171_v29 = vld [vmem:[#allocation38_spill] sm:$0xff] }
 0x629   : > { %21779 = vmatmul.mubr.f32.gmra.mrb[24].mxu0 %v30166_v9  ;;  %v30206_v9 = vld [vmem:[#allocation229_spill] sm:$0xff] }
 0x62a   : > { %21781 = vmatprep.mubr.f32.mxu0 %v30167_v44  ;;  %v30207_v44 = vld [vmem:[#allocation119_spill] sm:$0xff] }
 0x62b   : > { %20429 = vmatmul.mubr.f32.gmra.mrb[24].mxu1 %v30130_v20  ;;  %v30173_v20 = vld [vmem:[#allocation48_spill] sm:$0xff] }
 0x62c   : > { %20431 = vmatprep.mubr.f32.mxu1 %v30131_v21  ;;  %v30172_v21 = vld [vmem:[#allocation25_spill] sm:$0xff] }
 0x62d   : > { %21782 = vmatmul.mubr.f32.gmra.mrb[26].mxu0 %v30168_v25  ;;  %v30208_v25 = vld [vmem:[#allocation126_spill] sm:$0xff] }
 0x62e   : > { %21784 = vmatprep.mubr.f32.mxu0 %v30169_v61  ;;  %v30209_v61 = vld [vmem:[#allocation230_spill] sm:$0xff] }
 0x62f   : > { %20432 = vmatmul.mubr.f32.gmra.mrb[26].mxu1 %v30134_v30  ;;  %v30174_v30 = vld [vmem:[#allocation51_spill] sm:$0xff] }
 0x630   : > { %20434 = vmatprep.mubr.f32.mxu1 %v30135_v41  ;;  %v30175_v41 = vld [vmem:[#allocation28_spill] sm:$0xff] }
 0x631   : > { %21785 = vmatmul.mubr.f32.gmra.mrb[28].mxu0 %v30170_v40  ;;  %v30210_v40 = vld [vmem:[#allocation145_spill] sm:$0xff] }
 0x632   : > { %21787 = vmatprep.mubr.f32.mxu0 %v27271_v50 }
 0x633   : > { %20435 = vmatmul.mubr.f32.gmra.mrb[28].mxu1 %v30137_v55  ;;  %v30176_v55 = vld [vmem:[#allocation34_spill] sm:$0xff] }
 0x634   : > { %20437 = vmatprep.mubr.f32.mxu1 %v29995_v15  ;;  %v30177_v15 = vld [vmem:[#allocation195_spill] sm:$0xff] }
 0x635   : > { %21788 = vmatmul.mubr.f32.gmra.mrb[30].mxu0 %v27277_v56 }
 0x636   : > { %21792 = vmatprep.mubr.f32.mxu0 %v30171_v29  ;;  %v30211_v29 = vld [vmem:[#allocation130_spill] sm:$0xff] }
 0x637   : > { %20438 = vmatmul.mubr.f32.gmra.mrb[30].mxu1 %v29997_v49  ;;  %v30178_v49 = vld [vmem:[#allocation196_spill] sm:$0xff] }
 0x638   : > { %20442 = vmatprep.mubr.f32.mxu1 %v30172_v21  ;;  %v30212_v21 = vld [vmem:[#allocation139_spill] sm:$0xff] }
 0x639   : > { %21793 = vmatmul.mubr.f32.vlgmr.msra.gmra.mrb[0].mxu0 %v30173_v20  ;;  %v30213_v20 = vld [vmem:[#allocation156_spill] sm:$0xff] }
 0x63a   : > { %21795 = vmatprep.mubr.f32.mxu0 %v30174_v30  ;;  %21841 = vmatpush3.msra.mxu0 %v30143_v31  ;;  %v30182_v31 = vld [vmem:[#allocation198_spill] sm:$0xff]  ;;  %v30214_v30 = vld [vmem:[#allocation236_spill] sm:$0xff] }
 0x63b   : > { %20443 = vmatmul.mubr.f32.vlgmr.msra.gmra.mrb[0].mxu1 %v30175_v41  ;;  %21890 = vmatprep.subr.mxu0 %v27053_v34  ;;  %v30215_v41 = vld [vmem:[#allocation142_spill] sm:$0xff] }
 0x63c   : > { %20491 = vmatpush3.msra.mxu1 %v27375_v22  ;;  %20445 = vmatprep.mubr.f32.mxu1 %v30176_v55  ;;  %v30185_v22 = vld [vmem:[#allocation75_spill] sm:$0xff]  ;;  %v30216_v55 = vld [vmem:[#allocation146_spill] sm:$0xff] }
 0x63d   : > { %21796 = vmatmul.mubr.f32.gmra.mrb[2].mxu0 %v30177_v15  ;;  %20540 = vmatprep.subr.mxu1 %v30139_v19  ;;  %v30217_v15 = vld [vmem:[#allocation244_spill] sm:$0xff] }
 0x63e   : > { %21798 = vmatprep.mubr.f32.mxu0 %v30178_v49  ;;  %v30218_v49 = vld [vmem:[#allocation247_spill] sm:$0xff] }
 0x63f   : > { %20446 = vmatmul.mubr.f32.gmra.mrb[2].mxu1 %v30179_v36  ;;  %v30219_v36 = vld [vmem:[#allocation151_spill] sm:$0xff] }
 0x640   : > { %20448 = vmatprep.mubr.f32.mxu1 %v30180_v8  ;;  %v30220_v8 = vld [vmem:[#allocation157_spill] sm:$0xff] }
 0x641   : > { %21799 = vmatmul.mubr.f32.gmra.mrb[4].mxu0 %v30181_v59  ;;  %v30221_v59 = vld [vmem:[#allocation251_spill] sm:$0xff] }
 0x642   : > { %21801 = vmatprep.mubr.f32.mxu0 %v30182_v31  ;;  %v30222_v31 = vld [vmem:[#allocation255_spill] sm:$0xff] }
 0x643   : > { %20449 = vmatmul.mubr.f32.gmra.mrb[4].mxu1 %v30183_v4  ;;  %v30223_v4 = vld [vmem:[#allocation162_spill] sm:$0xff] }
 0x644   : > { %20451 = vmatprep.mubr.f32.mxu1 %v30184_v63  ;;  %v30224_v63 = vld [vmem:[#allocation168_spill] sm:$0xff] }
 0x645   : > { %21802 = vmatmul.mubr.f32.gmra.mrb[6].mxu0 %v30185_v22  ;;  %v30225_v22 = vld [vmem:[#allocation258_spill] sm:$0xff] }
 0x646   : > { %21804 = vmatprep.mubr.f32.mxu0 %v30186_v53  ;;  %v30226_v53 = vld [vmem:[#allocation261_spill] sm:$0xff] }
 0x647   : > { %20452 = vmatmul.mubr.f32.gmra.mrb[6].mxu1 %v30187_v51  ;;  %v30227_v51 = vld [vmem:[#allocation172_spill] sm:$0xff] }
 0x648   : > { %20454 = vmatprep.mubr.f32.mxu1 %v30188_v5  ;;  %v30228_v5 = vld [vmem:[#allocation174_spill] sm:$0xff] }
 0x649   : > { %21805 = vmatmul.mubr.f32.gmra.mrb[8].mxu0 %v30189_v18  ;;  %v30229_v18 = vld [vmem:[#allocation263_spill] sm:$0xff] }
 0x64a   : > { %21807 = vmatprep.mubr.f32.mxu0 %v30190_v58  ;;  %v30230_v58 = vand.u32 4294901760, %v27271_v50  ;;  %v30236_v50 = vld [vmem:[#allocation12_spill] sm:$0xff] }
 0x64b   : > { %20455 = vmatmul.mubr.f32.gmra.mrb[8].mxu1 %v30191_v26  ;;  %v30231_v26 = vld [vmem:[#allocation177_spill] sm:$0xff] }
 0x64c   : > { %20457 = vmatprep.mubr.f32.mxu1 %v30192_v54  ;;  %v30232_v54 = vld [vmem:[#allocation392_spill] sm:$0xff] }
 0x64d   : > { %21808 = vmatmul.mubr.f32.gmra.mrb[10].mxu0 %v30193_v23  ;;  %v30233_v23 = vand.u32 4294901760, %v27277_v56  ;;  %v30237_v56 = vld [vmem:[#allocation27_spill] sm:$0xff] }
 0x64e   : > { %21810 = vmatprep.mubr.f32.mxu0 %v30194_v24  ;;  %v30234_v24 = vld [vmem:[#allocation394_spill] sm:$0xff] }
 0x64f   : > { %20458 = vmatmul.mubr.f32.gmra.mrb[10].mxu1 %v30195_v62  ;;  %v30235_v62 = vld [vmem:[#allocation11_spill] sm:$0xff] }
 0x650   : > { %20460 = vmatprep.mubr.f32.mxu1 %v30196_v11  ;;  %v30238_v11 = vld [vmem:[#allocation33_spill] sm:$0xff] }
 0x651   : > { %21811 = vmatmul.mubr.f32.gmra.mrb[12].mxu0 %v30197_v17  ;;  %v30248_v17 = vld [vmem:[#allocation95_spill] sm:$0xff] }
 0x652   : > { %21813 = vmatprep.mubr.f32.mxu0 %v30198_v28  ;;  %v30249_v28 = vld [vmem:[#allocation216_spill] sm:$0xff] }
 0x653   : > { %20461 = vmatmul.mubr.f32.gmra.mrb[12].mxu1 %v30199_v16  ;;  %v30250_v16 = vld [vmem:[#allocation219_spill] sm:$0xff] }
 0x654   : > { %20463 = vmatprep.mubr.f32.mxu1 %v30200_v3  ;;  %v30251_v3 = vld [vmem:[#allocation96_spill] sm:$0xff] }
 0x655   : > { %21814 = vmatmul.mubr.f32.gmra.mrb[14].mxu0 %v30201_v32  ;;  %v30252_v32 = vld [vmem:[#allocation103_spill] sm:$0xff] }
 0x656   : > { %21816 = vmatprep.mubr.f32.mxu0 %v30202_v7  ;;  %v30253_v7 = vld [vmem:[#allocation220_spill] sm:$0xff] }
 0x657   : > { %20464 = vmatmul.mubr.f32.gmra.mrb[14].mxu1 %v30203_v43  ;;  %v30254_v43 = vld [vmem:[#allocation124_spill] sm:$0xff] }
 0x658   : > { %20466 = vmatprep.mubr.f32.mxu1 %v30204_v48  ;;  %v30255_v48 = vld [vmem:[#allocation111_spill] sm:$0xff] }
 0x659   : > { %21817 = vmatmul.mubr.f32.gmra.mrb[16].mxu0 %v30205_v46  ;;  %v30256_v46 = vld [vmem:[#allocation118_spill] sm:$0xff] }
 0x65a   : > { %21819 = vmatprep.mubr.f32.mxu0 %v30206_v9  ;;  %v30257_v9 = vld [vmem:[#allocation227_spill] sm:$0xff] }
 0x65b   : > { %20467 = vmatmul.mubr.f32.gmra.mrb[16].mxu1 %v30207_v44  ;;  %v30258_v44 = vld [vmem:[#allocation228_spill] sm:$0xff] }
 0x65c   : > { %20469 = vmatprep.mubr.f32.mxu1 %v30208_v25  ;;  %v30259_v25 = vld [vmem:[#allocation121_spill] sm:$0xff] }
 0x65d   : > { %21820 = vmatmul.mubr.f32.gmra.mrb[18].mxu0 %v30209_v61  ;;  %v30260_v61 = vld [vmem:[#allocation123_spill] sm:$0xff] }
 0x65e   : > { %21822 = vmatprep.mubr.f32.mxu0 %v30210_v40  ;;  %v30261_v40 = vld [vmem:[#allocation232_spill] sm:$0xff] }
 0x65f   : > { %20470 = vmatmul.mubr.f32.gmra.mrb[18].mxu1 %v30211_v29  ;;  %v30262_v29 = vld [vmem:[#allocation234_spill] sm:$0xff] }
 0x660   : > { %20472 = vmatprep.mubr.f32.mxu1 %v30212_v21  ;;  %v30263_v21 = vld [vmem:[#allocation132_spill] sm:$0xff] }
 0x661   : > { %21823 = vmatmul.mubr.f32.gmra.mrb[20].mxu0 %v30213_v20  ;;  %v30264_v20 = vld [vmem:[#allocation136_spill] sm:$0xff] }
 0x662   : > { %21825 = vmatprep.mubr.f32.mxu0 %v30214_v30  ;;  %v30265_v30 = vld [vmem:[#allocation238_spill] sm:$0xff] }
 0x663   : > { %20473 = vmatmul.mubr.f32.gmra.mrb[20].mxu1 %v30215_v41  ;;  %v30266_v41 = vld [vmem:[#allocation241_spill] sm:$0xff] }
 0x664   : > { %20475 = vmatprep.mubr.f32.mxu1 %v30216_v55  ;;  %v30267_v55 = vld [vmem:[#allocation143_spill] sm:$0xff] }
 0x665   : > { %21826 = vmatmul.mubr.f32.gmra.mrb[22].mxu0 %v30217_v15  ;;  %v30268_v15 = vld [vmem:[#allocation149_spill] sm:$0xff] }
 0x666   : > { %21828 = vmatprep.mubr.f32.mxu0 %v30218_v49  ;;  %v30269_v49 = vld [vmem:[#allocation246_spill] sm:$0xff] }
 0x667   : > { %20476 = vmatmul.mubr.f32.gmra.mrb[22].mxu1 %v30219_v36  ;;  %v30270_v36 = vld [vmem:[#allocation249_spill] sm:$0xff] }
 0x668   : > { %20478 = vmatprep.mubr.f32.mxu1 %v30220_v8  ;;  %v30271_v8 = vld [vmem:[#allocation153_spill] sm:$0xff] }
 0x669   : > { %21829 = vmatmul.mubr.f32.gmra.mrb[24].mxu0 %v30221_v59  ;;  %v30272_v59 = vld [vmem:[#allocation160_spill] sm:$0xff] }
 0x66a   : > { %21831 = vmatprep.mubr.f32.mxu0 %v30222_v31  ;;  %v30273_v31 = vld [vmem:[#allocation253_spill] sm:$0xff] }
 0x66b   : > { %20479 = vmatmul.mubr.f32.gmra.mrb[24].mxu1 %v30223_v4  ;;  %v30274_v4 = vld [vmem:[#allocation66_spill] sm:$0xff] }
 0x66c   : > { %20481 = vmatprep.mubr.f32.mxu1 %v30224_v63  ;;  %v30275_v63 = vld [vmem:[#allocation161_spill] sm:$0xff] }
 0x66d   : > { %21832 = vmatmul.mubr.f32.gmra.mrb[26].mxu0 %v30225_v22  ;;  %v30276_v22 = vld [vmem:[#allocation169_spill] sm:$0xff] }
 0x66e   : > { %21834 = vmatprep.mubr.f32.mxu0 %v30226_v53  ;;  %v30277_v53 = vld [vmem:[#allocation15_spill] sm:$0xff] }
 0x66f   : > { %20482 = vmatmul.mubr.f32.gmra.mrb[26].mxu1 %v30227_v51  ;;  %v30278_v51 = vld [vmem:[#allocation170_spill] sm:$0xff] }
 0x670   : > { %20484 = vmatprep.mubr.f32.mxu1 %v30228_v5  ;;  %v30279_v5 = vld [vmem:[#allocation13_spill] sm:$0xff] }
 0x671   : > { %21835 = vmatmul.mubr.f32.gmra.mrb[28].mxu0 %v30229_v18  ;;  %v30280_v18 = vld [vmem:[#allocation14_spill] sm:$0xff] }
 0x672   : > { %21837 = vmatprep.mubr.f32.mxu0 %v30230_v58  ;;  %v30281_v58 = vld [vmem:[#allocation20_spill] sm:$0xff] }
 0x673   : > { %20485 = vmatmul.mubr.f32.gmra.mrb[28].mxu1 %v30231_v26  ;;  %v30282_v26 = vld [vmem:[#allocation24_spill] sm:$0xff] }
 0x674   : > { %20487 = vmatprep.mubr.f32.mxu1 %v30232_v54  ;;  %v30283_v54 = vld [vmem:[#allocation32_spill] sm:$0xff] }
 0x675   : > { %21838 = vmatmul.mubr.f32.gmra.mrb[30].mxu0 %v30233_v23  ;;  %v30297_v23 = vld [vmem:[#allocation110_spill] sm:$0xff] }
 0x676   : > { %21842 = vmatprep.mubr.f32.mxu0 %v29684_v45 }
 0x677   : > { %20488 = vmatmul.mubr.f32.gmra.mrb[30].mxu1 %v30234_v24  ;;  %v30298_v24 = vld [vmem:[#allocation113_spill] sm:$0xff] }
 0x678   : > { %20492 = vmatprep.mubr.f32.mxu1 %v30235_v62  ;;  %v30299_v62 = vld [vmem:[#allocation122_spill] sm:$0xff] }
 0x679   : > { %21843 = vmatmul.mubr.f32.vlgmr.msra.gmra.mrb[0].mxu0 %v29685_v39 }
 0x67a   : > { %21845 = vmatprep.mubr.f32.mxu0 %v29686_v27  ;;  %21891 = vmatpush3.msra.mxu0 %v27053_v34  ;;  %v30245_v34 = vld [vmem:[#allocation212_spill] sm:$0xff] }
 0x67b   : > { %20493 = vmatmul.mubr.f32.vlgmr.msra.gmra.mrb[0].mxu1 %v30236_v50  ;;  %v30300_v50 = vld [vmem:[#allocation125_spill] sm:$0xff] }
 0x67c   : > { %20541 = vmatpush3.msra.mxu1 %v30139_v19  ;;  %20495 = vmatprep.mubr.f32.mxu1 %v29816_v12  ;;  %v30240_v19 = vld [vmem:[#allocation70_spill] sm:$0xff]  ;;  %v30241_v12 = vld [vmem:[#allocation209_spill] sm:$0xff] }
 0x67d   : > { %21846 = vmatmul.mubr.f32.gmra.mrb[2].mxu0 %v29687_v6 }
 0x67e   : > { %21848 = vmatprep.mubr.f32.mxu0 %v29688_v14 }
 0x67f   : > { %20496 = vmatmul.mubr.f32.gmra.mrb[2].mxu1 %v29818_v57  ;;  %v30239_v57 = vld [vmem:[#allocation68_spill] sm:$0xff] }
 0x680   : > { %20498 = vmatprep.mubr.f32.mxu1 %v30237_v56  ;;  %v30301_v56 = vld [vmem:[#allocation129_spill] sm:$0xff] }
 0x681   : > { %21849 = vmatmul.mubr.f32.gmra.mrb[4].mxu0 %v29689_v10 }
 0x682   : > { %21851 = vmatprep.mubr.f32.mxu0 %v29690_v1 }
 0x683   : > { %20499 = vmatmul.mubr.f32.gmra.mrb[4].mxu1 %v30238_v11  ;;  %v30302_v11 = vld [vmem:[#allocation135_spill] sm:$0xff] }
 0x684   : > { %20501 = vmatprep.mubr.f32.mxu1 %v29821_v13  ;;  %v30243_v13 = vld [vmem:[#allocation80_spill] sm:$0xff] }
 0x685   : > { %21852 = vmatmul.mubr.f32.gmra.mrb[6].mxu0 %v29691_v37 }
 0x686   : > { %21854 = vmatprep.mubr.f32.mxu0 %v29692_v33 }
 0x687   : > { %20502 = vmatmul.mubr.f32.gmra.mrb[6].mxu1 %v29822_v60  ;;  %v30242_v60 = vld [vmem:[#allocation100_spill] sm:$0xff] }
 0x688   : > { %20504 = vmatprep.mubr.f32.mxu1 %v29823_v42  ;;  %v30244_v42 = vld [vmem:[#allocation83_spill] sm:$0xff] }
 0x689   : > { %21855 = vmatmul.mubr.f32.gmra.mrb[8].mxu0 %v29693_v47 }
 0x68a   : > { %21857 = vmatprep.mubr.f32.mxu0 %v30097_v2 }
 0x68b   : > { %20505 = vmatmul.mubr.f32.gmra.mrb[8].mxu1 %v29824_v35  ;;  %v30246_v35 = vld [vmem:[#allocation214_spill] sm:$0xff] }
 0x68c   : > { %20507 = vmatprep.mubr.f32.mxu1 %v29825_v0  ;;  %v30247_v0 = vld [vmem:[#allocation85_spill] sm:$0xff] }
 0x68d   : > { %21858 = vmatmul.mubr.f32.gmra.mrb[10].mxu0 %v30100_v38 }
 0x68e   : > { %21860 = vmatprep.mubr.f32.mxu0 %v30101_v52 }
 0x68f   : > { %20508 = vmatmul.mubr.f32.gmra.mrb[10].mxu1 %v30239_v57  ;;  %v30303_v57 = vld [vmem:[#allocation141_spill] sm:$0xff] }
 0x690   : > { %20510 = vmatprep.mubr.f32.mxu1 %v30240_v19  ;;  %v30304_v19 = vld [vmem:[#allocation148_spill] sm:$0xff] }
 0x691   : > { %21861 = vmatmul.mubr.f32.gmra.mrb[12].mxu0 %v30241_v12 }
 0x692   : > { %21863 = vmatprep.mubr.f32.mxu0 %v30242_v60 }
 0x693   : > { %20511 = vmatmul.mubr.f32.gmra.mrb[12].mxu1 %v30243_v13  ;;  %v30307_v13 = vld [vmem:[#allocation164_spill] sm:$0xff] }
 0x694   : > { %20513 = vmatprep.mubr.f32.mxu1 %v30244_v42  ;;  %v30308_v42 = vld [vmem:[#allocation165_spill] sm:$0xff] }
 0x695   : > { %21864 = vmatmul.mubr.f32.gmra.mrb[14].mxu0 %v30245_v34 }
 0x696   : > { %21866 = vmatprep.mubr.f32.mxu0 %v30246_v35 }
 0x697   : > { %20514 = vmatmul.mubr.f32.gmra.mrb[14].mxu1 %v30247_v0 }
 0x698   : > { %20516 = vmatprep.mubr.f32.mxu1 %v30248_v17 }
 0x699   : > { %21867 = vmatmul.mubr.f32.gmra.mrb[16].mxu0 %v30249_v28 }
 0x69a   : > { %21869 = vmatprep.mubr.f32.mxu0 %v30250_v16 }
 0x69b   : > { %20517 = vmatmul.mubr.f32.gmra.mrb[16].mxu1 %v30251_v3 }
 0x69c   : > { %20519 = vmatprep.mubr.f32.mxu1 %v30252_v32 }
 0x69d   : > { %21870 = vmatmul.mubr.f32.gmra.mrb[18].mxu0 %v30253_v7 }
 0x69e   : > { %21872 = vmatprep.mubr.f32.mxu0 %v30254_v43 }
 0x69f   : > { %20520 = vmatmul.mubr.f32.gmra.mrb[18].mxu1 %v30255_v48 }
 0x6a0   : > { %20522 = vmatprep.mubr.f32.mxu1 %v30256_v46 }
 0x6a1   : > { %21873 = vmatmul.mubr.f32.gmra.mrb[20].mxu0 %v30257_v9 }
 0x6a2   : > { %21875 = vmatprep.mubr.f32.mxu0 %v30258_v44 }
 0x6a3   : > { %20523 = vmatmul.mubr.f32.gmra.mrb[20].mxu1 %v30259_v25 }
 0x6a4   : > { %20525 = vmatprep.mubr.f32.mxu1 %v30260_v61 }
 0x6a5   : > { %21876 = vmatmul.mubr.f32.gmra.mrb[22].mxu0 %v30261_v40 }
 0x6a6   : > { %21878 = vmatprep.mubr.f32.mxu0 %v30262_v29 }
 0x6a7   : > { %20526 = vmatmul.mubr.f32.gmra.mrb[22].mxu1 %v30263_v21 }
 0x6a8   : > { %20528 = vmatprep.mubr.f32.mxu1 %v30264_v20 }
 0x6a9   : > { %21879 = vmatmul.mubr.f32.gmra.mrb[24].mxu0 %v30265_v30 }
 0x6aa   : > { %21881 = vmatprep.mubr.f32.mxu0 %v30266_v41 }
 0x6ab   : > { %20529 = vmatmul.mubr.f32.gmra.mrb[24].mxu1 %v30267_v55 }
 0x6ac   : > { %20531 = vmatprep.mubr.f32.mxu1 %v30268_v15 }
 0x6ad   : > { %21882 = vmatmul.mubr.f32.gmra.mrb[26].mxu0 %v30269_v49 }
 0x6ae   : > { %21884 = vmatprep.mubr.f32.mxu0 %v30270_v36 }
 0x6af   : > { %20532 = vmatmul.mubr.f32.gmra.mrb[26].mxu1 %v30271_v8 }
 0x6b0   : > { %20534 = vmatprep.mubr.f32.mxu1 %v30272_v59 }
 0x6b1   : > { %21885 = vmatmul.mubr.f32.gmra.mrb[28].mxu0 %v30273_v31 }
 0x6b2   : > { %21887 = vmatprep.mubr.f32.mxu0 %v30274_v4 }
 0x6b3   : > { %20535 = vmatmul.mubr.f32.gmra.mrb[28].mxu1 %v30275_v63 }
 0x6b4   : > { %20537 = vmatprep.mubr.f32.mxu1 %v30276_v22 }
 0x6b5   : > { %21888 = vmatmul.mubr.f32.gmra.mrb[30].mxu0 %v30277_v53 }
 0x6b6   : > { %21892 = vmatprep.mubr.f32.mxu0 %v29684_v45  ;;  %v30284_v45 = vld [vmem:[#allocation39_spill] sm:$0xff] }
 0x6b7   : > { %20538 = vmatmul.mubr.f32.gmra.mrb[30].mxu1 %v30278_v51 }
 0x6b8   : > { %20542 = vmatprep.mubr.f32.mxu1 %v30279_v5 }
 0x6b9   : > { %21893 = vmatmul.mubr.f32.vlgmr.msra.gmra.mrb[0].mxu0 %v29685_v39  ;;  %v30285_v39 = vld [vmem:[#allocation45_spill] sm:$0xff] }
 0x6ba   : > { %21895 = vmatprep.mubr.f32.mxu0 %v29686_v27  ;;  %v30286_v27 = vld [vmem:[#allocation47_spill] sm:$0xff] }
 0x6bb   : > { %20543 = vmatmul.mubr.f32.vlgmr.msra.gmra.mrb[0].mxu1 %v30280_v18 }
 0x6bc   : > { %20545 = vmatprep.mubr.f32.mxu1 %v30281_v58 }
 0x6bd   : > { %21896 = vmatmul.mubr.f32.gmra.mrb[2].mxu0 %v29687_v6  ;;  %v30287_v6 = vld [vmem:[#allocation56_spill] sm:$0xff] }
 0x6be   : > { %21898 = vmatprep.mubr.f32.mxu0 %v29688_v14  ;;  %v30288_v14 = vld [vmem:[#allocation58_spill] sm:$0xff] }
 0x6bf   : > { %20546 = vmatmul.mubr.f32.gmra.mrb[2].mxu1 %v30282_v26 }
 0x6c0   : > { %20548 = vmatprep.mubr.f32.mxu1 %v30283_v54 }
 0x6c1   : > { %21899 = vmatmul.mubr.f32.gmra.mrb[4].mxu0 %v29689_v10  ;;  %v30289_v10 = vld [vmem:[#allocation61_spill] sm:$0xff] }
 0x6c2   : > { %21901 = vmatprep.mubr.f32.mxu0 %v29690_v1  ;;  %v30290_v1 = vld [vmem:[#allocation71_spill] sm:$0xff] }
 0x6c3   : > { %20549 = vmatmul.mubr.f32.gmra.mrb[4].mxu1 %v30284_v45 }
 0x6c4   : > { %20551 = vmatprep.mubr.f32.mxu1 %v30285_v39 }
 0x6c5   : > { %21902 = vmatmul.mubr.f32.gmra.mrb[6].mxu0 %v29691_v37  ;;  %v30291_v37 = vld [vmem:[#allocation73_spill] sm:$0xff] }
 0x6c6   : > { %21904 = vmatprep.mubr.f32.mxu0 %v29692_v33  ;;  %v30292_v33 = vld [vmem:[#allocation84_spill] sm:$0xff] }
 0x6c7   : > { %20552 = vmatmul.mubr.f32.gmra.mrb[6].mxu1 %v30286_v27 }
 0x6c8   : > { %20554 = vmatprep.mubr.f32.mxu1 %v30287_v6 }
 0x6c9   : > { %21905 = vmatmul.mubr.f32.gmra.mrb[8].mxu0 %v29693_v47  ;;  %v30293_v47 = vld [vmem:[#allocation87_spill] sm:$0xff] }
 0x6ca   : > { %21907 = vmatprep.mubr.f32.mxu0 %v30097_v2  ;;  %v30294_v2 = vld [vmem:[#allocation90_spill] sm:$0xff] }
 0x6cb   : > { %20555 = vmatmul.mubr.f32.gmra.mrb[8].mxu1 %v30288_v14 }
 0x6cc   : > { %20557 = vmatprep.mubr.f32.mxu1 %v30289_v10 }
 0x6cd   : > { %21908 = vmatmul.mubr.f32.gmra.mrb[10].mxu0 %v30100_v38  ;;  %v30295_v38 = vld [vmem:[#allocation98_spill] sm:$0xff] }
 0x6ce   : > { %21910 = vmatprep.mubr.f32.mxu0 %v30101_v52  ;;  %v30296_v52 = vld [vmem:[#allocation101_spill] sm:$0xff] }
 0x6cf   : > { %20558 = vmatmul.mubr.f32.gmra.mrb[10].mxu1 %v30290_v1 }
 0x6d0   : > { %20560 = vmatprep.mubr.f32.mxu1 %v30291_v37 }
 0x6d1   : > { %21911 = vmatmul.mubr.f32.gmra.mrb[12].mxu0 %v30241_v12  ;;  %v30305_v12 = vld [vmem:[#allocation152_spill] sm:$0xff] }
 0x6d2   : > { %21913 = vmatprep.mubr.f32.mxu0 %v30242_v60  ;;  %v30306_v60 = vld [vmem:[#allocation159_spill] sm:$0xff] }
 0x6d3   : > { %20561 = vmatmul.mubr.f32.gmra.mrb[12].mxu1 %v30292_v33 }
 0x6d4   : > { %20563 = vmatprep.mubr.f32.mxu1 %v30293_v47 }
 0x6d5   : > { %21914 = vmatmul.mubr.f32.gmra.mrb[14].mxu0 %v30245_v34  ;;  %v30309_v34 = vld [vmem:[#allocation171_spill] sm:$0xff] }
 0x6d6   : > { %21916 = vmatprep.mubr.f32.mxu0 %v30246_v35  ;;  %v30310_v35 = vld [vmem:[#allocation173_spill] sm:$0xff] }
 0x6d7   : > { %20564 = vmatmul.mubr.f32.gmra.mrb[14].mxu1 %v30294_v2 }
 0x6d8   : > { %20566 = vmatprep.mubr.f32.mxu1 %v30295_v38 }
 0x6d9   : > { %21917 = vmatmul.mubr.f32.gmra.mrb[16].mxu0 %v30249_v28 }
 0x6da   : > { %21919 = vmatprep.mubr.f32.mxu0 %v30250_v16  ;;  %v27646_v16 = vld [vmem:[%s27901_s2] ss:$0 sm:$0xff] }
 0x6db   : > { %20567 = vmatmul.mubr.f32.gmra.mrb[16].mxu1 %v30296_v52 }
 0x6dc   : > { %20569 = vmatprep.mubr.f32.mxu1 %v30297_v23 }
 0x6dd   : > { %21920 = vmatmul.mubr.f32.gmra.mrb[18].mxu0 %v30253_v7 }
 0x6de   : > { %21922 = vmatprep.mubr.f32.mxu0 %v30254_v43 }
 0x6df   : > { %20570 = vmatmul.mubr.f32.gmra.mrb[18].mxu1 %v30298_v24 }
 0x6e0   : > { %20572 = vmatprep.mubr.f32.mxu1 %v30299_v62 }
 0x6e1   : > { %21923 = vmatmul.mubr.f32.gmra.mrb[20].mxu0 %v30257_v9 }
 0x6e2   : > { %21925 = vmatprep.mubr.f32.mxu0 %v30258_v44 }
 0x6e3   : > { %20573 = vmatmul.mubr.f32.gmra.mrb[20].mxu1 %v30300_v50 }
 0x6e4   : > { %20575 = vmatprep.mubr.f32.mxu1 %v30301_v56 }
 0x6e5   : > { %21926 = vmatmul.mubr.f32.gmra.mrb[22].mxu0 %v30261_v40 }
 0x6e6   : > { %21928 = vmatprep.mubr.f32.mxu0 %v30262_v29 }
 0x6e7   : > { %20576 = vmatmul.mubr.f32.gmra.mrb[22].mxu1 %v30302_v11 }
 0x6e8   : > { %20578 = vmatprep.mubr.f32.mxu1 %v30303_v57 }
 0x6e9   : > { %21929 = vmatmul.mubr.f32.gmra.mrb[24].mxu0 %v30265_v30 }
 0x6ea   : > { %21931 = vmatprep.mubr.f32.mxu0 %v30266_v41 }
 0x6eb   : > { %20579 = vmatmul.mubr.f32.gmra.mrb[24].mxu1 %v30304_v19 }
 0x6ec   : > { %20581 = vmatprep.mubr.f32.mxu1 %v30305_v12 }
 0x6ed   : > { %21932 = vmatmul.mubr.f32.gmra.mrb[26].mxu0 %v30269_v49 }
 0x6ee   : > { %21934 = vmatprep.mubr.f32.mxu0 %v30270_v36 }
 0x6ef   : > { %20582 = vmatmul.mubr.f32.gmra.mrb[26].mxu1 %v30306_v60 }
 0x6f0   : > { %20584 = vmatprep.mubr.f32.mxu1 %v30307_v13 }
 0x6f1   : > { %21935 = vmatmul.mubr.f32.gmra.mrb[28].mxu0 %v30273_v31 }
 0x6f2   : > { %21937 = vmatprep.mubr.f32.mxu0 %v30274_v4 }
 0x6f3   : > { %20585 = vmatmul.mubr.f32.gmra.mrb[28].mxu1 %v30308_v42 }
 0x6f4   : > { %20587 = vmatprep.mubr.f32.mxu1 %v30309_v34 }
 0x6f5   : > { %21938 = vmatmul.mubr.f32.gmra.mrb[30].mxu0 %v30277_v53 }
 0x6f7   : > { %20588 = vmatmul.mubr.f32.gmra.mrb[30].mxu1 %v30310_v35 }
 0x78c   : > { %v21894_v0 = vpop.f32.mrb[0].mxu0 }
 0x78d   : > { %v16811_v17 = vpop.f32.mrb[1].mxu0 }
 0x78e   : > { %v20544_v28 = vpop.f32.mrb[0].mxu1 }
 0x78f   : > { %v21940_v3 = vadd.f32 %v21894_v0, %v20544_v28  ;;  %v8642_v32 = vpop.f32.mrb[1].mxu1 }
 0x790   : > { %v21897_v7 = vpop.f32.mrb[2].mxu0  ;;  %v21941_v43 = vadd.f32 %v16811_v17, %v8642_v32 }
 0x791   : > { %v17041_v48 = vadd.f32 %v21940_v3, %v27646_v16  ;;  %v16823_v46 = vpop.f32.mrb[3].mxu0 }
 0x792   : > { %v17040_v9 = vadd.f32 %v21941_v43, %v27646_v16  ;;  %v20547_v44 = vpop.f32.mrb[2].mxu1 }
 0x793   : > { %17074 = vst.msk [vmem:[%s27651_s23 + $0x8] sm:$0xff] %vm17072_vm4, %v17041_v48  ;;  %v17106_v25 = vsel %vm17072_vm4, %v17041_v48, 0.0  ;;  %v17175_v61 = vmul.f32 %v17041_v48, %v17041_v48  ;;  %v21942_v40 = vadd.f32 %v21897_v7, %v20547_v44  ;;  %v8656_v29 = vpop.f32.mrb[3].mxu1 }
 0x794   : > { %17073 = vst.msk [vmem:[%s27651_s23] sm:$0xff] %vm17072_vm4, %v17040_v9  ;;  %v17105_v21 = vsel %vm17072_vm4, %v17040_v9, 0.0  ;;  %v17174_v20 = vmul.f32 %v17040_v9, %v17040_v9  ;;  %v21900_v30 = vpop.f32.mrb[4].mxu0  ;;  %v21943_v41 = vadd.f32 %v16823_v46, %v8656_v29 }
 0x795   : > { %v17207_v55 = vsel %vm17072_vm4, %v17175_v61, 0.0  ;;  %v17107_v15 = vadd.f32 %v17106_v25, %v17105_v21  ;;  %v17043_v49 = vadd.f32 %v21942_v40, %v27646_v16  ;;  %v16835_v36 = vpop.f32.mrb[5].mxu0 }
 0x796   : > { %v17206_v8 = vsel %vm17072_vm4, %v17174_v20, 0.0  ;;  %v17042_v59 = vadd.f32 %v21943_v41, %v27646_v16  ;;  %v20550_v31 = vpop.f32.mrb[4].mxu1 }
 0x797   : > { %v17208_v4 = vadd.f32 %v17207_v55, %v17206_v8  ;;  %17076 = vst.msk [vmem:[%s27651_s23 + $0x18] sm:$0xff] %vm17072_vm4, %v17043_v49  ;;  %v17177_v63 = vmul.f32 %v17043_v49, %v17043_v49  ;;  %v21944_v22 = vadd.f32 %v21900_v30, %v20550_v31  ;;  %v8670_v53 = vpop.f32.mrb[5].mxu1  ;;  %v17110_v39 = vsel %vm17072_vm4, %v17043_v49, 0.0 }
 0x798   : > { %17075 = vst.msk [vmem:[%s27651_s23 + $0x10] sm:$0xff] %vm17072_vm4, %v17042_v59  ;;  %v17108_v51 = vsel %vm17072_vm4, %v17042_v59, 0.0  ;;  %v17176_v5 = vmul.f32 %v17042_v59, %v17042_v59  ;;  %v21903_v18 = vpop.f32.mrb[6].mxu0  ;;  %v21945_v58 = vadd.f32 %v16835_v36, %v8670_v53 }
 0x799   : > { %v17109_v26 = vadd.f32 %v17108_v51, %v17107_v15  ;;  %v17045_v54 = vadd.f32 %v21944_v22, %v27646_v16  ;;  %v16847_v45 = vpop.f32.mrb[7].mxu0  ;;  %v17211_v10 = vsel %vm17072_vm4, %v17177_v63, 0.0 }
 0x79a   : > { %v17209_v27 = vsel %vm17072_vm4, %v17176_v5, 0.0  ;;  %v17044_v6 = vadd.f32 %v21945_v58, %v27646_v16  ;;  %v20553_v14 = vpop.f32.mrb[6].mxu1 }
 0x79b   : > { %v17210_v1 = vadd.f32 %v17209_v27, %v17208_v4  ;;  %17078 = vst.msk [vmem:[%s27651_s23 + $0x28] sm:$0xff] %vm17072_vm4, %v17045_v54  ;;  %v17179_v37 = vmul.f32 %v17045_v54, %v17045_v54  ;;  %v17111_v33 = vadd.f32 %v17110_v39, %v17109_v26  ;;  %v8684_v47 = vpop.f32.mrb[7].mxu1  ;;  %v21946_v52 = vadd.f32 %v21903_v18, %v20553_v14 }
 0x79c   : > { %17077 = vst.msk [vmem:[%s27651_s23 + $0x20] sm:$0xff] %vm17072_vm4, %v17044_v6  ;;  %v17112_v2 = vsel %vm17072_vm4, %v17044_v6, 0.0  ;;  %v17178_v38 = vmul.f32 %v17044_v6, %v17044_v6  ;;  %v21906_v23 = vpop.f32.mrb[8].mxu0  ;;  %v21947_v24 = vadd.f32 %v16847_v45, %v8684_v47  ;;  %v17114_v11 = vsel %vm17072_vm4, %v17045_v54, 0.0 }
 0x79d   : > { %v17113_v62 = vadd.f32 %v17112_v2, %v17111_v33  ;;  %v17212_v50 = vadd.f32 %v17211_v10, %v17210_v1  ;;  %v16859_v56 = vpop.f32.mrb[9].mxu0  ;;  %v17047_v19 = vadd.f32 %v21946_v52, %v27646_v16  ;;  %v17215_v0 = vsel %vm17072_vm4, %v17179_v37, 0.0 }
 0x79e   : > { %v17213_v57 = vsel %vm17072_vm4, %v17178_v38, 0.0  ;;  %v17046_v12 = vadd.f32 %v21947_v24, %v27646_v16  ;;  %v20556_v60 = vpop.f32.mrb[8].mxu1 }
 0x79f   : > { %v17214_v13 = vadd.f32 %v17213_v57, %v17212_v50  ;;  %v17115_v42 = vadd.f32 %v17114_v11, %v17113_v62  ;;  %v21948_v34 = vadd.f32 %v21906_v23, %v20556_v60  ;;  %v8698_v35 = vpop.f32.mrb[9].mxu1  ;;  %17080 = vst.msk [vmem:[%s27651_s23 + $0x38] sm:$0xff] %vm17072_vm4, %v17047_v19  ;;  %v17181_v17 = vmul.f32 %v17047_v19, %v17047_v19 }
 0x7a0   : > { %17079 = vst.msk [vmem:[%s27651_s23 + $0x30] sm:$0xff] %vm17072_vm4, %v17046_v12  ;;  %v17116_v28 = vsel %vm17072_vm4, %v17046_v12, 0.0  ;;  %v17180_v3 = vmul.f32 %v17046_v12, %v17046_v12  ;;  %v21909_v32 = vpop.f32.mrb[10].mxu0  ;;  %v21949_v46 = vadd.f32 %v16859_v56, %v8698_v35  ;;  %v17118_v61 = vsel %vm17072_vm4, %v17047_v19, 0.0 }
 0x7a1   : > { %v17117_v7 = vadd.f32 %v17116_v28, %v17115_v42  ;;  %v17216_v43 = vadd.f32 %v17215_v0, %v17214_v13  ;;  %v17049_v48 = vadd.f32 %v21948_v34, %v27646_v16  ;;  %v16871_v9 = vpop.f32.mrb[11].mxu0  ;;  %v17219_v40 = vsel %vm17072_vm4, %v17181_v17, 0.0 }
 0x7a2   : > { %v17217_v44 = vsel %vm17072_vm4, %v17180_v3, 0.0  ;;  %v20559_v25 = vpop.f32.mrb[10].mxu1  ;;  %v17048_v21 = vadd.f32 %v21949_v46, %v27646_v16 }
 0x7a3   : > { %v17218_v29 = vadd.f32 %v17217_v44, %v17216_v43  ;;  %17082 = vst.msk [vmem:[%s27651_s23 + $0x48] sm:$0xff] %vm17072_vm4, %v17049_v48  ;;  %v8712_v20 = vpop.f32.mrb[11].mxu1  ;;  %v17183_v30 = vmul.f32 %v17049_v48, %v17049_v48  ;;  %v17119_v41 = vadd.f32 %v17118_v61, %v17117_v7  ;;  %v21950_v55 = vadd.f32 %v21909_v32, %v20559_v25 }
 0x7a4   : > { %v21912_v15 = vpop.f32.mrb[12].mxu0  ;;  %v21951_v49 = vadd.f32 %v16871_v9, %v8712_v20  ;;  %17081 = vst.msk [vmem:[%s27651_s23 + $0x40] sm:$0xff] %vm17072_vm4, %v17048_v21  ;;  %v17120_v36 = vsel %vm17072_vm4, %v17048_v21, 0.0  ;;  %v17182_v8 = vmul.f32 %v17048_v21, %v17048_v21  ;;  %v17122_v51 = vsel %vm17072_vm4, %v17049_v48, 0.0 }
 0x7a5   : > { %v17220_v59 = vadd.f32 %v17219_v40, %v17218_v29  ;;  %v16883_v31 = vpop.f32.mrb[13].mxu0  ;;  %v17121_v4 = vadd.f32 %v17120_v36, %v17119_v41  ;;  %v17051_v63 = vadd.f32 %v21950_v55, %v27646_v16  ;;  %v17223_v26 = vsel %vm17072_vm4, %v17183_v30, 0.0 }
 0x7a6   : > { %v17050_v22 = vadd.f32 %v21951_v49, %v27646_v16  ;;  %v20562_v53 = vpop.f32.mrb[12].mxu1  ;;  %v17221_v5 = vsel %vm17072_vm4, %v17182_v8, 0.0 }
 0x7a7   : > { %v21952_v18 = vadd.f32 %v21912_v15, %v20562_v53  ;;  %v8726_v58 = vpop.f32.mrb[13].mxu1  ;;  %v17222_v54 = vadd.f32 %v17221_v5, %v17220_v59  ;;  %17084 = vst.msk [vmem:[%s27651_s23 + $0x58] sm:$0xff] %vm17072_vm4, %v17051_v63  ;;  %v17185_v45 = vmul.f32 %v17051_v63, %v17051_v63  ;;  %v17123_v39 = vadd.f32 %v17122_v51, %v17121_v4 }
 0x7a8   : > { %17083 = vst.msk [vmem:[%s27651_s23 + $0x50] sm:$0xff] %vm17072_vm4, %v17050_v22  ;;  %v21915_v27 = vpop.f32.mrb[14].mxu0  ;;  %v17124_v6 = vsel %vm17072_vm4, %v17050_v22, 0.0  ;;  %v17184_v14 = vmul.f32 %v17050_v22, %v17050_v22  ;;  %v21953_v1 = vadd.f32 %v16883_v31, %v8726_v58  ;;  %v17126_v38 = vsel %vm17072_vm4, %v17051_v63, 0.0 }
 0x7a9   : > { %v17053_v10 = vadd.f32 %v21952_v18, %v27646_v16  ;;  %v16895_v37 = vpop.f32.mrb[15].mxu0  ;;  %v17125_v33 = vadd.f32 %v17124_v6, %v17123_v39  ;;  %v17224_v47 = vadd.f32 %v17223_v26, %v17222_v54  ;;  %v17227_v12 = vsel %vm17072_vm4, %v17185_v45, 0.0 }
 0x7aa   : > { %v20565_v2 = vpop.f32.mrb[14].mxu1  ;;  %v17225_v52 = vsel %vm17072_vm4, %v17184_v14, 0.0  ;;  %v17052_v24 = vadd.f32 %v21953_v1, %v27646_v16 }
 0x7ab   : > { %17086 = vst.msk [vmem:[%s27651_s23 + $0x68] sm:$0xff] %vm17072_vm4, %v17053_v10  ;;  %v17187_v23 = vmul.f32 %v17053_v10, %v17053_v10  ;;  %v8740_v62 = vpop.f32.mrb[15].mxu1  ;;  %v17226_v50 = vadd.f32 %v17225_v52, %v17224_v47  ;;  %v17127_v56 = vadd.f32 %v17126_v38, %v17125_v33  ;;  %v21954_v11 = vadd.f32 %v21915_v27, %v20565_v2 }
 0x7ac   : > { %v21918_v57 = vpop.f32.mrb[16].mxu0  ;;  %v21955_v19 = vadd.f32 %v16895_v37, %v8740_v62  ;;  %17085 = vst.msk [vmem:[%s27651_s23 + $0x60] sm:$0xff] %vm17072_vm4, %v17052_v24  ;;  %v17128_v60 = vsel %vm17072_vm4, %v17052_v24, 0.0  ;;  %v17186_v13 = vmul.f32 %v17052_v24, %v17052_v24  ;;  %v17130_v3 = vsel %vm17072_vm4, %v17053_v10, 0.0 }
 0x7ad   : > { %v16907_v42 = vpop.f32.mrb[17].mxu0  ;;  %v17129_v34 = vadd.f32 %v17128_v60, %v17127_v56  ;;  %v17228_v35 = vadd.f32 %v17227_v12, %v17226_v50  ;;  %v17055_v0 = vadd.f32 %v21954_v11, %v27646_v16  ;;  %v17231_v48 = vsel %vm17072_vm4, %v17187_v23, 0.0 }
 0x7ae   : > { %v17054_v17 = vadd.f32 %v21955_v19, %v27646_v16  ;;  %v20568_v28 = vpop.f32.mrb[16].mxu1  ;;  %v17229_v32 = vsel %vm17072_vm4, %v17186_v13, 0.0 }
 0x7af   : > { %v21956_v7 = vadd.f32 %v21918_v57, %v20568_v28  ;;  %v8754_v43 = vpop.f32.mrb[17].mxu1  ;;  %v17230_v46 = vadd.f32 %v17229_v32, %v17228_v35  ;;  %17088 = vst.msk [vmem:[%s27651_s23 + $0x78] sm:$0xff] %vm17072_vm4, %v17055_v0  ;;  %v17189_v9 = vmul.f32 %v17055_v0, %v17055_v0  ;;  %v17131_v44 = vadd.f32 %v17130_v3, %v17129_v34 }
 0x7b0   : > { %17087 = vst.msk [vmem:[%s27651_s23 + $0x70] sm:$0xff] %vm17072_vm4, %v17054_v17  ;;  %v21921_v25 = vpop.f32.mrb[18].mxu0  ;;  %v17132_v61 = vsel %vm17072_vm4, %v17054_v17, 0.0  ;;  %v17188_v40 = vmul.f32 %v17054_v17, %v17054_v17  ;;  %v21957_v21 = vadd.f32 %v16907_v42, %v8754_v43  ;;  %v17134_v15 = vsel %vm17072_vm4, %v17055_v0, 0.0 }
 0x7b1   : > { %v17057_v29 = vadd.f32 %v21956_v7, %v27646_v16  ;;  %v16919_v20 = vpop.f32.mrb[19].mxu0  ;;  %v17133_v30 = vadd.f32 %v17132_v61, %v17131_v44  ;;  %v17232_v41 = vadd.f32 %v17231_v48, %v17230_v46  ;;  %v17235_v51 = vsel %vm17072_vm4, %v17189_v9, 0.0 }
 0x7b2   : > { %v20571_v55 = vpop.f32.mrb[18].mxu1  ;;  %v17233_v49 = vsel %vm17072_vm4, %v17188_v40, 0.0  ;;  %v17056_v8 = vadd.f32 %v21957_v21, %v27646_v16 }
 0x7b3   : > { %17090 = vst.msk [vmem:[%s27651_s23 + $0x88] sm:$0xff] %vm17072_vm4, %v17057_v29  ;;  %v17191_v36 = vmul.f32 %v17057_v29, %v17057_v29  ;;  %v8768_v59 = vpop.f32.mrb[19].mxu1  ;;  %v17234_v31 = vadd.f32 %v17233_v49, %v17232_v41  ;;  %v17135_v4 = vadd.f32 %v17134_v15, %v17133_v30  ;;  %v21958_v63 = vadd.f32 %v21921_v25, %v20571_v55 }
 0x7b4   : > { %v21924_v22 = vpop.f32.mrb[20].mxu0  ;;  %v21959_v53 = vadd.f32 %v16919_v20, %v8768_v59  ;;  %17089 = vst.msk [vmem:[%s27651_s23 + $0x80] sm:$0xff] %vm17072_vm4, %v17056_v8  ;;  %v17136_v5 = vsel %vm17072_vm4, %v17056_v8, 0.0  ;;  %v17190_v18 = vmul.f32 %v17056_v8, %v17056_v8  ;;  %v17138_v6 = vsel %vm17072_vm4, %v17057_v29, 0.0 }
 0x7b5   : > { %v16931_v58 = vpop.f32.mrb[21].mxu0  ;;  %v17137_v26 = vadd.f32 %v17136_v5, %v17135_v4  ;;  %v17236_v54 = vadd.f32 %v17235_v51, %v17234_v31  ;;  %v17059_v45 = vadd.f32 %v21958_v63, %v27646_v16  ;;  %v17239_v37 = vsel %vm17072_vm4, %v17191_v36, 0.0 }
 0x7b6   : > { %v17058_v39 = vadd.f32 %v21959_v53, %v27646_v16  ;;  %v20574_v27 = vpop.f32.mrb[20].mxu1  ;;  %v17237_v14 = vsel %vm17072_vm4, %v17190_v18, 0.0 }
 0x7b7   : > { %v21960_v10 = vadd.f32 %v21924_v22, %v20574_v27  ;;  %v8782_v1 = vpop.f32.mrb[21].mxu1  ;;  %v17238_v33 = vadd.f32 %v17237_v14, %v17236_v54  ;;  %17092 = vst.msk [vmem:[%s27651_s23 + $0x98] sm:$0xff] %vm17072_vm4, %v17059_v45  ;;  %v17193_v47 = vmul.f32 %v17059_v45, %v17059_v45  ;;  %v17139_v2 = vadd.f32 %v17138_v6, %v17137_v26 }
 0x7b8   : > { %17091 = vst.msk [vmem:[%s27651_s23 + $0x90] sm:$0xff] %vm17072_vm4, %v17058_v39  ;;  %v21927_v38 = vpop.f32.mrb[22].mxu0  ;;  %v17140_v52 = vsel %vm17072_vm4, %v17058_v39, 0.0  ;;  %v17192_v23 = vmul.f32 %v17058_v39, %v17058_v39  ;;  %v21961_v62 = vadd.f32 %v16931_v58, %v8782_v1  ;;  %v17142_v19 = vsel %vm17072_vm4, %v17059_v45, 0.0 }
 0x7b9   : > { %v17061_v24 = vadd.f32 %v21960_v10, %v27646_v16  ;;  %v16943_v50 = vpop.f32.mrb[23].mxu0  ;;  %v17141_v56 = vadd.f32 %v17140_v52, %v17139_v2  ;;  %v17240_v11 = vadd.f32 %v17239_v37, %v17238_v33  ;;  %v17243_v3 = vsel %vm17072_vm4, %v17193_v47, 0.0 }
 0x7ba   : > { %v20577_v57 = vpop.f32.mrb[22].mxu1  ;;  %v17241_v12 = vsel %vm17072_vm4, %v17192_v23, 0.0  ;;  %v17060_v13 = vadd.f32 %v21961_v62, %v27646_v16 }
 0x7bb   : > { %17094 = vst.msk [vmem:[%s27651_s23 + $0xa8] sm:$0xff] %vm17072_vm4, %v17061_v24  ;;  %v17195_v60 = vmul.f32 %v17061_v24, %v17061_v24  ;;  %v8796_v42 = vpop.f32.mrb[23].mxu1  ;;  %v17242_v34 = vadd.f32 %v17241_v12, %v17240_v11  ;;  %v17143_v35 = vadd.f32 %v17142_v19, %v17141_v56  ;;  %v21962_v0 = vadd.f32 %v21927_v38, %v20577_v57 }
 0x7bc   : > { %v21930_v17 = vpop.f32.mrb[24].mxu0  ;;  %v21963_v28 = vadd.f32 %v16943_v50, %v8796_v42  ;;  %17093 = vst.msk [vmem:[%s27651_s23 + $0xa0] sm:$0xff] %vm17072_vm4, %v17060_v13  ;;  %v17144_v32 = vsel %vm17072_vm4, %v17060_v13, 0.0  ;;  %v17194_v7 = vmul.f32 %v17060_v13, %v17060_v13  ;;  %v17146_v61 = vsel %vm17072_vm4, %v17061_v24, 0.0 }
 0x7bd   : > { %v16955_v43 = vpop.f32.mrb[25].mxu0  ;;  %v17145_v48 = vadd.f32 %v17144_v32, %v17143_v35  ;;  %v17244_v46 = vadd.f32 %v17243_v3, %v17242_v34  ;;  %v17063_v9 = vadd.f32 %v21962_v0, %v27646_v16  ;;  %v17247_v20 = vsel %vm17072_vm4, %v17195_v60, 0.0 }
 0x7be   : > { %v17062_v44 = vadd.f32 %v21963_v28, %v27646_v16  ;;  %v20580_v25 = vpop.f32.mrb[24].mxu1  ;;  %v17245_v40 = vsel %vm17072_vm4, %v17194_v7, 0.0 }
 0x7bf   : > { %v21964_v29 = vadd.f32 %v21930_v17, %v20580_v25  ;;  %v8810_v21 = vpop.f32.mrb[25].mxu1  ;;  %v17246_v30 = vadd.f32 %v17245_v40, %v17244_v46  ;;  %17096 = vst.msk [vmem:[%s27651_s23 + $0xb8] sm:$0xff] %vm17072_vm4, %v17063_v9  ;;  %v17197_v41 = vmul.f32 %v17063_v9, %v17063_v9  ;;  %v17147_v55 = vadd.f32 %v17146_v61, %v17145_v48 }
 0x7c0   : > { %17095 = vst.msk [vmem:[%s27651_s23 + $0xb0] sm:$0xff] %vm17072_vm4, %v17062_v44  ;;  %v21933_v15 = vpop.f32.mrb[26].mxu0  ;;  %v17148_v49 = vsel %vm17072_vm4, %v17062_v44, 0.0  ;;  %v17196_v36 = vmul.f32 %v17062_v44, %v17062_v44  ;;  %v21965_v59 = vadd.f32 %v16955_v43, %v8810_v21  ;;  %v17150_v53 = vsel %vm17072_vm4, %v17063_v9, 0.0 }
 0x7c1   : > { %v17065_v8 = vadd.f32 %v21964_v29, %v27646_v16  ;;  %v16967_v31 = vpop.f32.mrb[27].mxu0  ;;  %v17149_v4 = vadd.f32 %v17148_v49, %v17147_v55  ;;  %v17248_v63 = vadd.f32 %v17247_v20, %v17246_v30  ;;  %v17251_v6 = vsel %vm17072_vm4, %v17197_v41, 0.0 }
 0x7c2   : > { %v20583_v22 = vpop.f32.mrb[26].mxu1  ;;  %v17249_v51 = vsel %vm17072_vm4, %v17196_v36, 0.0  ;;  %v17064_v18 = vadd.f32 %v21965_v59, %v27646_v16 }
 0x7c3   : > { %17098 = vst.msk [vmem:[%s27651_s23 + $0xc8] sm:$0xff] %vm17072_vm4, %v17065_v8  ;;  %v17199_v5 = vmul.f32 %v17065_v8, %v17065_v8  ;;  %v8824_v58 = vpop.f32.mrb[27].mxu1  ;;  %v17250_v26 = vadd.f32 %v17249_v51, %v17248_v63  ;;  %v17151_v54 = vadd.f32 %v17150_v53, %v17149_v4  ;;  %v21966_v45 = vadd.f32 %v21933_v15, %v20583_v22 }
 0x7c4   : > { %v21936_v39 = vpop.f32.mrb[28].mxu0  ;;  %v21967_v27 = vadd.f32 %v16967_v31, %v8824_v58  ;;  %17097 = vst.msk [vmem:[%s27651_s23 + $0xc0] sm:$0xff] %vm17072_vm4, %v17064_v18  ;;  %v17152_v14 = vsel %vm17072_vm4, %v17064_v18, 0.0  ;;  %v17198_v10 = vmul.f32 %v17064_v18, %v17064_v18  ;;  %v17154_v52 = vsel %vm17072_vm4, %v17065_v8, 0.0 }
 0x7c5   : > { %v16979_v1 = vpop.f32.mrb[29].mxu0  ;;  %v17153_v37 = vadd.f32 %v17152_v14, %v17151_v54  ;;  %v17252_v33 = vadd.f32 %v17251_v6, %v17250_v26  ;;  %v17067_v47 = vadd.f32 %v21966_v45, %v27646_v16  ;;  %v17255_v50 = vsel %vm17072_vm4, %v17199_v5, 0.0 }
 0x7c6   : > { %v17066_v2 = vadd.f32 %v21967_v27, %v27646_v16  ;;  %v20586_v38 = vpop.f32.mrb[28].mxu1  ;;  %v17253_v23 = vsel %vm17072_vm4, %v17198_v10, 0.0 }
 0x7c7   : > { %v21968_v24 = vadd.f32 %v21936_v39, %v20586_v38  ;;  %v8838_v62 = vpop.f32.mrb[29].mxu1  ;;  %v17254_v56 = vadd.f32 %v17253_v23, %v17252_v33  ;;  %17100 = vst.msk [vmem:[%s27651_s23 + $0xd8] sm:$0xff] %vm17072_vm4, %v17067_v47  ;;  %v17201_v11 = vmul.f32 %v17067_v47, %v17067_v47  ;;  %v17155_v57 = vadd.f32 %v17154_v52, %v17153_v37 }
 0x7c8   : > { %17099 = vst.msk [vmem:[%s27651_s23 + $0xd0] sm:$0xff] %vm17072_vm4, %v17066_v2  ;;  %v21939_v19 = vpop.f32.mrb[30].mxu0  ;;  %v17156_v12 = vsel %vm17072_vm4, %v17066_v2, 0.0  ;;  %v17200_v60 = vmul.f32 %v17066_v2, %v17066_v2  ;;  %v21969_v42 = vadd.f32 %v16979_v1, %v8838_v62  ;;  %v17158_v28 = vsel %vm17072_vm4, %v17067_v47, 0.0 }
 0x7c9   : > { %v17069_v13 = vadd.f32 %v21968_v24, %v27646_v16  ;;  %v16991_v34 = vpop.f32.mrb[31].mxu0  ;;  %v17157_v35 = vadd.f32 %v17156_v12, %v17155_v57  ;;  %v17256_v0 = vadd.f32 %v17255_v50, %v17254_v56  ;;  %v17259_v44 = vsel %vm17072_vm4, %v17201_v11, 0.0 }
 0x7ca   : > { %v20589_v17 = vpop.f32.mrb[30].mxu1  ;;  %v17257_v3 = vsel %vm17072_vm4, %v17200_v60, 0.0  ;;  %v17068_v32 = vadd.f32 %v21969_v42, %v27646_v16 }
 0x7cb   : > { %17102 = vst.msk [vmem:[%s27651_s23 + $0xe8] sm:$0xff] %vm17072_vm4, %v17069_v13  ;;  %v8852_v7 = vpop.f32.mrb[31].mxu1  ;;  %v17258_v43 = vadd.f32 %v17257_v3, %v17256_v0  ;;  %v17159_v48 = vadd.f32 %v17158_v28, %v17157_v35  ;;  %v21970_v46 = vadd.f32 %v21939_v19, %v20589_v17  ;;  %v17203_v25 = vmul.f32 %v17069_v13, %v17069_v13 }
 0x7cc   : > { %v21971_v9 = vadd.f32 %v16991_v34, %v8852_v7  ;;  %17101 = vst.msk [vmem:[%s27651_s23 + $0xe0] sm:$0xff] %vm17072_vm4, %v17068_v32  ;;  %v17160_v61 = vsel %vm17072_vm4, %v17068_v32, 0.0  ;;  %v17202_v40 = vmul.f32 %v17068_v32, %v17068_v32  ;;  %v17162_v41 = vsel %vm17072_vm4, %v17069_v13, 0.0 }
 0x7cd   : > { %v17161_v29 = vadd.f32 %v17160_v61, %v17159_v48  ;;  %v17260_v21 = vadd.f32 %v17259_v44, %v17258_v43  ;;  %v17071_v20 = vadd.f32 %v21970_v46, %v27646_v16  ;;  %v17263_v36 = vsel %vm17072_vm4, %v17203_v25, 0.0 }
 0x7ce   : > { %v17070_v30 = vadd.f32 %v21971_v9, %v27646_v16  ;;  %v17261_v55 = vsel %vm17072_vm4, %v17202_v40, 0.0 }
 0x7cf   : > { %v17262_v15 = vadd.f32 %v17261_v55, %v17260_v21  ;;  %17104 = vst.msk [vmem:[%s27651_s23 + $0xf8] sm:$0xff] %vm17072_vm4, %v17071_v20  ;;  %v17163_v49 = vadd.f32 %v17162_v41, %v17161_v29  ;;  %v17205_v8 = vmul.f32 %v17071_v20, %v17071_v20  ;;  %v17166_v16 = vsel %vm17072_vm4, %v17071_v20, 0.0 }
 0x7d0   : > { %17103 = vst.msk [vmem:[%s27651_s23 + $0xf0] sm:$0xff] %vm17072_vm4, %v17070_v30  ;;  %v17164_v59 = vsel %vm17072_vm4, %v17070_v30, 0.0  ;;  %v17204_v31 = vmul.f32 %v17070_v30, %v17070_v30  ;;  %s23727_s23 = sshll.u32 %s23819_s17, 4  ;;  %s23728_s23 = int_to_ptr.vmem [resolvable:$false] %s23727_s23 }
 0x7d1   : > { %v17165_v4 = vadd.f32 %v17164_v59, %v17163_v49  ;;  %v17264_v63 = vadd.f32 %v17263_v36, %v17262_v15  ;;  %v17267_v5 = vsel %vm17072_vm4, %v17205_v8, 0.0  ;;  %s23729_s25 = scalar_lea.vmem %s23728_s23, 256  ;;  %p23730_p0 = scmp.lt.s32.totalorder %s27826_s6, %s23728_s23 }
 0x7d2   : > { %v17265_v22 = vsel %vm17072_vm4, %v17204_v31, 0.0  ;;  %p23731_p1 = scmp.lt.s32.totalorder %s23729_s25, %s23723_s16 }
 0x7d3   : > { %v17167_v53 = vadd.f32 %v17166_v16, %v17165_v4  ;;  %v17266_v51 = vadd.f32 %v17265_v22, %v17264_v63 }
 0x7d4   : > { %p23732_p2 = por %p23731_p1, %p23730_p0 }
 0x7d5   : > { %v17168_v18 = vrot.slane %v17167_v53, 4  ;;  %v17268_v58 = vadd.f32 %v17267_v5, %v17266_v51 }
 0x7d6   : > { %p23733_p3 = pnand %p23732_p2, %p23726_p13 }
 0x7d7   : > { %v17169_v26 = vadd.f32 %v17168_v18, %v17167_v53  ;;  %v17269_v54 = vrot.slane %v17268_v58, 4 }
 0x7d9   : > { %v17170_v45 = vrot.slane %v17169_v26, 2  ;;  %v17270_v39 = vadd.f32 %v17269_v54, %v17268_v58 }
 0x7db   : > { %v17171_v27 = vadd.f32 %v17170_v45, %v17169_v26  ;;  %v17271_v6 = vrot.slane %v17270_v39, 2 }
 0x7dd   : > { %v17172_v14 = vrot.slane %v17171_v27, 1  ;;  %v17272_v10 = vadd.f32 %v17271_v6, %v17270_v39 }
 0x7df   : > { %v17173_v1 = vadd.f32 %v17172_v14, %v17171_v27  ;;  %v17273_v37 = vrot.slane %v17272_v10, 1 }
 0x7e1   : > { %17275 = vst.msk [vmem:[%s228_s30] sm:$0xff] %vm17072_vm4, %v17173_v1  ;;  %v17274_v33 = vadd.f32 %v17273_v37, %v17272_v10 }
 0x7e2   : > { %23736 = shalt.err (!%p23733_p3)
}
 0x7e3   : > { %s23737_s26 = scalar_lea.hbm %s27824_s12, 128  ;;  %s23741_s11 = scalar_lea.hbm %s27903_s4, 256 }
 0x7e4   : > { %p23738_p4 = scmp.ne.s32.totalorder %s27824_s12, %s23737_s26  ;;  %p23742_p9 = scmp.lt.u32.totalorder %s27824_s12, %s27903_s4 }
 0x7e5   : > { %p23743_p10 = scmp.lt.u32.totalorder %s23741_s11, %s23737_s26  ;;  %p23745_p12 = scmp.lt.u32.totalorder %s23737_s26, %s27824_s12 }
 0x7e6   : > { %p23739_p7 = pnand %p23738_p4, %p23889_p5 }
 0x7e7   : > { %p23744_p11 = por %p23743_p10, %p23742_p9 }
 0x7e8   : > { %p23740_p8 = pneg %p23739_p7 }
 0x7e9   : > { %p23746_p13 = por %p23745_p12, %p23744_p11 }
 0x7eb   : > { %p23747_p0 = pnand %p23746_p13, %p23740_p8 }
 0x7ed   : > { %23750 = shalt.err (!%p23747_p0)
}
 0x7ee   : > { %23637 = dma.vmem_to_hbm [thread:$0]  (%p23889_p5), %s27826_s6, 128, %s27824_s12, %s17283_s15   ;;  %17276 = vst.msk [vmem:[%s27818_s7] sm:$0xff] %vm17072_vm4, %v17274_v33 }
 0x7ef   : > { %s17288_s16 = scalar_lea.sflag [#allocation5], %s27813_s9  ;;  %s23751_s17 = scalar_lea.vmem %s27834_s8, 128 }
 0x7f0   : > { %p23752_p1 = scmp.ne.s32.totalorder %s27834_s8, %s23751_s17  ;;  %s23820_s23 = smov [#allocation4]  }
 0x7f1   : > { %s23755_s25 = sshll.u32 %s23820_s23, 4  ;;  %s23756_s25 = int_to_ptr.vmem [resolvable:$false] %s23755_s25 }
 0x7f2   : > { %p23753_p2 = pnand %p23752_p1, %p23889_p5  ;;  %s23757_s26 = scalar_lea.vmem %s23756_s25, 256 }
 0x7f3   : > { %p23758_p4 = scmp.lt.s32.totalorder %s27834_s8, %s23756_s25  ;;  %p23759_p7 = scmp.lt.s32.totalorder %s23757_s26, %s23751_s17 }
 0x7f4   : > { %p23754_p3 = pneg %p23753_p2 }
 0x7f5   : > { %p23760_p8 = por %p23759_p7, %p23758_p4 }
 0x7f7   : > { %p23761_p9 = pnand %p23760_p8, %p23754_p3 }
 0x7f9   : > { %23764 = shalt.err (!%p23761_p9)
}
 0x7fa   : > { %s23765_s9 = scalar_lea.hbm %s27832_s14, 128  ;;  %s23769_s12 = scalar_lea.hbm %s27904_s5, 256 }
 0x7fb   : > { %p23766_p10 = scmp.ne.s32.totalorder %s27832_s14, %s23765_s9  ;;  %p23770_p13 = scmp.lt.u32.totalorder %s27832_s14, %s27904_s5 }
 0x7fc   : > { %p23771_p0 = scmp.lt.u32.totalorder %s23769_s12, %s23765_s9  ;;  %p23773_p2 = scmp.lt.u32.totalorder %s23765_s9, %s27832_s14 }
 0x7fd   : > { %p23767_p11 = pnand %p23766_p10, %p23889_p5 }
 0x7fe   : > { %p23772_p1 = por %p23771_p0, %p23770_p13 }
 0x7ff   : > { %p23768_p12 = pneg %p23767_p11 }
 0x800   : > { %p23774_p3 = por %p23773_p2, %p23772_p1 }
 0x802   : > { %p23775_p4 = pnand %p23774_p3, %p23768_p12 }
 0x804   : > { %23778 = shalt.err (!%p23775_p4)
}
 0x805   : > { %23638 = dma.vmem_to_hbm [thread:$0]  (%p23889_p5), %s27834_s8, 128, %s27832_s14, %s17288_s16  }
 0x806 PF: > { %p23648_p7 = scmp.ge.s32.totalorder %s23817_s21, 2  ;;  %s17337_s10 = sand.u32 1, %s23805_s18  }
 0x807   : > { %s17338_s11 = scalar_lea.sflag [#allocation3], %s17337_s10 }
 0x808   : > { %p23642_p8 = pnand %p23648_p7, %p23893_p6 }
 0x80a   : > { %23796 = dma.done.wait (!%p23642_p8), %s17338_s11, 128  }
 0x80b   : > { %23798 = vsyncadd (!%p23642_p8), %s17338_s11, 4294967168  ;;  %s17347_s22 = scalar_lea.sflag [#allocation5], %s17337_s10 }
 0x80c   : > { %23800 = dma.done.wait (!%p23642_p8), %s17347_s22, 128  }
 0x80d   : > { %23802 = vsyncadd (!%p23642_p8), %s17347_s22, 4294967168  ;;  %p19_p5 = scmp.ge.s32.totalorder %s23876_s24, 4   ;;  %s30311_s18 = smov %s23809_s19 }
 0x80e   : > { %s30312_s19 = smov %s23813_s20  ;;  %s30313_s20 = smov %s23887_s27 }
 0x80f   : > { %s30314_s21 = smov %s23876_s24  ;;  %21 = sbr.rel (!%p19_p5) target bundleno = 5 (0x5), region = 104 }
 0x816   :  { %17352 = vsyncpa [#allocation3], 1 }
 0x817   :  { %17354 = vsyncpa [#allocation3 + $0x1], 1 }
 0x818   :  { %17355 = vsyncpa [#allocation5], 1 }
 0x819   :  { %17357 = vsyncpa [#allocation5 + $0x1], 1 }

</bundles_post_ra>
